<compile_context>
chip_gen: v7x
topology: tpu7x:2x2x1
jax: 0.10.0
libtpu: 0.0.40
codegen_flags: <defaults>
</compile_context>

<pallas_src>
import functools
import math

import jax
import jax.numpy as jnp
from jax import lax
from jax.experimental import pallas as pl
from jax.experimental.pallas import tpu as pltpu

F32 = jnp.float32
# bf16 matmul operands (f32 accumulation) for v5e/v6e/v7x MXU throughput.
MXU_DTYPE = jnp.bfloat16


def _mxu(x):
    return x.astype(MXU_DTYPE)


def _mm(a, b):
    return jnp.dot(_mxu(a), _mxu(b), preferred_element_type=F32)


def _ln(x, g, b, eps=1e-5):
    mu = jnp.mean(x, axis=-1, keepdims=True)
    xc = x - mu
    var = jnp.mean(xc * xc, axis=-1, keepdims=True)
    return xc * lax.rsqrt(var + eps) * g + b


def _swish(x):
    return x * jax.nn.sigmoid(x)


def _const_spec(shape):
    nd = len(shape)
    return pl.BlockSpec(shape, lambda *_: (0,) * nd)


def _cparams(sem):
    # 48 MiB scoped VMEM is safe on v5e/v6e (128 MiB) and v7x (64 MiB physical).
    return pltpu.CompilerParams(dimension_semantics=sem,
                                vmem_limit_bytes=48 * 1024 * 1024)


def _row_tile(M, target=512):
    # Largest row tile <= target that evenly divides M and is a multiple of 8.
    # When M is small, still split into >=2 grid steps so v7x can use both TensorCores.
    if M <= target:
        return M // 2 if (M % 16 == 0 and M >= 16) else M
    for t in range(target, 7, -1):
        if M % t == 0 and t % 8 == 0:
            return t
    return M


# ----------------------------------------------------------------------------
# Fused kernels
# ----------------------------------------------------------------------------
def _ffn_kernel(x_ref, g1_ref, b1_ref, w1_ref, c1_ref, w2_ref, c2_ref,
                g2_ref, b2_ref, o_ref, *, eps, final_ln):
    # LayerNorm -> Linear -> Swish -> Linear -> +residual [-> final LayerNorm]
    x = x_ref[...]
    h = _ln(x, g1_ref[...], b1_ref[...], eps)
    h = _swish(_mm(h, w1_ref[...]) + c1_ref[...])
    h = _mm(h, w2_ref[...]) + c2_ref[...]
    y = x + h
    if final_ln:
        y = _ln(y, g2_ref[...], b2_ref[...], eps)
    o_ref[...] = y


def pallas_ffn_block(x2d, p, post_ln=None, eps=1e-5):
    M, C = x2d.shape
    d_ffn = p["w1"].shape[1]
    TM = _row_tile(M)
    if post_ln is None:
        g2 = jnp.ones((1, C), F32)
        b2 = jnp.zeros((1, C), F32)
    else:
        g2, b2 = post_ln["g"], post_ln["b"]
    # TODO(synk): constant weight blocks could use pipeline_mode=pl.Buffered(1) to halve
    # their VMEM reservation; skipped to keep lowering risk minimal.
    return pl.pallas_call(
        functools.partial(_ffn_kernel, eps=eps, final_ln=post_ln is not None),
        grid=(M // TM,),
        in_specs=[pl.BlockSpec((TM, C), lambda i: (i, 0)),
                  _const_spec((1, C)), _const_spec((1, C)),
                  _const_spec((C, d_ffn)), _const_spec((1, d_ffn)),
                  _const_spec((d_ffn, C)), _const_spec((1, C)),
                  _const_spec((1, C)), _const_spec((1, C))],
        out_specs=pl.BlockSpec((TM, C), lambda i: (i, 0)),
        out_shape=jax.ShapeDtypeStruct((M, C), F32),
        compiler_params=_cparams(("parallel",)),
    )(x2d, p["ln_g"], p["ln_b"], p["w1"], p["b1"], p["w2"], p["b2"], g2, b2)


def _ln_kernel(x_ref, g_ref, b_ref, o_ref, *, eps):
    o_ref[...] = _ln(x_ref[...], g_ref[...], b_ref[...], eps)


def pallas_layernorm(x2d, g, b, eps=1e-5):
    M, C = x2d.shape
    TM = _row_tile(M)
    return pl.pallas_call(
        functools.partial(_ln_kernel, eps=eps),
        grid=(M // TM,),
        in_specs=[pl.BlockSpec((TM, C), lambda i: (i, 0)),
                  _const_spec((1, C)), _const_spec((1, C))],
        out_specs=pl.BlockSpec((TM, C), lambda i: (i, 0)),
        out_shape=jax.ShapeDtypeStruct((M, C), F32),
        compiler_params=_cparams(("parallel",)),
    )(x2d, g, b)


def _ln_matmul_kernel(x_ref, g_ref, b_ref, w_ref, bias_ref, o_ref, *, eps):
    # norm1 fused with the combined QKV projection (+ bias).
    xn = _ln(x_ref[...], g_ref[...], b_ref[...], eps)
    o_ref[...] = _mm(xn, w_ref[...]) + bias_ref[...]


def pallas_ln_matmul(x2d, g, b, w, bias, eps=1e-5):
    M, C = x2d.shape
    N = w.shape[1]
    TM = _row_tile(M)
    return pl.pallas_call(
        functools.partial(_ln_matmul_kernel, eps=eps),
        grid=(M // TM,),
        in_specs=[pl.BlockSpec((TM, C), lambda i: (i, 0)),
                  _const_spec((1, C)), _const_spec((1, C)),
                  _const_spec((C, N)), _const_spec((1, N))],
        out_specs=pl.BlockSpec((TM, N), lambda i: (i, 0)),
        out_shape=jax.ShapeDtypeStruct((M, N), F32),
        compiler_params=_cparams(("parallel",)),
    )(x2d, g, b, w, bias)


def _relpos_attn_kernel(qkv_ref, res_ref, pk_ref, bu_ref, bv_ref, wo_ref, bo_ref,
                        o_ref, attn_ref, *, scale, T, H, Dh, C):
    # One batch element, ALL heads: AC + BD matmuls, strided-roll rel_shift, softmax,
    # PV, per-head slice of the output projection, +bias, +skip1 residual.
    qkv = qkv_ref[0]                         # (T, 3C) f32
    q = qkv[:, 0:C]
    k = qkv[:, C:2 * C]
    v = qkv[:, 2 * C:3 * C]
    q_u = q + bu_ref[...]                    # pos_bias_u, broadcast over rows
    q_v = q + bv_ref[...]                    # pos_bias_v
    acc = bo_ref[...] + res_ref[0]           # out-proj bias + skip1, (T, C) f32

    for h in range(H):
        sl = slice(h * Dh, (h + 1) * Dh)
        q_u_h = q_u[:, sl]
        q_v_h = q_v[:, sl]
        k_h = k[:, sl]
        v_h = v[:, sl]
        pk_h = pk_ref[h]                     # (P_pad, Dh) bf16, zero-padded rows
        ac = lax.dot_general(_mxu(q_u_h), _mxu(k_h), (((1,), (1,)), ((), ())),
                             preferred_element_type=F32)            # (T, T)
        bd_full = lax.dot_general(_mxu(q_v_h), pk_h, (((1,), (1,)), ((), ())),
                                  preferred_element_type=F32)        # (T, P_pad)
        # Transformer-XL rel_shift: bd[t, j] = bd_full[t, T-1-t+j].
        # Row t is rotated by (1 + t) lanes, then columns [T : 2T) are read:
        # rolled[t, T-1+j+1] = bd_full[t, T-1+j+1 - (1+t)] = bd_full[t, T-1-t+j].
        rolled = pltpu.roll(bd_full, 1, 1, stride=1, stride_axis=0)
        bd = rolled[:, T:2 * T]                                       # (T, T)
        # TODO(synk): attn_mask / key_padding_mask would be applied to `s` here (None in this test).
        s = (ac + bd) * scale
        m = jnp.max(s, axis=-1, keepdims=True)
        e = jnp.exp(s - m)
        p = e / jnp.sum(e, axis=-1, keepdims=True)
        attn_ref[0, h] = p                                            # returned attention weights
        pv = jnp.dot(_mxu(p), _mxu(v_h), preferred_element_type=F32)  # (T, Dh)
        acc = acc + jnp.dot(_mxu(pv), wo_ref[h], preferred_element_type=F32)
    o_ref[0] = acc


def pallas_relpos_attention(qkv3, res, pk_pad, bias_u, bias_v, wo_h, bo, scale, nhead):
    B, T, C3 = qkv3.shape
    C = C3 // 3
    H = nhead
    Dh = C // H
    P_pad = pk_pad.shape[1]
    return pl.pallas_call(
        functools.partial(_relpos_attn_kernel, scale=scale, T=T, H=H, Dh=Dh, C=C),
        grid=(B,),
        in_specs=[pl.BlockSpec((1, T, 3 * C), lambda b: (b, 0, 0)),
                  pl.BlockSpec((1, T, C), lambda b: (b, 0, 0)),
                  _const_spec((H, P_pad, Dh)),
                  _const_spec((1, C)), _const_spec((1, C)),
                  _const_spec((H, Dh, C)), _const_spec((1, C))],
        out_specs=(pl.BlockSpec((1, T, C), lambda b: (b, 0, 0)),
                   pl.BlockSpec((1, H, T, T), lambda b: (b, 0, 0, 0))),
        out_shape=(jax.ShapeDtypeStruct((B, T, C), F32),
                   jax.ShapeDtypeStruct((B, H, T, T), F32)),
        compiler_params=_cparams(("parallel",)),
    )(qkv3, res, pk_pad, bias_u, bias_v, wo_h, bo)


def _conv_branches_kernel(x_ref, gln_ref, bln_ref, pww_ref, pwb_ref,
                          dww_ref, dwb_ref, ag_ref, ab_ref, lw_ref, lb_ref,
                          o_ref, *, K, pad, T, C, eps):
    # Both ConvolutionModules (LN -> 1x1 conv + GLU -> depthwise conv -> LN -> Swish
    # -> Linear[pool folded]) + concat + skip2 residual, for one batch element.
    x = x_ref[0]                                         # (T, C)
    rows = lax.broadcasted_iota(jnp.int32, (T, 1), 0)
    outs = []
    for br in range(2):
        h = _ln(x, gln_ref[br], bln_ref[br], eps)
        h = _mm(h, pww_ref[br]) + pwb_ref[br]            # pointwise (1x1) conv -> (T, 2C)
        h = h[:, :C] * jax.nn.sigmoid(h[:, C:])          # GLU over channels
        dww = dww_ref[br]                                # (K, C)
        acc = jnp.zeros((T, C), F32)
        for kk in range(K):                              # depthwise taps: roll + mask (XLU/VPU)
            s = pad - kk                                 # want h[t - s] at output row t
            if s == 0:
                tap = h
            else:
                r = pltpu.roll(h, s % T, 0)
                valid = (rows >= s) if s > 0 else (rows < T + s)
                tap = jnp.where(valid, r, 0.0)
            acc = acc + tap * dww[kk:kk + 1, :]
        h = acc + dwb_ref[br]
        h = _swish(_ln(h, ag_ref[br], ab_ref[br], eps))
        outs.append(_mm(h, lw_ref[br]) + lb_ref[br])     # (T, C//2), pooling pre-folded
    # concat of the two pooled branches == AdaptiveAvgPool1d(256) of the width-2C concat
    o_ref[0] = jnp.concatenate(outs, axis=-1) + x
    # TODO(synk): conv_mask (key padding) path not implemented; mask is None here.


def pallas_conv_branches(x, p, K, eps=1e-5):
    B, T, C = x.shape
    pad = (K - 1) // 2
    half = C // 2
    assert pad < T, "roll-based depthwise conv requires T > (kernel_size-1)//2"
    return pl.pallas_call(
        functools.partial(_conv_branches_kernel, K=K, pad=pad, T=T, C=C, eps=eps),
        grid=(B,),
        in_specs=[pl.BlockSpec((1, T, C), lambda b: (b, 0, 0)),
                  _const_spec((2, 1, C)), _const_spec((2, 1, C)),
                  _const_spec((2, C, 2 * C)), _const_spec((2, 1, 2 * C)),
                  _const_spec((2, K, C)), _const_spec((2, 1, C)),
                  _const_spec((2, 1, C)), _const_spec((2, 1, C)),
                  _const_spec((2, C, half)), _const_spec((2, 1, half))],
        out_specs=pl.BlockSpec((1, T, C), lambda b: (b, 0, 0)),
        out_shape=jax.ShapeDtypeStruct((B, T, C), F32),
        compiler_params=_cparams(("parallel",)),
    )(x, p["ln_g"], p["ln_b"], p["pw_w"], p["pw_b"], p["dw_w"], p["dw_b"],
      p["aln_g"], p["aln_b"], p["lin_w"], p["lin_b"])


def _drsn_kernel(x_ref, c0w_ref, c0b_ref, g1_ref, b1_ref, c1w_ref, c1b_ref,
                 g2_ref, b2_ref, c2w_ref, c2b_ref, f1w_ref, f1b_ref,
                 gf_ref, bf_ref, f2w_ref, f2b_ref, g3_ref, b3_ref,
                 lw_ref, lb_ref, ow_ref, ob_ref, o_ref, *, T, C, eps):
    # Whole DRSNet ("SRN") for one batch element.  Conv1d(k=3, pad=1) over time is three
    # (C, C) matmuls + sublane rolls (no (T, 3C) im2col lane-concat copies).
    rows = lax.broadcasted_iota(jnp.int32, (T, 1), 0)

    def shift_rows(g, s):
        # out[t] = g[t - s], zero outside [0, T)
        if s == 0:
            return g
        r = pltpu.roll(g, s % T, 0)
        valid = (rows >= s) if s > 0 else (rows < T + s)
        return jnp.where(valid, r, 0.0)

    def conv3(h, w_ref, bias):
        # out[t] = h[t-1] @ W0 + h[t] @ W1 + h[t+1] @ W2 + b
        return (shift_rows(_mm(h, w_ref[0]), 1) + _mm(h, w_ref[1])
                + shift_rows(_mm(h, w_ref[2]), -1) + bias)

    x = x_ref[0]                                          # (T, C)
    h0 = conv3(x, c0w_ref, c0b_ref[...])                  # DRSNet.conv1 -> RSBU input
    # RSBU_CW BRC branch
    h = jnp.maximum(_ln(h0, g1_ref[...], b1_ref[...], eps), 0.0)
    h = conv3(h, c1w_ref, c1b_ref[...])
    h = jnp.maximum(_ln(h, g2_ref[...], b2_ref[...], eps), 0.0)
    xb = conv3(h, c2w_ref, c2b_ref[...])
    # channel-wise soft threshold (AdaptiveAvgPool1d(256) is the identity at C=256)
    xa = jnp.abs(xb)
    a = _mm(xa, f1w_ref[...]) + f1b_ref[...]
    a = jnp.maximum(_ln(a, gf_ref[...], bf_ref[...], eps), 0.0)
    alpha = jax.nn.sigmoid(_mm(a, f2w_ref[...]) + f2b_ref[...])
    nsub = jnp.maximum(xa - xa * alpha, 0.0)
    # sign(xb)*nsub: where xb == 0 we also have nsub == 0, so a 2-way select is exact.
    r = jnp.where(xb >= 0.0, 1.0, -1.0) * nsub + h0       # + RSBU residual
    # DRSNet tail: LN -> ReLU -> (identity gap) -> Linear -> Linear -> softmax over time
    h = jnp.maximum(_ln(r, g3_ref[...], b3_ref[...], eps), 0.0)
    h = _mm(h, lw_ref[...]) + lb_ref[...]
    h = _mm(h, ow_ref[...]) + ob_ref[...]
    m = jnp.max(h, axis=0, keepdims=True)
    e = jnp.exp(h - m)
    o_ref[0] = e / jnp.sum(e, axis=0, keepdims=True)


_DRSN_PARAM_ORDER = ("c0_w", "c0_b", "ln1_g", "ln1_b", "c1_w", "c1_b", "ln2_g",
                     "ln2_b", "c2_w", "c2_b", "fc1_w", "fc1_b", "fcln_g", "fcln_b",
                     "fc2_w", "fc2_b", "ln_g", "ln_b", "lin_w", "lin_b",
                     "out_w", "out_b")


def pallas_drsn(x, p, eps=1e-5):
    B, T, C = x.shape
    specs = [pl.BlockSpec((1, T, C), lambda b: (b, 0, 0))]
    args = [x]
    for name in _DRSN_PARAM_ORDER:
        a = p[name]
        specs.append(_const_spec(a.shape))
        args.append(a)
    return pl.pallas_call(
        functools.partial(_drsn_kernel, T=T, C=C, eps=eps),
        grid=(B,),
        in_specs=specs,
        out_specs=pl.BlockSpec((1, T, C), lambda b: (b, 0, 0)),
        out_shape=jax.ShapeDtypeStruct((B, T, C), F32),
        compiler_params=_cparams(("parallel",)),
    )(*args)


# ----------------------------------------------------------------------------
# Module composition (JAX glue = reshapes / tiny positional projection only)
# ----------------------------------------------------------------------------
def relpos_mha_block(x, pos, p, nhead, norm1):
    B, T, C = x.shape
    Dh = C // nhead
    P = pos.shape[1]                                     # 2T - 1
    M = B * T
    # norm1 fused with the combined QKV projection (+bias)
    qkv = pallas_ln_matmul(x.reshape(M, C), norm1["g"], norm1["b"],
                           p["wqkv"], p["bqkv"])
    qkv3 = qkv.reshape(B, T, 3 * C)                      # free reshape, no HBM transpose
    # tiny positional projection: plain jnp (too small to justify its own pallas_call)
    pk = jnp.dot(pos[0], p["wpos"], preferred_element_type=F32)      # (P, C)
    pk = pk.reshape(P, nhead, Dh).transpose(1, 0, 2)                  # (H, P, Dh)
    P_pad = ((2 * T - 1 + 127) // 128) * 128                          # lane-dense BD
    pk = jnp.pad(pk, ((0, 0), (0, P_pad - P), (0, 0))).astype(MXU_DTYPE)
    scale = 1.0 / math.sqrt(Dh)
    # attention kernel also applies the output projection, its bias and the skip1 residual
    return pallas_relpos_attention(qkv3, x, pk, p["bias_u"], p["bias_v"],
                                   p["wo"], p["bo"], scale, nhead)


def conformer_layer(x, pos, p, nhead, K):
    B, T, C = x.shape
    M = B * T
    # skip0 + ffn_module1(x): residual folded into the kernel
    x = pallas_ffn_block(x.reshape(M, C), p["ffn1"]).reshape(B, T, C)
    # SRN (DRSNet) replaces the activation entirely (matches the PyTorch graph)
    x = pallas_drsn(x, p["srn"])
    # norm1 + RelPosMHAXL + out-proj + skip1, fully fused
    x, attn = relpos_mha_block(x, pos, p["mha"], nhead, p["norm1"])
    # both convolution modules + AdaptiveAvgPool1d(256) + skip2, one fused kernel
    x = pallas_conv_branches(x, p["conv"], K)
    # skip3 + ffn_module2 + norm2, one fused kernel
    x = pallas_ffn_block(x.reshape(M, C), p["ffn2"],
                         post_ln=p["norm2"]).reshape(B, T, C)
    return x, attn


@functools.partial(jax.jit, static_argnames=("nhead", "kernel_size"))
def encoder_forward(src, pos_embs, params, nhead, kernel_size):
    # TODO(synk): src_mask / src_key_padding_mask paths not implemented (None here).
    x = src
    attn_list = []
    for lp in params["layers"]:
        x, a = conformer_layer(x, pos_embs, lp, nhead, kernel_size)
        attn_list.append(a)
    B, T, C = x.shape
    x = pallas_layernorm(x.reshape(B * T, C), params["norm"]["g"],
                         params["norm"]["b"], eps=1e-6).reshape(B, T, C)
    return x, attn_list


# ----------------------------------------------------------------------------
# Deterministic parameter initialization (synthetic, kernel-ready layouts:
# matmul weights pre-cast to bf16 outside the kernels, biases/LN params in f32)
# ----------------------------------------------------------------------------
class KeyGen:
    def __init__(self, key):
        self.key = key

    def __call__(self):
        self.key, sub = jax.random.split(self.key)
        return sub


def init_params(key, num_layers, C, d_ffn, nhead, K):
    kg = KeyGen(key)
    std = 0.05
    Dh = C // nhead
    half = C // 2

    def W(*shape):
        return std * jax.random.normal(kg(), shape, F32)

    def Wmx(*shape):
        return W(*shape).astype(MXU_DTYPE)

    def ones(*shape):
        return jnp.ones(shape, F32)

    def zeros(*shape):
        return jnp.zeros(shape, F32)

    def ffn():
        return {"ln_g": ones(1, C), "ln_b": zeros(1, C),
                "w1": Wmx(C, d_ffn), "b1": zeros(1, d_ffn),
                "w2": Wmx(d_ffn, C), "b2": zeros(1, C)}

    def mha():
        return {"wqkv": Wmx(C, 3 * C), "bqkv": zeros(1, 3 * C),
                "wpos": W(C, C),
                "bias_u": W(1, C), "bias_v": W(1, C),
                # out-proj weight stored per head: (H, Dh, C)
                "wo": Wmx(C, C).reshape(nhead, Dh, C), "bo": zeros(1, C)}

    # AdaptiveAvgPool1d(256) on the width-2C concat averages adjacent feature pairs
    # within each branch; fold that pooling into each branch's final Linear.
    p_half = 0.5 * jnp.repeat(jnp.eye(half, dtype=F32), 2, axis=0)   # (C, C//2)

    def conv():
        return {"ln_g": ones(2, 1, C), "ln_b": zeros(2, 1, C),
                "pw_w": Wmx(2, C, 2 * C), "pw_b": zeros(2, 1, 2 * C),
                "dw_w": W(2, K, C), "dw_b": zeros(2, 1, C),
                "aln_g": ones(2, 1, C), "aln_b": zeros(2, 1, C),
                "lin_w": jnp.einsum("bij,jk->bik", W(2, C, C), p_half).astype(MXU_DTYPE),
                "lin_b": jnp.einsum("bij,jk->bik", zeros(2, 1, C), p_half)}

    def srn():
        # TODO(synk): the PyTorch DRSNet re-instantiates RSBU_CW with fresh random
        # weights (.cuda()) on every forward; fixed deterministic params are used here.
        return {"c0_w": Wmx(3, C, C), "c0_b": zeros(1, C),
                "ln1_g": ones(1, C), "ln1_b": zeros(1, C),
                "c1_w": Wmx(3, C, C), "c1_b": zeros(1, C),
                "ln2_g": ones(1, C), "ln2_b": zeros(1, C),
                "c2_w": Wmx(3, C, C), "c2_b": zeros(1, C),
                "fc1_w": Wmx(C, C), "fc1_b": zeros(1, C),
                "fcln_g": ones(1, C), "fcln_b": zeros(1, C),
                "fc2_w": Wmx(C, C), "fc2_b": zeros(1, C),
                "ln_g": ones(1, C), "ln_b": zeros(1, C),
                "lin_w": Wmx(C, C), "lin_b": zeros(1, C),
                "out_w": Wmx(C, C), "out_b": zeros(1, C)}

    def ln():
        return {"g": ones(1, C), "b": zeros(1, C)}

    def layer():
        return {"ffn1": ffn(), "ffn2": ffn(), "mha": mha(),
                "norm1": ln(), "norm2": ln(), "conv": conv(), "srn": srn()}

    return {"layers": [layer() for _ in range(num_layers)], "norm": ln()}


# ----------------------------------------------------------------------------
if __name__ == "__main__":
    # d_model is forced to 256 by DRSNet / AdaptiveAvgPool1d(256) hardcoding.
    B, T, C = 2, 8, 256
    d_ffn = 256
    nhead = 4
    kernel_size = 7
    num_layers = 1

    key = jax.random.PRNGKey(0)
    kx, kp, kw = jax.random.split(key, 3)
    src = jax.random.normal(kx, (B, T, C), F32)
    pos_embs = jax.random.normal(kp, (1, 2 * T - 1, C), F32)
    params = init_params(kw, num_layers, C, d_ffn, nhead, kernel_size)

    out, attn_list = encoder_forward(src, pos_embs, params, nhead, kernel_size)
    out = jax.block_until_ready(out)

    assert out.shape == (B, T, C)
    assert attn_list[0].shape == (B, nhead, T, T)
    assert bool(jnp.all(jnp.isfinite(out)))
    print("KERNEL_OK")
</pallas_src>

<mosaic_0001>
module attributes {stable_mosaic.version = 11 : i64} {
  func.func @_ln_matmul_kernel(%arg0: i32, %arg1: memref<8x256xf32, #tpu.memory_space<vmem>>, %arg2: memref<1x256xf32, #tpu.memory_space<vmem>>, %arg3: memref<1x256xf32, #tpu.memory_space<vmem>>, %arg4: memref<256x768xbf16, #tpu.memory_space<vmem>>, %arg5: memref<1x768xf32, #tpu.memory_space<vmem>>, %arg6: memref<8x768xf32, #tpu.memory_space<vmem>>) attributes {dimension_semantics = [#tpu.dimension_semantics<parallel>], iteration_bounds = array<i64: 2>, scalar_prefetch = 0 : i64, scratch_operands = 0 : i64, tpu.core_type = #tpu.core_type<tc>, window_params = [{transform_indices = @transform_0, window_bounds = array<i64: 8, 256>}, {pipeline_mode = #tpu.pipeline_mode<synchronous>, transform_indices = @transform_1, window_bounds = array<i64: 1, 256>}, {pipeline_mode = #tpu.pipeline_mode<synchronous>, transform_indices = @transform_2, window_bounds = array<i64: 1, 256>}, {pipeline_mode = #tpu.pipeline_mode<synchronous>, transform_indices = @transform_3, window_bounds = array<i64: 256, 768>}, {pipeline_mode = #tpu.pipeline_mode<synchronous>, transform_indices = @transform_4, window_bounds = array<i64: 1, 768>}, {transform_indices = @transform_5, window_bounds = array<i64: 8, 768>}]} {
    %c0 = arith.constant 0 : index
    %c0_0 = arith.constant 0 : index
    %0 = vector.load %arg1[%c0, %c0_0] : memref<8x256xf32, #tpu.memory_space<vmem>>, vector<8x256xf32>
    %c0_1 = arith.constant 0 : index
    %c0_2 = arith.constant 0 : index
    %1 = vector.load %arg2[%c0_1, %c0_2] : memref<1x256xf32, #tpu.memory_space<vmem>>, vector<1x256xf32>
    %c0_3 = arith.constant 0 : index
    %c0_4 = arith.constant 0 : index
    %2 = vector.load %arg3[%c0_3, %c0_4] : memref<1x256xf32, #tpu.memory_space<vmem>>, vector<1x256xf32>
    %cst = arith.constant dense<0.000000e+00> : vector<8xf32>
    %3 = vector.multi_reduction <add>, %0, %cst [1] : vector<8x256xf32> to vector<8xf32>
    %4 = vector.shape_cast %3 : vector<8xf32> to vector<8x1xf32>
    %cst_5 = arith.constant 2.560000e+02 : f32
    %5 = vector.broadcast %cst_5 : f32 to vector<8x1xf32>
    %6 = arith.divf %4, %5 : vector<8x1xf32>
    %7 = vector.broadcast %6 : vector<8x1xf32> to vector<8x256xf32>
    %8 = arith.subf %0, %7 : vector<8x256xf32>
    %9 = arith.mulf %8, %8 : vector<8x256xf32>
    %cst_6 = arith.constant dense<0.000000e+00> : vector<8xf32>
    %10 = vector.multi_reduction <add>, %9, %cst_6 [1] : vector<8x256xf32> to vector<8xf32>
    %11 = vector.shape_cast %10 : vector<8xf32> to vector<8x1xf32>
    %cst_7 = arith.constant 2.560000e+02 : f32
    %12 = vector.broadcast %cst_7 : f32 to vector<8x1xf32>
    %13 = arith.divf %11, %12 : vector<8x1xf32>
    %cst_8 = arith.constant 9.99999974E-6 : f32
    %14 = vector.broadcast %cst_8 : f32 to vector<8x1xf32>
    %15 = arith.addf %13, %14 : vector<8x1xf32>
    %16 = math.rsqrt %15 : vector<8x1xf32>
    %17 = vector.broadcast %16 : vector<8x1xf32> to vector<8x256xf32>
    %18 = arith.mulf %8, %17 : vector<8x256xf32>
    %19 = vector.broadcast %1 : vector<1x256xf32> to vector<8x256xf32>
    %20 = arith.mulf %18, %19 : vector<8x256xf32>
    %21 = vector.broadcast %2 : vector<1x256xf32> to vector<8x256xf32>
    %22 = arith.addf %20, %21 : vector<8x256xf32>
    %c0_9 = arith.constant 0 : index
    %c0_10 = arith.constant 0 : index
    %23 = vector.load %arg4[%c0_9, %c0_10] : memref<256x768xbf16, #tpu.memory_space<vmem>>, vector<256x768xbf16>
    %24 = arith.truncf %22 : vector<8x256xf32> to vector<8x256xbf16>
    %cst_11 = arith.constant dense<0.000000e+00> : vector<8x768xf32>
    %25 = tpu.matmul %24, %23, %cst_11 {dimension_numbers = #tpu.dot_dimension_numbers<[1], [0], [0], [1], [0, 0, 1, 1], [], []>} : vector<8x256xbf16>, vector<256x768xbf16>, vector<8x768xf32> -> vector<8x768xf32>
    %c0_12 = arith.constant 0 : index
    %c0_13 = arith.constant 0 : index
    %26 = vector.load %arg5[%c0_12, %c0_13] : memref<1x768xf32, #tpu.memory_space<vmem>>, vector<1x768xf32>
    %27 = vector.broadcast %26 : vector<1x768xf32> to vector<8x768xf32>
    %28 = arith.addf %25, %27 : vector<8x768xf32>
    %c0_14 = arith.constant 0 : index
    %c0_15 = arith.constant 0 : index
    %29 = vector.load %arg6[%c0_14, %c0_15] : memref<8x768xf32, #tpu.memory_space<vmem>>, vector<8x768xf32>
    tpu.vector_store %arg6[%c0_14, %c0_15], %28 {strides = array<i32>} : memref<8x768xf32, #tpu.memory_space<vmem>>, vector<8x768xf32>,
    return
  }
  func.func @transform_0(%arg0: i32) -> (i32, i32) {
    %c0_i32 = arith.constant 0 : i32
    %c0_i32_0 = arith.constant 0 : i32
    return %arg0, %c0_i32 : i32, i32
  }
  func.func @transform_1(%arg0: i32) -> (i32, i32) {
    %c0_i32 = arith.constant 0 : i32
    %c0_i32_0 = arith.constant 0 : i32
    %c0_i32_1 = arith.constant 0 : i32
    return %c0_i32, %c0_i32_0 : i32, i32
  }
  func.func @transform_2(%arg0: i32) -> (i32, i32) {
    %c0_i32 = arith.constant 0 : i32
    %c0_i32_0 = arith.constant 0 : i32
    %c0_i32_1 = arith.constant 0 : i32
    return %c0_i32, %c0_i32_0 : i32, i32
  }
  func.func @transform_3(%arg0: i32) -> (i32, i32) {
    %c0_i32 = arith.constant 0 : i32
    %c0_i32_0 = arith.constant 0 : i32
    %c0_i32_1 = arith.constant 0 : i32
    return %c0_i32, %c0_i32_0 : i32, i32
  }
  func.func @transform_4(%arg0: i32) -> (i32, i32) {
    %c0_i32 = arith.constant 0 : i32
    %c0_i32_0 = arith.constant 0 : i32
    %c0_i32_1 = arith.constant 0 : i32
    return %c0_i32, %c0_i32_0 : i32, i32
  }
  func.func @transform_5(%arg0: i32) -> (i32, i32) {
    %c0_i32 = arith.constant 0 : i32
    %c0_i32_0 = arith.constant 0 : i32
    return %arg0, %c0_i32 : i32, i32
  }
}

module attributes {stable_mosaic.version = 11 : i64} {
  func.func @_drsn_kernel(%arg0: i32, %arg1: memref<1x8x256xf32, #tpu.memory_space<vmem>>, %arg2: memref<3x256x256xbf16, #tpu.memory_space<vmem>>, %arg3: memref<1x256xf32, #tpu.memory_space<vmem>>, %arg4: memref<1x256xf32, #tpu.memory_space<vmem>>, %arg5: memref<1x256xf32, #tpu.memory_space<vmem>>, %arg6: memref<3x256x256xbf16, #tpu.memory_space<vmem>>, %arg7: memref<1x256xf32, #tpu.memory_space<vmem>>, %arg8: memref<1x256xf32, #tpu.memory_space<vmem>>, %arg9: memref<1x256xf32, #tpu.memory_space<vmem>>, %arg10: memref<3x256x256xbf16, #tpu.memory_space<vmem>>, %arg11: memref<1x256xf32, #tpu.memory_space<vmem>>, %arg12: memref<256x256xbf16, #tpu.memory_space<vmem>>, %arg13: memref<1x256xf32, #tpu.memory_space<vmem>>, %arg14: memref<1x256xf32, #tpu.memory_space<vmem>>, %arg15: memref<1x256xf32, #tpu.memory_space<vmem>>, %arg16: memref<256x256xbf16, #tpu.memory_space<vmem>>, %arg17: memref<1x256xf32, #tpu.memory_space<vmem>>, %arg18: memref<1x256xf32, #tpu.memory_space<vmem>>, %arg19: memref<1x256xf32, #tpu.memory_space<vmem>>, %arg20: memref<256x256xbf16, #tpu.memory_space<vmem>>, %arg21: memref<1x256xf32, #tpu.memory_space<vmem>>, %arg22: memref<256x256xbf16, #tpu.memory_space<vmem>>, %arg23: memref<1x256xf32, #tpu.memory_space<vmem>>, %arg24: memref<1x8x256xf32, #tpu.memory_space<vmem>>) attributes {dimension_semantics = [#tpu.dimension_semantics<parallel>], iteration_bounds = array<i64: 2>, scalar_prefetch = 0 : i64, scratch_operands = 0 : i64, tpu.core_type = #tpu.core_type<tc>, window_params = [{transform_indices = @transform_0, window_bounds = array<i64: 1, 8, 256>}, {pipeline_mode = #tpu.pipeline_mode<synchronous>, transform_indices = @transform_1, window_bounds = array<i64: 3, 256, 256>}, {pipeline_mode = #tpu.pipeline_mode<synchronous>, transform_indices = @transform_2, window_bounds = array<i64: 1, 256>}, {pipeline_mode = #tpu.pipeline_mode<synchronous>, transform_indices = @transform_3, window_bounds = array<i64: 1, 256>}, {pipeline_mode = #tpu.pipeline_mode<synchronous>, transform_indices = @transform_4, window_bounds = array<i64: 1, 256>}, {pipeline_mode = #tpu.pipeline_mode<synchronous>, transform_indices = @transform_5, window_bounds = array<i64: 3, 256, 256>}, {pipeline_mode = #tpu.pipeline_mode<synchronous>, transform_indices = @transform_6, window_bounds = array<i64: 1, 256>}, {pipeline_mode = #tpu.pipeline_mode<synchronous>, transform_indices = @transform_7, window_bounds = array<i64: 1, 256>}, {pipeline_mode = #tpu.pipeline_mode<synchronous>, transform_indices = @transform_8, window_bounds = array<i64: 1, 256>}, {pipeline_mode = #tpu.pipeline_mode<synchronous>, transform_indices = @transform_9, window_bounds = array<i64: 3, 256, 256>}, {pipeline_mode = #tpu.pipeline_mode<synchronous>, transform_indices = @transform_10, window_bounds = array<i64: 1, 256>}, {pipeline_mode = #tpu.pipeline_mode<synchronous>, transform_indices = @transform_11, window_bounds = array<i64: 256, 256>}, {pipeline_mode = #tpu.pipeline_mode<synchronous>, transform_indices = @transform_12, window_bounds = array<i64: 1, 256>}, {pipeline_mode = #tpu.pipeline_mode<synchronous>, transform_indices = @transform_13, window_bounds = array<i64: 1, 256>}, {pipeline_mode = #tpu.pipeline_mode<synchronous>, transform_indices = @transform_14, window_bounds = array<i64: 1, 256>}, {pipeline_mode = #tpu.pipeline_mode<synchronous>, transform_indices = @transform_15, window_bounds = array<i64: 256, 256>}, {pipeline_mode = #tpu.pipeline_mode<synchronous>, transform_indices = @transform_16, window_bounds = array<i64: 1, 256>}, {pipeline_mode = #tpu.pipeline_mode<synchronous>, transform_indices = @transform_17, window_bounds = array<i64: 1, 256>}, {pipeline_mode = #tpu.pipeline_mode<synchronous>, transform_indices = @transform_18, window_bounds = array<i64: 1, 256>}, {pipeline_mode = #tpu.pipeline_mode<synchronous>, transform_indices = @transform_19, window_bounds = array<i64: 256, 256>}, {pipeline_mode = #tpu.pipeline_mode<synchronous>, transform_indices = @transform_20, window_bounds = array<i64: 1, 256>}, {pipeline_mode = #tpu.pipeline_mode<synchronous>, transform_indices = @transform_21, window_bounds = array<i64: 256, 256>}, {pipeline_mode = #tpu.pipeline_mode<synchronous>, transform_indices = @transform_22, window_bounds = array<i64: 1, 256>}, {transform_indices = @transform_23, window_bounds = array<i64: 1, 8, 256>}]} {
    %0 = tpu.iota {dimensions = array<i32: 0>} : vector<8x1xi32>
    %c0 = arith.constant 0 : index
    %c0_0 = arith.constant 0 : index
    %c0_1 = arith.constant 0 : index
    %1 = vector.load %arg1[%c0, %c0_0, %c0_1] : memref<1x8x256xf32, #tpu.memory_space<vmem>>, vector<1x8x256xf32>
    %2 = vector.shape_cast %1 : vector<1x8x256xf32> to vector<8x256xf32>
    %c0_2 = arith.constant 0 : index
    %c0_3 = arith.constant 0 : index
    %3 = vector.load %arg3[%c0_2, %c0_3] : memref<1x256xf32, #tpu.memory_space<vmem>>, vector<1x256xf32>
    %c0_4 = arith.constant 0 : index
    %c0_5 = arith.constant 0 : index
    %c0_6 = arith.constant 0 : index
    %4 = vector.load %arg2[%c0_4, %c0_5, %c0_6] : memref<3x256x256xbf16, #tpu.memory_space<vmem>>, vector<1x256x256xbf16>
    %5 = vector.shape_cast %4 : vector<1x256x256xbf16> to vector<256x256xbf16>
    %6 = arith.truncf %2 : vector<8x256xf32> to vector<8x256xbf16>
    %cst = arith.constant dense<0.000000e+00> : vector<8x256xf32>
    %7 = tpu.matmul %6, %5, %cst {dimension_numbers = #tpu.dot_dimension_numbers<[1], [0], [0], [1], [0, 0, 1, 1], [], []>} : vector<8x256xbf16>, vector<256x256xbf16>, vector<8x256xf32> -> vector<8x256xf32>
    %c1_i32 = arith.constant 1 : i32
    %8 = tpu.dynamic_rotate %7 by %c1_i32 dim 0 : vector<8x256xf32>, i32 -> vector<8x256xf32>
    %c1_i32_7 = arith.constant 1 : i32
    %9 = vector.broadcast %c1_i32_7 : i32 to vector<8x1xi32>
    %10 = arith.cmpi sge, %0, %9 : vector<8x1xi32>
    %cst_8 = arith.constant 0.000000e+00 : f32
    %11 = vector.shape_cast %10 : vector<8x1xi1> to vector<8x1xi1>
    %12 = vector.broadcast %11 : vector<8x1xi1> to vector<8x256xi1>
    %13 = vector.broadcast %cst_8 : f32 to vector<8x256xf32>
    %14 = arith.select %12, %8, %13 : vector<8x256xi1>, vector<8x256xf32>
    %c1 = arith.constant 1 : index
    %c0_9 = arith.constant 0 : index
    %c0_10 = arith.constant 0 : index
    %15 = vector.load %arg2[%c1, %c0_9, %c0_10] : memref<3x256x256xbf16, #tpu.memory_space<vmem>>, vector<1x256x256xbf16>
    %16 = vector.shape_cast %15 : vector<1x256x256xbf16> to vector<256x256xbf16>
    %17 = arith.truncf %2 : vector<8x256xf32> to vector<8x256xbf16>
    %cst_11 = arith.constant dense<0.000000e+00> : vector<8x256xf32>
    %18 = tpu.matmul %17, %16, %cst_11 {dimension_numbers = #tpu.dot_dimension_numbers<[1], [0], [0], [1], [0, 0, 1, 1], [], []>} : vector<8x256xbf16>, vector<256x256xbf16>, vector<8x256xf32> -> vector<8x256xf32>
    %19 = arith.addf %14, %18 : vector<8x256xf32>
    %c2 = arith.constant 2 : index
    %c0_12 = arith.constant 0 : index
    %c0_13 = arith.constant 0 : index
    %20 = vector.load %arg2[%c2, %c0_12, %c0_13] : memref<3x256x256xbf16, #tpu.memory_space<vmem>>, vector<1x256x256xbf16>
    %21 = vector.shape_cast %20 : vector<1x256x256xbf16> to vector<256x256xbf16>
    %22 = arith.truncf %2 : vector<8x256xf32> to vector<8x256xbf16>
    %cst_14 = arith.constant dense<0.000000e+00> : vector<8x256xf32>
    %23 = tpu.matmul %22, %21, %cst_14 {dimension_numbers = #tpu.dot_dimension_numbers<[1], [0], [0], [1], [0, 0, 1, 1], [], []>} : vector<8x256xbf16>, vector<256x256xbf16>, vector<8x256xf32> -> vector<8x256xf32>
    %c7_i32 = arith.constant 7 : i32
    %24 = tpu.dynamic_rotate %23 by %c7_i32 dim 0 : vector<8x256xf32>, i32 -> vector<8x256xf32>
    %c7_i32_15 = arith.constant 7 : i32
    %25 = vector.broadcast %c7_i32_15 : i32 to vector<8x1xi32>
    %26 = arith.cmpi slt, %0, %25 : vector<8x1xi32>
    %cst_16 = arith.constant 0.000000e+00 : f32
    %27 = vector.shape_cast %26 : vector<8x1xi1> to vector<8x1xi1>
    %28 = vector.broadcast %27 : vector<8x1xi1> to vector<8x256xi1>
    %29 = vector.broadcast %cst_16 : f32 to vector<8x256xf32>
    %30 = arith.select %28, %24, %29 : vector<8x256xi1>, vector<8x256xf32>
    %31 = arith.addf %19, %30 : vector<8x256xf32>
    %32 = vector.broadcast %3 : vector<1x256xf32> to vector<8x256xf32>
    %33 = arith.addf %31, %32 : vector<8x256xf32>
    %c0_17 = arith.constant 0 : index
    %c0_18 = arith.constant 0 : index
    %34 = vector.load %arg4[%c0_17, %c0_18] : memref<1x256xf32, #tpu.memory_space<vmem>>, vector<1x256xf32>
    %c0_19 = arith.constant 0 : index
    %c0_20 = arith.constant 0 : index
    %35 = vector.load %arg5[%c0_19, %c0_20] : memref<1x256xf32, #tpu.memory_space<vmem>>, vector<1x256xf32>
    %cst_21 = arith.constant dense<0.000000e+00> : vector<8xf32>
    %36 = vector.multi_reduction <add>, %33, %cst_21 [1] : vector<8x256xf32> to vector<8xf32>
    %37 = vector.shape_cast %36 : vector<8xf32> to vector<8x1xf32>
    %cst_22 = arith.constant 2.560000e+02 : f32
    %38 = vector.broadcast %cst_22 : f32 to vector<8x1xf32>
    %39 = arith.divf %37, %38 : vector<8x1xf32>
    %40 = vector.broadcast %39 : vector<8x1xf32> to vector<8x256xf32>
    %41 = arith.subf %33, %40 : vector<8x256xf32>
    %42 = arith.mulf %41, %41 : vector<8x256xf32>
    %cst_23 = arith.constant dense<0.000000e+00> : vector<8xf32>
    %43 = vector.multi_reduction <add>, %42, %cst_23 [1] : vector<8x256xf32> to vector<8xf32>
    %44 = vector.shape_cast %43 : vector<8xf32> to vector<8x1xf32>
    %cst_24 = arith.constant 2.560000e+02 : f32
    %45 = vector.broadcast %cst_24 : f32 to vector<8x1xf32>
    %46 = arith.divf %44, %45 : vector<8x1xf32>
    %cst_25 = arith.constant 9.99999974E-6 : f32
    %47 = vector.broadcast %cst_25 : f32 to vector<8x1xf32>
    %48 = arith.addf %46, %47 : vector<8x1xf32>
    %49 = math.rsqrt %48 : vector<8x1xf32>
    %50 = vector.broadcast %49 : vector<8x1xf32> to vector<8x256xf32>
    %51 = arith.mulf %41, %50 : vector<8x256xf32>
    %52 = vector.broadcast %34 : vector<1x256xf32> to vector<8x256xf32>
    %53 = arith.mulf %51, %52 : vector<8x256xf32>
    %54 = vector.broadcast %35 : vector<1x256xf32> to vector<8x256xf32>
    %55 = arith.addf %53, %54 : vector<8x256xf32>
    %cst_26 = arith.constant 0.000000e+00 : f32
    %56 = vector.broadcast %cst_26 : f32 to vector<8x256xf32>
    %57 = arith.maximumf %55, %56 : vector<8x256xf32>
    %c0_27 = arith.constant 0 : index
    %c0_28 = arith.constant 0 : index
    %58 = vector.load %arg7[%c0_27, %c0_28] : memref<1x256xf32, #tpu.memory_space<vmem>>, vector<1x256xf32>
    %c0_29 = arith.constant 0 : index
    %c0_30 = arith.constant 0 : index
    %c0_31 = arith.constant 0 : index
    %59 = vector.load %arg6[%c0_29, %c0_30, %c0_31] : memref<3x256x256xbf16, #tpu.memory_space<vmem>>, vector<1x256x256xbf16>
    %60 = vector.shape_cast %59 : vector<1x256x256xbf16> to vector<256x256xbf16>
    %61 = arith.truncf %57 : vector<8x256xf32> to vector<8x256xbf16>
    %cst_32 = arith.constant dense<0.000000e+00> : vector<8x256xf32>
    %62 = tpu.matmul %61, %60, %cst_32 {dimension_numbers = #tpu.dot_dimension_numbers<[1], [0], [0], [1], [0, 0, 1, 1], [], []>} : vector<8x256xbf16>, vector<256x256xbf16>, vector<8x256xf32> -> vector<8x256xf32>
    %c1_i32_33 = arith.constant 1 : i32
    %63 = tpu.dynamic_rotate %62 by %c1_i32_33 dim 0 : vector<8x256xf32>, i32 -> vector<8x256xf32>
    %c1_i32_34 = arith.constant 1 : i32
    %64 = vector.broadcast %c1_i32_34 : i32 to vector<8x1xi32>
    %65 = arith.cmpi sge, %0, %64 : vector<8x1xi32>
    %cst_35 = arith.constant 0.000000e+00 : f32
    %66 = vector.shape_cast %65 : vector<8x1xi1> to vector<8x1xi1>
    %67 = vector.broadcast %66 : vector<8x1xi1> to vector<8x256xi1>
    %68 = vector.broadcast %cst_35 : f32 to vector<8x256xf32>
    %69 = arith.select %67, %63, %68 : vector<8x256xi1>, vector<8x256xf32>
    %c1_36 = arith.constant 1 : index
    %c0_37 = arith.constant 0 : index
    %c0_38 = arith.constant 0 : index
    %70 = vector.load %arg6[%c1_36, %c0_37, %c0_38] : memref<3x256x256xbf16, #tpu.memory_space<vmem>>, vector<1x256x256xbf16>
    %71 = vector.shape_cast %70 : vector<1x256x256xbf16> to vector<256x256xbf16>
    %72 = arith.truncf %57 : vector<8x256xf32> to vector<8x256xbf16>
    %cst_39 = arith.constant dense<0.000000e+00> : vector<8x256xf32>
    %73 = tpu.matmul %72, %71, %cst_39 {dimension_numbers = #tpu.dot_dimension_numbers<[1], [0], [0], [1], [0, 0, 1, 1], [], []>} : vector<8x256xbf16>, vector<256x256xbf16>, vector<8x256xf32> -> vector<8x256xf32>
    %74 = arith.addf %69, %73 : vector<8x256xf32>
    %c2_40 = arith.constant 2 : index
    %c0_41 = arith.constant 0 : index
    %c0_42 = arith.constant 0 : index
    %75 = vector.load %arg6[%c2_40, %c0_41, %c0_42] : memref<3x256x256xbf16, #tpu.memory_space<vmem>>, vector<1x256x256xbf16>
    %76 = vector.shape_cast %75 : vector<1x256x256xbf16> to vector<256x256xbf16>
    %77 = arith.truncf %57 : vector<8x256xf32> to vector<8x256xbf16>
    %cst_43 = arith.constant dense<0.000000e+00> : vector<8x256xf32>
    %78 = tpu.matmul %77, %76, %cst_43 {dimension_numbers = #tpu.dot_dimension_numbers<[1], [0], [0], [1], [0, 0, 1, 1], [], []>} : vector<8x256xbf16>, vector<256x256xbf16>, vector<8x256xf32> -> vector<8x256xf32>
    %c7_i32_44 = arith.constant 7 : i32
    %79 = tpu.dynamic_rotate %78 by %c7_i32_44 dim 0 : vector<8x256xf32>, i32 -> vector<8x256xf32>
    %c7_i32_45 = arith.constant 7 : i32
    %80 = vector.broadcast %c7_i32_45 : i32 to vector<8x1xi32>
    %81 = arith.cmpi slt, %0, %80 : vector<8x1xi32>
    %cst_46 = arith.constant 0.000000e+00 : f32
    %82 = vector.shape_cast %81 : vector<8x1xi1> to vector<8x1xi1>
    %83 = vector.broadcast %82 : vector<8x1xi1> to vector<8x256xi1>
    %84 = vector.broadcast %cst_46 : f32 to vector<8x256xf32>
    %85 = arith.select %83, %79, %84 : vector<8x256xi1>, vector<8x256xf32>
    %86 = arith.addf %74, %85 : vector<8x256xf32>
    %87 = vector.broadcast %58 : vector<1x256xf32> to vector<8x256xf32>
    %88 = arith.addf %86, %87 : vector<8x256xf32>
    %c0_47 = arith.constant 0 : index
    %c0_48 = arith.constant 0 : index
    %89 = vector.load %arg8[%c0_47, %c0_48] : memref<1x256xf32, #tpu.memory_space<vmem>>, vector<1x256xf32>
    %c0_49 = arith.constant 0 : index
    %c0_50 = arith.constant 0 : index
    %90 = vector.load %arg9[%c0_49, %c0_50] : memref<1x256xf32, #tpu.memory_space<vmem>>, vector<1x256xf32>
    %cst_51 = arith.constant dense<0.000000e+00> : vector<8xf32>
    %91 = vector.multi_reduction <add>, %88, %cst_51 [1] : vector<8x256xf32> to vector<8xf32>
    %92 = vector.shape_cast %91 : vector<8xf32> to vector<8x1xf32>
    %cst_52 = arith.constant 2.560000e+02 : f32
    %93 = vector.broadcast %cst_52 : f32 to vector<8x1xf32>
    %94 = arith.divf %92, %93 : vector<8x1xf32>
    %95 = vector.broadcast %94 : vector<8x1xf32> to vector<8x256xf32>
    %96 = arith.subf %88, %95 : vector<8x256xf32>
    %97 = arith.mulf %96, %96 : vector<8x256xf32>
    %cst_53 = arith.constant dense<0.000000e+00> : vector<8xf32>
    %98 = vector.multi_reduction <add>, %97, %cst_53 [1] : vector<8x256xf32> to vector<8xf32>
    %99 = vector.shape_cast %98 : vector<8xf32> to vector<8x1xf32>
    %cst_54 = arith.constant 2.560000e+02 : f32
    %100 = vector.broadcast %cst_54 : f32 to vector<8x1xf32>
    %101 = arith.divf %99, %100 : vector<8x1xf32>
    %cst_55 = arith.constant 9.99999974E-6 : f32
    %102 = vector.broadcast %cst_55 : f32 to vector<8x1xf32>
    %103 = arith.addf %101, %102 : vector<8x1xf32>
    %104 = math.rsqrt %103 : vector<8x1xf32>
    %105 = vector.broadcast %104 : vector<8x1xf32> to vector<8x256xf32>
    %106 = arith.mulf %96, %105 : vector<8x256xf32>
    %107 = vector.broadcast %89 : vector<1x256xf32> to vector<8x256xf32>
    %108 = arith.mulf %106, %107 : vector<8x256xf32>
    %109 = vector.broadcast %90 : vector<1x256xf32> to vector<8x256xf32>
    %110 = arith.addf %108, %109 : vector<8x256xf32>
    %cst_56 = arith.constant 0.000000e+00 : f32
    %111 = vector.broadcast %cst_56 : f32 to vector<8x256xf32>
    %112 = arith.maximumf %110, %111 : vector<8x256xf32>
    %c0_57 = arith.constant 0 : index
    %c0_58 = arith.constant 0 : index
    %113 = vector.load %arg11[%c0_57, %c0_58] : memref<1x256xf32, #tpu.memory_space<vmem>>, vector<1x256xf32>
    %c0_59 = arith.constant 0 : index
    %c0_60 = arith.constant 0 : index
    %c0_61 = arith.constant 0 : index
    %114 = vector.load %arg10[%c0_59, %c0_60, %c0_61] : memref<3x256x256xbf16, #tpu.memory_space<vmem>>, vector<1x256x256xbf16>
    %115 = vector.shape_cast %114 : vector<1x256x256xbf16> to vector<256x256xbf16>
    %116 = arith.truncf %112 : vector<8x256xf32> to vector<8x256xbf16>
    %cst_62 = arith.constant dense<0.000000e+00> : vector<8x256xf32>
    %117 = tpu.matmul %116, %115, %cst_62 {dimension_numbers = #tpu.dot_dimension_numbers<[1], [0], [0], [1], [0, 0, 1, 1], [], []>} : vector<8x256xbf16>, vector<256x256xbf16>, vector<8x256xf32> -> vector<8x256xf32>
    %c1_i32_63 = arith.constant 1 : i32
    %118 = tpu.dynamic_rotate %117 by %c1_i32_63 dim 0 : vector<8x256xf32>, i32 -> vector<8x256xf32>
    %c1_i32_64 = arith.constant 1 : i32
    %119 = vector.broadcast %c1_i32_64 : i32 to vector<8x1xi32>
    %120 = arith.cmpi sge, %0, %119 : vector<8x1xi32>
    %cst_65 = arith.constant 0.000000e+00 : f32
    %121 = vector.shape_cast %120 : vector<8x1xi1> to vector<8x1xi1>
    %122 = vector.broadcast %121 : vector<8x1xi1> to vector<8x256xi1>
    %123 = vector.broadcast %cst_65 : f32 to vector<8x256xf32>
    %124 = arith.select %122, %118, %123 : vector<8x256xi1>, vector<8x256xf32>
    %c1_66 = arith.constant 1 : index
    %c0_67 = arith.constant 0 : index
    %c0_68 = arith.constant 0 : index
    %125 = vector.load %arg10[%c1_66, %c0_67, %c0_68] : memref<3x256x256xbf16, #tpu.memory_space<vmem>>, vector<1x256x256xbf16>
    %126 = vector.shape_cast %125 : vector<1x256x256xbf16> to vector<256x256xbf16>
    %127 = arith.truncf %112 : vector<8x256xf32> to vector<8x256xbf16>
    %cst_69 = arith.constant dense<0.000000e+00> : vector<8x256xf32>
    %128 = tpu.matmul %127, %126, %cst_69 {dimension_numbers = #tpu.dot_dimension_numbers<[1], [0], [0], [1], [0, 0, 1, 1], [], []>} : vector<8x256xbf16>, vector<256x256xbf16>, vector<8x256xf32> -> vector<8x256xf32>
    %129 = arith.addf %124, %128 : vector<8x256xf32>
    %c2_70 = arith.constant 2 : index
    %c0_71 = arith.constant 0 : index
    %c0_72 = arith.constant 0 : index
    %130 = vector.load %arg10[%c2_70, %c0_71, %c0_72] : memref<3x256x256xbf16, #tpu.memory_space<vmem>>, vector<1x256x256xbf16>
    %131 = vector.shape_cast %130 : vector<1x256x256xbf16> to vector<256x256xbf16>
    %132 = arith.truncf %112 : vector<8x256xf32> to vector<8x256xbf16>
    %cst_73 = arith.constant dense<0.000000e+00> : vector<8x256xf32>
    %133 = tpu.matmul %132, %131, %cst_73 {dimension_numbers = #tpu.dot_dimension_numbers<[1], [0], [0], [1], [0, 0, 1, 1], [], []>} : vector<8x256xbf16>, vector<256x256xbf16>, vector<8x256xf32> -> vector<8x256xf32>
    %c7_i32_74 = arith.constant 7 : i32
    %134 = tpu.dynamic_rotate %133 by %c7_i32_74 dim 0 : vector<8x256xf32>, i32 -> vector<8x256xf32>
    %c7_i32_75 = arith.constant 7 : i32
    %135 = vector.broadcast %c7_i32_75 : i32 to vector<8x1xi32>
    %136 = arith.cmpi slt, %0, %135 : vector<8x1xi32>
    %cst_76 = arith.constant 0.000000e+00 : f32
    %137 = vector.shape_cast %136 : vector<8x1xi1> to vector<8x1xi1>
    %138 = vector.broadcast %137 : vector<8x1xi1> to vector<8x256xi1>
    %139 = vector.broadcast %cst_76 : f32 to vector<8x256xf32>
    %140 = arith.select %138, %134, %139 : vector<8x256xi1>, vector<8x256xf32>
    %141 = arith.addf %129, %140 : vector<8x256xf32>
    %142 = vector.broadcast %113 : vector<1x256xf32> to vector<8x256xf32>
    %143 = arith.addf %141, %142 : vector<8x256xf32>
    %144 = math.absf %143 : vector<8x256xf32>
    %c0_77 = arith.constant 0 : index
    %c0_78 = arith.constant 0 : index
    %145 = vector.load %arg12[%c0_77, %c0_78] : memref<256x256xbf16, #tpu.memory_space<vmem>>, vector<256x256xbf16>
    %146 = arith.truncf %144 : vector<8x256xf32> to vector<8x256xbf16>
    %cst_79 = arith.constant dense<0.000000e+00> : vector<8x256xf32>
    %147 = tpu.matmul %146, %145, %cst_79 {dimension_numbers = #tpu.dot_dimension_numbers<[1], [0], [0], [1], [0, 0, 1, 1], [], []>} : vector<8x256xbf16>, vector<256x256xbf16>, vector<8x256xf32> -> vector<8x256xf32>
    %c0_80 = arith.constant 0 : index
    %c0_81 = arith.constant 0 : index
    %148 = vector.load %arg13[%c0_80, %c0_81] : memref<1x256xf32, #tpu.memory_space<vmem>>, vector<1x256xf32>
    %149 = vector.broadcast %148 : vector<1x256xf32> to vector<8x256xf32>
    %150 = arith.addf %147, %149 : vector<8x256xf32>
    %c0_82 = arith.constant 0 : index
    %c0_83 = arith.constant 0 : index
    %151 = vector.load %arg14[%c0_82, %c0_83] : memref<1x256xf32, #tpu.memory_space<vmem>>, vector<1x256xf32>
    %c0_84 = arith.constant 0 : index
    %c0_85 = arith.constant 0 : index
    %152 = vector.load %arg15[%c0_84, %c0_85] : memref<1x256xf32, #tpu.memory_space<vmem>>, vector<1x256xf32>
    %cst_86 = arith.constant dense<0.000000e+00> : vector<8xf32>
    %153 = vector.multi_reduction <add>, %150, %cst_86 [1] : vector<8x256xf32> to vector<8xf32>
    %154 = vector.shape_cast %153 : vector<8xf32> to vector<8x1xf32>
    %cst_87 = arith.constant 2.560000e+02 : f32
    %155 = vector.broadcast %cst_87 : f32 to vector<8x1xf32>
    %156 = arith.divf %154, %155 : vector<8x1xf32>
    %157 = vector.broadcast %156 : vector<8x1xf32> to vector<8x256xf32>
    %158 = arith.subf %150, %157 : vector<8x256xf32>
    %159 = arith.mulf %158, %158 : vector<8x256xf32>
    %cst_88 = arith.constant dense<0.000000e+00> : vector<8xf32>
    %160 = vector.multi_reduction <add>, %159, %cst_88 [1] : vector<8x256xf32> to vector<8xf32>
    %161 = vector.shape_cast %160 : vector<8xf32> to vector<8x1xf32>
    %cst_89 = arith.constant 2.560000e+02 : f32
    %162 = vector.broadcast %cst_89 : f32 to vector<8x1xf32>
    %163 = arith.divf %161, %162 : vector<8x1xf32>
    %cst_90 = arith.constant 9.99999974E-6 : f32
    %164 = vector.broadcast %cst_90 : f32 to vector<8x1xf32>
    %165 = arith.addf %163, %164 : vector<8x1xf32>
    %166 = math.rsqrt %165 : vector<8x1xf32>
    %167 = vector.broadcast %166 : vector<8x1xf32> to vector<8x256xf32>
    %168 = arith.mulf %158, %167 : vector<8x256xf32>
    %169 = vector.broadcast %151 : vector<1x256xf32> to vector<8x256xf32>
    %170 = arith.mulf %168, %169 : vector<8x256xf32>
    %171 = vector.broadcast %152 : vector<1x256xf32> to vector<8x256xf32>
    %172 = arith.addf %170, %171 : vector<8x256xf32>
    %cst_91 = arith.constant 0.000000e+00 : f32
    %173 = vector.broadcast %cst_91 : f32 to vector<8x256xf32>
    %174 = arith.maximumf %172, %173 : vector<8x256xf32>
    %c0_92 = arith.constant 0 : index
    %c0_93 = arith.constant 0 : index
    %175 = vector.load %arg16[%c0_92, %c0_93] : memref<256x256xbf16, #tpu.memory_space<vmem>>, vector<256x256xbf16>
    %176 = arith.truncf %174 : vector<8x256xf32> to vector<8x256xbf16>
    %cst_94 = arith.constant dense<0.000000e+00> : vector<8x256xf32>
    %177 = tpu.matmul %176, %175, %cst_94 {dimension_numbers = #tpu.dot_dimension_numbers<[1], [0], [0], [1], [0, 0, 1, 1], [], []>} : vector<8x256xbf16>, vector<256x256xbf16>, vector<8x256xf32> -> vector<8x256xf32>
    %c0_95 = arith.constant 0 : index
    %c0_96 = arith.constant 0 : index
    %178 = vector.load %arg17[%c0_95, %c0_96] : memref<1x256xf32, #tpu.memory_space<vmem>>, vector<1x256xf32>
    %179 = vector.broadcast %178 : vector<1x256xf32> to vector<8x256xf32>
    %180 = arith.addf %177, %179 : vector<8x256xf32>
    %181 = arith.negf %180 : vector<8x256xf32>
    %182 = math.exp %181 : vector<8x256xf32>
    %cst_97 = arith.constant 1.000000e+00 : f32
    %183 = vector.broadcast %cst_97 : f32 to vector<8x256xf32>
    %184 = arith.addf %183, %182 : vector<8x256xf32>
    %185 = arith.divf %183, %184 : vector<8x256xf32>
    %186 = arith.mulf %144, %185 : vector<8x256xf32>
    %187 = arith.subf %144, %186 : vector<8x256xf32>
    %cst_98 = arith.constant 0.000000e+00 : f32
    %188 = vector.broadcast %cst_98 : f32 to vector<8x256xf32>
    %189 = arith.maximumf %187, %188 : vector<8x256xf32>
    %cst_99 = arith.constant 0.000000e+00 : f32
    %190 = vector.broadcast %cst_99 : f32 to vector<8x256xf32>
    %191 = arith.cmpf oge, %143, %190 : vector<8x256xf32>
    %cst_100 = arith.constant 1.000000e+00 : f32
    %cst_101 = arith.constant -1.000000e+00 : f32
    %192 = vector.broadcast %cst_100 : f32 to vector<8x256xf32>
    %193 = vector.broadcast %cst_101 : f32 to vector<8x256xf32>
    %194 = arith.select %191, %192, %193 : vector<8x256xi1>, vector<8x256xf32>
    %195 = arith.mulf %194, %189 : vector<8x256xf32>
    %196 = arith.addf %195, %33 : vector<8x256xf32>
    %c0_102 = arith.constant 0 : index
    %c0_103 = arith.constant 0 : index
    %197 = vector.load %arg18[%c0_102, %c0_103] : memref<1x256xf32, #tpu.memory_space<vmem>>, vector<1x256xf32>
    %c0_104 = arith.constant 0 : index
    %c0_105 = arith.constant 0 : index
    %198 = vector.load %arg19[%c0_104, %c0_105] : memref<1x256xf32, #tpu.memory_space<vmem>>, vector<1x256xf32>
    %cst_106 = arith.constant dense<0.000000e+00> : vector<8xf32>
    %199 = vector.multi_reduction <add>, %196, %cst_106 [1] : vector<8x256xf32> to vector<8xf32>
    %200 = vector.shape_cast %199 : vector<8xf32> to vector<8x1xf32>
    %cst_107 = arith.constant 2.560000e+02 : f32
    %201 = vector.broadcast %cst_107 : f32 to vector<8x1xf32>
    %202 = arith.divf %200, %201 : vector<8x1xf32>
    %203 = vector.broadcast %202 : vector<8x1xf32> to vector<8x256xf32>
    %204 = arith.subf %196, %203 : vector<8x256xf32>
    %205 = arith.mulf %204, %204 : vector<8x256xf32>
    %cst_108 = arith.constant dense<0.000000e+00> : vector<8xf32>
    %206 = vector.multi_reduction <add>, %205, %cst_108 [1] : vector<8x256xf32> to vector<8xf32>
    %207 = vector.shape_cast %206 : vector<8xf32> to vector<8x1xf32>
    %cst_109 = arith.constant 2.560000e+02 : f32
    %208 = vector.broadcast %cst_109 : f32 to vector<8x1xf32>
    %209 = arith.divf %207, %208 : vector<8x1xf32>
    %cst_110 = arith.constant 9.99999974E-6 : f32
    %210 = vector.broadcast %cst_110 : f32 to vector<8x1xf32>
    %211 = arith.addf %209, %210 : vector<8x1xf32>
    %212 = math.rsqrt %211 : vector<8x1xf32>
    %213 = vector.broadcast %212 : vector<8x1xf32> to vector<8x256xf32>
    %214 = arith.mulf %204, %213 : vector<8x256xf32>
    %215 = vector.broadcast %197 : vector<1x256xf32> to vector<8x256xf32>
    %216 = arith.mulf %214, %215 : vector<8x256xf32>
    %217 = vector.broadcast %198 : vector<1x256xf32> to vector<8x256xf32>
    %218 = arith.addf %216, %217 : vector<8x256xf32>
    %cst_111 = arith.constant 0.000000e+00 : f32
    %219 = vector.broadcast %cst_111 : f32 to vector<8x256xf32>
    %220 = arith.maximumf %218, %219 : vector<8x256xf32>
    %c0_112 = arith.constant 0 : index
    %c0_113 = arith.constant 0 : index
    %221 = vector.load %arg20[%c0_112, %c0_113] : memref<256x256xbf16, #tpu.memory_space<vmem>>, vector<256x256xbf16>
    %222 = arith.truncf %220 : vector<8x256xf32> to vector<8x256xbf16>
    %cst_114 = arith.constant dense<0.000000e+00> : vector<8x256xf32>
    %223 = tpu.matmul %222, %221, %cst_114 {dimension_numbers = #tpu.dot_dimension_numbers<[1], [0], [0], [1], [0, 0, 1, 1], [], []>} : vector<8x256xbf16>, vector<256x256xbf16>, vector<8x256xf32> -> vector<8x256xf32>
    %c0_115 = arith.constant 0 : index
    %c0_116 = arith.constant 0 : index
    %224 = vector.load %arg21[%c0_115, %c0_116] : memref<1x256xf32, #tpu.memory_space<vmem>>, vector<1x256xf32>
    %225 = vector.broadcast %224 : vector<1x256xf32> to vector<8x256xf32>
    %226 = arith.addf %223, %225 : vector<8x256xf32>
    %c0_117 = arith.constant 0 : index
    %c0_118 = arith.constant 0 : index
    %227 = vector.load %arg22[%c0_117, %c0_118] : memref<256x256xbf16, #tpu.memory_space<vmem>>, vector<256x256xbf16>
    %228 = arith.truncf %226 : vector<8x256xf32> to vector<8x256xbf16>
    %cst_119 = arith.constant dense<0.000000e+00> : vector<8x256xf32>
    %229 = tpu.matmul %228, %227, %cst_119 {dimension_numbers = #tpu.dot_dimension_numbers<[1], [0], [0], [1], [0, 0, 1, 1], [], []>} : vector<8x256xbf16>, vector<256x256xbf16>, vector<8x256xf32> -> vector<8x256xf32>
    %c0_120 = arith.constant 0 : index
    %c0_121 = arith.constant 0 : index
    %230 = vector.load %arg23[%c0_120, %c0_121] : memref<1x256xf32, #tpu.memory_space<vmem>>, vector<1x256xf32>
    %231 = vector.broadcast %230 : vector<1x256xf32> to vector<8x256xf32>
    %232 = arith.addf %229, %231 : vector<8x256xf32>
    %cst_122 = arith.constant dense<0xFF800000> : vector<256xf32>
    %233 = vector.multi_reduction <maximumf>, %232, %cst_122 [0] : vector<8x256xf32> to vector<256xf32>
    %234 = vector.shape_cast %233 : vector<256xf32> to vector<1x256xf32>
    %235 = vector.broadcast %234 : vector<1x256xf32> to vector<8x256xf32>
    %236 = arith.subf %232, %235 : vector<8x256xf32>
    %237 = math.exp %236 : vector<8x256xf32>
    %cst_123 = arith.constant dense<0.000000e+00> : vector<256xf32>
    %238 = vector.multi_reduction <add>, %237, %cst_123 [0] : vector<8x256xf32> to vector<256xf32>
    %239 = vector.shape_cast %238 : vector<256xf32> to vector<1x256xf32>
    %240 = vector.broadcast %239 : vector<1x256xf32> to vector<8x256xf32>
    %241 = arith.divf %237, %240 : vector<8x256xf32>
    %c0_124 = arith.constant 0 : index
    %c0_125 = arith.constant 0 : index
    %c0_126 = arith.constant 0 : index
    %242 = vector.load %arg24[%c0_124, %c0_125, %c0_126] : memref<1x8x256xf32, #tpu.memory_space<vmem>>, vector<1x8x256xf32>
    %243 = vector.shape_cast %242 : vector<1x8x256xf32> to vector<8x256xf32>
    %244 = vector.shape_cast %241 : vector<8x256xf32> to vector<1x8x256xf32>
    tpu.vector_store %arg24[%c0_124, %c0_125, %c0_126], %244 {strides = array<i32>} : memref<1x8x256xf32, #tpu.memory_space<vmem>>, vector<1x8x256xf32>,
    return
  }
  func.func @transform_0(%arg0: i32) -> (i32, i32, i32) {
    %c0_i32 = arith.constant 0 : i32
    %c0_i32_0 = arith.constant 0 : i32
    %c0_i32_1 = arith.constant 0 : i32
    return %arg0, %c0_i32, %c0_i32_0 : i32, i32, i32
  }
  func.func @transform_1(%arg0: i32) -> (i32, i32, i32) {
    %c0_i32 = arith.constant 0 : i32
    %c0_i32_0 = arith.constant 0 : i32
    %c0_i32_1 = arith.constant 0 : i32
    %c0_i32_2 = arith.constant 0 : i32
    return %c0_i32, %c0_i32_0, %c0_i32_1 : i32, i32, i32
  }
  func.func @transform_2(%arg0: i32) -> (i32, i32) {
    %c0_i32 = arith.constant 0 : i32
    %c0_i32_0 = arith.constant 0 : i32
    %c0_i32_1 = arith.constant 0 : i32
    return %c0_i32, %c0_i32_0 : i32, i32
  }
  func.func @transform_3(%arg0: i32) -> (i32, i32) {
    %c0_i32 = arith.constant 0 : i32
    %c0_i32_0 = arith.constant 0 : i32
    %c0_i32_1 = arith.constant 0 : i32
    return %c0_i32, %c0_i32_0 : i32, i32
  }
  func.func @transform_4(%arg0: i32) -> (i32, i32) {
    %c0_i32 = arith.constant 0 : i32
    %c0_i32_0 = arith.constant 0 : i32
    %c0_i32_1 = arith.constant 0 : i32
    return %c0_i32, %c0_i32_0 : i32, i32
  }
  func.func @transform_5(%arg0: i32) -> (i32, i32, i32) {
    %c0_i32 = arith.constant 0 : i32
    %c0_i32_0 = arith.constant 0 : i32
    %c0_i32_1 = arith.constant 0 : i32
    %c0_i32_2 = arith.constant 0 : i32
    return %c0_i32, %c0_i32_0, %c0_i32_1 : i32, i32, i32
  }
  func.func @transform_6(%arg0: i32) -> (i32, i32) {
    %c0_i32 = arith.constant 0 : i32
    %c0_i32_0 = arith.constant 0 : i32
    %c0_i32_1 = arith.constant 0 : i32
    return %c0_i32, %c0_i32_0 : i32, i32
  }
  func.func @transform_7(%arg0: i32) -> (i32, i32) {
    %c0_i32 = arith.constant 0 : i32
    %c0_i32_0 = arith.constant 0 : i32
    %c0_i32_1 = arith.constant 0 : i32
    return %c0_i32, %c0_i32_0 : i32, i32
  }
  func.func @transform_8(%arg0: i32) -> (i32, i32) {
    %c0_i32 = arith.constant 0 : i32
    %c0_i32_0 = arith.constant 0 : i32
    %c0_i32_1 = arith.constant 0 : i32
    return %c0_i32, %c0_i32_0 : i32, i32
  }
  func.func @transform_9(%arg0: i32) -> (i32, i32, i32) {
    %c0_i32 = arith.constant 0 : i32
    %c0_i32_0 = arith.constant 0 : i32
    %c0_i32_1 = arith.constant 0 : i32
    %c0_i32_2 = arith.constant 0 : i32
    return %c0_i32, %c0_i32_0, %c0_i32_1 : i32, i32, i32
  }
  func.func @transform_10(%arg0: i32) -> (i32, i32) {
    %c0_i32 = arith.constant 0 : i32
    %c0_i32_0 = arith.constant 0 : i32
    %c0_i32_1 = arith.constant 0 : i32
    return %c0_i32, %c0_i32_0 : i32, i32
  }
  func.func @transform_11(%arg0: i32) -> (i32, i32) {
    %c0_i32 = arith.constant 0 : i32
    %c0_i32_0 = arith.constant 0 : i32
    %c0_i32_1 = arith.constant 0 : i32
    return %c0_i32, %c0_i32_0 : i32, i32
  }
  func.func @transform_12(%arg0: i32) -> (i32, i32) {
    %c0_i32 = arith.constant 0 : i32
    %c0_i32_0 = arith.constant 0 : i32
    %c0_i32_1 = arith.constant 0 : i32
    return %c0_i32, %c0_i32_0 : i32, i32
  }
  func.func @transform_13(%arg0: i32) -> (i32, i32) {
    %c0_i32 = arith.constant 0 : i32
    %c0_i32_0 = arith.constant 0 : i32
    %c0_i32_1 = arith.constant 0 : i32
    return %c0_i32, %c0_i32_0 : i32, i32
  }
  func.func @transform_14(%arg0: i32) -> (i32, i32) {
    %c0_i32 = arith.constant 0 : i32
    %c0_i32_0 = arith.constant 0 : i32
    %c0_i32_1 = arith.constant 0 : i32
    return %c0_i32, %c0_i32_0 : i32, i32
  }
  func.func @transform_15(%arg0: i32) -> (i32, i32) {
    %c0_i32 = arith.constant 0 : i32
    %c0_i32_0 = arith.constant 0 : i32
    %c0_i32_1 = arith.constant 0 : i32
    return %c0_i32, %c0_i32_0 : i32, i32
  }
  func.func @transform_16(%arg0: i32) -> (i32, i32) {
    %c0_i32 = arith.constant 0 : i32
    %c0_i32_0 = arith.constant 0 : i32
    %c0_i32_1 = arith.constant 0 : i32
    return %c0_i32, %c0_i32_0 : i32, i32
  }
  func.func @transform_17(%arg0: i32) -> (i32, i32) {
    %c0_i32 = arith.constant 0 : i32
    %c0_i32_0 = arith.constant 0 : i32
    %c0_i32_1 = arith.constant 0 : i32
    return %c0_i32, %c0_i32_0 : i32, i32
  }
  func.func @transform_18(%arg0: i32) -> (i32, i32) {
    %c0_i32 = arith.constant 0 : i32
    %c0_i32_0 = arith.constant 0 : i32
    %c0_i32_1 = arith.constant 0 : i32
    return %c0_i32, %c0_i32_0 : i32, i32
  }
  func.func @transform_19(%arg0: i32) -> (i32, i32) {
    %c0_i32 = arith.constant 0 : i32
    %c0_i32_0 = arith.constant 0 : i32
    %c0_i32_1 = arith.constant 0 : i32
    return %c0_i32, %c0_i32_0 : i32, i32
  }
  func.func @transform_20(%arg0: i32) -> (i32, i32) {
    %c0_i32 = arith.constant 0 : i32
    %c0_i32_0 = arith.constant 0 : i32
    %c0_i32_1 = arith.constant 0 : i32
    return %c0_i32, %c0_i32_0 : i32, i32
  }
  func.func @transform_21(%arg0: i32) -> (i32, i32) {
    %c0_i32 = arith.constant 0 : i32
    %c0_i32_0 = arith.constant 0 : i32
    %c0_i32_1 = arith.constant 0 : i32
    return %c0_i32, %c0_i32_0 : i32, i32
  }
  func.func @transform_22(%arg0: i32) -> (i32, i32) {
    %c0_i32 = arith.constant 0 : i32
    %c0_i32_0 = arith.constant 0 : i32
    %c0_i32_1 = arith.constant 0 : i32
    return %c0_i32, %c0_i32_0 : i32, i32
  }
  func.func @transform_23(%arg0: i32) -> (i32, i32, i32) {
    %c0_i32 = arith.constant 0 : i32
    %c0_i32_0 = arith.constant 0 : i32
    %c0_i32_1 = arith.constant 0 : i32
    return %arg0, %c0_i32, %c0_i32_0 : i32, i32, i32
  }
}

module attributes {stable_mosaic.version = 11 : i64} {
  func.func @_ffn_kernel(%arg0: i32, %arg1: memref<8x256xf32, #tpu.memory_space<vmem>>, %arg2: memref<1x256xf32, #tpu.memory_space<vmem>>, %arg3: memref<1x256xf32, #tpu.memory_space<vmem>>, %arg4: memref<256x256xbf16, #tpu.memory_space<vmem>>, %arg5: memref<1x256xf32, #tpu.memory_space<vmem>>, %arg6: memref<256x256xbf16, #tpu.memory_space<vmem>>, %arg7: memref<1x256xf32, #tpu.memory_space<vmem>>, %arg8: memref<1x256xf32, #tpu.memory_space<vmem>>, %arg9: memref<1x256xf32, #tpu.memory_space<vmem>>, %arg10: memref<8x256xf32, #tpu.memory_space<vmem>>) attributes {dimension_semantics = [#tpu.dimension_semantics<parallel>], iteration_bounds = array<i64: 2>, scalar_prefetch = 0 : i64, scratch_operands = 0 : i64, tpu.core_type = #tpu.core_type<tc>, window_params = [{transform_indices = @transform_0, window_bounds = array<i64: 8, 256>}, {pipeline_mode = #tpu.pipeline_mode<synchronous>, transform_indices = @transform_1, window_bounds = array<i64: 1, 256>}, {pipeline_mode = #tpu.pipeline_mode<synchronous>, transform_indices = @transform_2, window_bounds = array<i64: 1, 256>}, {pipeline_mode = #tpu.pipeline_mode<synchronous>, transform_indices = @transform_3, window_bounds = array<i64: 256, 256>}, {pipeline_mode = #tpu.pipeline_mode<synchronous>, transform_indices = @transform_4, window_bounds = array<i64: 1, 256>}, {pipeline_mode = #tpu.pipeline_mode<synchronous>, transform_indices = @transform_5, window_bounds = array<i64: 256, 256>}, {pipeline_mode = #tpu.pipeline_mode<synchronous>, transform_indices = @transform_6, window_bounds = array<i64: 1, 256>}, {pipeline_mode = #tpu.pipeline_mode<synchronous>, transform_indices = @transform_7, window_bounds = array<i64: 1, 256>}, {pipeline_mode = #tpu.pipeline_mode<synchronous>, transform_indices = @transform_8, window_bounds = array<i64: 1, 256>}, {transform_indices = @transform_9, window_bounds = array<i64: 8, 256>}]} {
    %c0 = arith.constant 0 : index
    %c0_0 = arith.constant 0 : index
    %0 = vector.load %arg1[%c0, %c0_0] : memref<8x256xf32, #tpu.memory_space<vmem>>, vector<8x256xf32>
    %c0_1 = arith.constant 0 : index
    %c0_2 = arith.constant 0 : index
    %1 = vector.load %arg2[%c0_1, %c0_2] : memref<1x256xf32, #tpu.memory_space<vmem>>, vector<1x256xf32>
    %c0_3 = arith.constant 0 : index
    %c0_4 = arith.constant 0 : index
    %2 = vector.load %arg3[%c0_3, %c0_4] : memref<1x256xf32, #tpu.memory_space<vmem>>, vector<1x256xf32>
    %cst = arith.constant dense<0.000000e+00> : vector<8xf32>
    %3 = vector.multi_reduction <add>, %0, %cst [1] : vector<8x256xf32> to vector<8xf32>
    %4 = vector.shape_cast %3 : vector<8xf32> to vector<8x1xf32>
    %cst_5 = arith.constant 2.560000e+02 : f32
    %5 = vector.broadcast %cst_5 : f32 to vector<8x1xf32>
    %6 = arith.divf %4, %5 : vector<8x1xf32>
    %7 = vector.broadcast %6 : vector<8x1xf32> to vector<8x256xf32>
    %8 = arith.subf %0, %7 : vector<8x256xf32>
    %9 = arith.mulf %8, %8 : vector<8x256xf32>
    %cst_6 = arith.constant dense<0.000000e+00> : vector<8xf32>
    %10 = vector.multi_reduction <add>, %9, %cst_6 [1] : vector<8x256xf32> to vector<8xf32>
    %11 = vector.shape_cast %10 : vector<8xf32> to vector<8x1xf32>
    %cst_7 = arith.constant 2.560000e+02 : f32
    %12 = vector.broadcast %cst_7 : f32 to vector<8x1xf32>
    %13 = arith.divf %11, %12 : vector<8x1xf32>
    %cst_8 = arith.constant 9.99999974E-6 : f32
    %14 = vector.broadcast %cst_8 : f32 to vector<8x1xf32>
    %15 = arith.addf %13, %14 : vector<8x1xf32>
    %16 = math.rsqrt %15 : vector<8x1xf32>
    %17 = vector.broadcast %16 : vector<8x1xf32> to vector<8x256xf32>
    %18 = arith.mulf %8, %17 : vector<8x256xf32>
    %19 = vector.broadcast %1 : vector<1x256xf32> to vector<8x256xf32>
    %20 = arith.mulf %18, %19 : vector<8x256xf32>
    %21 = vector.broadcast %2 : vector<1x256xf32> to vector<8x256xf32>
    %22 = arith.addf %20, %21 : vector<8x256xf32>
    %c0_9 = arith.constant 0 : index
    %c0_10 = arith.constant 0 : index
    %23 = vector.load %arg4[%c0_9, %c0_10] : memref<256x256xbf16, #tpu.memory_space<vmem>>, vector<256x256xbf16>
    %24 = arith.truncf %22 : vector<8x256xf32> to vector<8x256xbf16>
    %cst_11 = arith.constant dense<0.000000e+00> : vector<8x256xf32>
    %25 = tpu.matmul %24, %23, %cst_11 {dimension_numbers = #tpu.dot_dimension_numbers<[1], [0], [0], [1], [0, 0, 1, 1], [], []>} : vector<8x256xbf16>, vector<256x256xbf16>, vector<8x256xf32> -> vector<8x256xf32>
    %c0_12 = arith.constant 0 : index
    %c0_13 = arith.constant 0 : index
    %26 = vector.load %arg5[%c0_12, %c0_13] : memref<1x256xf32, #tpu.memory_space<vmem>>, vector<1x256xf32>
    %27 = vector.broadcast %26 : vector<1x256xf32> to vector<8x256xf32>
    %28 = arith.addf %25, %27 : vector<8x256xf32>
    %29 = arith.negf %28 : vector<8x256xf32>
    %30 = math.exp %29 : vector<8x256xf32>
    %cst_14 = arith.constant 1.000000e+00 : f32
    %31 = vector.broadcast %cst_14 : f32 to vector<8x256xf32>
    %32 = arith.addf %31, %30 : vector<8x256xf32>
    %33 = arith.divf %31, %32 : vector<8x256xf32>
    %34 = arith.mulf %28, %33 : vector<8x256xf32>
    %c0_15 = arith.constant 0 : index
    %c0_16 = arith.constant 0 : index
    %35 = vector.load %arg6[%c0_15, %c0_16] : memref<256x256xbf16, #tpu.memory_space<vmem>>, vector<256x256xbf16>
    %36 = arith.truncf %34 : vector<8x256xf32> to vector<8x256xbf16>
    %cst_17 = arith.constant dense<0.000000e+00> : vector<8x256xf32>
    %37 = tpu.matmul %36, %35, %cst_17 {dimension_numbers = #tpu.dot_dimension_numbers<[1], [0], [0], [1], [0, 0, 1, 1], [], []>} : vector<8x256xbf16>, vector<256x256xbf16>, vector<8x256xf32> -> vector<8x256xf32>
    %c0_18 = arith.constant 0 : index
    %c0_19 = arith.constant 0 : index
    %38 = vector.load %arg7[%c0_18, %c0_19] : memref<1x256xf32, #tpu.memory_space<vmem>>, vector<1x256xf32>
    %39 = vector.broadcast %38 : vector<1x256xf32> to vector<8x256xf32>
    %40 = arith.addf %37, %39 : vector<8x256xf32>
    %41 = arith.addf %0, %40 : vector<8x256xf32>
    %c0_20 = arith.constant 0 : index
    %c0_21 = arith.constant 0 : index
    %42 = vector.load %arg10[%c0_20, %c0_21] : memref<8x256xf32, #tpu.memory_space<vmem>>, vector<8x256xf32>
    tpu.vector_store %arg10[%c0_20, %c0_21], %41 {strides = array<i32>} : memref<8x256xf32, #tpu.memory_space<vmem>>, vector<8x256xf32>,
    return
  }
  func.func @transform_0(%arg0: i32) -> (i32, i32) {
    %c0_i32 = arith.constant 0 : i32
    %c0_i32_0 = arith.constant 0 : i32
    return %arg0, %c0_i32 : i32, i32
  }
  func.func @transform_1(%arg0: i32) -> (i32, i32) {
    %c0_i32 = arith.constant 0 : i32
    %c0_i32_0 = arith.constant 0 : i32
    %c0_i32_1 = arith.constant 0 : i32
    return %c0_i32, %c0_i32_0 : i32, i32
  }
  func.func @transform_2(%arg0: i32) -> (i32, i32) {
    %c0_i32 = arith.constant 0 : i32
    %c0_i32_0 = arith.constant 0 : i32
    %c0_i32_1 = arith.constant 0 : i32
    return %c0_i32, %c0_i32_0 : i32, i32
  }
  func.func @transform_3(%arg0: i32) -> (i32, i32) {
    %c0_i32 = arith.constant 0 : i32
    %c0_i32_0 = arith.constant 0 : i32
    %c0_i32_1 = arith.constant 0 : i32
    return %c0_i32, %c0_i32_0 : i32, i32
  }
  func.func @transform_4(%arg0: i32) -> (i32, i32) {
    %c0_i32 = arith.constant 0 : i32
    %c0_i32_0 = arith.constant 0 : i32
    %c0_i32_1 = arith.constant 0 : i32
    return %c0_i32, %c0_i32_0 : i32, i32
  }
  func.func @transform_5(%arg0: i32) -> (i32, i32) {
    %c0_i32 = arith.constant 0 : i32
    %c0_i32_0 = arith.constant 0 : i32
    %c0_i32_1 = arith.constant 0 : i32
    return %c0_i32, %c0_i32_0 : i32, i32
  }
  func.func @transform_6(%arg0: i32) -> (i32, i32) {
    %c0_i32 = arith.constant 0 : i32
    %c0_i32_0 = arith.constant 0 : i32
    %c0_i32_1 = arith.constant 0 : i32
    return %c0_i32, %c0_i32_0 : i32, i32
  }
  func.func @transform_7(%arg0: i32) -> (i32, i32) {
    %c0_i32 = arith.constant 0 : i32
    %c0_i32_0 = arith.constant 0 : i32
    %c0_i32_1 = arith.constant 0 : i32
    return %c0_i32, %c0_i32_0 : i32, i32
  }
  func.func @transform_8(%arg0: i32) -> (i32, i32) {
    %c0_i32 = arith.constant 0 : i32
    %c0_i32_0 = arith.constant 0 : i32
    %c0_i32_1 = arith.constant 0 : i32
    return %c0_i32, %c0_i32_0 : i32, i32
  }
  func.func @transform_9(%arg0: i32) -> (i32, i32) {
    %c0_i32 = arith.constant 0 : i32
    %c0_i32_0 = arith.constant 0 : i32
    return %arg0, %c0_i32 : i32, i32
  }
}

module attributes {stable_mosaic.version = 11 : i64} {
  func.func @_relpos_attn_kernel(%arg0: i32, %arg1: memref<1x8x768xf32, #tpu.memory_space<vmem>>, %arg2: memref<1x8x256xf32, #tpu.memory_space<vmem>>, %arg3: memref<4x128x64xbf16, #tpu.memory_space<vmem>>, %arg4: memref<1x256xf32, #tpu.memory_space<vmem>>, %arg5: memref<1x256xf32, #tpu.memory_space<vmem>>, %arg6: memref<4x64x256xbf16, #tpu.memory_space<vmem>>, %arg7: memref<1x256xf32, #tpu.memory_space<vmem>>, %arg8: memref<1x8x256xf32, #tpu.memory_space<vmem>>, %arg9: memref<1x4x8x8xf32, #tpu.memory_space<vmem>>) attributes {dimension_semantics = [#tpu.dimension_semantics<parallel>], iteration_bounds = array<i64: 2>, scalar_prefetch = 0 : i64, scratch_operands = 0 : i64, tpu.core_type = #tpu.core_type<tc>, window_params = [{transform_indices = @transform_0, window_bounds = array<i64: 1, 8, 768>}, {transform_indices = @transform_1, window_bounds = array<i64: 1, 8, 256>}, {pipeline_mode = #tpu.pipeline_mode<synchronous>, transform_indices = @transform_2, window_bounds = array<i64: 4, 128, 64>}, {pipeline_mode = #tpu.pipeline_mode<synchronous>, transform_indices = @transform_3, window_bounds = array<i64: 1, 256>}, {pipeline_mode = #tpu.pipeline_mode<synchronous>, transform_indices = @transform_4, window_bounds = array<i64: 1, 256>}, {pipeline_mode = #tpu.pipeline_mode<synchronous>, transform_indices = @transform_5, window_bounds = array<i64: 4, 64, 256>}, {pipeline_mode = #tpu.pipeline_mode<synchronous>, transform_indices = @transform_6, window_bounds = array<i64: 1, 256>}, {transform_indices = @transform_7, window_bounds = array<i64: 1, 8, 256>}, {transform_indices = @transform_8, window_bounds = array<i64: 1, 4, 8, 8>}]} {
    %c0 = arith.constant 0 : index
    %c0_0 = arith.constant 0 : index
    %c0_1 = arith.constant 0 : index
    %0 = vector.load %arg1[%c0, %c0_0, %c0_1] : memref<1x8x768xf32, #tpu.memory_space<vmem>>, vector<1x8x768xf32>
    %1 = vector.shape_cast %0 : vector<1x8x768xf32> to vector<8x768xf32>
    %2 = vector.extract_strided_slice %1 {offsets = [0, 0], sizes = [8, 256], strides = [1, 1]} : vector<8x768xf32> to vector<8x256xf32>
    %3 = vector.extract_strided_slice %1 {offsets = [0, 256], sizes = [8, 256], strides = [1, 1]} : vector<8x768xf32> to vector<8x256xf32>
    %4 = vector.extract_strided_slice %1 {offsets = [0, 512], sizes = [8, 256], strides = [1, 1]} : vector<8x768xf32> to vector<8x256xf32>
    %c0_2 = arith.constant 0 : index
    %c0_3 = arith.constant 0 : index
    %5 = vector.load %arg4[%c0_2, %c0_3] : memref<1x256xf32, #tpu.memory_space<vmem>>, vector<1x256xf32>
    %6 = vector.broadcast %5 : vector<1x256xf32> to vector<8x256xf32>
    %7 = arith.addf %2, %6 : vector<8x256xf32>
    %c0_4 = arith.constant 0 : index
    %c0_5 = arith.constant 0 : index
    %8 = vector.load %arg5[%c0_4, %c0_5] : memref<1x256xf32, #tpu.memory_space<vmem>>, vector<1x256xf32>
    %9 = vector.broadcast %8 : vector<1x256xf32> to vector<8x256xf32>
    %10 = arith.addf %2, %9 : vector<8x256xf32>
    %c0_6 = arith.constant 0 : index
    %c0_7 = arith.constant 0 : index
    %11 = vector.load %arg7[%c0_6, %c0_7] : memref<1x256xf32, #tpu.memory_space<vmem>>, vector<1x256xf32>
    %c0_8 = arith.constant 0 : index
    %c0_9 = arith.constant 0 : index
    %c0_10 = arith.constant 0 : index
    %12 = vector.load %arg2[%c0_8, %c0_9, %c0_10] : memref<1x8x256xf32, #tpu.memory_space<vmem>>, vector<1x8x256xf32>
    %13 = vector.shape_cast %12 : vector<1x8x256xf32> to vector<8x256xf32>
    %14 = vector.broadcast %11 : vector<1x256xf32> to vector<8x256xf32>
    %15 = arith.addf %14, %13 : vector<8x256xf32>
    %16 = vector.extract_strided_slice %7 {offsets = [0, 0], sizes = [8, 64], strides = [1, 1]} : vector<8x256xf32> to vector<8x64xf32>
    %17 = vector.extract_strided_slice %10 {offsets = [0, 0], sizes = [8, 64], strides = [1, 1]} : vector<8x256xf32> to vector<8x64xf32>
    %18 = vector.extract_strided_slice %3 {offsets = [0, 0], sizes = [8, 64], strides = [1, 1]} : vector<8x256xf32> to vector<8x64xf32>
    %19 = vector.extract_strided_slice %4 {offsets = [0, 0], sizes = [8, 64], strides = [1, 1]} : vector<8x256xf32> to vector<8x64xf32>
    %c0_11 = arith.constant 0 : index
    %c0_12 = arith.constant 0 : index
    %c0_13 = arith.constant 0 : index
    %20 = vector.load %arg3[%c0_11, %c0_12, %c0_13] : memref<4x128x64xbf16, #tpu.memory_space<vmem>>, vector<1x128x64xbf16>
    %21 = vector.shape_cast %20 : vector<1x128x64xbf16> to vector<128x64xbf16>
    %22 = arith.truncf %16 : vector<8x64xf32> to vector<8x64xbf16>
    %23 = arith.truncf %18 : vector<8x64xf32> to vector<8x64xbf16>
    %cst = arith.constant dense<0.000000e+00> : vector<8x8xf32>
    %24 = tpu.matmul %22, %23, %cst {dimension_numbers = #tpu.dot_dimension_numbers<[1], [1], [0], [0], [0, 0, 1, 0], [], []>} : vector<8x64xbf16>, vector<8x64xbf16>, vector<8x8xf32> -> vector<8x8xf32>
    %25 = arith.truncf %17 : vector<8x64xf32> to vector<8x64xbf16>
    %cst_14 = arith.constant dense<0.000000e+00> : vector<8x128xf32>
    %26 = tpu.matmul %25, %21, %cst_14 {dimension_numbers = #tpu.dot_dimension_numbers<[1], [1], [0], [0], [0, 0, 1, 0], [], []>} : vector<8x64xbf16>, vector<128x64xbf16>, vector<8x128xf32> -> vector<8x128xf32>
    %c1_i32 = arith.constant 1 : i32
    %27 = tpu.dynamic_rotate %26 by %c1_i32 dim 1 {stride = 1 : si32, stride_dimension = 0 : si32} : vector<8x128xf32>, i32 -> vector<8x128xf32>
    %28 = vector.extract_strided_slice %27 {offsets = [0, 8], sizes = [8, 8], strides = [1, 1]} : vector<8x128xf32> to vector<8x8xf32>
    %29 = arith.addf %24, %28 : vector<8x8xf32>
    %cst_15 = arith.constant 1.250000e-01 : f32
    %30 = vector.broadcast %cst_15 : f32 to vector<8x8xf32>
    %31 = arith.mulf %29, %30 : vector<8x8xf32>
    %cst_16 = arith.constant dense<0xFF800000> : vector<8xf32>
    %32 = vector.multi_reduction <maximumf>, %31, %cst_16 [1] : vector<8x8xf32> to vector<8xf32>
    %33 = vector.shape_cast %32 : vector<8xf32> to vector<8x1xf32>
    %34 = vector.broadcast %33 : vector<8x1xf32> to vector<8x8xf32>
    %35 = arith.subf %31, %34 : vector<8x8xf32>
    %36 = math.exp %35 : vector<8x8xf32>
    %cst_17 = arith.constant dense<0.000000e+00> : vector<8xf32>
    %37 = vector.multi_reduction <add>, %36, %cst_17 [1] : vector<8x8xf32> to vector<8xf32>
    %38 = vector.shape_cast %37 : vector<8xf32> to vector<8x1xf32>
    %39 = vector.broadcast %38 : vector<8x1xf32> to vector<8x8xf32>
    %40 = arith.divf %36, %39 : vector<8x8xf32>
    %c0_18 = arith.constant 0 : index
    %c0_19 = arith.constant 0 : index
    %c0_20 = arith.constant 0 : index
    %c0_21 = arith.constant 0 : index
    %41 = vector.load %arg9[%c0_18, %c0_19, %c0_20, %c0_21] : memref<1x4x8x8xf32, #tpu.memory_space<vmem>>, vector<1x1x8x8xf32>
    %42 = vector.shape_cast %41 : vector<1x1x8x8xf32> to vector<8x8xf32>
    %43 = vector.shape_cast %40 : vector<8x8xf32> to vector<1x1x8x8xf32>
    tpu.vector_store %arg9[%c0_18, %c0_19, %c0_20, %c0_21], %43 {strides = array<i32>} : memref<1x4x8x8xf32, #tpu.memory_space<vmem>>, vector<1x1x8x8xf32>,
    %44 = arith.truncf %40 : vector<8x8xf32> to vector<8x8xbf16>
    %45 = arith.truncf %19 : vector<8x64xf32> to vector<8x64xbf16>
    %cst_22 = arith.constant dense<0.000000e+00> : vector<8x64xf32>
    %46 = tpu.matmul %44, %45, %cst_22 {dimension_numbers = #tpu.dot_dimension_numbers<[1], [0], [0], [1], [0, 0, 1, 1], [], []>} : vector<8x8xbf16>, vector<8x64xbf16>, vector<8x64xf32> -> vector<8x64xf32>
    %47 = arith.truncf %46 : vector<8x64xf32> to vector<8x64xbf16>
    %c0_23 = arith.constant 0 : index
    %c0_24 = arith.constant 0 : index
    %c0_25 = arith.constant 0 : index
    %48 = vector.load %arg6[%c0_23, %c0_24, %c0_25] : memref<4x64x256xbf16, #tpu.memory_space<vmem>>, vector<1x64x256xbf16>
    %49 = vector.shape_cast %48 : vector<1x64x256xbf16> to vector<64x256xbf16>
    %cst_26 = arith.constant dense<0.000000e+00> : vector<8x256xf32>
    %50 = tpu.matmul %47, %49, %cst_26 {dimension_numbers = #tpu.dot_dimension_numbers<[1], [0], [0], [1], [0, 0, 1, 1], [], []>} : vector<8x64xbf16>, vector<64x256xbf16>, vector<8x256xf32> -> vector<8x256xf32>
    %51 = arith.addf %15, %50 : vector<8x256xf32>
    %52 = vector.extract_strided_slice %7 {offsets = [0, 64], sizes = [8, 64], strides = [1, 1]} : vector<8x256xf32> to vector<8x64xf32>
    %53 = vector.extract_strided_slice %10 {offsets = [0, 64], sizes = [8, 64], strides = [1, 1]} : vector<8x256xf32> to vector<8x64xf32>
    %54 = vector.extract_strided_slice %3 {offsets = [0, 64], sizes = [8, 64], strides = [1, 1]} : vector<8x256xf32> to vector<8x64xf32>
    %55 = vector.extract_strided_slice %4 {offsets = [0, 64], sizes = [8, 64], strides = [1, 1]} : vector<8x256xf32> to vector<8x64xf32>
    %c1 = arith.constant 1 : index
    %c0_27 = arith.constant 0 : index
    %c0_28 = arith.constant 0 : index
    %56 = vector.load %arg3[%c1, %c0_27, %c0_28] : memref<4x128x64xbf16, #tpu.memory_space<vmem>>, vector<1x128x64xbf16>
    %57 = vector.shape_cast %56 : vector<1x128x64xbf16> to vector<128x64xbf16>
    %58 = arith.truncf %52 : vector<8x64xf32> to vector<8x64xbf16>
    %59 = arith.truncf %54 : vector<8x64xf32> to vector<8x64xbf16>
    %cst_29 = arith.constant dense<0.000000e+00> : vector<8x8xf32>
    %60 = tpu.matmul %58, %59, %cst_29 {dimension_numbers = #tpu.dot_dimension_numbers<[1], [1], [0], [0], [0, 0, 1, 0], [], []>} : vector<8x64xbf16>, vector<8x64xbf16>, vector<8x8xf32> -> vector<8x8xf32>
    %61 = arith.truncf %53 : vector<8x64xf32> to vector<8x64xbf16>
    %cst_30 = arith.constant dense<0.000000e+00> : vector<8x128xf32>
    %62 = tpu.matmul %61, %57, %cst_30 {dimension_numbers = #tpu.dot_dimension_numbers<[1], [1], [0], [0], [0, 0, 1, 0], [], []>} : vector<8x64xbf16>, vector<128x64xbf16>, vector<8x128xf32> -> vector<8x128xf32>
    %c1_i32_31 = arith.constant 1 : i32
    %63 = tpu.dynamic_rotate %62 by %c1_i32_31 dim 1 {stride = 1 : si32, stride_dimension = 0 : si32} : vector<8x128xf32>, i32 -> vector<8x128xf32>
    %64 = vector.extract_strided_slice %63 {offsets = [0, 8], sizes = [8, 8], strides = [1, 1]} : vector<8x128xf32> to vector<8x8xf32>
    %65 = arith.addf %60, %64 : vector<8x8xf32>
    %cst_32 = arith.constant 1.250000e-01 : f32
    %66 = vector.broadcast %cst_32 : f32 to vector<8x8xf32>
    %67 = arith.mulf %65, %66 : vector<8x8xf32>
    %cst_33 = arith.constant dense<0xFF800000> : vector<8xf32>
    %68 = vector.multi_reduction <maximumf>, %67, %cst_33 [1] : vector<8x8xf32> to vector<8xf32>
    %69 = vector.shape_cast %68 : vector<8xf32> to vector<8x1xf32>
    %70 = vector.broadcast %69 : vector<8x1xf32> to vector<8x8xf32>
    %71 = arith.subf %67, %70 : vector<8x8xf32>
    %72 = math.exp %71 : vector<8x8xf32>
    %cst_34 = arith.constant dense<0.000000e+00> : vector<8xf32>
    %73 = vector.multi_reduction <add>, %72, %cst_34 [1] : vector<8x8xf32> to vector<8xf32>
    %74 = vector.shape_cast %73 : vector<8xf32> to vector<8x1xf32>
    %75 = vector.broadcast %74 : vector<8x1xf32> to vector<8x8xf32>
    %76 = arith.divf %72, %75 : vector<8x8xf32>
    %c0_35 = arith.constant 0 : index
    %c1_36 = arith.constant 1 : index
    %c0_37 = arith.constant 0 : index
    %c0_38 = arith.constant 0 : index
    %77 = vector.load %arg9[%c0_35, %c1_36, %c0_37, %c0_38] : memref<1x4x8x8xf32, #tpu.memory_space<vmem>>, vector<1x1x8x8xf32>
    %78 = vector.shape_cast %77 : vector<1x1x8x8xf32> to vector<8x8xf32>
    %79 = vector.shape_cast %76 : vector<8x8xf32> to vector<1x1x8x8xf32>
    tpu.vector_store %arg9[%c0_35, %c1_36, %c0_37, %c0_38], %79 {strides = array<i32>} : memref<1x4x8x8xf32, #tpu.memory_space<vmem>>, vector<1x1x8x8xf32>,
    %80 = arith.truncf %76 : vector<8x8xf32> to vector<8x8xbf16>
    %81 = arith.truncf %55 : vector<8x64xf32> to vector<8x64xbf16>
    %cst_39 = arith.constant dense<0.000000e+00> : vector<8x64xf32>
    %82 = tpu.matmul %80, %81, %cst_39 {dimension_numbers = #tpu.dot_dimension_numbers<[1], [0], [0], [1], [0, 0, 1, 1], [], []>} : vector<8x8xbf16>, vector<8x64xbf16>, vector<8x64xf32> -> vector<8x64xf32>
    %83 = arith.truncf %82 : vector<8x64xf32> to vector<8x64xbf16>
    %c1_40 = arith.constant 1 : index
    %c0_41 = arith.constant 0 : index
    %c0_42 = arith.constant 0 : index
    %84 = vector.load %arg6[%c1_40, %c0_41, %c0_42] : memref<4x64x256xbf16, #tpu.memory_space<vmem>>, vector<1x64x256xbf16>
    %85 = vector.shape_cast %84 : vector<1x64x256xbf16> to vector<64x256xbf16>
    %cst_43 = arith.constant dense<0.000000e+00> : vector<8x256xf32>
    %86 = tpu.matmul %83, %85, %cst_43 {dimension_numbers = #tpu.dot_dimension_numbers<[1], [0], [0], [1], [0, 0, 1, 1], [], []>} : vector<8x64xbf16>, vector<64x256xbf16>, vector<8x256xf32> -> vector<8x256xf32>
    %87 = arith.addf %51, %86 : vector<8x256xf32>
    %88 = vector.extract_strided_slice %7 {offsets = [0, 128], sizes = [8, 64], strides = [1, 1]} : vector<8x256xf32> to vector<8x64xf32>
    %89 = vector.extract_strided_slice %10 {offsets = [0, 128], sizes = [8, 64], strides = [1, 1]} : vector<8x256xf32> to vector<8x64xf32>
    %90 = vector.extract_strided_slice %3 {offsets = [0, 128], sizes = [8, 64], strides = [1, 1]} : vector<8x256xf32> to vector<8x64xf32>
    %91 = vector.extract_strided_slice %4 {offsets = [0, 128], sizes = [8, 64], strides = [1, 1]} : vector<8x256xf32> to vector<8x64xf32>
    %c2 = arith.constant 2 : index
    %c0_44 = arith.constant 0 : index
    %c0_45 = arith.constant 0 : index
    %92 = vector.load %arg3[%c2, %c0_44, %c0_45] : memref<4x128x64xbf16, #tpu.memory_space<vmem>>, vector<1x128x64xbf16>
    %93 = vector.shape_cast %92 : vector<1x128x64xbf16> to vector<128x64xbf16>
    %94 = arith.truncf %88 : vector<8x64xf32> to vector<8x64xbf16>
    %95 = arith.truncf %90 : vector<8x64xf32> to vector<8x64xbf16>
    %cst_46 = arith.constant dense<0.000000e+00> : vector<8x8xf32>
    %96 = tpu.matmul %94, %95, %cst_46 {dimension_numbers = #tpu.dot_dimension_numbers<[1], [1], [0], [0], [0, 0, 1, 0], [], []>} : vector<8x64xbf16>, vector<8x64xbf16>, vector<8x8xf32> -> vector<8x8xf32>
    %97 = arith.truncf %89 : vector<8x64xf32> to vector<8x64xbf16>
    %cst_47 = arith.constant dense<0.000000e+00> : vector<8x128xf32>
    %98 = tpu.matmul %97, %93, %cst_47 {dimension_numbers = #tpu.dot_dimension_numbers<[1], [1], [0], [0], [0, 0, 1, 0], [], []>} : vector<8x64xbf16>, vector<128x64xbf16>, vector<8x128xf32> -> vector<8x128xf32>
    %c1_i32_48 = arith.constant 1 : i32
    %99 = tpu.dynamic_rotate %98 by %c1_i32_48 dim 1 {stride = 1 : si32, stride_dimension = 0 : si32} : vector<8x128xf32>, i32 -> vector<8x128xf32>
    %100 = vector.extract_strided_slice %99 {offsets = [0, 8], sizes = [8, 8], strides = [1, 1]} : vector<8x128xf32> to vector<8x8xf32>
    %101 = arith.addf %96, %100 : vector<8x8xf32>
    %cst_49 = arith.constant 1.250000e-01 : f32
    %102 = vector.broadcast %cst_49 : f32 to vector<8x8xf32>
    %103 = arith.mulf %101, %102 : vector<8x8xf32>
    %cst_50 = arith.constant dense<0xFF800000> : vector<8xf32>
    %104 = vector.multi_reduction <maximumf>, %103, %cst_50 [1] : vector<8x8xf32> to vector<8xf32>
    %105 = vector.shape_cast %104 : vector<8xf32> to vector<8x1xf32>
    %106 = vector.broadcast %105 : vector<8x1xf32> to vector<8x8xf32>
    %107 = arith.subf %103, %106 : vector<8x8xf32>
    %108 = math.exp %107 : vector<8x8xf32>
    %cst_51 = arith.constant dense<0.000000e+00> : vector<8xf32>
    %109 = vector.multi_reduction <add>, %108, %cst_51 [1] : vector<8x8xf32> to vector<8xf32>
    %110 = vector.shape_cast %109 : vector<8xf32> to vector<8x1xf32>
    %111 = vector.broadcast %110 : vector<8x1xf32> to vector<8x8xf32>
    %112 = arith.divf %108, %111 : vector<8x8xf32>
    %c0_52 = arith.constant 0 : index
    %c2_53 = arith.constant 2 : index
    %c0_54 = arith.constant 0 : index
    %c0_55 = arith.constant 0 : index
    %113 = vector.load %arg9[%c0_52, %c2_53, %c0_54, %c0_55] : memref<1x4x8x8xf32, #tpu.memory_space<vmem>>, vector<1x1x8x8xf32>
    %114 = vector.shape_cast %113 : vector<1x1x8x8xf32> to vector<8x8xf32>
    %115 = vector.shape_cast %112 : vector<8x8xf32> to vector<1x1x8x8xf32>
    tpu.vector_store %arg9[%c0_52, %c2_53, %c0_54, %c0_55], %115 {strides = array<i32>} : memref<1x4x8x8xf32, #tpu.memory_space<vmem>>, vector<1x1x8x8xf32>,
    %116 = arith.truncf %112 : vector<8x8xf32> to vector<8x8xbf16>
    %117 = arith.truncf %91 : vector<8x64xf32> to vector<8x64xbf16>
    %cst_56 = arith.constant dense<0.000000e+00> : vector<8x64xf32>
    %118 = tpu.matmul %116, %117, %cst_56 {dimension_numbers = #tpu.dot_dimension_numbers<[1], [0], [0], [1], [0, 0, 1, 1], [], []>} : vector<8x8xbf16>, vector<8x64xbf16>, vector<8x64xf32> -> vector<8x64xf32>
    %119 = arith.truncf %118 : vector<8x64xf32> to vector<8x64xbf16>
    %c2_57 = arith.constant 2 : index
    %c0_58 = arith.constant 0 : index
    %c0_59 = arith.constant 0 : index
    %120 = vector.load %arg6[%c2_57, %c0_58, %c0_59] : memref<4x64x256xbf16, #tpu.memory_space<vmem>>, vector<1x64x256xbf16>
    %121 = vector.shape_cast %120 : vector<1x64x256xbf16> to vector<64x256xbf16>
    %cst_60 = arith.constant dense<0.000000e+00> : vector<8x256xf32>
    %122 = tpu.matmul %119, %121, %cst_60 {dimension_numbers = #tpu.dot_dimension_numbers<[1], [0], [0], [1], [0, 0, 1, 1], [], []>} : vector<8x64xbf16>, vector<64x256xbf16>, vector<8x256xf32> -> vector<8x256xf32>
    %123 = arith.addf %87, %122 : vector<8x256xf32>
    %124 = vector.extract_strided_slice %7 {offsets = [0, 192], sizes = [8, 64], strides = [1, 1]} : vector<8x256xf32> to vector<8x64xf32>
    %125 = vector.extract_strided_slice %10 {offsets = [0, 192], sizes = [8, 64], strides = [1, 1]} : vector<8x256xf32> to vector<8x64xf32>
    %126 = vector.extract_strided_slice %3 {offsets = [0, 192], sizes = [8, 64], strides = [1, 1]} : vector<8x256xf32> to vector<8x64xf32>
    %127 = vector.extract_strided_slice %4 {offsets = [0, 192], sizes = [8, 64], strides = [1, 1]} : vector<8x256xf32> to vector<8x64xf32>
    %c3 = arith.constant 3 : index
    %c0_61 = arith.constant 0 : index
    %c0_62 = arith.constant 0 : index
    %128 = vector.load %arg3[%c3, %c0_61, %c0_62] : memref<4x128x64xbf16, #tpu.memory_space<vmem>>, vector<1x128x64xbf16>
    %129 = vector.shape_cast %128 : vector<1x128x64xbf16> to vector<128x64xbf16>
    %130 = arith.truncf %124 : vector<8x64xf32> to vector<8x64xbf16>
    %131 = arith.truncf %126 : vector<8x64xf32> to vector<8x64xbf16>
    %cst_63 = arith.constant dense<0.000000e+00> : vector<8x8xf32>
    %132 = tpu.matmul %130, %131, %cst_63 {dimension_numbers = #tpu.dot_dimension_numbers<[1], [1], [0], [0], [0, 0, 1, 0], [], []>} : vector<8x64xbf16>, vector<8x64xbf16>, vector<8x8xf32> -> vector<8x8xf32>
    %133 = arith.truncf %125 : vector<8x64xf32> to vector<8x64xbf16>
    %cst_64 = arith.constant dense<0.000000e+00> : vector<8x128xf32>
    %134 = tpu.matmul %133, %129, %cst_64 {dimension_numbers = #tpu.dot_dimension_numbers<[1], [1], [0], [0], [0, 0, 1, 0], [], []>} : vector<8x64xbf16>, vector<128x64xbf16>, vector<8x128xf32> -> vector<8x128xf32>
    %c1_i32_65 = arith.constant 1 : i32
    %135 = tpu.dynamic_rotate %134 by %c1_i32_65 dim 1 {stride = 1 : si32, stride_dimension = 0 : si32} : vector<8x128xf32>, i32 -> vector<8x128xf32>
    %136 = vector.extract_strided_slice %135 {offsets = [0, 8], sizes = [8, 8], strides = [1, 1]} : vector<8x128xf32> to vector<8x8xf32>
    %137 = arith.addf %132, %136 : vector<8x8xf32>
    %cst_66 = arith.constant 1.250000e-01 : f32
    %138 = vector.broadcast %cst_66 : f32 to vector<8x8xf32>
    %139 = arith.mulf %137, %138 : vector<8x8xf32>
    %cst_67 = arith.constant dense<0xFF800000> : vector<8xf32>
    %140 = vector.multi_reduction <maximumf>, %139, %cst_67 [1] : vector<8x8xf32> to vector<8xf32>
    %141 = vector.shape_cast %140 : vector<8xf32> to vector<8x1xf32>
    %142 = vector.broadcast %141 : vector<8x1xf32> to vector<8x8xf32>
    %143 = arith.subf %139, %142 : vector<8x8xf32>
    %144 = math.exp %143 : vector<8x8xf32>
    %cst_68 = arith.constant dense<0.000000e+00> : vector<8xf32>
    %145 = vector.multi_reduction <add>, %144, %cst_68 [1] : vector<8x8xf32> to vector<8xf32>
    %146 = vector.shape_cast %145 : vector<8xf32> to vector<8x1xf32>
    %147 = vector.broadcast %146 : vector<8x1xf32> to vector<8x8xf32>
    %148 = arith.divf %144, %147 : vector<8x8xf32>
    %c0_69 = arith.constant 0 : index
    %c3_70 = arith.constant 3 : index
    %c0_71 = arith.constant 0 : index
    %c0_72 = arith.constant 0 : index
    %149 = vector.load %arg9[%c0_69, %c3_70, %c0_71, %c0_72] : memref<1x4x8x8xf32, #tpu.memory_space<vmem>>, vector<1x1x8x8xf32>
    %150 = vector.shape_cast %149 : vector<1x1x8x8xf32> to vector<8x8xf32>
    %151 = vector.shape_cast %148 : vector<8x8xf32> to vector<1x1x8x8xf32>
    tpu.vector_store %arg9[%c0_69, %c3_70, %c0_71, %c0_72], %151 {strides = array<i32>} : memref<1x4x8x8xf32, #tpu.memory_space<vmem>>, vector<1x1x8x8xf32>,
    %152 = arith.truncf %148 : vector<8x8xf32> to vector<8x8xbf16>
    %153 = arith.truncf %127 : vector<8x64xf32> to vector<8x64xbf16>
    %cst_73 = arith.constant dense<0.000000e+00> : vector<8x64xf32>
    %154 = tpu.matmul %152, %153, %cst_73 {dimension_numbers = #tpu.dot_dimension_numbers<[1], [0], [0], [1], [0, 0, 1, 1], [], []>} : vector<8x8xbf16>, vector<8x64xbf16>, vector<8x64xf32> -> vector<8x64xf32>
    %155 = arith.truncf %154 : vector<8x64xf32> to vector<8x64xbf16>
    %c3_74 = arith.constant 3 : index
    %c0_75 = arith.constant 0 : index
    %c0_76 = arith.constant 0 : index
    %156 = vector.load %arg6[%c3_74, %c0_75, %c0_76] : memref<4x64x256xbf16, #tpu.memory_space<vmem>>, vector<1x64x256xbf16>
    %157 = vector.shape_cast %156 : vector<1x64x256xbf16> to vector<64x256xbf16>
    %cst_77 = arith.constant dense<0.000000e+00> : vector<8x256xf32>
    %158 = tpu.matmul %155, %157, %cst_77 {dimension_numbers = #tpu.dot_dimension_numbers<[1], [0], [0], [1], [0, 0, 1, 1], [], []>} : vector<8x64xbf16>, vector<64x256xbf16>, vector<8x256xf32> -> vector<8x256xf32>
    %159 = arith.addf %123, %158 : vector<8x256xf32>
    %c0_78 = arith.constant 0 : index
    %c0_79 = arith.constant 0 : index
    %c0_80 = arith.constant 0 : index
    %160 = vector.load %arg8[%c0_78, %c0_79, %c0_80] : memref<1x8x256xf32, #tpu.memory_space<vmem>>, vector<1x8x256xf32>
    %161 = vector.shape_cast %160 : vector<1x8x256xf32> to vector<8x256xf32>
    %162 = vector.shape_cast %159 : vector<8x256xf32> to vector<1x8x256xf32>
    tpu.vector_store %arg8[%c0_78, %c0_79, %c0_80], %162 {strides = array<i32>} : memref<1x8x256xf32, #tpu.memory_space<vmem>>, vector<1x8x256xf32>,
    return
  }
  func.func @transform_0(%arg0: i32) -> (i32, i32, i32) {
    %c0_i32 = arith.constant 0 : i32
    %c0_i32_0 = arith.constant 0 : i32
    %c0_i32_1 = arith.constant 0 : i32
    return %arg0, %c0_i32, %c0_i32_0 : i32, i32, i32
  }
  func.func @transform_1(%arg0: i32) -> (i32, i32, i32) {
    %c0_i32 = arith.constant 0 : i32
    %c0_i32_0 = arith.constant 0 : i32
    %c0_i32_1 = arith.constant 0 : i32
    return %arg0, %c0_i32, %c0_i32_0 : i32, i32, i32
  }
  func.func @transform_2(%arg0: i32) -> (i32, i32, i32) {
    %c0_i32 = arith.constant 0 : i32
    %c0_i32_0 = arith.constant 0 : i32
    %c0_i32_1 = arith.constant 0 : i32
    %c0_i32_2 = arith.constant 0 : i32
    return %c0_i32, %c0_i32_0, %c0_i32_1 : i32, i32, i32
  }
  func.func @transform_3(%arg0: i32) -> (i32, i32) {
    %c0_i32 = arith.constant 0 : i32
    %c0_i32_0 = arith.constant 0 : i32
    %c0_i32_1 = arith.constant 0 : i32
    return %c0_i32, %c0_i32_0 : i32, i32
  }
  func.func @transform_4(%arg0: i32) -> (i32, i32) {
    %c0_i32 = arith.constant 0 : i32
    %c0_i32_0 = arith.constant 0 : i32
    %c0_i32_1 = arith.constant 0 : i32
    return %c0_i32, %c0_i32_0 : i32, i32
  }
  func.func @transform_5(%arg0: i32) -> (i32, i32, i32) {
    %c0_i32 = arith.constant 0 : i32
    %c0_i32_0 = arith.constant 0 : i32
    %c0_i32_1 = arith.constant 0 : i32
    %c0_i32_2 = arith.constant 0 : i32
    return %c0_i32, %c0_i32_0, %c0_i32_1 : i32, i32, i32
  }
  func.func @transform_6(%arg0: i32) -> (i32, i32) {
    %c0_i32 = arith.constant 0 : i32
    %c0_i32_0 = arith.constant 0 : i32
    %c0_i32_1 = arith.constant 0 : i32
    return %c0_i32, %c0_i32_0 : i32, i32
  }
  func.func @transform_7(%arg0: i32) -> (i32, i32, i32) {
    %c0_i32 = arith.constant 0 : i32
    %c0_i32_0 = arith.constant 0 : i32
    %c0_i32_1 = arith.constant 0 : i32
    return %arg0, %c0_i32, %c0_i32_0 : i32, i32, i32
  }
  func.func @transform_8(%arg0: i32) -> (i32, i32, i32, i32) {
    %c0_i32 = arith.constant 0 : i32
    %c0_i32_0 = arith.constant 0 : i32
    %c0_i32_1 = arith.constant 0 : i32
    %c0_i32_2 = arith.constant 0 : i32
    return %arg0, %c0_i32, %c0_i32_0, %c0_i32_1 : i32, i32, i32, i32
  }
}

module attributes {stable_mosaic.version = 11 : i64} {
  func.func @_ffn_kernel(%arg0: i32, %arg1: memref<8x256xf32, #tpu.memory_space<vmem>>, %arg2: memref<1x256xf32, #tpu.memory_space<vmem>>, %arg3: memref<1x256xf32, #tpu.memory_space<vmem>>, %arg4: memref<256x256xbf16, #tpu.memory_space<vmem>>, %arg5: memref<1x256xf32, #tpu.memory_space<vmem>>, %arg6: memref<256x256xbf16, #tpu.memory_space<vmem>>, %arg7: memref<1x256xf32, #tpu.memory_space<vmem>>, %arg8: memref<1x256xf32, #tpu.memory_space<vmem>>, %arg9: memref<1x256xf32, #tpu.memory_space<vmem>>, %arg10: memref<8x256xf32, #tpu.memory_space<vmem>>) attributes {dimension_semantics = [#tpu.dimension_semantics<parallel>], iteration_bounds = array<i64: 2>, scalar_prefetch = 0 : i64, scratch_operands = 0 : i64, tpu.core_type = #tpu.core_type<tc>, window_params = [{transform_indices = @transform_0, window_bounds = array<i64: 8, 256>}, {pipeline_mode = #tpu.pipeline_mode<synchronous>, transform_indices = @transform_1, window_bounds = array<i64: 1, 256>}, {pipeline_mode = #tpu.pipeline_mode<synchronous>, transform_indices = @transform_2, window_bounds = array<i64: 1, 256>}, {pipeline_mode = #tpu.pipeline_mode<synchronous>, transform_indices = @transform_3, window_bounds = array<i64: 256, 256>}, {pipeline_mode = #tpu.pipeline_mode<synchronous>, transform_indices = @transform_4, window_bounds = array<i64: 1, 256>}, {pipeline_mode = #tpu.pipeline_mode<synchronous>, transform_indices = @transform_5, window_bounds = array<i64: 256, 256>}, {pipeline_mode = #tpu.pipeline_mode<synchronous>, transform_indices = @transform_6, window_bounds = array<i64: 1, 256>}, {pipeline_mode = #tpu.pipeline_mode<synchronous>, transform_indices = @transform_7, window_bounds = array<i64: 1, 256>}, {pipeline_mode = #tpu.pipeline_mode<synchronous>, transform_indices = @transform_8, window_bounds = array<i64: 1, 256>}, {transform_indices = @transform_9, window_bounds = array<i64: 8, 256>}]} {
    %c0 = arith.constant 0 : index
    %c0_0 = arith.constant 0 : index
    %0 = vector.load %arg1[%c0, %c0_0] : memref<8x256xf32, #tpu.memory_space<vmem>>, vector<8x256xf32>
    %c0_1 = arith.constant 0 : index
    %c0_2 = arith.constant 0 : index
    %1 = vector.load %arg2[%c0_1, %c0_2] : memref<1x256xf32, #tpu.memory_space<vmem>>, vector<1x256xf32>
    %c0_3 = arith.constant 0 : index
    %c0_4 = arith.constant 0 : index
    %2 = vector.load %arg3[%c0_3, %c0_4] : memref<1x256xf32, #tpu.memory_space<vmem>>, vector<1x256xf32>
    %cst = arith.constant dense<0.000000e+00> : vector<8xf32>
    %3 = vector.multi_reduction <add>, %0, %cst [1] : vector<8x256xf32> to vector<8xf32>
    %4 = vector.shape_cast %3 : vector<8xf32> to vector<8x1xf32>
    %cst_5 = arith.constant 2.560000e+02 : f32
    %5 = vector.broadcast %cst_5 : f32 to vector<8x1xf32>
    %6 = arith.divf %4, %5 : vector<8x1xf32>
    %7 = vector.broadcast %6 : vector<8x1xf32> to vector<8x256xf32>
    %8 = arith.subf %0, %7 : vector<8x256xf32>
    %9 = arith.mulf %8, %8 : vector<8x256xf32>
    %cst_6 = arith.constant dense<0.000000e+00> : vector<8xf32>
    %10 = vector.multi_reduction <add>, %9, %cst_6 [1] : vector<8x256xf32> to vector<8xf32>
    %11 = vector.shape_cast %10 : vector<8xf32> to vector<8x1xf32>
    %cst_7 = arith.constant 2.560000e+02 : f32
    %12 = vector.broadcast %cst_7 : f32 to vector<8x1xf32>
    %13 = arith.divf %11, %12 : vector<8x1xf32>
    %cst_8 = arith.constant 9.99999974E-6 : f32
    %14 = vector.broadcast %cst_8 : f32 to vector<8x1xf32>
    %15 = arith.addf %13, %14 : vector<8x1xf32>
    %16 = math.rsqrt %15 : vector<8x1xf32>
    %17 = vector.broadcast %16 : vector<8x1xf32> to vector<8x256xf32>
    %18 = arith.mulf %8, %17 : vector<8x256xf32>
    %19 = vector.broadcast %1 : vector<1x256xf32> to vector<8x256xf32>
    %20 = arith.mulf %18, %19 : vector<8x256xf32>
    %21 = vector.broadcast %2 : vector<1x256xf32> to vector<8x256xf32>
    %22 = arith.addf %20, %21 : vector<8x256xf32>
    %c0_9 = arith.constant 0 : index
    %c0_10 = arith.constant 0 : index
    %23 = vector.load %arg4[%c0_9, %c0_10] : memref<256x256xbf16, #tpu.memory_space<vmem>>, vector<256x256xbf16>
    %24 = arith.truncf %22 : vector<8x256xf32> to vector<8x256xbf16>
    %cst_11 = arith.constant dense<0.000000e+00> : vector<8x256xf32>
    %25 = tpu.matmul %24, %23, %cst_11 {dimension_numbers = #tpu.dot_dimension_numbers<[1], [0], [0], [1], [0, 0, 1, 1], [], []>} : vector<8x256xbf16>, vector<256x256xbf16>, vector<8x256xf32> -> vector<8x256xf32>
    %c0_12 = arith.constant 0 : index
    %c0_13 = arith.constant 0 : index
    %26 = vector.load %arg5[%c0_12, %c0_13] : memref<1x256xf32, #tpu.memory_space<vmem>>, vector<1x256xf32>
    %27 = vector.broadcast %26 : vector<1x256xf32> to vector<8x256xf32>
    %28 = arith.addf %25, %27 : vector<8x256xf32>
    %29 = arith.negf %28 : vector<8x256xf32>
    %30 = math.exp %29 : vector<8x256xf32>
    %cst_14 = arith.constant 1.000000e+00 : f32
    %31 = vector.broadcast %cst_14 : f32 to vector<8x256xf32>
    %32 = arith.addf %31, %30 : vector<8x256xf32>
    %33 = arith.divf %31, %32 : vector<8x256xf32>
    %34 = arith.mulf %28, %33 : vector<8x256xf32>
    %c0_15 = arith.constant 0 : index
    %c0_16 = arith.constant 0 : index
    %35 = vector.load %arg6[%c0_15, %c0_16] : memref<256x256xbf16, #tpu.memory_space<vmem>>, vector<256x256xbf16>
    %36 = arith.truncf %34 : vector<8x256xf32> to vector<8x256xbf16>
    %cst_17 = arith.constant dense<0.000000e+00> : vector<8x256xf32>
    %37 = tpu.matmul %36, %35, %cst_17 {dimension_numbers = #tpu.dot_dimension_numbers<[1], [0], [0], [1], [0, 0, 1, 1], [], []>} : vector<8x256xbf16>, vector<256x256xbf16>, vector<8x256xf32> -> vector<8x256xf32>
    %c0_18 = arith.constant 0 : index
    %c0_19 = arith.constant 0 : index
    %38 = vector.load %arg7[%c0_18, %c0_19] : memref<1x256xf32, #tpu.memory_space<vmem>>, vector<1x256xf32>
    %39 = vector.broadcast %38 : vector<1x256xf32> to vector<8x256xf32>
    %40 = arith.addf %37, %39 : vector<8x256xf32>
    %41 = arith.addf %0, %40 : vector<8x256xf32>
    %c0_20 = arith.constant 0 : index
    %c0_21 = arith.constant 0 : index
    %42 = vector.load %arg8[%c0_20, %c0_21] : memref<1x256xf32, #tpu.memory_space<vmem>>, vector<1x256xf32>
    %c0_22 = arith.constant 0 : index
    %c0_23 = arith.constant 0 : index
    %43 = vector.load %arg9[%c0_22, %c0_23] : memref<1x256xf32, #tpu.memory_space<vmem>>, vector<1x256xf32>
    %cst_24 = arith.constant dense<0.000000e+00> : vector<8xf32>
    %44 = vector.multi_reduction <add>, %41, %cst_24 [1] : vector<8x256xf32> to vector<8xf32>
    %45 = vector.shape_cast %44 : vector<8xf32> to vector<8x1xf32>
    %cst_25 = arith.constant 2.560000e+02 : f32
    %46 = vector.broadcast %cst_25 : f32 to vector<8x1xf32>
    %47 = arith.divf %45, %46 : vector<8x1xf32>
    %48 = vector.broadcast %47 : vector<8x1xf32> to vector<8x256xf32>
    %49 = arith.subf %41, %48 : vector<8x256xf32>
    %50 = arith.mulf %49, %49 : vector<8x256xf32>
    %cst_26 = arith.constant dense<0.000000e+00> : vector<8xf32>
    %51 = vector.multi_reduction <add>, %50, %cst_26 [1] : vector<8x256xf32> to vector<8xf32>
    %52 = vector.shape_cast %51 : vector<8xf32> to vector<8x1xf32>
    %cst_27 = arith.constant 2.560000e+02 : f32
    %53 = vector.broadcast %cst_27 : f32 to vector<8x1xf32>
    %54 = arith.divf %52, %53 : vector<8x1xf32>
    %cst_28 = arith.constant 9.99999974E-6 : f32
    %55 = vector.broadcast %cst_28 : f32 to vector<8x1xf32>
    %56 = arith.addf %54, %55 : vector<8x1xf32>
    %57 = math.rsqrt %56 : vector<8x1xf32>
    %58 = vector.broadcast %57 : vector<8x1xf32> to vector<8x256xf32>
    %59 = arith.mulf %49, %58 : vector<8x256xf32>
    %60 = vector.broadcast %42 : vector<1x256xf32> to vector<8x256xf32>
    %61 = arith.mulf %59, %60 : vector<8x256xf32>
    %62 = vector.broadcast %43 : vector<1x256xf32> to vector<8x256xf32>
    %63 = arith.addf %61, %62 : vector<8x256xf32>
    %c0_29 = arith.constant 0 : index
    %c0_30 = arith.constant 0 : index
    %64 = vector.load %arg10[%c0_29, %c0_30] : memref<8x256xf32, #tpu.memory_space<vmem>>, vector<8x256xf32>
    tpu.vector_store %arg10[%c0_29, %c0_30], %63 {strides = array<i32>} : memref<8x256xf32, #tpu.memory_space<vmem>>, vector<8x256xf32>,
    return
  }
  func.func @transform_0(%arg0: i32) -> (i32, i32) {
    %c0_i32 = arith.constant 0 : i32
    %c0_i32_0 = arith.constant 0 : i32
    return %arg0, %c0_i32 : i32, i32
  }
  func.func @transform_1(%arg0: i32) -> (i32, i32) {
    %c0_i32 = arith.constant 0 : i32
    %c0_i32_0 = arith.constant 0 : i32
    %c0_i32_1 = arith.constant 0 : i32
    return %c0_i32, %c0_i32_0 : i32, i32
  }
  func.func @transform_2(%arg0: i32) -> (i32, i32) {
    %c0_i32 = arith.constant 0 : i32
    %c0_i32_0 = arith.constant 0 : i32
    %c0_i32_1 = arith.constant 0 : i32
    return %c0_i32, %c0_i32_0 : i32, i32
  }
  func.func @transform_3(%arg0: i32) -> (i32, i32) {
    %c0_i32 = arith.constant 0 : i32
    %c0_i32_0 = arith.constant 0 : i32
    %c0_i32_1 = arith.constant 0 : i32
    return %c0_i32, %c0_i32_0 : i32, i32
  }
  func.func @transform_4(%arg0: i32) -> (i32, i32) {
    %c0_i32 = arith.constant 0 : i32
    %c0_i32_0 = arith.constant 0 : i32
    %c0_i32_1 = arith.constant 0 : i32
    return %c0_i32, %c0_i32_0 : i32, i32
  }
  func.func @transform_5(%arg0: i32) -> (i32, i32) {
    %c0_i32 = arith.constant 0 : i32
    %c0_i32_0 = arith.constant 0 : i32
    %c0_i32_1 = arith.constant 0 : i32
    return %c0_i32, %c0_i32_0 : i32, i32
  }
  func.func @transform_6(%arg0: i32) -> (i32, i32) {
    %c0_i32 = arith.constant 0 : i32
    %c0_i32_0 = arith.constant 0 : i32
    %c0_i32_1 = arith.constant 0 : i32
    return %c0_i32, %c0_i32_0 : i32, i32
  }
  func.func @transform_7(%arg0: i32) -> (i32, i32) {
    %c0_i32 = arith.constant 0 : i32
    %c0_i32_0 = arith.constant 0 : i32
    %c0_i32_1 = arith.constant 0 : i32
    return %c0_i32, %c0_i32_0 : i32, i32
  }
  func.func @transform_8(%arg0: i32) -> (i32, i32) {
    %c0_i32 = arith.constant 0 : i32
    %c0_i32_0 = arith.constant 0 : i32
    %c0_i32_1 = arith.constant 0 : i32
    return %c0_i32, %c0_i32_0 : i32, i32
  }
  func.func @transform_9(%arg0: i32) -> (i32, i32) {
    %c0_i32 = arith.constant 0 : i32
    %c0_i32_0 = arith.constant 0 : i32
    return %arg0, %c0_i32 : i32, i32
  }
}

module attributes {stable_mosaic.version = 11 : i64} {
  func.func @_conv_branches_kernel(%arg0: i32, %arg1: memref<1x8x256xf32, #tpu.memory_space<vmem>>, %arg2: memref<2x1x256xf32, #tpu.memory_space<vmem>>, %arg3: memref<2x1x256xf32, #tpu.memory_space<vmem>>, %arg4: memref<2x256x512xbf16, #tpu.memory_space<vmem>>, %arg5: memref<2x1x512xf32, #tpu.memory_space<vmem>>, %arg6: memref<2x7x256xf32, #tpu.memory_space<vmem>>, %arg7: memref<2x1x256xf32, #tpu.memory_space<vmem>>, %arg8: memref<2x1x256xf32, #tpu.memory_space<vmem>>, %arg9: memref<2x1x256xf32, #tpu.memory_space<vmem>>, %arg10: memref<2x256x128xbf16, #tpu.memory_space<vmem>>, %arg11: memref<2x1x128xf32, #tpu.memory_space<vmem>>, %arg12: memref<1x8x256xf32, #tpu.memory_space<vmem>>) attributes {dimension_semantics = [#tpu.dimension_semantics<parallel>], iteration_bounds = array<i64: 2>, scalar_prefetch = 0 : i64, scratch_operands = 0 : i64, tpu.core_type = #tpu.core_type<tc>, window_params = [{transform_indices = @transform_0, window_bounds = array<i64: 1, 8, 256>}, {pipeline_mode = #tpu.pipeline_mode<synchronous>, transform_indices = @transform_1, window_bounds = array<i64: 2, 1, 256>}, {pipeline_mode = #tpu.pipeline_mode<synchronous>, transform_indices = @transform_2, window_bounds = array<i64: 2, 1, 256>}, {pipeline_mode = #tpu.pipeline_mode<synchronous>, transform_indices = @transform_3, window_bounds = array<i64: 2, 256, 512>}, {pipeline_mode = #tpu.pipeline_mode<synchronous>, transform_indices = @transform_4, window_bounds = array<i64: 2, 1, 512>}, {pipeline_mode = #tpu.pipeline_mode<synchronous>, transform_indices = @transform_5, window_bounds = array<i64: 2, 7, 256>}, {pipeline_mode = #tpu.pipeline_mode<synchronous>, transform_indices = @transform_6, window_bounds = array<i64: 2, 1, 256>}, {pipeline_mode = #tpu.pipeline_mode<synchronous>, transform_indices = @transform_7, window_bounds = array<i64: 2, 1, 256>}, {pipeline_mode = #tpu.pipeline_mode<synchronous>, transform_indices = @transform_8, window_bounds = array<i64: 2, 1, 256>}, {pipeline_mode = #tpu.pipeline_mode<synchronous>, transform_indices = @transform_9, window_bounds = array<i64: 2, 256, 128>}, {pipeline_mode = #tpu.pipeline_mode<synchronous>, transform_indices = @transform_10, window_bounds = array<i64: 2, 1, 128>}, {transform_indices = @transform_11, window_bounds = array<i64: 1, 8, 256>}]} {
    %c0 = arith.constant 0 : index
    %c0_0 = arith.constant 0 : index
    %c0_1 = arith.constant 0 : index
    %0 = vector.load %arg1[%c0, %c0_0, %c0_1] : memref<1x8x256xf32, #tpu.memory_space<vmem>>, vector<1x8x256xf32>
    %1 = vector.shape_cast %0 : vector<1x8x256xf32> to vector<8x256xf32>
    %2 = tpu.iota {dimensions = array<i32: 0>} : vector<8x1xi32>
    %c0_2 = arith.constant 0 : index
    %c0_3 = arith.constant 0 : index
    %c0_4 = arith.constant 0 : index
    %3 = vector.load %arg2[%c0_2, %c0_3, %c0_4] : memref<2x1x256xf32, #tpu.memory_space<vmem>>, vector<1x1x256xf32>
    %4 = vector.shape_cast %3 : vector<1x1x256xf32> to vector<1x256xf32>
    %c0_5 = arith.constant 0 : index
    %c0_6 = arith.constant 0 : index
    %c0_7 = arith.constant 0 : index
    %5 = vector.load %arg3[%c0_5, %c0_6, %c0_7] : memref<2x1x256xf32, #tpu.memory_space<vmem>>, vector<1x1x256xf32>
    %6 = vector.shape_cast %5 : vector<1x1x256xf32> to vector<1x256xf32>
    %cst = arith.constant dense<0.000000e+00> : vector<8xf32>
    %7 = vector.multi_reduction <add>, %1, %cst [1] : vector<8x256xf32> to vector<8xf32>
    %8 = vector.shape_cast %7 : vector<8xf32> to vector<8x1xf32>
    %cst_8 = arith.constant 2.560000e+02 : f32
    %9 = vector.broadcast %cst_8 : f32 to vector<8x1xf32>
    %10 = arith.divf %8, %9 : vector<8x1xf32>
    %11 = vector.broadcast %10 : vector<8x1xf32> to vector<8x256xf32>
    %12 = arith.subf %1, %11 : vector<8x256xf32>
    %13 = arith.mulf %12, %12 : vector<8x256xf32>
    %cst_9 = arith.constant dense<0.000000e+00> : vector<8xf32>
    %14 = vector.multi_reduction <add>, %13, %cst_9 [1] : vector<8x256xf32> to vector<8xf32>
    %15 = vector.shape_cast %14 : vector<8xf32> to vector<8x1xf32>
    %cst_10 = arith.constant 2.560000e+02 : f32
    %16 = vector.broadcast %cst_10 : f32 to vector<8x1xf32>
    %17 = arith.divf %15, %16 : vector<8x1xf32>
    %cst_11 = arith.constant 9.99999974E-6 : f32
    %18 = vector.broadcast %cst_11 : f32 to vector<8x1xf32>
    %19 = arith.addf %17, %18 : vector<8x1xf32>
    %20 = math.rsqrt %19 : vector<8x1xf32>
    %21 = vector.broadcast %20 : vector<8x1xf32> to vector<8x256xf32>
    %22 = arith.mulf %12, %21 : vector<8x256xf32>
    %23 = vector.broadcast %4 : vector<1x256xf32> to vector<8x256xf32>
    %24 = arith.mulf %22, %23 : vector<8x256xf32>
    %25 = vector.broadcast %6 : vector<1x256xf32> to vector<8x256xf32>
    %26 = arith.addf %24, %25 : vector<8x256xf32>
    %c0_12 = arith.constant 0 : index
    %c0_13 = arith.constant 0 : index
    %c0_14 = arith.constant 0 : index
    %27 = vector.load %arg4[%c0_12, %c0_13, %c0_14] : memref<2x256x512xbf16, #tpu.memory_space<vmem>>, vector<1x256x512xbf16>
    %28 = vector.shape_cast %27 : vector<1x256x512xbf16> to vector<256x512xbf16>
    %29 = arith.truncf %26 : vector<8x256xf32> to vector<8x256xbf16>
    %cst_15 = arith.constant dense<0.000000e+00> : vector<8x512xf32>
    %30 = tpu.matmul %29, %28, %cst_15 {dimension_numbers = #tpu.dot_dimension_numbers<[1], [0], [0], [1], [0, 0, 1, 1], [], []>} : vector<8x256xbf16>, vector<256x512xbf16>, vector<8x512xf32> -> vector<8x512xf32>
    %c0_16 = arith.constant 0 : index
    %c0_17 = arith.constant 0 : index
    %c0_18 = arith.constant 0 : index
    %31 = vector.load %arg5[%c0_16, %c0_17, %c0_18] : memref<2x1x512xf32, #tpu.memory_space<vmem>>, vector<1x1x512xf32>
    %32 = vector.shape_cast %31 : vector<1x1x512xf32> to vector<1x512xf32>
    %33 = vector.broadcast %32 : vector<1x512xf32> to vector<8x512xf32>
    %34 = arith.addf %30, %33 : vector<8x512xf32>
    %35 = vector.extract_strided_slice %34 {offsets = [0, 0], sizes = [8, 256], strides = [1, 1]} : vector<8x512xf32> to vector<8x256xf32>
    %36 = vector.extract_strided_slice %34 {offsets = [0, 256], sizes = [8, 256], strides = [1, 1]} : vector<8x512xf32> to vector<8x256xf32>
    %37 = arith.negf %36 : vector<8x256xf32>
    %38 = math.exp %37 : vector<8x256xf32>
    %cst_19 = arith.constant 1.000000e+00 : f32
    %39 = vector.broadcast %cst_19 : f32 to vector<8x256xf32>
    %40 = arith.addf %39, %38 : vector<8x256xf32>
    %41 = arith.divf %39, %40 : vector<8x256xf32>
    %42 = arith.mulf %35, %41 : vector<8x256xf32>
    %c0_20 = arith.constant 0 : index
    %c0_21 = arith.constant 0 : index
    %c0_22 = arith.constant 0 : index
    %43 = vector.load %arg6[%c0_20, %c0_21, %c0_22] : memref<2x7x256xf32, #tpu.memory_space<vmem>>, vector<1x7x256xf32>
    %44 = vector.shape_cast %43 : vector<1x7x256xf32> to vector<7x256xf32>
    %cst_23 = arith.constant 0.000000e+00 : f32
    %45 = vector.broadcast %cst_23 : f32 to vector<8x256xf32>
    %c3_i32 = arith.constant 3 : i32
    %46 = tpu.dynamic_rotate %42 by %c3_i32 dim 0 : vector<8x256xf32>, i32 -> vector<8x256xf32>
    %c3_i32_24 = arith.constant 3 : i32
    %47 = vector.broadcast %c3_i32_24 : i32 to vector<8x1xi32>
    %48 = arith.cmpi sge, %2, %47 : vector<8x1xi32>
    %cst_25 = arith.constant 0.000000e+00 : f32
    %49 = vector.shape_cast %48 : vector<8x1xi1> to vector<8x1xi1>
    %50 = vector.broadcast %49 : vector<8x1xi1> to vector<8x256xi1>
    %51 = vector.broadcast %cst_25 : f32 to vector<8x256xf32>
    %52 = arith.select %50, %46, %51 : vector<8x256xi1>, vector<8x256xf32>
    %53 = vector.extract_strided_slice %44 {offsets = [0, 0], sizes = [1, 256], strides = [1, 1]} : vector<7x256xf32> to vector<1x256xf32>
    %54 = vector.broadcast %53 : vector<1x256xf32> to vector<8x256xf32>
    %55 = arith.mulf %52, %54 : vector<8x256xf32>
    %56 = arith.addf %45, %55 : vector<8x256xf32>
    %c2_i32 = arith.constant 2 : i32
    %57 = tpu.dynamic_rotate %42 by %c2_i32 dim 0 : vector<8x256xf32>, i32 -> vector<8x256xf32>
    %c2_i32_26 = arith.constant 2 : i32
    %58 = vector.broadcast %c2_i32_26 : i32 to vector<8x1xi32>
    %59 = arith.cmpi sge, %2, %58 : vector<8x1xi32>
    %cst_27 = arith.constant 0.000000e+00 : f32
    %60 = vector.shape_cast %59 : vector<8x1xi1> to vector<8x1xi1>
    %61 = vector.broadcast %60 : vector<8x1xi1> to vector<8x256xi1>
    %62 = vector.broadcast %cst_27 : f32 to vector<8x256xf32>
    %63 = arith.select %61, %57, %62 : vector<8x256xi1>, vector<8x256xf32>
    %64 = vector.extract_strided_slice %44 {offsets = [1, 0], sizes = [1, 256], strides = [1, 1]} : vector<7x256xf32> to vector<1x256xf32>
    %65 = vector.broadcast %64 : vector<1x256xf32> to vector<8x256xf32>
    %66 = arith.mulf %63, %65 : vector<8x256xf32>
    %67 = arith.addf %56, %66 : vector<8x256xf32>
    %c1_i32 = arith.constant 1 : i32
    %68 = tpu.dynamic_rotate %42 by %c1_i32 dim 0 : vector<8x256xf32>, i32 -> vector<8x256xf32>
    %c1_i32_28 = arith.constant 1 : i32
    %69 = vector.broadcast %c1_i32_28 : i32 to vector<8x1xi32>
    %70 = arith.cmpi sge, %2, %69 : vector<8x1xi32>
    %cst_29 = arith.constant 0.000000e+00 : f32
    %71 = vector.shape_cast %70 : vector<8x1xi1> to vector<8x1xi1>
    %72 = vector.broadcast %71 : vector<8x1xi1> to vector<8x256xi1>
    %73 = vector.broadcast %cst_29 : f32 to vector<8x256xf32>
    %74 = arith.select %72, %68, %73 : vector<8x256xi1>, vector<8x256xf32>
    %75 = vector.extract_strided_slice %44 {offsets = [2, 0], sizes = [1, 256], strides = [1, 1]} : vector<7x256xf32> to vector<1x256xf32>
    %76 = vector.broadcast %75 : vector<1x256xf32> to vector<8x256xf32>
    %77 = arith.mulf %74, %76 : vector<8x256xf32>
    %78 = arith.addf %67, %77 : vector<8x256xf32>
    %79 = vector.extract_strided_slice %44 {offsets = [3, 0], sizes = [1, 256], strides = [1, 1]} : vector<7x256xf32> to vector<1x256xf32>
    %80 = vector.broadcast %79 : vector<1x256xf32> to vector<8x256xf32>
    %81 = arith.mulf %42, %80 : vector<8x256xf32>
    %82 = arith.addf %78, %81 : vector<8x256xf32>
    %c7_i32 = arith.constant 7 : i32
    %83 = tpu.dynamic_rotate %42 by %c7_i32 dim 0 : vector<8x256xf32>, i32 -> vector<8x256xf32>
    %c7_i32_30 = arith.constant 7 : i32
    %84 = vector.broadcast %c7_i32_30 : i32 to vector<8x1xi32>
    %85 = arith.cmpi slt, %2, %84 : vector<8x1xi32>
    %cst_31 = arith.constant 0.000000e+00 : f32
    %86 = vector.shape_cast %85 : vector<8x1xi1> to vector<8x1xi1>
    %87 = vector.broadcast %86 : vector<8x1xi1> to vector<8x256xi1>
    %88 = vector.broadcast %cst_31 : f32 to vector<8x256xf32>
    %89 = arith.select %87, %83, %88 : vector<8x256xi1>, vector<8x256xf32>
    %90 = vector.extract_strided_slice %44 {offsets = [4, 0], sizes = [1, 256], strides = [1, 1]} : vector<7x256xf32> to vector<1x256xf32>
    %91 = vector.broadcast %90 : vector<1x256xf32> to vector<8x256xf32>
    %92 = arith.mulf %89, %91 : vector<8x256xf32>
    %93 = arith.addf %82, %92 : vector<8x256xf32>
    %c6_i32 = arith.constant 6 : i32
    %94 = tpu.dynamic_rotate %42 by %c6_i32 dim 0 : vector<8x256xf32>, i32 -> vector<8x256xf32>
    %c6_i32_32 = arith.constant 6 : i32
    %95 = vector.broadcast %c6_i32_32 : i32 to vector<8x1xi32>
    %96 = arith.cmpi slt, %2, %95 : vector<8x1xi32>
    %cst_33 = arith.constant 0.000000e+00 : f32
    %97 = vector.shape_cast %96 : vector<8x1xi1> to vector<8x1xi1>
    %98 = vector.broadcast %97 : vector<8x1xi1> to vector<8x256xi1>
    %99 = vector.broadcast %cst_33 : f32 to vector<8x256xf32>
    %100 = arith.select %98, %94, %99 : vector<8x256xi1>, vector<8x256xf32>
    %101 = vector.extract_strided_slice %44 {offsets = [5, 0], sizes = [1, 256], strides = [1, 1]} : vector<7x256xf32> to vector<1x256xf32>
    %102 = vector.broadcast %101 : vector<1x256xf32> to vector<8x256xf32>
    %103 = arith.mulf %100, %102 : vector<8x256xf32>
    %104 = arith.addf %93, %103 : vector<8x256xf32>
    %c5_i32 = arith.constant 5 : i32
    %105 = tpu.dynamic_rotate %42 by %c5_i32 dim 0 : vector<8x256xf32>, i32 -> vector<8x256xf32>
    %c5_i32_34 = arith.constant 5 : i32
    %106 = vector.broadcast %c5_i32_34 : i32 to vector<8x1xi32>
    %107 = arith.cmpi slt, %2, %106 : vector<8x1xi32>
    %cst_35 = arith.constant 0.000000e+00 : f32
    %108 = vector.shape_cast %107 : vector<8x1xi1> to vector<8x1xi1>
    %109 = vector.broadcast %108 : vector<8x1xi1> to vector<8x256xi1>
    %110 = vector.broadcast %cst_35 : f32 to vector<8x256xf32>
    %111 = arith.select %109, %105, %110 : vector<8x256xi1>, vector<8x256xf32>
    %112 = vector.extract_strided_slice %44 {offsets = [6, 0], sizes = [1, 256], strides = [1, 1]} : vector<7x256xf32> to vector<1x256xf32>
    %113 = vector.broadcast %112 : vector<1x256xf32> to vector<8x256xf32>
    %114 = arith.mulf %111, %113 : vector<8x256xf32>
    %115 = arith.addf %104, %114 : vector<8x256xf32>
    %c0_36 = arith.constant 0 : index
    %c0_37 = arith.constant 0 : index
    %c0_38 = arith.constant 0 : index
    %116 = vector.load %arg7[%c0_36, %c0_37, %c0_38] : memref<2x1x256xf32, #tpu.memory_space<vmem>>, vector<1x1x256xf32>
    %117 = vector.shape_cast %116 : vector<1x1x256xf32> to vector<1x256xf32>
    %118 = vector.broadcast %117 : vector<1x256xf32> to vector<8x256xf32>
    %119 = arith.addf %115, %118 : vector<8x256xf32>
    %c0_39 = arith.constant 0 : index
    %c0_40 = arith.constant 0 : index
    %c0_41 = arith.constant 0 : index
    %120 = vector.load %arg8[%c0_39, %c0_40, %c0_41] : memref<2x1x256xf32, #tpu.memory_space<vmem>>, vector<1x1x256xf32>
    %121 = vector.shape_cast %120 : vector<1x1x256xf32> to vector<1x256xf32>
    %c0_42 = arith.constant 0 : index
    %c0_43 = arith.constant 0 : index
    %c0_44 = arith.constant 0 : index
    %122 = vector.load %arg9[%c0_42, %c0_43, %c0_44] : memref<2x1x256xf32, #tpu.memory_space<vmem>>, vector<1x1x256xf32>
    %123 = vector.shape_cast %122 : vector<1x1x256xf32> to vector<1x256xf32>
    %cst_45 = arith.constant dense<0.000000e+00> : vector<8xf32>
    %124 = vector.multi_reduction <add>, %119, %cst_45 [1] : vector<8x256xf32> to vector<8xf32>
    %125 = vector.shape_cast %124 : vector<8xf32> to vector<8x1xf32>
    %cst_46 = arith.constant 2.560000e+02 : f32
    %126 = vector.broadcast %cst_46 : f32 to vector<8x1xf32>
    %127 = arith.divf %125, %126 : vector<8x1xf32>
    %128 = vector.broadcast %127 : vector<8x1xf32> to vector<8x256xf32>
    %129 = arith.subf %119, %128 : vector<8x256xf32>
    %130 = arith.mulf %129, %129 : vector<8x256xf32>
    %cst_47 = arith.constant dense<0.000000e+00> : vector<8xf32>
    %131 = vector.multi_reduction <add>, %130, %cst_47 [1] : vector<8x256xf32> to vector<8xf32>
    %132 = vector.shape_cast %131 : vector<8xf32> to vector<8x1xf32>
    %cst_48 = arith.constant 2.560000e+02 : f32
    %133 = vector.broadcast %cst_48 : f32 to vector<8x1xf32>
    %134 = arith.divf %132, %133 : vector<8x1xf32>
    %cst_49 = arith.constant 9.99999974E-6 : f32
    %135 = vector.broadcast %cst_49 : f32 to vector<8x1xf32>
    %136 = arith.addf %134, %135 : vector<8x1xf32>
    %137 = math.rsqrt %136 : vector<8x1xf32>
    %138 = vector.broadcast %137 : vector<8x1xf32> to vector<8x256xf32>
    %139 = arith.mulf %129, %138 : vector<8x256xf32>
    %140 = vector.broadcast %121 : vector<1x256xf32> to vector<8x256xf32>
    %141 = arith.mulf %139, %140 : vector<8x256xf32>
    %142 = vector.broadcast %123 : vector<1x256xf32> to vector<8x256xf32>
    %143 = arith.addf %141, %142 : vector<8x256xf32>
    %144 = arith.negf %143 : vector<8x256xf32>
    %145 = math.exp %144 : vector<8x256xf32>
    %cst_50 = arith.constant 1.000000e+00 : f32
    %146 = vector.broadcast %cst_50 : f32 to vector<8x256xf32>
    %147 = arith.addf %146, %145 : vector<8x256xf32>
    %148 = arith.divf %146, %147 : vector<8x256xf32>
    %149 = arith.mulf %143, %148 : vector<8x256xf32>
    %c0_51 = arith.constant 0 : index
    %c0_52 = arith.constant 0 : index
    %c0_53 = arith.constant 0 : index
    %150 = vector.load %arg10[%c0_51, %c0_52, %c0_53] : memref<2x256x128xbf16, #tpu.memory_space<vmem>>, vector<1x256x128xbf16>
    %151 = vector.shape_cast %150 : vector<1x256x128xbf16> to vector<256x128xbf16>
    %152 = arith.truncf %149 : vector<8x256xf32> to vector<8x256xbf16>
    %cst_54 = arith.constant dense<0.000000e+00> : vector<8x128xf32>
    %153 = tpu.matmul %152, %151, %cst_54 {dimension_numbers = #tpu.dot_dimension_numbers<[1], [0], [0], [1], [0, 0, 1, 1], [], []>} : vector<8x256xbf16>, vector<256x128xbf16>, vector<8x128xf32> -> vector<8x128xf32>
    %c0_55 = arith.constant 0 : index
    %c0_56 = arith.constant 0 : index
    %c0_57 = arith.constant 0 : index
    %154 = vector.load %arg11[%c0_55, %c0_56, %c0_57] : memref<2x1x128xf32, #tpu.memory_space<vmem>>, vector<1x1x128xf32>
    %155 = vector.shape_cast %154 : vector<1x1x128xf32> to vector<1x128xf32>
    %156 = vector.broadcast %155 : vector<1x128xf32> to vector<8x128xf32>
    %157 = arith.addf %153, %156 : vector<8x128xf32>
    %c1 = arith.constant 1 : index
    %c0_58 = arith.constant 0 : index
    %c0_59 = arith.constant 0 : index
    %158 = vector.load %arg2[%c1, %c0_58, %c0_59] : memref<2x1x256xf32, #tpu.memory_space<vmem>>, vector<1x1x256xf32>
    %159 = vector.shape_cast %158 : vector<1x1x256xf32> to vector<1x256xf32>
    %c1_60 = arith.constant 1 : index
    %c0_61 = arith.constant 0 : index
    %c0_62 = arith.constant 0 : index
    %160 = vector.load %arg3[%c1_60, %c0_61, %c0_62] : memref<2x1x256xf32, #tpu.memory_space<vmem>>, vector<1x1x256xf32>
    %161 = vector.shape_cast %160 : vector<1x1x256xf32> to vector<1x256xf32>
    %cst_63 = arith.constant dense<0.000000e+00> : vector<8xf32>
    %162 = vector.multi_reduction <add>, %1, %cst_63 [1] : vector<8x256xf32> to vector<8xf32>
    %163 = vector.shape_cast %162 : vector<8xf32> to vector<8x1xf32>
    %cst_64 = arith.constant 2.560000e+02 : f32
    %164 = vector.broadcast %cst_64 : f32 to vector<8x1xf32>
    %165 = arith.divf %163, %164 : vector<8x1xf32>
    %166 = vector.broadcast %165 : vector<8x1xf32> to vector<8x256xf32>
    %167 = arith.subf %1, %166 : vector<8x256xf32>
    %168 = arith.mulf %167, %167 : vector<8x256xf32>
    %cst_65 = arith.constant dense<0.000000e+00> : vector<8xf32>
    %169 = vector.multi_reduction <add>, %168, %cst_65 [1] : vector<8x256xf32> to vector<8xf32>
    %170 = vector.shape_cast %169 : vector<8xf32> to vector<8x1xf32>
    %cst_66 = arith.constant 2.560000e+02 : f32
    %171 = vector.broadcast %cst_66 : f32 to vector<8x1xf32>
    %172 = arith.divf %170, %171 : vector<8x1xf32>
    %cst_67 = arith.constant 9.99999974E-6 : f32
    %173 = vector.broadcast %cst_67 : f32 to vector<8x1xf32>
    %174 = arith.addf %172, %173 : vector<8x1xf32>
    %175 = math.rsqrt %174 : vector<8x1xf32>
    %176 = vector.broadcast %175 : vector<8x1xf32> to vector<8x256xf32>
    %177 = arith.mulf %167, %176 : vector<8x256xf32>
    %178 = vector.broadcast %159 : vector<1x256xf32> to vector<8x256xf32>
    %179 = arith.mulf %177, %178 : vector<8x256xf32>
    %180 = vector.broadcast %161 : vector<1x256xf32> to vector<8x256xf32>
    %181 = arith.addf %179, %180 : vector<8x256xf32>
    %c1_68 = arith.constant 1 : index
    %c0_69 = arith.constant 0 : index
    %c0_70 = arith.constant 0 : index
    %182 = vector.load %arg4[%c1_68, %c0_69, %c0_70] : memref<2x256x512xbf16, #tpu.memory_space<vmem>>, vector<1x256x512xbf16>
    %183 = vector.shape_cast %182 : vector<1x256x512xbf16> to vector<256x512xbf16>
    %184 = arith.truncf %181 : vector<8x256xf32> to vector<8x256xbf16>
    %cst_71 = arith.constant dense<0.000000e+00> : vector<8x512xf32>
    %185 = tpu.matmul %184, %183, %cst_71 {dimension_numbers = #tpu.dot_dimension_numbers<[1], [0], [0], [1], [0, 0, 1, 1], [], []>} : vector<8x256xbf16>, vector<256x512xbf16>, vector<8x512xf32> -> vector<8x512xf32>
    %c1_72 = arith.constant 1 : index
    %c0_73 = arith.constant 0 : index
    %c0_74 = arith.constant 0 : index
    %186 = vector.load %arg5[%c1_72, %c0_73, %c0_74] : memref<2x1x512xf32, #tpu.memory_space<vmem>>, vector<1x1x512xf32>
    %187 = vector.shape_cast %186 : vector<1x1x512xf32> to vector<1x512xf32>
    %188 = vector.broadcast %187 : vector<1x512xf32> to vector<8x512xf32>
    %189 = arith.addf %185, %188 : vector<8x512xf32>
    %190 = vector.extract_strided_slice %189 {offsets = [0, 0], sizes = [8, 256], strides = [1, 1]} : vector<8x512xf32> to vector<8x256xf32>
    %191 = vector.extract_strided_slice %189 {offsets = [0, 256], sizes = [8, 256], strides = [1, 1]} : vector<8x512xf32> to vector<8x256xf32>
    %192 = arith.negf %191 : vector<8x256xf32>
    %193 = math.exp %192 : vector<8x256xf32>
    %cst_75 = arith.constant 1.000000e+00 : f32
    %194 = vector.broadcast %cst_75 : f32 to vector<8x256xf32>
    %195 = arith.addf %194, %193 : vector<8x256xf32>
    %196 = arith.divf %194, %195 : vector<8x256xf32>
    %197 = arith.mulf %190, %196 : vector<8x256xf32>
    %c1_76 = arith.constant 1 : index
    %c0_77 = arith.constant 0 : index
    %c0_78 = arith.constant 0 : index
    %198 = vector.load %arg6[%c1_76, %c0_77, %c0_78] : memref<2x7x256xf32, #tpu.memory_space<vmem>>, vector<1x7x256xf32>
    %199 = vector.shape_cast %198 : vector<1x7x256xf32> to vector<7x256xf32>
    %cst_79 = arith.constant 0.000000e+00 : f32
    %200 = vector.broadcast %cst_79 : f32 to vector<8x256xf32>
    %c3_i32_80 = arith.constant 3 : i32
    %201 = tpu.dynamic_rotate %197 by %c3_i32_80 dim 0 : vector<8x256xf32>, i32 -> vector<8x256xf32>
    %c3_i32_81 = arith.constant 3 : i32
    %202 = vector.broadcast %c3_i32_81 : i32 to vector<8x1xi32>
    %203 = arith.cmpi sge, %2, %202 : vector<8x1xi32>
    %cst_82 = arith.constant 0.000000e+00 : f32
    %204 = vector.shape_cast %203 : vector<8x1xi1> to vector<8x1xi1>
    %205 = vector.broadcast %204 : vector<8x1xi1> to vector<8x256xi1>
    %206 = vector.broadcast %cst_82 : f32 to vector<8x256xf32>
    %207 = arith.select %205, %201, %206 : vector<8x256xi1>, vector<8x256xf32>
    %208 = vector.extract_strided_slice %199 {offsets = [0, 0], sizes = [1, 256], strides = [1, 1]} : vector<7x256xf32> to vector<1x256xf32>
    %209 = vector.broadcast %208 : vector<1x256xf32> to vector<8x256xf32>
    %210 = arith.mulf %207, %209 : vector<8x256xf32>
    %211 = arith.addf %200, %210 : vector<8x256xf32>
    %c2_i32_83 = arith.constant 2 : i32
    %212 = tpu.dynamic_rotate %197 by %c2_i32_83 dim 0 : vector<8x256xf32>, i32 -> vector<8x256xf32>
    %c2_i32_84 = arith.constant 2 : i32
    %213 = vector.broadcast %c2_i32_84 : i32 to vector<8x1xi32>
    %214 = arith.cmpi sge, %2, %213 : vector<8x1xi32>
    %cst_85 = arith.constant 0.000000e+00 : f32
    %215 = vector.shape_cast %214 : vector<8x1xi1> to vector<8x1xi1>
    %216 = vector.broadcast %215 : vector<8x1xi1> to vector<8x256xi1>
    %217 = vector.broadcast %cst_85 : f32 to vector<8x256xf32>
    %218 = arith.select %216, %212, %217 : vector<8x256xi1>, vector<8x256xf32>
    %219 = vector.extract_strided_slice %199 {offsets = [1, 0], sizes = [1, 256], strides = [1, 1]} : vector<7x256xf32> to vector<1x256xf32>
    %220 = vector.broadcast %219 : vector<1x256xf32> to vector<8x256xf32>
    %221 = arith.mulf %218, %220 : vector<8x256xf32>
    %222 = arith.addf %211, %221 : vector<8x256xf32>
    %c1_i32_86 = arith.constant 1 : i32
    %223 = tpu.dynamic_rotate %197 by %c1_i32_86 dim 0 : vector<8x256xf32>, i32 -> vector<8x256xf32>
    %c1_i32_87 = arith.constant 1 : i32
    %224 = vector.broadcast %c1_i32_87 : i32 to vector<8x1xi32>
    %225 = arith.cmpi sge, %2, %224 : vector<8x1xi32>
    %cst_88 = arith.constant 0.000000e+00 : f32
    %226 = vector.shape_cast %225 : vector<8x1xi1> to vector<8x1xi1>
    %227 = vector.broadcast %226 : vector<8x1xi1> to vector<8x256xi1>
    %228 = vector.broadcast %cst_88 : f32 to vector<8x256xf32>
    %229 = arith.select %227, %223, %228 : vector<8x256xi1>, vector<8x256xf32>
    %230 = vector.extract_strided_slice %199 {offsets = [2, 0], sizes = [1, 256], strides = [1, 1]} : vector<7x256xf32> to vector<1x256xf32>
    %231 = vector.broadcast %230 : vector<1x256xf32> to vector<8x256xf32>
    %232 = arith.mulf %229, %231 : vector<8x256xf32>
    %233 = arith.addf %222, %232 : vector<8x256xf32>
    %234 = vector.extract_strided_slice %199 {offsets = [3, 0], sizes = [1, 256], strides = [1, 1]} : vector<7x256xf32> to vector<1x256xf32>
    %235 = vector.broadcast %234 : vector<1x256xf32> to vector<8x256xf32>
    %236 = arith.mulf %197, %235 : vector<8x256xf32>
    %237 = arith.addf %233, %236 : vector<8x256xf32>
    %c7_i32_89 = arith.constant 7 : i32
    %238 = tpu.dynamic_rotate %197 by %c7_i32_89 dim 0 : vector<8x256xf32>, i32 -> vector<8x256xf32>
    %c7_i32_90 = arith.constant 7 : i32
    %239 = vector.broadcast %c7_i32_90 : i32 to vector<8x1xi32>
    %240 = arith.cmpi slt, %2, %239 : vector<8x1xi32>
    %cst_91 = arith.constant 0.000000e+00 : f32
    %241 = vector.shape_cast %240 : vector<8x1xi1> to vector<8x1xi1>
    %242 = vector.broadcast %241 : vector<8x1xi1> to vector<8x256xi1>
    %243 = vector.broadcast %cst_91 : f32 to vector<8x256xf32>
    %244 = arith.select %242, %238, %243 : vector<8x256xi1>, vector<8x256xf32>
    %245 = vector.extract_strided_slice %199 {offsets = [4, 0], sizes = [1, 256], strides = [1, 1]} : vector<7x256xf32> to vector<1x256xf32>
    %246 = vector.broadcast %245 : vector<1x256xf32> to vector<8x256xf32>
    %247 = arith.mulf %244, %246 : vector<8x256xf32>
    %248 = arith.addf %237, %247 : vector<8x256xf32>
    %c6_i32_92 = arith.constant 6 : i32
    %249 = tpu.dynamic_rotate %197 by %c6_i32_92 dim 0 : vector<8x256xf32>, i32 -> vector<8x256xf32>
    %c6_i32_93 = arith.constant 6 : i32
    %250 = vector.broadcast %c6_i32_93 : i32 to vector<8x1xi32>
    %251 = arith.cmpi slt, %2, %250 : vector<8x1xi32>
    %cst_94 = arith.constant 0.000000e+00 : f32
    %252 = vector.shape_cast %251 : vector<8x1xi1> to vector<8x1xi1>
    %253 = vector.broadcast %252 : vector<8x1xi1> to vector<8x256xi1>
    %254 = vector.broadcast %cst_94 : f32 to vector<8x256xf32>
    %255 = arith.select %253, %249, %254 : vector<8x256xi1>, vector<8x256xf32>
    %256 = vector.extract_strided_slice %199 {offsets = [5, 0], sizes = [1, 256], strides = [1, 1]} : vector<7x256xf32> to vector<1x256xf32>
    %257 = vector.broadcast %256 : vector<1x256xf32> to vector<8x256xf32>
    %258 = arith.mulf %255, %257 : vector<8x256xf32>
    %259 = arith.addf %248, %258 : vector<8x256xf32>
    %c5_i32_95 = arith.constant 5 : i32
    %260 = tpu.dynamic_rotate %197 by %c5_i32_95 dim 0 : vector<8x256xf32>, i32 -> vector<8x256xf32>
    %c5_i32_96 = arith.constant 5 : i32
    %261 = vector.broadcast %c5_i32_96 : i32 to vector<8x1xi32>
    %262 = arith.cmpi slt, %2, %261 : vector<8x1xi32>
    %cst_97 = arith.constant 0.000000e+00 : f32
    %263 = vector.shape_cast %262 : vector<8x1xi1> to vector<8x1xi1>
    %264 = vector.broadcast %263 : vector<8x1xi1> to vector<8x256xi1>
    %265 = vector.broadcast %cst_97 : f32 to vector<8x256xf32>
    %266 = arith.select %264, %260, %265 : vector<8x256xi1>, vector<8x256xf32>
    %267 = vector.extract_strided_slice %199 {offsets = [6, 0], sizes = [1, 256], strides = [1, 1]} : vector<7x256xf32> to vector<1x256xf32>
    %268 = vector.broadcast %267 : vector<1x256xf32> to vector<8x256xf32>
    %269 = arith.mulf %266, %268 : vector<8x256xf32>
    %270 = arith.addf %259, %269 : vector<8x256xf32>
    %c1_98 = arith.constant 1 : index
    %c0_99 = arith.constant 0 : index
    %c0_100 = arith.constant 0 : index
    %271 = vector.load %arg7[%c1_98, %c0_99, %c0_100] : memref<2x1x256xf32, #tpu.memory_space<vmem>>, vector<1x1x256xf32>
    %272 = vector.shape_cast %271 : vector<1x1x256xf32> to vector<1x256xf32>
    %273 = vector.broadcast %272 : vector<1x256xf32> to vector<8x256xf32>
    %274 = arith.addf %270, %273 : vector<8x256xf32>
    %c1_101 = arith.constant 1 : index
    %c0_102 = arith.constant 0 : index
    %c0_103 = arith.constant 0 : index
    %275 = vector.load %arg8[%c1_101, %c0_102, %c0_103] : memref<2x1x256xf32, #tpu.memory_space<vmem>>, vector<1x1x256xf32>
    %276 = vector.shape_cast %275 : vector<1x1x256xf32> to vector<1x256xf32>
    %c1_104 = arith.constant 1 : index
    %c0_105 = arith.constant 0 : index
    %c0_106 = arith.constant 0 : index
    %277 = vector.load %arg9[%c1_104, %c0_105, %c0_106] : memref<2x1x256xf32, #tpu.memory_space<vmem>>, vector<1x1x256xf32>
    %278 = vector.shape_cast %277 : vector<1x1x256xf32> to vector<1x256xf32>
    %cst_107 = arith.constant dense<0.000000e+00> : vector<8xf32>
    %279 = vector.multi_reduction <add>, %274, %cst_107 [1] : vector<8x256xf32> to vector<8xf32>
    %280 = vector.shape_cast %279 : vector<8xf32> to vector<8x1xf32>
    %cst_108 = arith.constant 2.560000e+02 : f32
    %281 = vector.broadcast %cst_108 : f32 to vector<8x1xf32>
    %282 = arith.divf %280, %281 : vector<8x1xf32>
    %283 = vector.broadcast %282 : vector<8x1xf32> to vector<8x256xf32>
    %284 = arith.subf %274, %283 : vector<8x256xf32>
    %285 = arith.mulf %284, %284 : vector<8x256xf32>
    %cst_109 = arith.constant dense<0.000000e+00> : vector<8xf32>
    %286 = vector.multi_reduction <add>, %285, %cst_109 [1] : vector<8x256xf32> to vector<8xf32>
    %287 = vector.shape_cast %286 : vector<8xf32> to vector<8x1xf32>
    %cst_110 = arith.constant 2.560000e+02 : f32
    %288 = vector.broadcast %cst_110 : f32 to vector<8x1xf32>
    %289 = arith.divf %287, %288 : vector<8x1xf32>
    %cst_111 = arith.constant 9.99999974E-6 : f32
    %290 = vector.broadcast %cst_111 : f32 to vector<8x1xf32>
    %291 = arith.addf %289, %290 : vector<8x1xf32>
    %292 = math.rsqrt %291 : vector<8x1xf32>
    %293 = vector.broadcast %292 : vector<8x1xf32> to vector<8x256xf32>
    %294 = arith.mulf %284, %293 : vector<8x256xf32>
    %295 = vector.broadcast %276 : vector<1x256xf32> to vector<8x256xf32>
    %296 = arith.mulf %294, %295 : vector<8x256xf32>
    %297 = vector.broadcast %278 : vector<1x256xf32> to vector<8x256xf32>
    %298 = arith.addf %296, %297 : vector<8x256xf32>
    %299 = arith.negf %298 : vector<8x256xf32>
    %300 = math.exp %299 : vector<8x256xf32>
    %cst_112 = arith.constant 1.000000e+00 : f32
    %301 = vector.broadcast %cst_112 : f32 to vector<8x256xf32>
    %302 = arith.addf %301, %300 : vector<8x256xf32>
    %303 = arith.divf %301, %302 : vector<8x256xf32>
    %304 = arith.mulf %298, %303 : vector<8x256xf32>
    %c1_113 = arith.constant 1 : index
    %c0_114 = arith.constant 0 : index
    %c0_115 = arith.constant 0 : index
    %305 = vector.load %arg10[%c1_113, %c0_114, %c0_115] : memref<2x256x128xbf16, #tpu.memory_space<vmem>>, vector<1x256x128xbf16>
    %306 = vector.shape_cast %305 : vector<1x256x128xbf16> to vector<256x128xbf16>
    %307 = arith.truncf %304 : vector<8x256xf32> to vector<8x256xbf16>
    %cst_116 = arith.constant dense<0.000000e+00> : vector<8x128xf32>
    %308 = tpu.matmul %307, %306, %cst_116 {dimension_numbers = #tpu.dot_dimension_numbers<[1], [0], [0], [1], [0, 0, 1, 1], [], []>} : vector<8x256xbf16>, vector<256x128xbf16>, vector<8x128xf32> -> vector<8x128xf32>
    %c1_117 = arith.constant 1 : index
    %c0_118 = arith.constant 0 : index
    %c0_119 = arith.constant 0 : index
    %309 = vector.load %arg11[%c1_117, %c0_118, %c0_119] : memref<2x1x128xf32, #tpu.memory_space<vmem>>, vector<1x1x128xf32>
    %310 = vector.shape_cast %309 : vector<1x1x128xf32> to vector<1x128xf32>
    %311 = vector.broadcast %310 : vector<1x128xf32> to vector<8x128xf32>
    %312 = arith.addf %308, %311 : vector<8x128xf32>
    %313 = tpu.concatenate %157, %312 in 1 : vector<8x128xf32>, vector<8x128xf32> -> vector<8x256xf32>
    %314 = arith.addf %313, %1 : vector<8x256xf32>
    %c0_120 = arith.constant 0 : index
    %c0_121 = arith.constant 0 : index
    %c0_122 = arith.constant 0 : index
    %315 = vector.load %arg12[%c0_120, %c0_121, %c0_122] : memref<1x8x256xf32, #tpu.memory_space<vmem>>, vector<1x8x256xf32>
    %316 = vector.shape_cast %315 : vector<1x8x256xf32> to vector<8x256xf32>
    %317 = vector.shape_cast %314 : vector<8x256xf32> to vector<1x8x256xf32>
    tpu.vector_store %arg12[%c0_120, %c0_121, %c0_122], %317 {strides = array<i32>} : memref<1x8x256xf32, #tpu.memory_space<vmem>>, vector<1x8x256xf32>,
    return
  }
  func.func @transform_0(%arg0: i32) -> (i32, i32, i32) {
    %c0_i32 = arith.constant 0 : i32
    %c0_i32_0 = arith.constant 0 : i32
    %c0_i32_1 = arith.constant 0 : i32
    return %arg0, %c0_i32, %c0_i32_0 : i32, i32, i32
  }
  func.func @transform_1(%arg0: i32) -> (i32, i32, i32) {
    %c0_i32 = arith.constant 0 : i32
    %c0_i32_0 = arith.constant 0 : i32
    %c0_i32_1 = arith.constant 0 : i32
    %c0_i32_2 = arith.constant 0 : i32
    return %c0_i32, %c0_i32_0, %c0_i32_1 : i32, i32, i32
  }
  func.func @transform_2(%arg0: i32) -> (i32, i32, i32) {
    %c0_i32 = arith.constant 0 : i32
    %c0_i32_0 = arith.constant 0 : i32
    %c0_i32_1 = arith.constant 0 : i32
    %c0_i32_2 = arith.constant 0 : i32
    return %c0_i32, %c0_i32_0, %c0_i32_1 : i32, i32, i32
  }
  func.func @transform_3(%arg0: i32) -> (i32, i32, i32) {
    %c0_i32 = arith.constant 0 : i32
    %c0_i32_0 = arith.constant 0 : i32
    %c0_i32_1 = arith.constant 0 : i32
    %c0_i32_2 = arith.constant 0 : i32
    return %c0_i32, %c0_i32_0, %c0_i32_1 : i32, i32, i32
  }
  func.func @transform_4(%arg0: i32) -> (i32, i32, i32) {
    %c0_i32 = arith.constant 0 : i32
    %c0_i32_0 = arith.constant 0 : i32
    %c0_i32_1 = arith.constant 0 : i32
    %c0_i32_2 = arith.constant 0 : i32
    return %c0_i32, %c0_i32_0, %c0_i32_1 : i32, i32, i32
  }
  func.func @transform_5(%arg0: i32) -> (i32, i32, i32) {
    %c0_i32 = arith.constant 0 : i32
    %c0_i32_0 = arith.constant 0 : i32
    %c0_i32_1 = arith.constant 0 : i32
    %c0_i32_2 = arith.constant 0 : i32
    return %c0_i32, %c0_i32_0, %c0_i32_1 : i32, i32, i32
  }
  func.func @transform_6(%arg0: i32) -> (i32, i32, i32) {
    %c0_i32 = arith.constant 0 : i32
    %c0_i32_0 = arith.constant 0 : i32
    %c0_i32_1 = arith.constant 0 : i32
    %c0_i32_2 = arith.constant 0 : i32
    return %c0_i32, %c0_i32_0, %c0_i32_1 : i32, i32, i32
  }
  func.func @transform_7(%arg0: i32) -> (i32, i32, i32) {
    %c0_i32 = arith.constant 0 : i32
    %c0_i32_0 = arith.constant 0 : i32
    %c0_i32_1 = arith.constant 0 : i32
    %c0_i32_2 = arith.constant 0 : i32
    return %c0_i32, %c0_i32_0, %c0_i32_1 : i32, i32, i32
  }
  func.func @transform_8(%arg0: i32) -> (i32, i32, i32) {
    %c0_i32 = arith.constant 0 : i32
    %c0_i32_0 = arith.constant 0 : i32
    %c0_i32_1 = arith.constant 0 : i32
    %c0_i32_2 = arith.constant 0 : i32
    return %c0_i32, %c0_i32_0, %c0_i32_1 : i32, i32, i32
  }
  func.func @transform_9(%arg0: i32) -> (i32, i32, i32) {
    %c0_i32 = arith.constant 0 : i32
    %c0_i32_0 = arith.constant 0 : i32
    %c0_i32_1 = arith.constant 0 : i32
    %c0_i32_2 = arith.constant 0 : i32
    return %c0_i32, %c0_i32_0, %c0_i32_1 : i32, i32, i32
  }
  func.func @transform_10(%arg0: i32) -> (i32, i32, i32) {
    %c0_i32 = arith.constant 0 : i32
    %c0_i32_0 = arith.constant 0 : i32
    %c0_i32_1 = arith.constant 0 : i32
    %c0_i32_2 = arith.constant 0 : i32
    return %c0_i32, %c0_i32_0, %c0_i32_1 : i32, i32, i32
  }
  func.func @transform_11(%arg0: i32) -> (i32, i32, i32) {
    %c0_i32 = arith.constant 0 : i32
    %c0_i32_0 = arith.constant 0 : i32
    %c0_i32_1 = arith.constant 0 : i32
    return %arg0, %c0_i32, %c0_i32_0 : i32, i32, i32
  }
}

module attributes {stable_mosaic.version = 11 : i64} {
  func.func @_ln_kernel(%arg0: i32, %arg1: memref<8x256xf32, #tpu.memory_space<vmem>>, %arg2: memref<1x256xf32, #tpu.memory_space<vmem>>, %arg3: memref<1x256xf32, #tpu.memory_space<vmem>>, %arg4: memref<8x256xf32, #tpu.memory_space<vmem>>) attributes {dimension_semantics = [#tpu.dimension_semantics<parallel>], iteration_bounds = array<i64: 2>, scalar_prefetch = 0 : i64, scratch_operands = 0 : i64, tpu.core_type = #tpu.core_type<tc>, window_params = [{transform_indices = @transform_0, window_bounds = array<i64: 8, 256>}, {pipeline_mode = #tpu.pipeline_mode<synchronous>, transform_indices = @transform_1, window_bounds = array<i64: 1, 256>}, {pipeline_mode = #tpu.pipeline_mode<synchronous>, transform_indices = @transform_2, window_bounds = array<i64: 1, 256>}, {transform_indices = @transform_3, window_bounds = array<i64: 8, 256>}]} {
    %c0 = arith.constant 0 : index
    %c0_0 = arith.constant 0 : index
    %0 = vector.load %arg1[%c0, %c0_0] : memref<8x256xf32, #tpu.memory_space<vmem>>, vector<8x256xf32>
    %c0_1 = arith.constant 0 : index
    %c0_2 = arith.constant 0 : index
    %1 = vector.load %arg2[%c0_1, %c0_2] : memref<1x256xf32, #tpu.memory_space<vmem>>, vector<1x256xf32>
    %c0_3 = arith.constant 0 : index
    %c0_4 = arith.constant 0 : index
    %2 = vector.load %arg3[%c0_3, %c0_4] : memref<1x256xf32, #tpu.memory_space<vmem>>, vector<1x256xf32>
    %cst = arith.constant dense<0.000000e+00> : vector<8xf32>
    %3 = vector.multi_reduction <add>, %0, %cst [1] : vector<8x256xf32> to vector<8xf32>
    %4 = vector.shape_cast %3 : vector<8xf32> to vector<8x1xf32>
    %cst_5 = arith.constant 2.560000e+02 : f32
    %5 = vector.broadcast %cst_5 : f32 to vector<8x1xf32>
    %6 = arith.divf %4, %5 : vector<8x1xf32>
    %7 = vector.broadcast %6 : vector<8x1xf32> to vector<8x256xf32>
    %8 = arith.subf %0, %7 : vector<8x256xf32>
    %9 = arith.mulf %8, %8 : vector<8x256xf32>
    %cst_6 = arith.constant dense<0.000000e+00> : vector<8xf32>
    %10 = vector.multi_reduction <add>, %9, %cst_6 [1] : vector<8x256xf32> to vector<8xf32>
    %11 = vector.shape_cast %10 : vector<8xf32> to vector<8x1xf32>
    %cst_7 = arith.constant 2.560000e+02 : f32
    %12 = vector.broadcast %cst_7 : f32 to vector<8x1xf32>
    %13 = arith.divf %11, %12 : vector<8x1xf32>
    %cst_8 = arith.constant 9.99999997E-7 : f32
    %14 = vector.broadcast %cst_8 : f32 to vector<8x1xf32>
    %15 = arith.addf %13, %14 : vector<8x1xf32>
    %16 = math.rsqrt %15 : vector<8x1xf32>
    %17 = vector.broadcast %16 : vector<8x1xf32> to vector<8x256xf32>
    %18 = arith.mulf %8, %17 : vector<8x256xf32>
    %19 = vector.broadcast %1 : vector<1x256xf32> to vector<8x256xf32>
    %20 = arith.mulf %18, %19 : vector<8x256xf32>
    %21 = vector.broadcast %2 : vector<1x256xf32> to vector<8x256xf32>
    %22 = arith.addf %20, %21 : vector<8x256xf32>
    %c0_9 = arith.constant 0 : index
    %c0_10 = arith.constant 0 : index
    %23 = vector.load %arg4[%c0_9, %c0_10] : memref<8x256xf32, #tpu.memory_space<vmem>>, vector<8x256xf32>
    tpu.vector_store %arg4[%c0_9, %c0_10], %22 {strides = array<i32>} : memref<8x256xf32, #tpu.memory_space<vmem>>, vector<8x256xf32>,
    return
  }
  func.func @transform_0(%arg0: i32) -> (i32, i32) {
    %c0_i32 = arith.constant 0 : i32
    %c0_i32_0 = arith.constant 0 : i32
    return %arg0, %c0_i32 : i32, i32
  }
  func.func @transform_1(%arg0: i32) -> (i32, i32) {
    %c0_i32 = arith.constant 0 : i32
    %c0_i32_0 = arith.constant 0 : i32
    %c0_i32_1 = arith.constant 0 : i32
    return %c0_i32, %c0_i32_0 : i32, i32
  }
  func.func @transform_2(%arg0: i32) -> (i32, i32) {
    %c0_i32 = arith.constant 0 : i32
    %c0_i32_0 = arith.constant 0 : i32
    %c0_i32_1 = arith.constant 0 : i32
    return %c0_i32, %c0_i32_0 : i32, i32
  }
  func.func @transform_3(%arg0: i32) -> (i32, i32) {
    %c0_i32 = arith.constant 0 : i32
    %c0_i32_0 = arith.constant 0 : i32
    return %arg0, %c0_i32 : i32, i32
  }
}

</mosaic_0001>

<bundles_post_ra>
// kernel: encoder_forward.7
= control target key start
LH: loop header
LB: loop body
LE: loop exit
PB: predicated region body
PF: predicated region fallthrough
CT: control target
= control target key end

     0   :  { %14 = vsyncpa [#allocation3], 0  ;;  %s1489_s0 = inlined_call_operand.vmem [shape: f32[16,256], index: 0, kind: input, shape index: {}]   ;;  %s1490_s1 = inlined_call_operand.vmem [shape: f32[1,256], index: 1, kind: input, shape index: {}]   ;;  %s1491_s2 = inlined_call_operand.vmem [shape: f32[1,256], index: 2, kind: input, shape index: {}]   ;;  %s1492_s3 = inlined_call_operand.hbm [shape: bf16[256,256], index: 3, kind: input, shape index: {}]   ;;  %s1493_s4 = inlined_call_operand.vmem [shape: f32[1,256], index: 4, kind: input, shape index: {}]   ;;  %s1494_s5 = inlined_call_operand.hbm [shape: bf16[256,256], index: 5, kind: input, shape index: {}]   ;;  %s1495_s6 = inlined_call_operand.vmem [shape: f32[1,256], index: 6, kind: input, shape index: {}]   ;;  %s1496_s7 = inlined_call_operand.vmem [shape: f32[1,256], index: 7, kind: input, shape index: {}]   ;;  %s1497_s8 = inlined_call_operand.vmem [shape: f32[1,256], index: 8, kind: input, shape index: {}]   ;;  %s1498_s9 = inlined_call_operand.vmem [shape: f32[16,256], index: 9, kind: output, shape index: {}]  }
   0x1   :  { %15 = vsyncpa [#allocation5], 0  ;;  %s1345_s30 = smov 0  }
   0x2 LB: > { %s1351_s10 = sadd.s32 4294967295, %s1289_s30   ;;  %p1001_p0 = scmp.ge.s32.totalorder %s1289_s30, 1  ;;  %s1289_s30 = sphi %s1345_s30, %s21_s30  }
   0x3   : > { %p246_p1 = scmp.lt.s32.totalorder %s1289_s30, 3  ;;  %s1291_s7 = smov [#allocation2]  }
   0x4   : > { %s264_s8 = sshll.u32 %s1291_s7, 4  ;;  %p1499_p3 = scmp.eq.s32.totalorder %s1351_s10, 0  ;;  %s265_s8 = int_to_ptr.vmem [resolvable:$true] %s264_s8 }
   0x5   : > { %p1355_p2 = pnand %p1001_p0, %p246_p1  ;;  %s1292_s12 = smov [#allocation4]  }
   0x6   : > { %s280_s13 = sshll.u32 %s1292_s12, 4  ;;  %s1219_s17 = scalar_lea.hbm %s1492_s3, 4096  ;;  %s1368_s13 = int_to_ptr.vmem [resolvable:$true] %s280_s13 }
   0x7   : > { %s1501_s11 = scalar_select %p1355_p2, 1, 0 }
   0x8   : > { %p1090_p4 = pneg %p1355_p2  ;;  %p1220_p6 = scmp.ne.s32.totalorder %s1492_s3, %s1219_s17 }
   0x9   : > { %p1226_p10 = scmp.lt.u32.totalorder %s1219_s17, %s1492_s3 }
   0xa   : > { %p1364_p5 = pnand %p1499_p3, %p1090_p4 }
   0xc   : > { %p1221_p7 = pneg %p1364_p5 }
   0xe   : > { %p1222_p8 = pnand %p1221_p7, %p1220_p6 }
  0x10   : > { %p1223_p9 = pneg %p1222_p8 }
  0x12   : > { %p1228_p11 = pnand %p1226_p10, %p1223_p9 }
  0x14   : > { %1231 = shalt.err (!%p1228_p11)
}
  0x15   : > { %s1232_s22 = scalar_lea.vmem %s265_s8, 4096  ;;  %p1240_p1 = scmp.lt.s32.totalorder %s265_s8, %s265_s8 }
  0x16   : > { %p1233_p12 = scmp.ne.s32.totalorder %s265_s8, %s1232_s22  ;;  %p1241_p4 = scmp.lt.s32.totalorder %s1232_s22, %s1232_s22 }
  0x18   : > { %p1235_p13 = pnand %p1233_p12, %p1221_p7  ;;  %p1242_p3 = por %p1241_p4, %p1240_p1 }
  0x1a   : > { %p1236_p0 = pneg %p1235_p13 }
  0x1c   : > { %p1243_p2 = pnand %p1242_p3, %p1236_p0 }
  0x1e   : > { %1246 = shalt.err (!%p1243_p2)
}
  0x1f   : > { %s1293_s23 = smov 128   ;;  %s1294_s24 = smov 8  }
  0x20   : > { %1093 = dma.hbm_to_vmem [thread:$0]  (!%p1364_p5), %s1492_s3, 4096, %s265_s8, [#allocation3], %s1293_s23, %s1293_s23, %s1294_s24  }
  0x21   : > { %s1247_s29 = scalar_lea.hbm %s1494_s5, 4096 }
  0x22   : > { %p1248_p6 = scmp.ne.s32.totalorder %s1494_s5, %s1247_s29  ;;  %p1254_p8 = scmp.lt.u32.totalorder %s1247_s29, %s1494_s5 }
  0x24   : > { %p1250_p2 = pnand %p1248_p6, %p1221_p7 }
  0x26   : > { %p1251_p3 = pneg %p1250_p2 }
  0x28   : > { %p1256_p9 = pnand %p1254_p8, %p1251_p3 }
  0x2a   : > { %1259 = shalt.err (!%p1256_p9)
}
  0x2b   : > { %s1260_s8 = scalar_lea.vmem %s1368_s13, 4096  ;;  %p1268_p13 = scmp.lt.s32.totalorder %s1368_s13, %s1368_s13 }
  0x2c   : > { %p1261_p10 = scmp.ne.s32.totalorder %s1368_s13, %s1260_s8  ;;  %p1269_p0 = scmp.lt.s32.totalorder %s1260_s8, %s1260_s8 }
  0x2e   : > { %p1263_p11 = pnand %p1261_p10, %p1221_p7  ;;  %p1270_p1 = por %p1269_p0, %p1268_p13 }
  0x30   : > { %p1264_p12 = pneg %p1263_p11 }
  0x32   : > { %p1271_p4 = pnand %p1270_p1, %p1264_p12 }
  0x34   : > { %1274 = shalt.err (!%p1271_p4)
}
  0x35   : > { %1096 = dma.hbm_to_vmem [thread:$0]  (!%p1364_p5), %s1494_s5, 4096, %s1368_s13, [#allocation5], %s1293_s23, %s1293_s23, %s1294_s24  }
  0x36   : > { %p1503_p6 = scmp.ne.s32.totalorder %s1501_s11, 0 }
  0x37   : > { %p1504_p2 = scmp.eq.s32.totalorder (!%p1503_p6), %s1351_s10, 0 }
  0x38   : > { %313 = sbr.rel (%p1503_p6) target bundleno = 855 (0x357), region = 56 }
  0x3f   : > { %1280 = dma.done.wait (%p1504_p2), [#allocation3], 4096   ;;  %p1505_p7 = pmov %p1504_p2 }
  0x40   : > { %p1506_p3 = pmov %p1504_p2 }
  0x41   : > { %1282 = vsyncadd (%p1505_p7), [#allocation3], 4294963200 }
  0x42   : > { %1284 = dma.done.wait (%p1506_p3), [#allocation5], 4096   ;;  %p1507_p8 = pmov %p1504_p2 }
  0x43   : > { %p353_p9 = scmp.lt.s32.totalorder %s1351_s10, 1  ;;  %v1113_v3 = vld [vmem:[#allocation2 + $0x4] ss:$8 sps:$4 sm:$0xff]   ;;  %v1115_v4 = vld [vmem:[#allocation2] ss:$8 sps:$4 sm:$0xff]   ;;  %v385_v59 = vlaneseq }
  0x44   : > { %1286 = vsyncadd (%p1507_p8), [#allocation5], 4294963200  ;;  %v1116_v5 = vld [vmem:[#allocation2 + $0x14] ss:$8 sps:$4 sm:$0xff]   ;;  %616 = vmatprep.subr.bf16.mxu0 %v1113_v3  ;;  %v1118_v6 = vld [vmem:[#allocation2 + $0x10] ss:$8 sps:$4 sm:$0xff]  }
  0x45   : > { %s1509_s10 = smov (!%p353_p9, %s1351_s10), 1  ;;  %617 = vmatpush1.bf16.msra.mxu0 %v1115_v4  ;;  %v1119_v7 = vld [vmem:[#allocation2 + $0x24] ss:$8 sps:$4 sm:$0xff]   ;;  %v1121_v8 = vld [vmem:[#allocation2 + $0x20] ss:$8 sps:$4 sm:$0xff]   ;;  %v386_v61 = vshrl.u32 %v385_v59, 7 }
  0x46   : > { %s1080_s11 = sshll.u32 %s1509_s10, 4  ;;  %618 = vmatprep.subr.bf16.mxu0 %v1116_v5  ;;  %v1122_v9 = vld [vmem:[#allocation2 + $0x34] ss:$8 sps:$4 sm:$0xff]   ;;  %v1124_v10 = vld [vmem:[#allocation2 + $0x30] ss:$8 sps:$4 sm:$0xff]  }
  0x47   : > { %s357_s19 = scalar_lea.vmem %s1489_s0, %s1080_s11  ;;  %v1125_v11 = vld [vmem:[#allocation2 + $0x44] ss:$8 sps:$4 sm:$0xff]   ;;  %v1127_v12 = vld [vmem:[#allocation2 + $0x40] ss:$8 sps:$4 sm:$0xff]   ;;  %v1128_v13 = vld [vmem:[#allocation2 + $0x54] ss:$8 sps:$4 sm:$0xff]   ;;  %s362_s7 = scalar_lea.vmem %s1498_s9, %s1080_s11 }
  0x48   : > { %v1437_v0 = vld [vmem:[%s357_s19] sm:$0xff]  ;;  %v1439_v1 = vld [vmem:[%s357_s19 + $0x8] sm:$0xff]  ;;  %v1130_v14 = vld [vmem:[#allocation2 + $0x50] ss:$8 sps:$4 sm:$0xff]   ;;  %v1453_v62 = vsub.s32 0, %v386_v61  ;;  %v1455_v63 = vsub.s32 1, %v386_v61 }
  0x49   : > { %v367_v2 = vadd.f32 %v1439_v1, %v1437_v0  ;;  %619 = vmatpush1.bf16.msra.mxu0 %v1118_v6  ;;  %v1131_v15 = vld [vmem:[#allocation2 + $0x64] ss:$8 sps:$4 sm:$0xff]   ;;  %v1133_v16 = vld [vmem:[#allocation2 + $0x60] ss:$8 sps:$4 sm:$0xff]   ;;  %v1134_v17 = vld [vmem:[#allocation2 + $0x74] ss:$8 sps:$4 sm:$0xff]  }
  0x4a   : > { %620 = vmatprep.subr.bf16.mxu0 %v1119_v7  ;;  %v1136_v18 = vld [vmem:[#allocation2 + $0x70] ss:$8 sps:$4 sm:$0xff]   ;;  %v1137_v19 = vld [vmem:[#allocation2 + $0x84] ss:$8 sps:$4 sm:$0xff]   ;;  %v1139_v20 = vld [vmem:[#allocation2 + $0x80] ss:$8 sps:$4 sm:$0xff]  }
  0x4b   : > { %368 = vadd.xlane.f32.xlu0 %v367_v2  ;;  %v1140_v21 = vld [vmem:[#allocation2 + $0x94] ss:$8 sps:$4 sm:$0xff]   ;;  %v1142_v22 = vld [vmem:[#allocation2 + $0x90] ss:$8 sps:$4 sm:$0xff]   ;;  %v1143_v30 = vld [vmem:[#allocation2 + $0xa4] ss:$8 sps:$4 sm:$0xff]  }
  0x4c   : > { %v1145_v31 = vld [vmem:[#allocation2 + $0xa0] ss:$8 sps:$4 sm:$0xff]   ;;  %v1146_v32 = vld [vmem:[#allocation2 + $0xb4] ss:$8 sps:$4 sm:$0xff]   ;;  %v1148_v33 = vld [vmem:[#allocation2 + $0xb0] ss:$8 sps:$4 sm:$0xff]  }
  0x4d   : > { %621 = vmatpush1.bf16.msra.mxu0 %v1121_v8  ;;  %v1149_v34 = vld [vmem:[#allocation2 + $0xc4] ss:$8 sps:$4 sm:$0xff]   ;;  %v1151_v35 = vld [vmem:[#allocation2 + $0xc0] ss:$8 sps:$4 sm:$0xff]   ;;  %v1152_v36 = vld [vmem:[#allocation2 + $0xd4] ss:$8 sps:$4 sm:$0xff]  }
  0x4e   : > { %622 = vmatprep.subr.bf16.mxu0 %v1122_v9  ;;  %v1154_v37 = vld [vmem:[#allocation2 + $0xd0] ss:$8 sps:$4 sm:$0xff]   ;;  %v1155_v38 = vld [vmem:[#allocation2 + $0xe4] ss:$8 sps:$4 sm:$0xff]   ;;  %v1157_v39 = vld [vmem:[#allocation2 + $0xe0] ss:$8 sps:$4 sm:$0xff]  }
  0x4f   : > { %v1158_v40 = vld [vmem:[#allocation2 + $0xf4] ss:$8 sps:$4 sm:$0xff]   ;;  %v1160_v41 = vld [vmem:[#allocation2 + $0xf0] ss:$8 sps:$4 sm:$0xff]   ;;  %v1161_v42 = vld [vmem:[#allocation4 + $0x4] ss:$8 sps:$4 sm:$0xff]  }
  0x50   : > { %v1163_v43 = vld [vmem:[#allocation4] ss:$8 sps:$4 sm:$0xff]   ;;  %v1164_v44 = vld [vmem:[#allocation4 + $0x14] ss:$8 sps:$4 sm:$0xff]   ;;  %877 = vmatprep.subr.bf16.mxu1 %v1161_v42  ;;  %v1166_v45 = vld [vmem:[#allocation4 + $0x10] ss:$8 sps:$4 sm:$0xff]  }
  0x51   : > { %623 = vmatpush1.bf16.msra.mxu0 %v1124_v10  ;;  %878 = vmatpush1.bf16.msra.mxu1 %v1163_v43  ;;  %v1167_v46 = vld [vmem:[#allocation4 + $0x24] ss:$8 sps:$4 sm:$0xff]   ;;  %v1169_v47 = vld [vmem:[#allocation4 + $0x20] ss:$8 sps:$4 sm:$0xff]   ;;  %v1170_v48 = vld [vmem:[#allocation4 + $0x34] ss:$8 sps:$4 sm:$0xff]  }
  0x52   : > { %624 = vmatprep.subr.bf16.mxu0 %v1125_v11  ;;  %879 = vmatprep.subr.bf16.mxu1 %v1164_v44  ;;  %v1172_v49 = vld [vmem:[#allocation4 + $0x30] ss:$8 sps:$4 sm:$0xff]   ;;  %v1173_v50 = vld [vmem:[#allocation4 + $0x44] ss:$8 sps:$4 sm:$0xff]   ;;  %v1175_v51 = vld [vmem:[#allocation4 + $0x40] ss:$8 sps:$4 sm:$0xff]  }
  0x53   : > { %v1176_v52 = vld [vmem:[#allocation4 + $0x54] ss:$8 sps:$4 sm:$0xff]   ;;  %v1178_v53 = vld [vmem:[#allocation4 + $0x50] ss:$8 sps:$4 sm:$0xff]   ;;  %v1179_v54 = vld [vmem:[#allocation4 + $0x64] ss:$8 sps:$4 sm:$0xff]  }
  0x54   : > { %v1181_v55 = vld [vmem:[#allocation4 + $0x60] ss:$8 sps:$4 sm:$0xff]   ;;  %v1182_v56 = vld [vmem:[#allocation4 + $0x74] ss:$8 sps:$4 sm:$0xff]  }
  0x55   : > { %625 = vmatpush1.bf16.msra.mxu0 %v1127_v12  ;;  %880 = vmatpush1.bf16.msra.mxu1 %v1166_v45  ;;  %v365_v2 = vld [vmem:[%s1490_s1] sm:$0x3] }
  0x56   : > { %626 = vmatprep.subr.bf16.mxu0 %v1128_v13  ;;  %881 = vmatprep.subr.bf16.mxu1 %v1167_v46  ;;  %v366_v3 = vld [vmem:[%s1491_s2] sm:$0x3]  ;;  %v388_v4 = vrot.slane %v365_v2, %v1453_v62  ;;  %v392_v5 = vrot.slane %v365_v2, %v1455_v63 }
  0x57   : > { %v401_v8 = vrot.slane %v366_v3, %v1453_v62  ;;  %v405_v9 = vrot.slane %v366_v3, %v1455_v63 }
  0x59   : > { %627 = vmatpush1.bf16.msra.mxu0 %v1130_v14  ;;  %882 = vmatpush1.bf16.msra.mxu1 %v1169_v47 }
  0x5a   : > { %628 = vmatprep.subr.bf16.mxu0 %v1131_v15  ;;  %883 = vmatprep.subr.bf16.mxu1 %v1170_v48 }
  0x5d   : > { %629 = vmatpush1.bf16.msra.mxu0 %v1133_v16  ;;  %884 = vmatpush1.bf16.msra.mxu1 %v1172_v49 }
  0x5e   : > { %630 = vmatprep.subr.bf16.mxu0 %v1134_v17  ;;  %885 = vmatprep.subr.bf16.mxu1 %v1173_v50  ;;  %v1184_v17 = vld [vmem:[#allocation4 + $0x70] ss:$8 sps:$4 sm:$0xff]  }
  0x61   : > { %631 = vmatpush1.bf16.msra.mxu0 %v1136_v18  ;;  %886 = vmatpush1.bf16.msra.mxu1 %v1175_v51  ;;  %v1185_v18 = vld [vmem:[#allocation4 + $0x84] ss:$8 sps:$4 sm:$0xff]  }
  0x62   : > { %632 = vmatprep.subr.bf16.mxu0 %v1137_v19  ;;  %887 = vmatprep.subr.bf16.mxu1 %v1176_v52  ;;  %v1187_v19 = vld [vmem:[#allocation4 + $0x80] ss:$8 sps:$4 sm:$0xff]  }
  0x65   : > { %633 = vmatpush1.bf16.msra.mxu0 %v1139_v20  ;;  %888 = vmatpush1.bf16.msra.mxu1 %v1178_v53  ;;  %v1188_v20 = vld [vmem:[#allocation4 + $0x94] ss:$8 sps:$4 sm:$0xff]  }
  0x66   : > { %634 = vmatprep.subr.bf16.mxu0 %v1140_v21  ;;  %889 = vmatprep.subr.bf16.mxu1 %v1179_v54  ;;  %v1190_v21 = vld [vmem:[#allocation4 + $0x90] ss:$8 sps:$4 sm:$0xff]  }
  0x69   : > { %635 = vmatpush1.bf16.msra.mxu0 %v1142_v22  ;;  %890 = vmatpush1.bf16.msra.mxu1 %v1181_v55  ;;  %v1191_v22 = vld [vmem:[#allocation4 + $0xa4] ss:$8 sps:$4 sm:$0xff]   ;;  %v705_v55 = vld [vmem:[%s1495_s6] sm:$0x3] }
  0x6a   : > { %636 = vmatprep.subr.bf16.mxu0 %v1143_v30  ;;  %891 = vmatprep.subr.bf16.mxu1 %v1182_v56  ;;  %v1203_v30 = vld [vmem:[#allocation4 + $0xe4] ss:$8 sps:$4 sm:$0xff]   ;;  %v710_v56 = vrot.slane %v705_v55, %v1453_v62 }
  0x6d   : > { %637 = vmatpush1.bf16.msra.mxu0 %v1145_v31  ;;  %892 = vmatpush1.bf16.msra.mxu1 %v1184_v17  ;;  %v1205_v31 = vld [vmem:[#allocation4 + $0xe0] ss:$8 sps:$4 sm:$0xff]  }
  0x6e   : > { %638 = vmatprep.subr.bf16.mxu0 %v1146_v32  ;;  %893 = vmatprep.subr.bf16.mxu1 %v1185_v18  ;;  %v1206_v32 = vld [vmem:[#allocation4 + $0xf4] ss:$8 sps:$4 sm:$0xff]  }
  0x71   : > { %639 = vmatpush1.bf16.msra.mxu0 %v1148_v33  ;;  %894 = vmatpush1.bf16.msra.mxu1 %v1187_v19  ;;  %v1208_v33 = vld [vmem:[#allocation4 + $0xf0] ss:$8 sps:$4 sm:$0xff]  }
  0x72   : > { %640 = vmatprep.subr.bf16.mxu0 %v1149_v34  ;;  %895 = vmatprep.subr.bf16.mxu1 %v1188_v20  ;;  %v444_v34 = vld [vmem:[%s1493_s4] sm:$0x3] }
  0x75   : > { %641 = vmatpush1.bf16.msra.mxu0 %v1151_v35  ;;  %896 = vmatpush1.bf16.msra.mxu1 %v1190_v21  ;;  %v449_v35 = vrot.slane %v444_v34, %v1453_v62 }
  0x76   : > { %642 = vmatprep.subr.bf16.mxu0 %v1152_v36  ;;  %897 = vmatprep.subr.bf16.mxu1 %v1191_v22  ;;  %v453_v36 = vrot.slane %v444_v34, %v1455_v63 }
  0x79   : > { %643 = vmatpush1.bf16.msra.mxu0 %v1154_v37 }
  0x7a   : > { %644 = vmatprep.subr.bf16.mxu0 %v1155_v38 }
  0x7d   : > { %645 = vmatpush1.bf16.msra.mxu0 %v1157_v39 }
  0x7e   : > { %646 = vmatprep.subr.bf16.mxu0 %v1158_v40 }
  0x81   : > { %647 = vmatpush1.bf16.msra.mxu0 %v1160_v41 }
  0xd8   : > { %v369_v23 = vpop.xlane.xlu0 %368 }
  0xd9   : > { %v371_v24 = vmul.f32 0.00390625, %v369_v23  ;;  %v1193_v23 = vld [vmem:[#allocation4 + $0xa0] ss:$8 sps:$4 sm:$0xff]  }
  0xda   : > { %898 = vmatpush1.bf16.msra.mxu1 %v1193_v23 }
  0xdb   : > { %v1444_v25 = vsub.f32 %v1437_v0, %v371_v24  ;;  %v1447_v26 = vsub.f32 %v1439_v1, %v371_v24  ;;  %v1194_v24 = vld [vmem:[#allocation4 + $0xb4] ss:$8 sps:$4 sm:$0xff]  }
  0xdc   : > { %899 = vmatprep.subr.bf16.mxu1 %v1194_v24 }
  0xdd   : > { %v374_v27 = vmul.f32 %v1444_v25, %v1444_v25  ;;  %v375_v28 = vmul.f32 %v1447_v26, %v1447_v26 }
  0xdf   : > { %v376_v29 = vadd.f32 %v375_v28, %v374_v27  ;;  %v1199_v27 = vld [vmem:[#allocation4 + $0xc0] ss:$8 sps:$4 sm:$0xff]   ;;  %v1200_v28 = vld [vmem:[#allocation4 + $0xd4] ss:$8 sps:$4 sm:$0xff]  }
  0xe1   : > { %377 = vadd.xlane.f32.xlu0 %v376_v29  ;;  %v1202_v29 = vld [vmem:[#allocation4 + $0xd0] ss:$8 sps:$4 sm:$0xff]  }
 0x16e   : > { %v378_v57 = vpop.xlane.xlu0 %377 }
 0x16f   : > { %v379_v58 = vmul.f32 0.00390625, %v378_v57  ;;  %v714_v57 = vrot.slane %v705_v55, %v1455_v63 }
 0x171   : > { %v380_v60 = vadd.f32 1e-05, %v379_v58 }
 0x173   : > { %1209 = vrsqrt.f32 %v380_v60 }
 0x17d   : > { %v1210_v6 = vpop.eup %1209 }
 0x17e   : > { %v383_v7 = vmul.f32 %v1210_v6, %v1447_v26  ;;  %v382_v10 = vmul.f32 %v1210_v6, %v1444_v25  ;;  %v1196_v25 = vld [vmem:[#allocation4 + $0xb0] ss:$8 sps:$4 sm:$0xff]   ;;  %v1197_v26 = vld [vmem:[#allocation4 + $0xc4] ss:$8 sps:$4 sm:$0xff]  }
 0x17f   : > { %900 = vmatpush1.bf16.msra.mxu1 %v1196_v25 }
 0x180   : > { %v396_v11 = vmul.f32 %v392_v5, %v383_v7  ;;  %v395_v12 = vmul.f32 %v388_v4, %v382_v10  ;;  %901 = vmatprep.subr.bf16.mxu1 %v1197_v26 }
 0x182   : > { %v409_v13 = vadd.f32 %v405_v9, %v396_v11  ;;  %v408_v14 = vadd.f32 %v401_v8, %v395_v12 }
 0x183   : > { %902 = vmatpush1.bf16.msra.mxu1 %v1199_v27 }
 0x184   : > { %v443_v15 = vpack.c.bf16 %v409_v13, %v409_v13  ;;  %v442_v16 = vpack.c.bf16 %v408_v14, %v408_v14  ;;  %903 = vmatprep.subr.bf16.mxu1 %v1200_v28 }
 0x186   : > { %648 = vmatprep.mubr.bf16.mxu0 %v443_v15 }
 0x187   : > { %649 = vmatmul.mubr.bf16.vlgmr.msra.gmra.mrb[0].mxu0 %v442_v16  ;;  %904 = vmatpush1.bf16.msra.mxu1 %v1202_v29 }
 0x188   : > { %905 = vmatprep.subr.bf16.mxu1 %v1203_v30 }
 0x18b   : > { %906 = vmatpush1.bf16.msra.mxu1 %v1205_v31 }
 0x18c   : > { %907 = vmatprep.subr.bf16.mxu1 %v1206_v32 }
 0x18f   : > { %908 = vmatpush1.bf16.msra.mxu1 %v1208_v33 }
 0x25a   : > { %v650_v37 = vpop.f32.mrb[0].mxu0 }
 0x25b   : > { %v651_v38 = vadd.f32 %v650_v37, %v449_v35  ;;  %v652_v39 = vpop.f32.mrb[1].mxu0 }
 0x25c   : > { %v653_v40 = vadd.f32 %v652_v39, %v453_v36  ;;  %v654_v41 = vpop.f32.mrb[2].mxu0 }
 0x25d   : > { %v1044_v42 = vmul.f32 -1.442695, %v651_v38  ;;  %v655_v43 = vpop.f32.mrb[3].mxu0 }
 0x25e   : > { %v1045_v44 = vmul.f32 -1.442695, %v653_v40 }
 0x25f   : > { %1211 = vpow2.f32 %v1044_v42 }
 0x260   : > { %1213 = vpow2.f32 %v1045_v44 }
 0x269   : > { %v1212_v45 = vpop.eup %1211 }
 0x26a   : > { %v1214_v46 = vpop.eup %1213  ;;  %v663_v47 = vadd.f32 1.0, %v1212_v45 }
 0x26b   : > { %v664_v48 = vadd.f32 1.0, %v1214_v46 }
 0x26c   : > { %1215 = vrcp.f32 %v663_v47 }
 0x26d   : > { %1217 = vrcp.f32 %v664_v48 }
 0x276   : > { %v1216_v49 = vpop.eup %1215 }
 0x277   : > { %v1218_v50 = vpop.eup %1217  ;;  %v669_v51 = vmul.f32 %v1216_v49, %v651_v38 }
 0x278   : > { %v670_v52 = vmul.f32 %v1218_v50, %v653_v40 }
 0x279   : > { %v703_v54 = vpack.c.bf16 %v669_v51, %v669_v51 }
 0x27a   : > { %v704_v53 = vpack.c.bf16 %v670_v52, %v670_v52 }
 0x27c   : > { %909 = vmatprep.mubr.bf16.mxu1 %v704_v53 }
 0x27d   : > { %910 = vmatmul.mubr.bf16.vlgmr.msra.gmra.mrb[0].mxu1 %v703_v54 }
 0x350   : > { %v911_v58 = vpop.f32.mrb[0].mxu1 }
 0x351   : > { %v912_v59 = vadd.f32 %v911_v58, %v710_v56  ;;  %v913_v60 = vpop.f32.mrb[1].mxu1 }
 0x352   : > { %v914_v61 = vadd.f32 %v913_v60, %v714_v57  ;;  %v915_v2 = vpop.f32.mrb[2].mxu1 }
 0x353   : > { %v918_v3 = vadd.f32 %v912_v59, %v1437_v0  ;;  %v916_v4 = vpop.f32.mrb[3].mxu1 }
 0x354   : > { %v919_v5 = vadd.f32 %v914_v61, %v1439_v1 }
 0x355   : > { %920 = vst [vmem:[%s362_s7] sm:$0xff] %v918_v3 }
 0x356   : > { %921 = vst [vmem:[%s362_s7 + $0x8] sm:$0xff] %v919_v5 }
 0x357 PF: > { %s21_s30 = sadd.s32 1, %s1289_s30  }
 0x358   : > { %p18_p5 = scmp.ge.s32.totalorder %s21_s30, 4  }
 0x35a   :  { %20 = sbr.rel (!%p18_p5) target bundleno = 2 (0x2), region = 95 }
 0x361   :  { %943 = vsyncpa [#allocation3], 1 }
 0x362   :  { %945 = vsyncpa [#allocation3 + $0x1], 1 }
 0x363   :  { %946 = vsyncpa [#allocation5], 1 }

// kernel: encoder_forward.9
= control target key start
LH: loop header
LB: loop body
LE: loop exit
PB: predicated region body
PF: predicated region fallthrough
CT: control target
= control target key end

     0   :  { %s1366_s18 = smov 0   ;;  %s1725_s0 = inlined_call_operand.vmem [shape: f32[16,256], index: 0, kind: input, shape index: {}]   ;;  %s1726_s1 = inlined_call_operand.vmem [shape: f32[1,256], index: 1, kind: input, shape index: {}]   ;;  %s1727_s2 = inlined_call_operand.vmem [shape: f32[1,256], index: 2, kind: input, shape index: {}]   ;;  %s1728_s3 = inlined_call_operand.vmem [shape: bf16[256,768], index: 3, kind: input, shape index: {}]   ;;  %s1729_s4 = inlined_call_operand.vmem [shape: f32[1,768], index: 4, kind: input, shape index: {}]   ;;  %s1730_s5 = inlined_call_operand.vmem [shape: f32[16,768], index: 5, kind: output, shape index: {}]  }
   0x1 LB: > { %s1066_s19 = sadd.s32 4294967295, %s1334_s18   ;;  %p1070_p0 = scmp.ge.s32.totalorder %s1334_s18, 1  ;;  %s1334_s18 = sphi %s1366_s18, %s15_s18  }
   0x2   : > { %p187_p1 = scmp.lt.s32.totalorder %s1334_s18, 3 }
   0x4   : > { %p188_p2 = pnand %p1070_p0, %p187_p1 }
   0x5   : > { %p215_p3 = scmp.lt.s32.totalorder (!%p188_p2), %s1066_s19, 1  ;;  %v1182_v3 = vld [vmem:[%s1728_s3 + $0x4] ss:$24 sps:$4 sm:$0xff] (!%p188_p2)   ;;  %v1184_v4 = vld [vmem:[%s1728_s3] ss:$24 sps:$4 sm:$0xff] (!%p188_p2)  }
   0x6   : > { %191 = sbr.rel (%p188_p2) target bundleno = 615 (0x267), region = 40  ;;  %v1185_v5 = vld [vmem:[%s1728_s3 + $0xc] ss:$24 sps:$4 sm:$0xff] (!%p188_p2)   ;;  %v1187_v6 = vld [vmem:[%s1728_s3 + $0x8] ss:$24 sps:$4 sm:$0xff] (!%p188_p2)   ;;  %882 = vmatprep.subr.bf16.mxu0 (!%p188_p2), %v1182_v3 }
   0x7   : > { %v1188_v7 = vld [vmem:[%s1728_s3 + $0x34] ss:$24 sps:$4 sm:$0xff] (!%p188_p2)   ;;  %923 = vmatprep.subr.bf16.mxu1 (!%p188_p2), %v1185_v5  ;;  %883 = vmatpush1.bf16.msra.mxu0 (!%p188_p2), %v1184_v4  ;;  %v1190_v9 = vld [vmem:[%s1728_s3 + $0x30] ss:$24 sps:$4 sm:$0xff] (!%p188_p2)   ;;  %v1194_v11 = vld [vmem:[%s1728_s3 + $0x64] ss:$24 sps:$4 sm:$0xff] (!%p188_p2)  }
   0x8   : > { %v1191_v8 = vld [vmem:[%s1728_s3 + $0x3c] ss:$24 sps:$4 sm:$0xff] (!%p188_p2)   ;;  %924 = vmatpush1.bf16.msra.mxu1 (!%p188_p2), %v1187_v6  ;;  %v1193_v10 = vld [vmem:[%s1728_s3 + $0x38] ss:$24 sps:$4 sm:$0xff] (!%p188_p2)   ;;  %884 = vmatprep.subr.bf16.mxu0 (!%p188_p2), %v1188_v7  ;;  %v1197_v12 = vld [vmem:[%s1728_s3 + $0x6c] ss:$24 sps:$4 sm:$0xff] (!%p188_p2)  }
   0x9   : > { %925 = vmatprep.subr.bf16.mxu1 (!%p188_p2), %v1191_v8  ;;  %v1196_v13 = vld [vmem:[%s1728_s3 + $0x60] ss:$24 sps:$4 sm:$0xff] (!%p188_p2)   ;;  %v1200_v15 = vld [vmem:[%s1728_s3 + $0x94] ss:$24 sps:$4 sm:$0xff] (!%p188_p2)   ;;  %v1202_v17 = vld [vmem:[%s1728_s3 + $0x90] ss:$24 sps:$4 sm:$0xff] (!%p188_p2)  }
   0xa   : > { %v1199_v14 = vld [vmem:[%s1728_s3 + $0x68] ss:$24 sps:$4 sm:$0xff] (!%p188_p2)   ;;  %v1203_v16 = vld [vmem:[%s1728_s3 + $0x9c] ss:$24 sps:$4 sm:$0xff] (!%p188_p2)   ;;  %v1205_v18 = vld [vmem:[%s1728_s3 + $0x98] ss:$24 sps:$4 sm:$0xff] (!%p188_p2)  }
   0xb   : > { %885 = vmatpush1.bf16.msra.mxu0 (!%p188_p2), %v1190_v9  ;;  %v1206_v19 = vld [vmem:[%s1728_s3 + $0xc4] ss:$24 sps:$4 sm:$0xff] (!%p188_p2)   ;;  %v1208_v21 = vld [vmem:[%s1728_s3 + $0xc0] ss:$24 sps:$4 sm:$0xff] (!%p188_p2)   ;;  %v1212_v23 = vld [vmem:[%s1728_s3 + $0xf4] ss:$24 sps:$4 sm:$0xff] (!%p188_p2)  }
   0xc   : > { %926 = vmatpush1.bf16.msra.mxu1 (!%p188_p2), %v1193_v10  ;;  %886 = vmatprep.subr.bf16.mxu0 (!%p188_p2), %v1194_v11  ;;  %v1209_v20 = vld [vmem:[%s1728_s3 + $0xcc] ss:$24 sps:$4 sm:$0xff] (!%p188_p2)   ;;  %v1211_v22 = vld [vmem:[%s1728_s3 + $0xc8] ss:$24 sps:$4 sm:$0xff] (!%p188_p2)   ;;  %v1215_v24 = vld [vmem:[%s1728_s3 + $0xfc] ss:$24 sps:$4 sm:$0xff] (!%p188_p2)  }
   0xd   : > { %s1732_s19 = smov (!%p215_p3, %s1066_s19), 1  ;;  %927 = vmatprep.subr.bf16.mxu1 %v1197_v12  ;;  %v1214_v25 = vld [vmem:[%s1728_s3 + $0xf0] ss:$24 sps:$4 sm:$0xff]   ;;  %v1218_v27 = vld [vmem:[%s1728_s3 + $0x124] ss:$24 sps:$4 sm:$0xff]  }
   0xe   : > { %s1172_s20 = sshll.u32 %s1732_s19, 4  ;;  %v1217_v26 = vld [vmem:[%s1728_s3 + $0xf8] ss:$24 sps:$4 sm:$0xff]   ;;  %v1221_v28 = vld [vmem:[%s1728_s3 + $0x12c] ss:$24 sps:$4 sm:$0xff]   ;;  %s1173_s13 = smul.u32 48, %s1732_s19 }
   0xf   : > { %s219_s23 = scalar_lea.vmem %s1725_s0, %s1172_s20  ;;  %887 = vmatpush1.bf16.msra.mxu0 %v1196_v13  ;;  %v1220_v29 = vld [vmem:[%s1728_s3 + $0x120] ss:$24 sps:$4 sm:$0xff]   ;;  %v1224_v31 = vld [vmem:[%s1728_s3 + $0x154] ss:$24 sps:$4 sm:$0xff]   ;;  %v1226_v33 = vld [vmem:[%s1728_s3 + $0x150] ss:$24 sps:$4 sm:$0xff]   ;;  %v247_v13 = vlaneseq }
  0x10   : > { %v1380_v0 = vld [vmem:[%s219_s23] sm:$0xff]  ;;  %v1382_v1 = vld [vmem:[%s219_s23 + $0x8] sm:$0xff]  ;;  %928 = vmatpush1.bf16.msra.mxu1 %v1199_v14  ;;  %888 = vmatprep.subr.bf16.mxu0 %v1200_v15  ;;  %v1227_v32 = vld [vmem:[%s1728_s3 + $0x15c] ss:$24 sps:$4 sm:$0xff]   ;;  %s224_s16 = scalar_lea.vmem %s1730_s5, %s1173_s13 }
  0x11   : > { %v229_v2 = vadd.f32 %v1382_v1, %v1380_v0  ;;  %929 = vmatprep.subr.bf16.mxu1 %v1203_v16  ;;  %v1223_v30 = vld [vmem:[%s1728_s3 + $0x128] ss:$24 sps:$4 sm:$0xff]   ;;  %v1229_v34 = vld [vmem:[%s1728_s3 + $0x158] ss:$24 sps:$4 sm:$0xff]   ;;  %v1230_v35 = vld [vmem:[%s1728_s3 + $0x184] ss:$24 sps:$4 sm:$0xff]  }
  0x12   : > { %v1233_v36 = vld [vmem:[%s1728_s3 + $0x18c] ss:$24 sps:$4 sm:$0xff]   ;;  %v1232_v37 = vld [vmem:[%s1728_s3 + $0x180] ss:$24 sps:$4 sm:$0xff]   ;;  %v1239_v40 = vld [vmem:[%s1728_s3 + $0x1bc] ss:$24 sps:$4 sm:$0xff]  }
  0x13   : > { %230 = vadd.xlane.f32.xlu0 %v229_v2  ;;  %889 = vmatpush1.bf16.msra.mxu0 %v1202_v17  ;;  %v1235_v38 = vld [vmem:[%s1728_s3 + $0x188] ss:$24 sps:$4 sm:$0xff]   ;;  %v1236_v39 = vld [vmem:[%s1728_s3 + $0x1b4] ss:$24 sps:$4 sm:$0xff]   ;;  %v1241_v42 = vld [vmem:[%s1728_s3 + $0x1b8] ss:$24 sps:$4 sm:$0xff]  }
  0x14   : > { %930 = vmatpush1.bf16.msra.mxu1 %v1205_v18  ;;  %890 = vmatprep.subr.bf16.mxu0 %v1206_v19  ;;  %v1238_v41 = vld [vmem:[%s1728_s3 + $0x1b0] ss:$24 sps:$4 sm:$0xff]   ;;  %v1242_v43 = vld [vmem:[%s1728_s3 + $0x1e4] ss:$24 sps:$4 sm:$0xff]   ;;  %v1244_v51 = vld [vmem:[%s1728_s3 + $0x1e0] ss:$24 sps:$4 sm:$0xff]  }
  0x15   : > { %931 = vmatprep.subr.bf16.mxu1 %v1209_v20  ;;  %v1245_v52 = vld [vmem:[%s1728_s3 + $0x1ec] ss:$24 sps:$4 sm:$0xff]   ;;  %v1247_v53 = vld [vmem:[%s1728_s3 + $0x1e8] ss:$24 sps:$4 sm:$0xff]   ;;  %v1251_v56 = vld [vmem:[%s1728_s3 + $0x21c] ss:$24 sps:$4 sm:$0xff]  }
  0x16   : > { %v1248_v54 = vld [vmem:[%s1728_s3 + $0x214] ss:$24 sps:$4 sm:$0xff]   ;;  %v1250_v55 = vld [vmem:[%s1728_s3 + $0x210] ss:$24 sps:$4 sm:$0xff]   ;;  %v1254_v58 = vld [vmem:[%s1728_s3 + $0x244] ss:$24 sps:$4 sm:$0xff]  }
  0x17   : > { %891 = vmatpush1.bf16.msra.mxu0 %v1208_v21  ;;  %v1253_v57 = vld [vmem:[%s1728_s3 + $0x218] ss:$24 sps:$4 sm:$0xff]   ;;  %v1257_v60 = vld [vmem:[%s1728_s3 + $0x24c] ss:$24 sps:$4 sm:$0xff]   ;;  %v1259_v61 = vld [vmem:[%s1728_s3 + $0x248] ss:$24 sps:$4 sm:$0xff]  }
  0x18   : > { %932 = vmatpush1.bf16.msra.mxu1 %v1211_v22  ;;  %892 = vmatprep.subr.bf16.mxu0 %v1212_v23  ;;  %v1256_v59 = vld [vmem:[%s1728_s3 + $0x240] ss:$24 sps:$4 sm:$0xff]   ;;  %v1260_v62 = vld [vmem:[%s1728_s3 + $0x274] ss:$24 sps:$4 sm:$0xff]   ;;  %v1266_v2 = vld [vmem:[%s1728_s3 + $0x2a4] ss:$24 sps:$4 sm:$0xff]  }
  0x19   : > { %933 = vmatprep.subr.bf16.mxu1 %v1215_v24  ;;  %v1263_v63 = vld [vmem:[%s1728_s3 + $0x27c] ss:$24 sps:$4 sm:$0xff]   ;;  %v1269_v3 = vld [vmem:[%s1728_s3 + $0x2ac] ss:$24 sps:$4 sm:$0xff]   ;;  %v1268_v4 = vld [vmem:[%s1728_s3 + $0x2a0] ss:$24 sps:$4 sm:$0xff]  }
  0x1a   : > { %v1271_v5 = vld [vmem:[%s1728_s3 + $0x2a8] ss:$24 sps:$4 sm:$0xff]   ;;  %v1272_v6 = vld [vmem:[%s1728_s3 + $0x2d4] ss:$24 sps:$4 sm:$0xff]   ;;  %v1277_v9 = vld [vmem:[%s1728_s3 + $0x2d8] ss:$24 sps:$4 sm:$0xff]  }
  0x1b   : > { %893 = vmatpush1.bf16.msra.mxu0 %v1214_v25  ;;  %v1275_v7 = vld [vmem:[%s1728_s3 + $0x2dc] ss:$24 sps:$4 sm:$0xff]   ;;  %v1274_v8 = vld [vmem:[%s1728_s3 + $0x2d0] ss:$24 sps:$4 sm:$0xff]   ;;  %v1591_v15 = vshrl.u32 %v247_v13, 7 }
  0x1c   : > { %934 = vmatpush1.bf16.msra.mxu1 %v1217_v26  ;;  %894 = vmatprep.subr.bf16.mxu0 %v1218_v27  ;;  %v1280_v10 = vld [vmem:[%s1728_s3 + $0x14] ss:$24 sps:$4 sm:$0xff]   ;;  %v227_v18 = vld [vmem:[%s1726_s1] sm:$0x3] }
  0x1d   : > { %935 = vmatprep.subr.bf16.mxu1 %v1221_v28  ;;  %v1594_v16 = vsub.s32 1, %v1591_v15  ;;  %v1597_v17 = vsub.s32 0, %v1591_v15  ;;  %v228_v19 = vld [vmem:[%s1727_s2] sm:$0x3] }
  0x1f   : > { %895 = vmatpush1.bf16.msra.mxu0 %v1220_v29  ;;  %v254_v20 = vrot.slane %v227_v18, %v1594_v16  ;;  %v250_v21 = vrot.slane %v227_v18, %v1597_v17  ;;  %v267_v24 = vrot.slane %v228_v19, %v1594_v16  ;;  %v263_v26 = vrot.slane %v228_v19, %v1597_v17 }
  0x20   : > { %936 = vmatpush1.bf16.msra.mxu1 %v1223_v30  ;;  %896 = vmatprep.subr.bf16.mxu0 %v1224_v31 }
  0x21   : > { %937 = vmatprep.subr.bf16.mxu1 %v1227_v32  ;;  %v1278_v32 = vld [vmem:[%s1728_s3 + $0x10] ss:$24 sps:$4 sm:$0xff]  }
  0x23   : > { %897 = vmatpush1.bf16.msra.mxu0 %v1226_v33 }
  0x24   : > { %938 = vmatpush1.bf16.msra.mxu1 %v1229_v34  ;;  %898 = vmatprep.subr.bf16.mxu0 %v1230_v35  ;;  %v1283_v34 = vld [vmem:[%s1728_s3 + $0x44] ss:$24 sps:$4 sm:$0xff]   ;;  %v1281_v35 = vld [vmem:[%s1728_s3 + $0x40] ss:$24 sps:$4 sm:$0xff]  }
  0x25   : > { %939 = vmatprep.subr.bf16.mxu1 %v1233_v36  ;;  %v1286_v36 = vld [vmem:[%s1728_s3 + $0x74] ss:$24 sps:$4 sm:$0xff]  }
  0x27   : > { %899 = vmatpush1.bf16.msra.mxu0 %v1232_v37  ;;  %v1284_v37 = vld [vmem:[%s1728_s3 + $0x70] ss:$24 sps:$4 sm:$0xff]  }
  0x28   : > { %940 = vmatpush1.bf16.msra.mxu1 %v1235_v38  ;;  %900 = vmatprep.subr.bf16.mxu0 %v1236_v39  ;;  %v1289_v38 = vld [vmem:[%s1728_s3 + $0xa4] ss:$24 sps:$4 sm:$0xff]   ;;  %v1287_v39 = vld [vmem:[%s1728_s3 + $0xa0] ss:$24 sps:$4 sm:$0xff]  }
  0x29   : > { %941 = vmatprep.subr.bf16.mxu1 %v1239_v40  ;;  %v1292_v40 = vld [vmem:[%s1728_s3 + $0xd4] ss:$24 sps:$4 sm:$0xff]  }
  0x2b   : > { %901 = vmatpush1.bf16.msra.mxu0 %v1238_v41  ;;  %v1290_v41 = vld [vmem:[%s1728_s3 + $0xd0] ss:$24 sps:$4 sm:$0xff]  }
  0x2c   : > { %942 = vmatpush1.bf16.msra.mxu1 %v1241_v42  ;;  %902 = vmatprep.subr.bf16.mxu0 %v1242_v43  ;;  %v1295_v42 = vld [vmem:[%s1728_s3 + $0x104] ss:$24 sps:$4 sm:$0xff]   ;;  %v1293_v43 = vld [vmem:[%s1728_s3 + $0x100] ss:$24 sps:$4 sm:$0xff]  }
  0x2d   : > { %943 = vmatprep.subr.bf16.mxu1 %v1245_v52  ;;  %v1310_v52 = vld [vmem:[%s1728_s3 + $0x1f4] ss:$24 sps:$4 sm:$0xff]  }
  0x2f   : > { %903 = vmatpush1.bf16.msra.mxu0 %v1244_v51  ;;  %v1305_v51 = vld [vmem:[%s1728_s3 + $0x1c0] ss:$24 sps:$4 sm:$0xff]  }
  0x30   : > { %944 = vmatpush1.bf16.msra.mxu1 %v1247_v53  ;;  %904 = vmatprep.subr.bf16.mxu0 %v1248_v54  ;;  %v1308_v53 = vld [vmem:[%s1728_s3 + $0x1f0] ss:$24 sps:$4 sm:$0xff]   ;;  %v1313_v54 = vld [vmem:[%s1728_s3 + $0x224] ss:$24 sps:$4 sm:$0xff]  }
  0x31   : > { %945 = vmatprep.subr.bf16.mxu1 %v1251_v56  ;;  %v1316_v56 = vld [vmem:[%s1728_s3 + $0x254] ss:$24 sps:$4 sm:$0xff]  }
  0x33   : > { %905 = vmatpush1.bf16.msra.mxu0 %v1250_v55  ;;  %v1311_v55 = vld [vmem:[%s1728_s3 + $0x220] ss:$24 sps:$4 sm:$0xff]  }
  0x34   : > { %946 = vmatpush1.bf16.msra.mxu1 %v1253_v57  ;;  %906 = vmatprep.subr.bf16.mxu0 %v1254_v58  ;;  %v1314_v57 = vld [vmem:[%s1728_s3 + $0x250] ss:$24 sps:$4 sm:$0xff]   ;;  %v1319_v58 = vld [vmem:[%s1728_s3 + $0x284] ss:$24 sps:$4 sm:$0xff]  }
  0x35   : > { %947 = vmatprep.subr.bf16.mxu1 %v1257_v60  ;;  %v1322_v60 = vld [vmem:[%s1728_s3 + $0x2b4] ss:$24 sps:$4 sm:$0xff]  }
  0x37   : > { %907 = vmatpush1.bf16.msra.mxu0 %v1256_v59  ;;  %v1317_v59 = vld [vmem:[%s1728_s3 + $0x280] ss:$24 sps:$4 sm:$0xff]  }
  0x38   : > { %948 = vmatpush1.bf16.msra.mxu1 %v1259_v61  ;;  %908 = vmatprep.subr.bf16.mxu0 %v1260_v62  ;;  %v1320_v61 = vld [vmem:[%s1728_s3 + $0x2b0] ss:$24 sps:$4 sm:$0xff]   ;;  %v1325_v62 = vld [vmem:[%s1728_s3 + $0x2e4] ss:$24 sps:$4 sm:$0xff]  }
  0x39   : > { %949 = vmatprep.subr.bf16.mxu1 %v1263_v63  ;;  %v1323_v63 = vld [vmem:[%s1728_s3 + $0x2e0] ss:$24 sps:$4 sm:$0xff]  }
  0xa0   : > { %v231_v44 = vpop.xlane.xlu0 %230 }
  0xa1   : > { %v233_v45 = vmul.f32 0.00390625, %v231_v44  ;;  %v1298_v44 = vld [vmem:[%s1728_s3 + $0x134] ss:$24 sps:$4 sm:$0xff]  }
  0xa3   : > { %v1510_v46 = vsub.f32 %v1380_v0, %v233_v45  ;;  %v1513_v47 = vsub.f32 %v1382_v1, %v233_v45  ;;  %v1262_v0 = vld [vmem:[%s1728_s3 + $0x270] ss:$24 sps:$4 sm:$0xff]  }
  0xa4   : > { %v1265_v1 = vld [vmem:[%s1728_s3 + $0x278] ss:$24 sps:$4 sm:$0xff]   ;;  %909 = vmatpush1.bf16.msra.mxu0 %v1262_v0  ;;  %v382_v0 = vsub.s32 2, %v1591_v15 }
  0xa5   : > { %v236_v48 = vmul.f32 %v1510_v46, %v1510_v46  ;;  %v237_v49 = vmul.f32 %v1513_v47, %v1513_v47  ;;  %950 = vmatpush1.bf16.msra.mxu1 %v1265_v1  ;;  %910 = vmatprep.subr.bf16.mxu0 %v1266_v2  ;;  %v1296_v45 = vld [vmem:[%s1728_s3 + $0x130] ss:$24 sps:$4 sm:$0xff]   ;;  %v370_v1 = vld [vmem:[%s1729_s4] sm:$0x3f]  ;;  %v386_v2 = vsub.s32 3, %v1591_v15 }
  0xa6   : > { %951 = vmatprep.subr.bf16.mxu1 %v1269_v3  ;;  %v375_v3 = vrot.slane %v370_v1, %v1597_v17 }
  0xa7   : > { %v238_v50 = vadd.f32 %v237_v49, %v236_v48  ;;  %v1304_v48 = vld [vmem:[%s1728_s3 + $0x194] ss:$24 sps:$4 sm:$0xff]   ;;  %v1302_v49 = vld [vmem:[%s1728_s3 + $0x190] ss:$24 sps:$4 sm:$0xff]  }
  0xa8   : > { %911 = vmatpush1.bf16.msra.mxu0 %v1268_v4  ;;  %v383_v4 = vrot.slane %v370_v1, %v382_v0 }
  0xa9   : > { %239 = vadd.xlane.f32.xlu0 %v238_v50  ;;  %952 = vmatpush1.bf16.msra.mxu1 %v1271_v5  ;;  %v1307_v50 = vld [vmem:[%s1728_s3 + $0x1c4] ss:$24 sps:$4 sm:$0xff]   ;;  %v379_v5 = vrot.slane %v370_v1, %v1594_v16  ;;  %v390_v16 = vsub.s32 4, %v1591_v15 }
  0xaa   : > { %912 = vmatprep.subr.bf16.mxu0 %v1272_v6  ;;  %953 = vmatprep.subr.bf16.mxu1 %v1275_v7  ;;  %v387_v6 = vrot.slane %v370_v1, %v386_v2 }
  0xac   : > { %913 = vmatpush1.bf16.msra.mxu0 %v1274_v8 }
  0xad   : > { %954 = vmatpush1.bf16.msra.mxu1 %v1277_v9  ;;  %964 = vmatprep.subr.bf16.mxu0 %v1280_v10 }
 0x136   : > { %v240_v11 = vpop.xlane.xlu0 %239 }
 0x137   : > { %v241_v12 = vmul.f32 0.00390625, %v240_v11 }
 0x139   : > { %v242_v14 = vadd.f32 1e-05, %v241_v12 }
 0x13b   : > { %1326 = vrsqrt.f32 %v242_v14 }
 0x145   : > { %v1327_v22 = vpop.eup %1326 }
 0x146   : > { %v245_v23 = vmul.f32 %v1327_v22, %v1513_v47  ;;  %v244_v25 = vmul.f32 %v1327_v22, %v1510_v46  ;;  %v1301_v46 = vld [vmem:[%s1728_s3 + $0x164] ss:$24 sps:$4 sm:$0xff]   ;;  %v1299_v47 = vld [vmem:[%s1728_s3 + $0x160] ss:$24 sps:$4 sm:$0xff]   ;;  %v391_v22 = vrot.slane %v370_v1, %v390_v16 }
 0x148   : > { %v258_v27 = vmul.f32 %v254_v20, %v245_v23  ;;  %v257_v28 = vmul.f32 %v250_v21, %v244_v25  ;;  %v394_v21 = vsub.s32 5, %v1591_v15 }
 0x14a   : > { %v271_v29 = vadd.f32 %v267_v24, %v258_v27  ;;  %v270_v30 = vadd.f32 %v263_v26, %v257_v28  ;;  %v395_v23 = vrot.slane %v370_v1, %v394_v21 }
 0x14c   : > { %v369_v31 = vpack.c.bf16 %v271_v29, %v271_v29  ;;  %v1614_v33 = vpack.c.bf16 %v270_v30, %v270_v30 }
 0x14e   : > { %914 = vmatprep.mubr.bf16.mxu0 %v369_v31  ;;  %955 = vmatprep.mubr.bf16.mxu1 %v369_v31 }
 0x14f   : > { %915 = vmatmul.mubr.bf16.vlgmr.msra.gmra.mrb[0].mxu0 %v1614_v33  ;;  %956 = vmatmul.mubr.bf16.vlgmr.msra.gmra.mrb[0].mxu1 %v1614_v33 }
 0x150   : > { %965 = vmatpush1.bf16.msra.mxu0 %v1278_v32  ;;  %996 = vmatprep.mubr.bf16.mxu0 %v369_v31 }
 0x151   : > { %966 = vmatprep.subr.bf16.mxu0 %v1283_v34 }
 0x154   : > { %967 = vmatpush1.bf16.msra.mxu0 %v1281_v35 }
 0x155   : > { %968 = vmatprep.subr.bf16.mxu0 %v1286_v36 }
 0x158   : > { %969 = vmatpush1.bf16.msra.mxu0 %v1284_v37 }
 0x159   : > { %970 = vmatprep.subr.bf16.mxu0 %v1289_v38 }
 0x15c   : > { %971 = vmatpush1.bf16.msra.mxu0 %v1287_v39 }
 0x15d   : > { %972 = vmatprep.subr.bf16.mxu0 %v1292_v40 }
 0x160   : > { %973 = vmatpush1.bf16.msra.mxu0 %v1290_v41 }
 0x161   : > { %974 = vmatprep.subr.bf16.mxu0 %v1295_v42 }
 0x164   : > { %975 = vmatpush1.bf16.msra.mxu0 %v1293_v43 }
 0x165   : > { %976 = vmatprep.subr.bf16.mxu0 %v1298_v44 }
 0x168   : > { %977 = vmatpush1.bf16.msra.mxu0 %v1296_v45 }
 0x169   : > { %978 = vmatprep.subr.bf16.mxu0 %v1301_v46 }
 0x16c   : > { %979 = vmatpush1.bf16.msra.mxu0 %v1299_v47 }
 0x16d   : > { %980 = vmatprep.subr.bf16.mxu0 %v1304_v48 }
 0x170   : > { %981 = vmatpush1.bf16.msra.mxu0 %v1302_v49 }
 0x171   : > { %982 = vmatprep.subr.bf16.mxu0 %v1307_v50 }
 0x174   : > { %983 = vmatpush1.bf16.msra.mxu0 %v1305_v51 }
 0x175   : > { %984 = vmatprep.subr.bf16.mxu0 %v1310_v52 }
 0x178   : > { %985 = vmatpush1.bf16.msra.mxu0 %v1308_v53 }
 0x179   : > { %986 = vmatprep.subr.bf16.mxu0 %v1313_v54 }
 0x17c   : > { %987 = vmatpush1.bf16.msra.mxu0 %v1311_v55 }
 0x17d   : > { %988 = vmatprep.subr.bf16.mxu0 %v1316_v56 }
 0x180   : > { %989 = vmatpush1.bf16.msra.mxu0 %v1314_v57 }
 0x181   : > { %990 = vmatprep.subr.bf16.mxu0 %v1319_v58 }
 0x184   : > { %991 = vmatpush1.bf16.msra.mxu0 %v1317_v59 }
 0x185   : > { %992 = vmatprep.subr.bf16.mxu0 %v1322_v60 }
 0x188   : > { %993 = vmatpush1.bf16.msra.mxu0 %v1320_v61 }
 0x189   : > { %994 = vmatprep.subr.bf16.mxu0 %v1325_v62 }
 0x18c   : > { %995 = vmatpush1.bf16.msra.mxu0 %v1323_v63 }
 0x18f   : > { %997 = vmatmul.mubr.bf16.vlgmr.msra.gmra.mrb[4].mxu0 %v1614_v33 }
 0x222   : > { %v916_v7 = vpop.f32.mrb[0].mxu0  ;;  %v957_v8 = vpop.f32.mrb[0].mxu1 }
 0x223   : > { %v917_v9 = vadd.f32 %v916_v7, %v375_v3  ;;  %v958_v10 = vadd.f32 %v957_v8, %v383_v4  ;;  %v918_v11 = vpop.f32.mrb[1].mxu0  ;;  %v959_v12 = vpop.f32.mrb[1].mxu1 }
 0x224   : > { %v919_v13 = vadd.f32 %v918_v11, %v379_v5  ;;  %v960_v14 = vadd.f32 %v959_v12, %v387_v6  ;;  %v920_v18 = vpop.f32.mrb[2].mxu0  ;;  %v961_v19 = vpop.f32.mrb[2].mxu1 }
 0x225   : > { %1005 = vst [vmem:[%s224_s16] sm:$0xff] %v917_v9  ;;  %1007 = vst [vmem:[%s224_s16 + $0x10] sm:$0xff] %v958_v10  ;;  %v921_v17 = vpop.f32.mrb[3].mxu0  ;;  %v962_v20 = vpop.f32.mrb[3].mxu1 }
 0x226   : > { %1006 = vst [vmem:[%s224_s16 + $0x8] sm:$0xff] %v919_v13  ;;  %1008 = vst [vmem:[%s224_s16 + $0x18] sm:$0xff] %v960_v14 }
 0x262   : > { %v998_v24 = vpop.f32.mrb[4].mxu0 }
 0x263   : > { %v999_v25 = vadd.f32 %v998_v24, %v391_v22  ;;  %v1000_v26 = vpop.f32.mrb[5].mxu0 }
 0x264   : > { %v1001_v27 = vadd.f32 %v1000_v26, %v395_v23  ;;  %v1002_v28 = vpop.f32.mrb[6].mxu0 }
 0x265   : > { %1009 = vst [vmem:[%s224_s16 + $0x20] sm:$0xff] %v999_v25  ;;  %v1003_v29 = vpop.f32.mrb[7].mxu0 }
 0x266   : > { %1010 = vst [vmem:[%s224_s16 + $0x28] sm:$0xff] %v1001_v27 }
 0x267 PF: > { %s15_s18 = sadd.s32 1, %s1334_s18  }
 0x268   : > { %p12_p4 = scmp.ge.s32.totalorder %s15_s18, 4  }
 0x26a   :  { %14 = sbr.rel (!%p12_p4) target bundleno = 1 (0x1), region = 70 }

// kernel: encoder_forward.12
= control target key start
LH: loop header
LB: loop body
LE: loop exit
PB: predicated region body
PF: predicated region fallthrough
CT: control target
= control target key end

     0   :  { %s1244_s30 = smov 0   ;;  %s1514_s0 = inlined_call_operand.vmem [shape: f32[16,256], index: 0, kind: input, shape index: {}]   ;;  %s1515_s1 = inlined_call_operand.vmem [shape: f32[1,256], index: 1, kind: input, shape index: {}]   ;;  %s1516_s2 = inlined_call_operand.vmem [shape: f32[1,256], index: 2, kind: input, shape index: {}]   ;;  %s1517_s3 = inlined_call_operand.vmem [shape: bf16[256,256], index: 3, kind: input, shape index: {}]   ;;  %s1518_s4 = inlined_call_operand.vmem [shape: f32[1,256], index: 4, kind: input, shape index: {}]   ;;  %s1519_s5 = inlined_call_operand.vmem [shape: bf16[256,256], index: 5, kind: input, shape index: {}]   ;;  %s1520_s6 = inlined_call_operand.vmem [shape: f32[1,256], index: 6, kind: input, shape index: {}]   ;;  %s1521_s7 = inlined_call_operand.vmem [shape: f32[1,256], index: 7, kind: input, shape index: {}]   ;;  %s1522_s8 = inlined_call_operand.vmem [shape: f32[1,256], index: 8, kind: input, shape index: {}]   ;;  %s1523_s9 = inlined_call_operand.vmem [shape: f32[16,256], index: 9, kind: output, shape index: {}]  }
   0x1 LB: > { %s991_s10 = sadd.s32 4294967295, %s1192_s30   ;;  %p995_p0 = scmp.ge.s32.totalorder %s1192_s30, 1  ;;  %s1192_s30 = sphi %s1244_s30, %s19_s30  }
   0x2   : > { %p287_p1 = scmp.lt.s32.totalorder %s1192_s30, 3 }
   0x4   : > { %p288_p2 = pnand %p995_p0, %p287_p1 }
   0x5   : > { %p323_p3 = scmp.lt.s32.totalorder (!%p288_p2), %s991_s10, 1  ;;  %v1078_v3 = vld [vmem:[%s1517_s3 + $0x4] ss:$8 sps:$4 sm:$0xff] (!%p288_p2)   ;;  %v1080_v4 = vld [vmem:[%s1517_s3] ss:$8 sps:$4 sm:$0xff] (!%p288_p2)   ;;  %v355_v59 = vlaneseq (!%p288_p2) }
   0x6   : > { %291 = sbr.rel (%p288_p2) target bundleno = 1114 (0x45a), region = 56  ;;  %v1081_v5 = vld [vmem:[%s1517_s3 + $0x14] ss:$8 sps:$4 sm:$0xff] (!%p288_p2)   ;;  %586 = vmatprep.subr.bf16.mxu0 (!%p288_p2), %v1078_v3  ;;  %v1083_v6 = vld [vmem:[%s1517_s3 + $0x10] ss:$8 sps:$4 sm:$0xff] (!%p288_p2)  }
   0x7   : > { %587 = vmatpush1.bf16.msra.mxu0 (!%p288_p2), %v1080_v4  ;;  %v1084_v7 = vld [vmem:[%s1517_s3 + $0x24] ss:$8 sps:$4 sm:$0xff] (!%p288_p2)   ;;  %v1086_v8 = vld [vmem:[%s1517_s3 + $0x20] ss:$8 sps:$4 sm:$0xff] (!%p288_p2)   ;;  %v1087_v9 = vld [vmem:[%s1517_s3 + $0x34] ss:$8 sps:$4 sm:$0xff] (!%p288_p2)  }
   0x8   : > { %588 = vmatprep.subr.bf16.mxu0 (!%p288_p2), %v1081_v5  ;;  %v1089_v10 = vld [vmem:[%s1517_s3 + $0x30] ss:$8 sps:$4 sm:$0xff] (!%p288_p2)   ;;  %v1090_v11 = vld [vmem:[%s1517_s3 + $0x44] ss:$8 sps:$4 sm:$0xff] (!%p288_p2)   ;;  %v1092_v12 = vld [vmem:[%s1517_s3 + $0x40] ss:$8 sps:$4 sm:$0xff] (!%p288_p2)  }
   0x9   : > { %v1093_v13 = vld [vmem:[%s1517_s3 + $0x54] ss:$8 sps:$4 sm:$0xff] (!%p288_p2)   ;;  %v1095_v14 = vld [vmem:[%s1517_s3 + $0x50] ss:$8 sps:$4 sm:$0xff] (!%p288_p2)   ;;  %v1096_v15 = vld [vmem:[%s1517_s3 + $0x64] ss:$8 sps:$4 sm:$0xff] (!%p288_p2)  }
   0xa   : > { %v1098_v16 = vld [vmem:[%s1517_s3 + $0x60] ss:$8 sps:$4 sm:$0xff] (!%p288_p2)   ;;  %v1099_v17 = vld [vmem:[%s1517_s3 + $0x74] ss:$8 sps:$4 sm:$0xff] (!%p288_p2)   ;;  %v1101_v18 = vld [vmem:[%s1517_s3 + $0x70] ss:$8 sps:$4 sm:$0xff] (!%p288_p2)  }
   0xb   : > { %589 = vmatpush1.bf16.msra.mxu0 (!%p288_p2), %v1083_v6  ;;  %v1102_v19 = vld [vmem:[%s1517_s3 + $0x84] ss:$8 sps:$4 sm:$0xff] (!%p288_p2)   ;;  %v1104_v20 = vld [vmem:[%s1517_s3 + $0x80] ss:$8 sps:$4 sm:$0xff] (!%p288_p2)   ;;  %v1105_v21 = vld [vmem:[%s1517_s3 + $0x94] ss:$8 sps:$4 sm:$0xff] (!%p288_p2)  }
   0xc   : > { %590 = vmatprep.subr.bf16.mxu0 (!%p288_p2), %v1084_v7  ;;  %v1107_v22 = vld [vmem:[%s1517_s3 + $0x90] ss:$8 sps:$4 sm:$0xff] (!%p288_p2)   ;;  %v1108_v30 = vld [vmem:[%s1517_s3 + $0xa4] ss:$8 sps:$4 sm:$0xff] (!%p288_p2)   ;;  %v1110_v31 = vld [vmem:[%s1517_s3 + $0xa0] ss:$8 sps:$4 sm:$0xff] (!%p288_p2)  }
   0xd   : > { %s1525_s10 = smov (!%p323_p3, %s991_s10), 1  ;;  %v1111_v32 = vld [vmem:[%s1517_s3 + $0xb4] ss:$8 sps:$4 sm:$0xff]   ;;  %v1113_v33 = vld [vmem:[%s1517_s3 + $0xb0] ss:$8 sps:$4 sm:$0xff]   ;;  %v356_v61 = vshrl.u32 %v355_v59, 7 }
   0xe   : > { %s1068_s11 = sshll.u32 %s1525_s10, 4  ;;  %v1114_v34 = vld [vmem:[%s1517_s3 + $0xc4] ss:$8 sps:$4 sm:$0xff]   ;;  %v1116_v35 = vld [vmem:[%s1517_s3 + $0xc0] ss:$8 sps:$4 sm:$0xff]  }
   0xf   : > { %s327_s14 = scalar_lea.vmem %s1514_s0, %s1068_s11  ;;  %591 = vmatpush1.bf16.msra.mxu0 %v1086_v8  ;;  %v1117_v36 = vld [vmem:[%s1517_s3 + $0xd4] ss:$8 sps:$4 sm:$0xff]   ;;  %v1119_v37 = vld [vmem:[%s1517_s3 + $0xd0] ss:$8 sps:$4 sm:$0xff]   ;;  %v1120_v38 = vld [vmem:[%s1517_s3 + $0xe4] ss:$8 sps:$4 sm:$0xff]   ;;  %s332_s13 = scalar_lea.vmem %s1523_s9, %s1068_s11 }
  0x10   : > { %v1260_v0 = vld [vmem:[%s327_s14] sm:$0xff]  ;;  %v1262_v1 = vld [vmem:[%s327_s14 + $0x8] sm:$0xff]  ;;  %592 = vmatprep.subr.bf16.mxu0 %v1087_v9  ;;  %v1123_v40 = vld [vmem:[%s1517_s3 + $0xf4] ss:$8 sps:$4 sm:$0xff]   ;;  %v1417_v62 = vsub.s32 0, %v356_v61  ;;  %v1419_v63 = vsub.s32 1, %v356_v61 }
  0x11   : > { %v337_v2 = vadd.f32 %v1262_v1, %v1260_v0  ;;  %v1122_v39 = vld [vmem:[%s1517_s3 + $0xe0] ss:$8 sps:$4 sm:$0xff]   ;;  %v1125_v41 = vld [vmem:[%s1517_s3 + $0xf0] ss:$8 sps:$4 sm:$0xff]   ;;  %v1126_v42 = vld [vmem:[%s1519_s5 + $0x4] ss:$8 sps:$4 sm:$0xff]  }
  0x12   : > { %v1128_v43 = vld [vmem:[%s1519_s5] ss:$8 sps:$4 sm:$0xff]   ;;  %v1129_v44 = vld [vmem:[%s1519_s5 + $0x14] ss:$8 sps:$4 sm:$0xff]   ;;  %847 = vmatprep.subr.bf16.mxu1 %v1126_v42  ;;  %v1131_v45 = vld [vmem:[%s1519_s5 + $0x10] ss:$8 sps:$4 sm:$0xff]  }
  0x13   : > { %338 = vadd.xlane.f32.xlu0 %v337_v2  ;;  %593 = vmatpush1.bf16.msra.mxu0 %v1089_v10  ;;  %v1132_v46 = vld [vmem:[%s1519_s5 + $0x24] ss:$8 sps:$4 sm:$0xff]   ;;  %v1134_v47 = vld [vmem:[%s1519_s5 + $0x20] ss:$8 sps:$4 sm:$0xff]   ;;  %v1135_v48 = vld [vmem:[%s1519_s5 + $0x34] ss:$8 sps:$4 sm:$0xff]  }
  0x14   : > { %594 = vmatprep.subr.bf16.mxu0 %v1090_v11  ;;  %848 = vmatpush1.bf16.msra.mxu1 %v1128_v43  ;;  %v1137_v49 = vld [vmem:[%s1519_s5 + $0x30] ss:$8 sps:$4 sm:$0xff]   ;;  %v1138_v50 = vld [vmem:[%s1519_s5 + $0x44] ss:$8 sps:$4 sm:$0xff]   ;;  %v1140_v51 = vld [vmem:[%s1519_s5 + $0x40] ss:$8 sps:$4 sm:$0xff]  }
  0x15   : > { %849 = vmatprep.subr.bf16.mxu1 %v1129_v44  ;;  %v1141_v52 = vld [vmem:[%s1519_s5 + $0x54] ss:$8 sps:$4 sm:$0xff]   ;;  %v1143_v53 = vld [vmem:[%s1519_s5 + $0x50] ss:$8 sps:$4 sm:$0xff]   ;;  %v1144_v54 = vld [vmem:[%s1519_s5 + $0x64] ss:$8 sps:$4 sm:$0xff]  }
  0x16   : > { %v1146_v55 = vld [vmem:[%s1519_s5 + $0x60] ss:$8 sps:$4 sm:$0xff]   ;;  %v1147_v56 = vld [vmem:[%s1519_s5 + $0x74] ss:$8 sps:$4 sm:$0xff]  }
  0x17   : > { %595 = vmatpush1.bf16.msra.mxu0 %v1092_v12  ;;  %v335_v2 = vld [vmem:[%s1515_s1] sm:$0x3] }
  0x18   : > { %596 = vmatprep.subr.bf16.mxu0 %v1093_v13  ;;  %850 = vmatpush1.bf16.msra.mxu1 %v1131_v45  ;;  %v336_v3 = vld [vmem:[%s1516_s2] sm:$0x3]  ;;  %v358_v4 = vrot.slane %v335_v2, %v1417_v62  ;;  %v362_v5 = vrot.slane %v335_v2, %v1419_v63 }
  0x19   : > { %851 = vmatprep.subr.bf16.mxu1 %v1132_v46  ;;  %v371_v8 = vrot.slane %v336_v3, %v1417_v62  ;;  %v375_v9 = vrot.slane %v336_v3, %v1419_v63 }
  0x1b   : > { %597 = vmatpush1.bf16.msra.mxu0 %v1095_v14 }
  0x1c   : > { %598 = vmatprep.subr.bf16.mxu0 %v1096_v15  ;;  %852 = vmatpush1.bf16.msra.mxu1 %v1134_v47 }
  0x1d   : > { %853 = vmatprep.subr.bf16.mxu1 %v1135_v48 }
  0x1f   : > { %599 = vmatpush1.bf16.msra.mxu0 %v1098_v16 }
  0x20   : > { %600 = vmatprep.subr.bf16.mxu0 %v1099_v17  ;;  %854 = vmatpush1.bf16.msra.mxu1 %v1137_v49  ;;  %v1149_v17 = vld [vmem:[%s1519_s5 + $0x70] ss:$8 sps:$4 sm:$0xff]  }
  0x21   : > { %855 = vmatprep.subr.bf16.mxu1 %v1138_v50 }
  0x23   : > { %601 = vmatpush1.bf16.msra.mxu0 %v1101_v18  ;;  %v1150_v18 = vld [vmem:[%s1519_s5 + $0x84] ss:$8 sps:$4 sm:$0xff]  }
  0x24   : > { %602 = vmatprep.subr.bf16.mxu0 %v1102_v19  ;;  %856 = vmatpush1.bf16.msra.mxu1 %v1140_v51  ;;  %v1152_v19 = vld [vmem:[%s1519_s5 + $0x80] ss:$8 sps:$4 sm:$0xff]  }
  0x25   : > { %857 = vmatprep.subr.bf16.mxu1 %v1141_v52 }
  0x27   : > { %603 = vmatpush1.bf16.msra.mxu0 %v1104_v20  ;;  %v1153_v20 = vld [vmem:[%s1519_s5 + $0x94] ss:$8 sps:$4 sm:$0xff]  }
  0x28   : > { %604 = vmatprep.subr.bf16.mxu0 %v1105_v21  ;;  %858 = vmatpush1.bf16.msra.mxu1 %v1143_v53  ;;  %v1155_v21 = vld [vmem:[%s1519_s5 + $0x90] ss:$8 sps:$4 sm:$0xff]  }
  0x29   : > { %859 = vmatprep.subr.bf16.mxu1 %v1144_v54 }
  0x2b   : > { %605 = vmatpush1.bf16.msra.mxu0 %v1107_v22  ;;  %v1156_v22 = vld [vmem:[%s1519_s5 + $0xa4] ss:$8 sps:$4 sm:$0xff]  }
  0x2c   : > { %606 = vmatprep.subr.bf16.mxu0 %v1108_v30  ;;  %860 = vmatpush1.bf16.msra.mxu1 %v1146_v55  ;;  %v1168_v30 = vld [vmem:[%s1519_s5 + $0xe4] ss:$8 sps:$4 sm:$0xff]   ;;  %v675_v55 = vld [vmem:[%s1520_s6] sm:$0x3] }
  0x2d   : > { %861 = vmatprep.subr.bf16.mxu1 %v1147_v56  ;;  %v680_v56 = vrot.slane %v675_v55, %v1417_v62 }
  0x2f   : > { %607 = vmatpush1.bf16.msra.mxu0 %v1110_v31  ;;  %v1170_v31 = vld [vmem:[%s1519_s5 + $0xe0] ss:$8 sps:$4 sm:$0xff]  }
  0x30   : > { %608 = vmatprep.subr.bf16.mxu0 %v1111_v32  ;;  %862 = vmatpush1.bf16.msra.mxu1 %v1149_v17  ;;  %v1171_v32 = vld [vmem:[%s1519_s5 + $0xf4] ss:$8 sps:$4 sm:$0xff]  }
  0x31   : > { %863 = vmatprep.subr.bf16.mxu1 %v1150_v18 }
  0x33   : > { %609 = vmatpush1.bf16.msra.mxu0 %v1113_v33  ;;  %v1173_v33 = vld [vmem:[%s1519_s5 + $0xf0] ss:$8 sps:$4 sm:$0xff]  }
  0x34   : > { %610 = vmatprep.subr.bf16.mxu0 %v1114_v34  ;;  %864 = vmatpush1.bf16.msra.mxu1 %v1152_v19  ;;  %v414_v34 = vld [vmem:[%s1518_s4] sm:$0x3] }
  0x35   : > { %865 = vmatprep.subr.bf16.mxu1 %v1153_v20 }
  0x37   : > { %611 = vmatpush1.bf16.msra.mxu0 %v1116_v35  ;;  %v419_v35 = vrot.slane %v414_v34, %v1417_v62 }
  0x38   : > { %612 = vmatprep.subr.bf16.mxu0 %v1117_v36  ;;  %866 = vmatpush1.bf16.msra.mxu1 %v1155_v21  ;;  %v423_v36 = vrot.slane %v414_v34, %v1419_v63 }
  0x39   : > { %867 = vmatprep.subr.bf16.mxu1 %v1156_v22 }
  0x3b   : > { %613 = vmatpush1.bf16.msra.mxu0 %v1119_v37 }
  0x3c   : > { %614 = vmatprep.subr.bf16.mxu0 %v1120_v38 }
  0x3f   : > { %615 = vmatpush1.bf16.msra.mxu0 %v1122_v39 }
  0x40   : > { %616 = vmatprep.subr.bf16.mxu0 %v1123_v40 }
  0x43   : > { %617 = vmatpush1.bf16.msra.mxu0 %v1125_v41 }
  0xa0   : > { %v339_v23 = vpop.xlane.xlu0 %338 }
  0xa1   : > { %v341_v24 = vmul.f32 0.00390625, %v339_v23  ;;  %v1158_v23 = vld [vmem:[%s1519_s5 + $0xa0] ss:$8 sps:$4 sm:$0xff]  }
  0xa2   : > { %868 = vmatpush1.bf16.msra.mxu1 %v1158_v23 }
  0xa3   : > { %v1327_v25 = vsub.f32 %v1260_v0, %v341_v24  ;;  %v1330_v26 = vsub.f32 %v1262_v1, %v341_v24  ;;  %v1159_v24 = vld [vmem:[%s1519_s5 + $0xb4] ss:$8 sps:$4 sm:$0xff]  }
  0xa4   : > { %869 = vmatprep.subr.bf16.mxu1 %v1159_v24 }
  0xa5   : > { %v344_v27 = vmul.f32 %v1327_v25, %v1327_v25  ;;  %v345_v28 = vmul.f32 %v1330_v26, %v1330_v26 }
  0xa7   : > { %v346_v29 = vadd.f32 %v345_v28, %v344_v27  ;;  %v1164_v27 = vld [vmem:[%s1519_s5 + $0xc0] ss:$8 sps:$4 sm:$0xff]   ;;  %v1165_v28 = vld [vmem:[%s1519_s5 + $0xd4] ss:$8 sps:$4 sm:$0xff]  }
  0xa9   : > { %347 = vadd.xlane.f32.xlu0 %v346_v29  ;;  %v1167_v29 = vld [vmem:[%s1519_s5 + $0xd0] ss:$8 sps:$4 sm:$0xff]  }
 0x136   : > { %v348_v57 = vpop.xlane.xlu0 %347 }
 0x137   : > { %v349_v58 = vmul.f32 0.00390625, %v348_v57  ;;  %v684_v57 = vrot.slane %v675_v55, %v1419_v63 }
 0x139   : > { %v350_v60 = vadd.f32 1e-05, %v349_v58 }
 0x13b   : > { %1174 = vrsqrt.f32 %v350_v60 }
 0x145   : > { %v1175_v6 = vpop.eup %1174 }
 0x146   : > { %v353_v7 = vmul.f32 %v1175_v6, %v1330_v26  ;;  %v352_v10 = vmul.f32 %v1175_v6, %v1327_v25  ;;  %v1161_v25 = vld [vmem:[%s1519_s5 + $0xb0] ss:$8 sps:$4 sm:$0xff]   ;;  %v1162_v26 = vld [vmem:[%s1519_s5 + $0xc4] ss:$8 sps:$4 sm:$0xff]  }
 0x147   : > { %870 = vmatpush1.bf16.msra.mxu1 %v1161_v25 }
 0x148   : > { %v366_v11 = vmul.f32 %v362_v5, %v353_v7  ;;  %v365_v12 = vmul.f32 %v358_v4, %v352_v10  ;;  %871 = vmatprep.subr.bf16.mxu1 %v1162_v26 }
 0x14a   : > { %v379_v13 = vadd.f32 %v375_v9, %v366_v11  ;;  %v378_v14 = vadd.f32 %v371_v8, %v365_v12 }
 0x14b   : > { %872 = vmatpush1.bf16.msra.mxu1 %v1164_v27 }
 0x14c   : > { %v413_v15 = vpack.c.bf16 %v379_v13, %v379_v13  ;;  %v412_v16 = vpack.c.bf16 %v378_v14, %v378_v14  ;;  %873 = vmatprep.subr.bf16.mxu1 %v1165_v28 }
 0x14e   : > { %618 = vmatprep.mubr.bf16.mxu0 %v413_v15 }
 0x14f   : > { %619 = vmatmul.mubr.bf16.vlgmr.msra.gmra.mrb[0].mxu0 %v412_v16  ;;  %874 = vmatpush1.bf16.msra.mxu1 %v1167_v29 }
 0x150   : > { %875 = vmatprep.subr.bf16.mxu1 %v1168_v30 }
 0x153   : > { %876 = vmatpush1.bf16.msra.mxu1 %v1170_v31 }
 0x154   : > { %877 = vmatprep.subr.bf16.mxu1 %v1171_v32 }
 0x157   : > { %878 = vmatpush1.bf16.msra.mxu1 %v1173_v33 }
 0x222   : > { %v620_v37 = vpop.f32.mrb[0].mxu0 }
 0x223   : > { %v621_v38 = vadd.f32 %v620_v37, %v419_v35  ;;  %v622_v39 = vpop.f32.mrb[1].mxu0 }
 0x224   : > { %v623_v40 = vadd.f32 %v622_v39, %v423_v36  ;;  %v624_v41 = vpop.f32.mrb[2].mxu0 }
 0x225   : > { %v1032_v42 = vmul.f32 -1.442695, %v621_v38  ;;  %v625_v43 = vpop.f32.mrb[3].mxu0 }
 0x226   : > { %v1033_v44 = vmul.f32 -1.442695, %v623_v40 }
 0x227   : > { %1176 = vpow2.f32 %v1032_v42 }
 0x228   : > { %1178 = vpow2.f32 %v1033_v44 }
 0x231   : > { %v1177_v45 = vpop.eup %1176 }
 0x232   : > { %v1179_v46 = vpop.eup %1178  ;;  %v633_v47 = vadd.f32 1.0, %v1177_v45 }
 0x233   : > { %v634_v48 = vadd.f32 1.0, %v1179_v46 }
 0x234   : > { %1180 = vrcp.f32 %v633_v47 }
 0x235   : > { %1182 = vrcp.f32 %v634_v48 }
 0x23e   : > { %v1181_v49 = vpop.eup %1180 }
 0x23f   : > { %v1183_v50 = vpop.eup %1182  ;;  %v639_v51 = vmul.f32 %v1181_v49, %v621_v38 }
 0x240   : > { %v640_v52 = vmul.f32 %v1183_v50, %v623_v40 }
 0x241   : > { %v673_v54 = vpack.c.bf16 %v639_v51, %v639_v51 }
 0x242   : > { %v674_v53 = vpack.c.bf16 %v640_v52, %v640_v52 }
 0x244   : > { %879 = vmatprep.mubr.bf16.mxu1 %v674_v53 }
 0x245   : > { %880 = vmatmul.mubr.bf16.vlgmr.msra.gmra.mrb[0].mxu1 %v673_v54 }
 0x318   : > { %v881_v58 = vpop.f32.mrb[0].mxu1 }
 0x319   : > { %v882_v59 = vadd.f32 %v881_v58, %v680_v56  ;;  %v883_v60 = vpop.f32.mrb[1].mxu1 }
 0x31a   : > { %v884_v61 = vadd.f32 %v883_v60, %v684_v57  ;;  %v885_v2 = vpop.f32.mrb[2].mxu1 }
 0x31b   : > { %v886_v3 = vpop.f32.mrb[3].mxu1  ;;  %v888_v4 = vadd.f32 %v882_v59, %v1260_v0  ;;  %v890_v0 = vld [vmem:[%s1521_s7] sm:$0x3] }
 0x31c   : > { %v889_v5 = vadd.f32 %v884_v61, %v1262_v1  ;;  %v891_v1 = vld [vmem:[%s1522_s8] sm:$0x3]  ;;  %v912_v17 = vrot.slane %v890_v0, %v1417_v62  ;;  %v916_v18 = vrot.slane %v890_v0, %v1419_v63 }
 0x31d   : > { %v925_v20 = vrot.slane %v891_v1, %v1417_v62  ;;  %v929_v21 = vrot.slane %v891_v1, %v1419_v63 }
 0x31e   : > { %v892_v6 = vadd.f32 %v889_v5, %v888_v4 }
 0x320   : > { %893 = vadd.xlane.f32.xlu1 %v892_v6 }
 0x3ad   : > { %v894_v7 = vpop.xlane.xlu1 %893 }
 0x3ae   : > { %v895_v8 = vmul.f32 0.00390625, %v894_v7 }
 0x3b0   : > { %v896_v9 = vsub.f32 %v888_v4, %v895_v8  ;;  %v897_v10 = vsub.f32 %v889_v5, %v895_v8 }
 0x3b2   : > { %v898_v11 = vmul.f32 %v896_v9, %v896_v9  ;;  %v899_v12 = vmul.f32 %v897_v10, %v897_v10 }
 0x3b4   : > { %v900_v13 = vadd.f32 %v899_v12, %v898_v11 }
 0x3b6   : > { %901 = vadd.xlane.f32.xlu1 %v900_v13 }
 0x443   : > { %v902_v14 = vpop.xlane.xlu1 %901 }
 0x444   : > { %v903_v15 = vmul.f32 0.00390625, %v902_v14 }
 0x446   : > { %v904_v16 = vadd.f32 1e-05, %v903_v15 }
 0x448   : > { %1184 = vrsqrt.f32 %v904_v16 }
 0x452   : > { %v1185_v19 = vpop.eup %1184 }
 0x453   : > { %v906_v22 = vmul.f32 %v1185_v19, %v896_v9  ;;  %v907_v23 = vmul.f32 %v1185_v19, %v897_v10 }
 0x455   : > { %v919_v24 = vmul.f32 %v912_v17, %v906_v22  ;;  %v920_v25 = vmul.f32 %v916_v18, %v907_v23 }
 0x457   : > { %v932_v26 = vadd.f32 %v925_v20, %v919_v24  ;;  %v933_v27 = vadd.f32 %v929_v21, %v920_v25 }
 0x459   : > { %934 = vst [vmem:[%s332_s13] sm:$0xff] %v932_v26  ;;  %935 = vst [vmem:[%s332_s13 + $0x8] sm:$0xff] %v933_v27 }
 0x45a PF: > { %s19_s30 = sadd.s32 1, %s1192_s30  }
 0x45b   : > { %p16_p4 = scmp.ge.s32.totalorder %s19_s30, 4  }
 0x45d   :  { %18 = sbr.rel (!%p16_p4) target bundleno = 1 (0x1), region = 86 }

// kernel: encoder_forward.10
= control target key start
LH: loop header
LB: loop body
LE: loop exit
PB: predicated region body
PF: predicated region fallthrough
CT: control target
= control target key end

     0   :  { %s3027_s0 = inlined_call_operand.vmem [shape: f32[2,8,768], index: 0, kind: input, shape index: {}]   ;;  %s3028_s1 = inlined_call_operand.vmem [shape: f32[2,8,256], index: 1, kind: input, shape index: {}]   ;;  %s3029_s2 = inlined_call_operand.vmem [shape: bf16[4,128,64], index: 2, kind: input, shape index: {}]   ;;  %s3030_s3 = inlined_call_operand.vmem [shape: f32[1,256], index: 3, kind: input, shape index: {}]   ;;  %s3031_s4 = inlined_call_operand.vmem [shape: f32[1,256], index: 4, kind: input, shape index: {}]   ;;  %s3032_s5 = inlined_call_operand.vmem [shape: bf16[4,64,256], index: 5, kind: input, shape index: {}]   ;;  %s3033_s6 = inlined_call_operand.vmem [shape: f32[1,256], index: 6, kind: input, shape index: {}]   ;;  %s3034_s7 = inlined_call_operand.vmem [shape: f32[2,8,256], index: 7, kind: output, shape index: {0}]   ;;  %s3035_s8 = inlined_call_operand.hbm [shape: f32[2,4,8,8], index: 8, kind: output, shape index: {1}]  }
   0x1   :  { %3043 = sst [smem:[#allocation5_spill]] %s3027_s0 }
   0x2   :  { %14 = vsyncpa [#allocation3], 0 }
   0x3   :  { %16 = vsyncpa [#allocation3 + $0x1], 0  ;;  %s2512_s27 = smov 0   ;;  %s2514_s28 = smov 0  }
   0x4   :  { %s2516_s29 = smov 0   ;;  %s2518_s30 = smov 0  }
   0x5 LB: > { %s2533_s9 = sadd.s32 4294967295, %s2456_s30   ;;  %s1883_s10 = sadd.s32 4294967294, %s2456_s30   ;;  %s2456_s30 = sphi %s2518_s30, %s3054_s30   ;;  %s2452_s29 = sphi %s2516_s29, %s3053_s29   ;;  %s2448_s28 = sphi %s2514_s28, %s3052_s28   ;;  %s2444_s27 = sphi %s2512_s27, %s3051_s27  }
   0x6   : > { %s2537_s11 = sadd.s32 1, %s2456_s30   ;;  %s212_s12 = sadd.s32 1, %s2452_s29 }
   0x7   : > { %s209_s13 = ssub.s32 %s2456_s30, %s2537_s11  ;;  %p222_p0 = scmp.ne.s32.totalorder %s2452_s29, %s2448_s28 }
   0x8   : > { %p210_p1 = scmp.eq.s32.totalorder %s209_s13, 0  ;;  %p223_p2 = scmp.eq.s32.totalorder %s2533_s9, 1 }
   0x9   : > { %p228_p3 = scmp.ne.s32.totalorder %s2448_s28, %s2444_s27  ;;  %p229_p4 = scmp.eq.s32.totalorder %s1883_s10, 1 }
   0xa   : > { %s2548_s14 = scalar_select %p210_p1, %s2452_s29, %s212_s12  }
   0xb   : > { %p2550_p5 = por %p223_p2, %p222_p0  ;;  %p2554_p6 = por %p229_p4, %p228_p3 }
   0xc   : > { %p1886_p7 = scmp.ge.s32.totalorder %s2456_s30, 1  ;;  %p278_p8 = scmp.lt.s32.totalorder %s2456_s30, 3 }
   0xe   : > { %p279_p9 = pnand %p1886_p7, %p278_p8 }
   0xf   : > { %v2298_v0 = vld [vmem:[%s3029_s2] sm:$0xff] (!%p279_p9)   ;;  %v2458_v1 = vmov (!%p279_p9), 0.0   ;;  %vm447_vm0 = vcmask (!%p279_p9), 523264   ;;  %v2299_v3 = vld [vmem:[%s3029_s2 + $0x8] sm:$0xff] (!%p279_p9)   ;;  %v2300_v5 = vld [vmem:[%s3029_s2 + $0x10] sm:$0xff] (!%p279_p9)   ;;  %vm2459_vm1 = vmmov (!%p279_p9), 0   ;;  %v346_v13 = vlaneseq (!%p279_p9) }
  0x10   : > { %282 = sbr.rel (%p279_p9) target bundleno = 3820 (0xeec), region = 48  ;;  %2108 = vmatprep.subr.bf16.mxu0 (!%p279_p9), %v2458_v1  ;;  %2128 = vmatprep.subr.bf16.mxu1 (!%p279_p9), %v2458_v1  ;;  %v452_v2 = vsel (!%p279_p9), %vm447_vm0, %v2298_v0, 0  ;;  %v455_v4 = vsel (!%p279_p9), %vm447_vm0, %v2299_v3, 0  ;;  %v458_v6 = vsel (!%p279_p9), %vm447_vm0, %v2300_v5, 0  ;;  %v2301_v7 = vld [vmem:[%s3029_s2 + $0x18] sm:$0xff] (!%p279_p9)   ;;  %v2302_v9 = vld [vmem:[%s3029_s2 + $0x20] sm:$0xff] (!%p279_p9)  }
  0x11   : > { %2109 = vmatpush3.bf16.xpose.msra.mxu0 (!%p279_p9), %v452_v2  ;;  %2124 = vmatprep.mubr.msk.bf16.mxu0 (!%p279_p9), %vm2459_vm1, %v2458_v1  ;;  %v461_v8 = vsel (!%p279_p9), %vm447_vm0, %v2301_v7, 0  ;;  %v464_v10 = vsel (!%p279_p9), %vm447_vm0, %v2302_v9, 0  ;;  %v2303_v11 = vld [vmem:[%s3029_s2 + $0x28] sm:$0xff] (!%p279_p9)   ;;  %p322_p10 = scmp.lt.s32.totalorder (!%p279_p9), %s2533_s9, 1  ;;  %v2304_v14 = vld [vmem:[%s3029_s2 + $0x30] sm:$0xff] (!%p279_p9)   ;;  %v2603_v15 = vshrl.u32 (!%p279_p9), %v346_v13, 7 }
  0x12   : > { %2110 = vmatprep.subr.bf16.mxu0 (!%p279_p9), %v2458_v1  ;;  %2130 = vmatprep.mubr.msk.bf16.mxu1 (!%p279_p9), %vm2459_vm1, %v2458_v1  ;;  %v467_v12 = vsel (!%p279_p9), %vm447_vm0, %v2303_v11, 0  ;;  %v470_v16 = vsel (!%p279_p9), %vm447_vm0, %v2304_v14, 0  ;;  %v2613_v18 = vld [vmem:[%s3031_s4] sm:$0x3] (!%p279_p9)  ;;  %v2305_v19 = vld [vmem:[%s3029_s2 + $0x38] sm:$0xff] (!%p279_p9)   ;;  %s3046_s0 = sld [smem:[#allocation5_spill]] (!%p279_p9) }
  0x13   : > { %v2608_v17 = vsub.s32 (!%p279_p9), 0, %v2603_v15  ;;  %v473_v22 = vsel (!%p279_p9), %vm447_vm0, %v2305_v19, 0  ;;  %v2636_v26 = vld [vmem:[%s3030_s3] sm:$0x3] (!%p279_p9)  ;;  %s3041_s13 = smov (!%p279_p9), 257   ;;  %s3039_s17 = smov (!%p279_p9), 120  }
  0x14   : > { %vm570_vm2 = vcmask (!%p279_p9), 64512   ;;  %vm588_vm3 = vcmask (!%p279_p9), 1043456   ;;  %v2308_v53 = vld [vmem:[%s3032_s5 + $0x4] ss:$8 sps:$4 sm:$0xff] (!%p279_p9)   ;;  %s3037_s21 = smov (!%p279_p9), 64   ;;  %s3036_s22 = sand.u32 (!%p279_p9), 1, %s2448_s28  }
  0x15   : > { %v363_v20 = vrot.slane (!%p279_p9), %v2613_v18, %v2608_v17  ;;  %v349_v28 = vrot.slane (!%p279_p9), %v2636_v26, %v2608_v17  ;;  %s1887_s23 = sshll.u32 (!%p279_p9), %s3036_s22, 5  ;;  %v2306_v57 = vld [vmem:[%s3032_s5] ss:$8 sps:$4 sm:$0xff] (!%p279_p9)   ;;  %v2311_v59 = vld [vmem:[%s3032_s5 + $0x14] ss:$8 sps:$4 sm:$0xff] (!%p279_p9)   ;;  %v2463_v2 = vmov (!%p279_p9), 0  }
  0x16   : > { %s2666_s10 = scalar_lea.vmem (!%p279_p9), [#allocation2], %s1887_s23  ;;  %v2309_v60 = vld [vmem:[%s3032_s5 + $0x10] ss:$8 sps:$4 sm:$0xff] (!%p279_p9)   ;;  %v2314_v61 = vld [vmem:[%s3032_s5 + $0x24] ss:$8 sps:$4 sm:$0xff] (!%p279_p9)   ;;  %s3047_s25 = smov (!%p279_p9), 257  }
  0x17   : > { %s2601_s18 = scalar_select %p322_p10, %s2533_s9, 1  ;;  %v2312_v62 = vld [vmem:[%s3032_s5 + $0x20] ss:$8 sps:$4 sm:$0xff]   ;;  %v2317_v63 = vld [vmem:[%s3032_s5 + $0x34] ss:$8 sps:$4 sm:$0xff]  }
  0x18   : > { %v2315_v0 = vld [vmem:[%s3032_s5 + $0x30] ss:$8 sps:$4 sm:$0xff]   ;;  %v2318_v3 = vld [vmem:[%s3029_s2 + $0x40] sm:$0xff]   ;;  %s3048_s23 = smov 120   ;;  %s3049_s12 = smov 64  }
  0x19   : > { %2111 = vmatpush3.bf16.xpose.msra.mxu0 %v455_v4  ;;  %s2250_s19 = smul.u32 48, %s2601_s18  ;;  %v791_v7 = vsel %vm447_vm0, %v2318_v3, 0  ;;  %v2321_v14 = vld [vmem:[%s3029_s2 + $0x58] sm:$0xff]   ;;  %v2322_v19 = vld [vmem:[%s3029_s2 + $0x60] sm:$0xff]  }
  0x1a   : > { %2112 = vmatprep.subr.bf16.mxu0 %v2458_v1 }
  0x1b   : > { %s2622_s26 = scalar_lea.vmem %s3046_s0, %s2250_s19  ;;  %s1784_s0 = sshll.u32 %s2666_s10, 4  ;;  %s2970_s0 = int_to_ptr.vmem [resolvable:$true] %s1784_s0 }
  0x1c   : > { %v338_v21 = vld [vmem:[%s2622_s26] sm:$0xff]  ;;  %v340_v25 = vld [vmem:[%s2622_s26 + $0x10] sm:$0xff]  ;;  %s2394_s19 = scalar_lea.vmem %s2970_s0, 512 }
  0x1d   : > { %v370_v23 = vadd.f32 %v363_v20, %v338_v21  ;;  %v405_v27 = vpack.c.bf16 %v340_v25, %v340_v25  ;;  %v356_v30 = vadd.f32 %v349_v28, %v338_v21  ;;  %v342_v50 = vld [vmem:[%s2622_s26 + $0x20] sm:$0xff]  ;;  %v803_v20 = vsel %vm447_vm0, %v2322_v19, 0  ;;  %v2323_v21 = vld [vmem:[%s3029_s2 + $0x68] sm:$0xff]   ;;  %v2325_v25 = vld [vmem:[%s3029_s2 + $0x78] sm:$0xff]   ;;  %p2395_p11 = scmp.ne.s32.totalorder %s2970_s0, %s2394_s19 }
  0x1e   : > { %v2650_v51 = vpack.c.bf16 %v342_v50, %v342_v50  ;;  %v2337_v19 = vld [vmem:[%s3032_s5 + $0x50] ss:$8 sps:$4 sm:$0xff]  }
  0x1f   : > { %v406_v24 = vpack.c.bf16 %v370_v23, %v370_v23  ;;  %v527_v29 = vsel %vm447_vm0, %v405_v27, 0  ;;  %v404_v31 = vpack.c.bf16 %v356_v30, %v356_v30  ;;  %v2324_v23 = vld [vmem:[%s3029_s2 + $0x70] sm:$0xff]   ;;  %p2396_p12 = pnand %p2395_p11, %p2550_p5 }
  0x20   : > { %2129 = vmatpush3.bf16.xpose.msra.mxu1 %v527_v29  ;;  %v590_v52 = vsel %vm588_vm3, %v2650_v51, 0 }
  0x21   : > { %2113 = vmatpush3.bf16.xpose.msra.mxu0 %v458_v6  ;;  %2134 = vmatprep.subr.bf16.mxu1 %v2458_v1  ;;  %p2397_p13 = pneg %p2396_p12 }
  0x22   : > { %2114 = vmatprep.subr.bf16.mxu0 %v2458_v1 }
  0x27   : > { %2131 = vmatmul.mubr.msk.bf16.vlgmr.msra.gmra.mrb[0].mxu1 %vm447_vm0, %v404_v31 }
  0x28   : > { %2136 = vmatprep.mubr.msk.bf16.mxu1 %vm2459_vm1, %v2458_v1  ;;  %2135 = vmatpush3.bf16.msra.mxu1 %v590_v52 }
  0x29   : > { %2115 = vmatpush3.bf16.xpose.msra.mxu0 %v461_v8  ;;  %684 = vmatprep.subr.bf16.mxu1 %v2308_v53  ;;  %v2330_v53 = vld [vmem:[%s3029_s2 + $0xa0] sm:$0xff]  }
  0x2a   : > { %2116 = vmatprep.subr.bf16.mxu0 %v2458_v1 }
  0x31   : > { %2117 = vmatpush3.bf16.xpose.msra.mxu0 %v464_v10  ;;  %v2319_v10 = vld [vmem:[%s3029_s2 + $0x48] sm:$0xff]  }
  0x32   : > { %2118 = vmatprep.subr.bf16.mxu0 %v2458_v1  ;;  %v794_v11 = vsel %vm447_vm0, %v2319_v10, 0 }
  0x39   : > { %2119 = vmatpush3.bf16.xpose.msra.mxu0 %v467_v12  ;;  %v2320_v12 = vld [vmem:[%s3029_s2 + $0x50] sm:$0xff]  }
  0x3a   : > { %2120 = vmatprep.subr.bf16.mxu0 %v2458_v1  ;;  %v797_v13 = vsel %vm447_vm0, %v2320_v12, 0 }
  0x41   : > { %2121 = vmatpush3.bf16.xpose.msra.mxu0 %v470_v16  ;;  %v800_v16 = vsel %vm447_vm0, %v2321_v14, 0 }
  0x42   : > { %2122 = vmatprep.subr.bf16.mxu0 %v2458_v1 }
  0x49   : > { %2123 = vmatpush3.bf16.xpose.msra.mxu0 %v473_v22  ;;  %v806_v22 = vsel %vm447_vm0, %v2323_v21, 0  ;;  %v2340_v21 = vld [vmem:[%s3032_s5 + $0x60] ss:$8 sps:$4 sm:$0xff]  }
  0x4a   : > { %2172 = vmatprep.subr.bf16.mxu0 %v2458_v1 }
  0x50   : > { %2125 = vmatmul.mubr.msk.bf16.vlgmr.msra.gmra.mrb[0].mxu0 %vm447_vm0, %v406_v24 }
  0x51   : > { %2188 = vmatprep.mubr.msk.bf16.mxu0 %vm2459_vm1, %v2458_v1 }
  0xfa   : > { %v563_v36 = vpop.f32.mrb[0].mxu1 }
  0xfb   : > { %v2132_v37 = vpop.f32.mrb[1].mxu1 }
  0xfc   : > { %v566_v38 = vpop.f32.mrb[2].mxu1 }
  0xfd   : > { %v2133_v39 = vpop.f32.mrb[3].mxu1 }
 0x123   : > { %v509_v32 = vpop.f32.mrb[0].mxu0 }
 0x124   : > { %517 = vrot.lane.b32.xlu0 %v509_v32, %s3041_s13  ;;  %v2126_v33 = vpop.f32.mrb[1].mxu0 }
 0x125   : > { %v512_v34 = vpop.f32.mrb[2].mxu0 }
 0x126   : > { %v2127_v35 = vpop.f32.mrb[3].mxu0 }
 0x196   : > { %v518_v40 = vpop.permute.xlu0 %517 }
 0x197   : > { %520 = vrot.lane.b32.xlu0 %v518_v40, %s3039_s17 }
 0x19b   : > { %745 = vrot.lane.b32.xlu0 %v406_v24, %s3037_s21  ;;  %v809_v24 = vsel %vm447_vm0, %v2324_v23, 0  ;;  %v2343_v23 = vld [vmem:[%s3032_s5 + $0x70] ss:$8 sps:$4 sm:$0xff]  }
 0x19f   : > { %859 = vrot.lane.b32.xlu0 %v404_v31, %s3037_s21 }
 0x209   : > { %v521_v41 = vpop.permute.xlu0 %520 }
 0x20a   : > { %v564_v42 = vadd.f32 %v563_v36, %v521_v41 }
 0x20c   : > { %v569_v43 = vmul.f32 0.125, %v564_v42 }
 0x20d   : > { %v746_v28 = vpop.permute.xlu0 %745 }
 0x20e   : > { %v571_v44 = vsel %vm570_vm2, %v569_v43, -inf }
 0x20f   : > { %572 = vmax.xlane.f32.xlu1 %v571_v44 }
 0x211   : > { %v860_v31 = vpop.permute.xlu0 %859 }
 0x29c   : > { %v573_v45 = vpop.xlane.xlu1 %572 }
 0x29d   : > { %v574_v46 = vsub.f32 %v569_v43, %v573_v45  ;;  %v2326_v45 = vld [vmem:[%s3029_s2 + $0x80] sm:$0xff]  }
 0x29f   : > { %v575_v47 = vmul.f32 1.442695, %v574_v46  ;;  %v1138_v46 = vsel %vm447_vm0, %v2326_v45, 0 }
 0x2a0   : > { %2173 = vmatpush3.bf16.xpose.msra.mxu0 %v1138_v46 }
 0x2a1   : > { %2378 = vpow2.f32 %v575_v47  ;;  %2174 = vmatprep.subr.bf16.mxu0 %v2458_v1  ;;  %v2327_v47 = vld [vmem:[%s3029_s2 + $0x88] sm:$0xff]  }
 0x2ab   : > { %v2379_v48 = vpop.eup %2378 }
 0x2ac   : > { %v577_v49 = vsel %vm570_vm2, %v2379_v48, 0.0 }
 0x2ad   : > { %578 = vadd.xlane.f32.xlu1 %v577_v49  ;;  %v2328_v49 = vld [vmem:[%s3029_s2 + $0x90] sm:$0xff]  }
 0x2ae   : > { %v1144_v50 = vsel %vm447_vm0, %v2328_v49, 0 }
 0x2be   : > { %862 = vrot.lane.b32.xlu1 %v405_v27, %s3037_s21  ;;  %v812_v27 = vsel %vm447_vm0, %v2325_v25, 0  ;;  %s2055_s21 = sshll.u32 %s2533_s9, 9  ;;  %s2464_s9 = smov [#allocation2]  }
 0x2bf   : > { %s2968_s20 = scalar_lea.hbm %s3035_s8, %s2055_s21 }
 0x33a   : > { %v579_v54 = vpop.xlane.xlu1 %578 }
 0x33b   : > { %2380 = vrcp.f32 %v579_v54  ;;  %v1150_v54 = vsel %vm447_vm0, %v2330_v53, 0 }
 0x33e   : > { %v863_v29 = vpop.permute.xlu1 %862 }
 0x33f   : > { %v872_v30 = vsel %vm447_vm0, %v863_v29, 0 }
 0x345   : > { %v2381_v55 = vpop.eup %2380 }
 0x346   : > { %v581_v56 = vmul.f32 %v2381_v55, %v2379_v48  ;;  %v1141_v48 = vsel %vm447_vm0, %v2327_v47, 0  ;;  %v2331_v55 = vld [vmem:[%s3029_s2 + $0xa8] sm:$0xff]  }
 0x347   : > { %2175 = vmatpush3.bf16.xpose.msra.mxu0 %v1141_v48  ;;  %v2346_v48 = vld [vmem:[%s3029_s2 + $0xc0] sm:$0xff]  }
 0x348   : > { %582 = vst.msk [vmem:[%s2666_s10] sm:$0xff] %vm570_vm2, %v581_v56  ;;  %v583_v58 = vpack.c.bf16 %v581_v56, %v581_v56  ;;  %2176 = vmatprep.subr.bf16.mxu0 %v2458_v1  ;;  %v1153_v56 = vsel %vm447_vm0, %v2331_v55, 0  ;;  %v1477_v49 = vsel %vm447_vm0, %v2346_v48, 0 }
 0x34a   : > { %2137 = vmatmul.mubr.msk.bf16.vlgmr.msra.gmra.mrb[4].mxu1 %vm570_vm2, %v583_v58 }
 0x34b   : > { %685 = vmatpush1.bf16.msra.mxu1 %v2306_v57  ;;  %716 = vmatprep.mubr.bf16.mxu1 %v2463_v2  ;;  %v2332_v57 = vld [vmem:[%s3029_s2 + $0xb0] sm:$0xff]  }
 0x34c   : > { %686 = vmatprep.subr.bf16.mxu1 %v2311_v59  ;;  %v1156_v58 = vsel %vm447_vm0, %v2332_v57, 0  ;;  %v2333_v59 = vld [vmem:[%s3029_s2 + $0xb8] sm:$0xff]  }
 0x34f   : > { %687 = vmatpush1.bf16.msra.mxu1 %v2309_v60  ;;  %2177 = vmatpush3.bf16.xpose.msra.mxu0 %v1144_v50  ;;  %v1159_v60 = vsel %vm447_vm0, %v2333_v59, 0  ;;  %v2347_v50 = vld [vmem:[%s3029_s2 + $0xc8] sm:$0xff]  }
 0x350   : > { %688 = vmatprep.subr.bf16.mxu1 %v2314_v61  ;;  %2178 = vmatprep.subr.bf16.mxu0 %v2458_v1 }
 0x353   : > { %689 = vmatpush1.bf16.msra.mxu1 %v2312_v62 }
 0x354   : > { %690 = vmatprep.subr.bf16.mxu1 %v2317_v63 }
 0x357   : > { %691 = vmatpush1.bf16.msra.mxu1 %v2315_v0 }
 0x358   : > { %2140 = vmatprep.subr.bf16.mxu1 %v2458_v1 }
 0x41d   : > { %v626_v4 = vpop.f32.mrb[4].mxu1 }
 0x41e   : > { %v632_v5 = vpack.c.bf16 %v626_v4, %v626_v4  ;;  %v2138_v6 = vpop.f32.mrb[5].mxu1  ;;  %v2789_v4 = vsub.s32 1, %v2603_v15  ;;  %v2336_v15 = vld [vmem:[%s3032_s5 + $0x44] ss:$8 sps:$4 sm:$0xff]  }
 0x41f   : > { %v629_v8 = vpop.f32.mrb[6].mxu1  ;;  %v339_v6 = vld [vmem:[%s2622_s26 + $0x8] sm:$0xff] }
 0x420   : > { %v2139_v9 = vpop.f32.mrb[7].mxu1  ;;  %1912 = vmatmul.mubr.msk.bf16.vlgmr.msra.gmra.mrb[8].mxu1 %vm447_vm0, %v632_v5  ;;  %v367_v5 = vrot.slane %v2613_v18, %v2789_v4 }
 0x421   : > { %2141 = vmatpush3.bf16.xpose.msra.mxu1 %v791_v7  ;;  %2156 = vmatprep.mubr.msk.bf16.mxu1 %vm2459_vm1, %v2458_v1 }
 0x422   : > { %2142 = vmatprep.subr.bf16.mxu1 %v2458_v1  ;;  %v371_v7 = vadd.f32 %v367_v5, %v339_v6 }
 0x424   : > { %v2794_v8 = vpack.c.bf16 %v371_v7, %v371_v7 }
 0x429   : > { %2143 = vmatpush3.bf16.xpose.msra.mxu1 %v794_v11 }
 0x42a   : > { %2144 = vmatprep.subr.bf16.mxu1 %v2458_v1 }
 0x431   : > { %2145 = vmatpush3.bf16.xpose.msra.mxu1 %v797_v13  ;;  %v2334_v13 = vld [vmem:[%s3032_s5 + $0x40] ss:$8 sps:$4 sm:$0xff]  }
 0x432   : > { %2146 = vmatprep.subr.bf16.mxu1 %v2458_v1 }
 0x439   : > { %2147 = vmatpush3.bf16.xpose.msra.mxu1 %v800_v16  ;;  %v2339_v16 = vld [vmem:[%s3032_s5 + $0x54] ss:$8 sps:$4 sm:$0xff]  }
 0x43a   : > { %2148 = vmatprep.subr.bf16.mxu1 %v2458_v1 }
 0x441   : > { %2149 = vmatpush3.bf16.xpose.msra.mxu1 %v803_v20  ;;  %v2342_v20 = vld [vmem:[%s3032_s5 + $0x64] ss:$8 sps:$4 sm:$0xff]  }
 0x442   : > { %2150 = vmatprep.subr.bf16.mxu1 %v2458_v1 }
 0x449   : > { %2151 = vmatpush3.bf16.xpose.msra.mxu1 %v806_v22  ;;  %v2345_v22 = vld [vmem:[%s3032_s5 + $0x74] ss:$8 sps:$4 sm:$0xff]  }
 0x44a   : > { %2152 = vmatprep.subr.bf16.mxu1 %v2458_v1 }
 0x451   : > { %2153 = vmatpush3.bf16.xpose.msra.mxu1 %v809_v24 }
 0x452   : > { %2154 = vmatprep.subr.bf16.mxu1 %v2458_v1 }
 0x459   : > { %2155 = vmatpush3.bf16.xpose.msra.mxu1 %v812_v27 }
 0x45a   : > { %2160 = vmatprep.subr.bf16.mxu1 %v2458_v1 }
 0x460   : > { %2157 = vmatmul.mubr.msk.bf16.vlgmr.msra.gmra.mrb[12].mxu1 %vm447_vm0, %v746_v28 }
 0x461   : > { %2162 = vmatprep.mubr.msk.bf16.mxu1 %vm2459_vm1, %v2458_v1  ;;  %2161 = vmatpush3.bf16.xpose.msra.mxu1 %v872_v30  ;;  %v341_v30 = vld [vmem:[%s2622_s26 + $0x18] sm:$0xff] }
 0x462   : > { %2166 = vmatprep.subr.bf16.mxu1 %v2458_v1 }
 0x468   : > { %2163 = vmatmul.mubr.msk.bf16.vlgmr.msra.gmra.mrb[16].mxu1 %vm447_vm0, %v860_v31  ;;  %v1092_v31 = vpack.c.bf16 %v341_v30, %v341_v30 }
 0x469   : > { %2168 = vmatprep.mubr.msk.bf16.mxu1 %vm2459_vm1, %v2458_v1 }
 0x533   : > { %v848_v32 = vpop.f32.mrb[12].mxu1 }
 0x534   : > { %856 = vrot.lane.b32.xlu0 %v848_v32, %s3047_s25  ;;  %v2158_v33 = vpop.f32.mrb[13].mxu1  ;;  %v353_v32 = vrot.slane %v2636_v26, %v2789_v4 }
 0x535   : > { %v851_v34 = vpop.f32.mrb[14].mxu1 }
 0x536   : > { %v2159_v35 = vpop.f32.mrb[15].mxu1 }
 0x53b   : > { %v908_v36 = vpop.f32.mrb[16].mxu1 }
 0x53c   : > { %v2164_v37 = vpop.f32.mrb[17].mxu1 }
 0x53d   : > { %v911_v38 = vpop.f32.mrb[18].mxu1 }
 0x53e   : > { %v2165_v39 = vpop.f32.mrb[19].mxu1 }
 0x53f   : > { %v357_v39 = vadd.f32 %v353_v32, %v339_v6 }
 0x5a6   : > { %v857_v40 = vpop.permute.xlu0 %856 }
 0x5a7   : > { %865 = vrot.lane.b32.xlu0 %v857_v40, %s3048_s23  ;;  %v1091_v40 = vpack.c.bf16 %v357_v39, %v357_v39 }
 0x619   : > { %v866_v41 = vpop.permute.xlu0 %865 }
 0x61a   : > { %v909_v42 = vadd.f32 %v908_v36, %v866_v41  ;;  %v1213_v36 = vsel %vm447_vm0, %v1092_v31, 0 }
 0x61c   : > { %v914_v43 = vmul.f32 0.125, %v909_v42 }
 0x61e   : > { %v915_v44 = vsel %vm570_vm2, %v914_v43, -inf }
 0x61f   : > { %916 = vmax.xlane.f32.xlu0 %v915_v44 }
 0x635   : > { %930 = vrot.lane.b32.xlu0 %v2650_v51, %s3049_s12  ;;  %v2329_v51 = vld [vmem:[%s3029_s2 + $0x98] sm:$0xff]  }
 0x636   : > { %v1147_v52 = vsel %vm447_vm0, %v2329_v51, 0  ;;  %v1480_v51 = vsel %vm447_vm0, %v2347_v50, 0 }
 0x637   : > { %2179 = vmatpush3.bf16.xpose.msra.mxu0 %v1147_v52  ;;  %v2348_v52 = vld [vmem:[%s3029_s2 + $0xd0] sm:$0xff]  }
 0x638   : > { %2180 = vmatprep.subr.bf16.mxu0 %v2458_v1  ;;  %v1483_v53 = vsel %vm447_vm0, %v2348_v52, 0  ;;  %v2368_v52 = vld [vmem:[%s3032_s5 + $0xc4] ss:$8 sps:$4 sm:$0xff]  }
 0x63f   : > { %2181 = vmatpush3.bf16.xpose.msra.mxu0 %v1150_v54  ;;  %v2349_v54 = vld [vmem:[%s3029_s2 + $0xd8] sm:$0xff]  }
 0x640   : > { %2182 = vmatprep.subr.bf16.mxu0 %v2458_v1  ;;  %v1486_v55 = vsel %vm447_vm0, %v2349_v54, 0 }
 0x647   : > { %2183 = vmatpush3.bf16.xpose.msra.mxu0 %v1153_v56  ;;  %v2350_v56 = vld [vmem:[%s3029_s2 + $0xe0] sm:$0xff]  }
 0x648   : > { %2184 = vmatprep.subr.bf16.mxu0 %v2458_v1  ;;  %v1489_v57 = vsel %vm447_vm0, %v2350_v56, 0  ;;  %v2366_v56 = vld [vmem:[%s3032_s5 + $0xc0] ss:$8 sps:$4 sm:$0xff]  }
 0x64f   : > { %2185 = vmatpush3.bf16.xpose.msra.mxu0 %v1156_v58  ;;  %v2351_v58 = vld [vmem:[%s3029_s2 + $0xe8] sm:$0xff]  }
 0x650   : > { %2186 = vmatprep.subr.bf16.mxu0 %v2458_v1  ;;  %v1492_v59 = vsel %vm447_vm0, %v2351_v58, 0  ;;  %v2371_v58 = vld [vmem:[%s3032_s5 + $0xd4] ss:$8 sps:$4 sm:$0xff]  }
 0x657   : > { %2187 = vmatpush3.bf16.xpose.msra.mxu0 %v1159_v60  ;;  %v2352_v60 = vld [vmem:[%s3029_s2 + $0xf0] sm:$0xff]  }
 0x658   : > { %2204 = vmatprep.subr.bf16.mxu0 %v2458_v1 }
 0x65e   : > { %2189 = vmatmul.mubr.msk.bf16.vlgmr.msra.gmra.mrb[4].mxu0 %vm447_vm0, %v2794_v8 }
 0x65f   : > { %2220 = vmatprep.mubr.msk.bf16.mxu0 %vm2459_vm1, %v2458_v1  ;;  %2205 = vmatpush3.bf16.xpose.msra.mxu0 %v1477_v49 }
 0x660   : > { %2206 = vmatprep.subr.bf16.mxu0 %v2458_v1 }
 0x667   : > { %2207 = vmatpush3.bf16.xpose.msra.mxu0 %v1480_v51 }
 0x668   : > { %2208 = vmatprep.subr.bf16.mxu0 %v2458_v1 }
 0x66f   : > { %2209 = vmatpush3.bf16.xpose.msra.mxu0 %v1483_v53 }
 0x670   : > { %2210 = vmatprep.subr.bf16.mxu0 %v2458_v1 }
 0x677   : > { %2211 = vmatpush3.bf16.xpose.msra.mxu0 %v1486_v55 }
 0x678   : > { %2212 = vmatprep.subr.bf16.mxu0 %v2458_v1 }
 0x67f   : > { %2213 = vmatpush3.bf16.xpose.msra.mxu0 %v1489_v57 }
 0x680   : > { %2214 = vmatprep.subr.bf16.mxu0 %v2458_v1 }
 0x687   : > { %2215 = vmatpush3.bf16.xpose.msra.mxu0 %v1492_v59  ;;  %v2369_v59 = vld [vmem:[%s3032_s5 + $0xd0] ss:$8 sps:$4 sm:$0xff]  }
 0x688   : > { %2216 = vmatprep.subr.bf16.mxu0 %v2458_v1 }
 0x6ac   : > { %v917_v61 = vpop.xlane.xlu0 %916 }
 0x6ad   : > { %v918_v62 = vsub.f32 %v914_v43, %v917_v61  ;;  %v1495_v61 = vsel %vm447_vm0, %v2352_v60, 0  ;;  %v2374_v60 = vld [vmem:[%s3032_s5 + $0xe4] ss:$8 sps:$4 sm:$0xff]  }
 0x6ae   : > { %2217 = vmatpush3.bf16.xpose.msra.mxu0 %v1495_v61  ;;  %v2372_v61 = vld [vmem:[%s3032_s5 + $0xe0] ss:$8 sps:$4 sm:$0xff]  }
 0x6af   : > { %v919_v63 = vmul.f32 1.442695, %v918_v62  ;;  %2218 = vmatprep.subr.bf16.mxu0 %v2458_v1  ;;  %v2353_v62 = vld [vmem:[%s3029_s2 + $0xf8] sm:$0xff]  }
 0x6b0   : > { %v931_v9 = vpop.permute.xlu0 %930 }
 0x6b1   : > { %2382 = vpow2.f32 %v919_v63  ;;  %v936_v10 = vsel %vm588_vm3, %v931_v9, 0  ;;  %v1498_v63 = vsel %vm447_vm0, %v2353_v62, 0  ;;  %v343_v9 = vld [vmem:[%s2622_s26 + $0x28] sm:$0xff]  ;;  %v2377_v62 = vld [vmem:[%s3032_s5 + $0xf4] ss:$8 sps:$4 sm:$0xff]   ;;  %s3050_s26 = sand.u32 1, %s2448_s28  }
 0x6b2   : > { %2167 = vmatpush3.bf16.msra.mxu1 %v936_v10  ;;  %v1270_v10 = vpack.c.bf16 %v343_v9, %v343_v9  ;;  %s2974_s24 = scalar_lea.sflag [#allocation3], %s3050_s26 }
 0x6b3   : > { %1031 = vmatprep.subr.bf16.mxu1 %v2336_v15 }
 0x6b4   : > { %v1275_v15 = vsel %vm588_vm3, %v1270_v10, 0 }
 0x6b6   : > { %2219 = vmatpush3.bf16.xpose.msra.mxu0 %v1498_v63 }
 0x6bb   : > { %v2383_v0 = vpop.eup %2382 }
 0x6bc   : > { %v921_v3 = vsel %vm570_vm2, %v2383_v0, 0.0 }
 0x6bd   : > { %922 = vadd.xlane.f32.xlu1 %v921_v3 }
 0x731   : > { %v1195_v24 = vpop.f32.mrb[4].mxu0 }
 0x732   : > { %v2190_v25 = vpop.f32.mrb[5].mxu0  ;;  %1203 = vrot.lane.b32.xlu1 %v1195_v24, %s3047_s25  ;;  %v2365_v24 = vld [vmem:[%s3032_s5 + $0xb4] ss:$8 sps:$4 sm:$0xff]  }
 0x733   : > { %v1198_v27 = vpop.f32.mrb[6].mxu0 }
 0x734   : > { %v2191_v28 = vpop.f32.mrb[7].mxu0 }
 0x74a   : > { %v923_v18 = vpop.xlane.xlu1 %922 }
 0x74b   : > { %2384 = vrcp.f32 %v923_v18  ;;  %v2356_v18 = vld [vmem:[%s3032_s5 + $0x84] ss:$8 sps:$4 sm:$0xff]  }
 0x755   : > { %v2385_v11 = vpop.eup %2384 }
 0x756   : > { %v925_v12 = vmul.f32 %v2385_v11, %v2383_v0 }
 0x758   : > { %1939 = vst.msk [vmem:[%s2666_s10 + $0x8] sm:$0xff] %vm570_vm2, %v925_v12  ;;  %v928_v14 = vpack.c.bf16 %v925_v12, %v925_v12 }
 0x75a   : > { %2169 = vmatmul.mubr.msk.bf16.vlgmr.msra.gmra.mrb[20].mxu1 %vm570_vm2, %v928_v14 }
 0x75b   : > { %1032 = vmatpush1.bf16.msra.mxu1 %v2334_v13  ;;  %1063 = vmatprep.mubr.bf16.mxu1 %v2463_v2 }
 0x75c   : > { %1033 = vmatprep.subr.bf16.mxu1 %v2339_v16 }
 0x75f   : > { %1034 = vmatpush1.bf16.msra.mxu1 %v2337_v19  ;;  %v2359_v19 = vld [vmem:[%s3032_s5 + $0x94] ss:$8 sps:$4 sm:$0xff]  }
 0x760   : > { %1035 = vmatprep.subr.bf16.mxu1 %v2342_v20  ;;  %v2357_v20 = vld [vmem:[%s3032_s5 + $0x90] ss:$8 sps:$4 sm:$0xff]  }
 0x763   : > { %1036 = vmatpush1.bf16.msra.mxu1 %v2340_v21  ;;  %v2362_v21 = vld [vmem:[%s3032_s5 + $0xa4] ss:$8 sps:$4 sm:$0xff]  }
 0x764   : > { %1037 = vmatprep.subr.bf16.mxu1 %v2345_v22  ;;  %v2360_v22 = vld [vmem:[%s3032_s5 + $0xa0] ss:$8 sps:$4 sm:$0xff]  }
 0x767   : > { %1038 = vmatpush1.bf16.msra.mxu1 %v2343_v23  ;;  %v2363_v23 = vld [vmem:[%s3032_s5 + $0xb0] ss:$8 sps:$4 sm:$0xff]  }
 0x768   : > { %2192 = vmatprep.subr.bf16.mxu1 %v2458_v1 }
 0x7a4   : > { %v1204_v29 = vpop.permute.xlu1 %1203 }
 0x7a5   : > { %1206 = vrot.lane.b32.xlu0 %v1204_v29, %s3048_s23 }
 0x817   : > { %v1207_v26 = vpop.permute.xlu0 %1206 }
 0x82d   : > { %v972_v33 = vpop.f32.mrb[20].mxu1 }
 0x82e   : > { %v978_v34 = vpack.c.bf16 %v972_v33, %v972_v33  ;;  %v2170_v35 = vpop.f32.mrb[21].mxu1 }
 0x82f   : > { %v975_v37 = vpop.f32.mrb[22].mxu1 }
 0x830   : > { %v2171_v38 = vpop.f32.mrb[23].mxu1  ;;  %1957 = vmatmul.mubr.msk.bf16.vlgmr.msra.gmra.mrb[8].mxu1 %vm447_vm0, %v978_v34 }
 0x831   : > { %2193 = vmatpush3.bf16.xpose.msra.mxu1 %v1213_v36  ;;  %2194 = vmatprep.mubr.msk.bf16.mxu1 %vm2459_vm1, %v2458_v1 }
 0x832   : > { %2198 = vmatprep.subr.bf16.mxu1 %v2458_v1 }
 0x838   : > { %2195 = vmatmul.mubr.msk.bf16.vlgmr.msra.gmra.mrb[24].mxu1 %vm447_vm0, %v1091_v40 }
 0x839   : > { %2200 = vmatprep.mubr.msk.bf16.mxu1 %vm2459_vm1, %v2458_v1  ;;  %2199 = vmatpush3.bf16.msra.mxu1 %v1275_v15 }
 0x83a   : > { %1370 = vmatprep.subr.bf16.mxu1 %v2356_v18 }
 0x90b   : > { %v1249_v41 = vpop.f32.mrb[24].mxu1 }
 0x90c   : > { %v1250_v42 = vadd.f32 %v1249_v41, %v1207_v26  ;;  %v2196_v43 = vpop.f32.mrb[25].mxu1 }
 0x90d   : > { %v1252_v44 = vpop.f32.mrb[26].mxu1 }
 0x90e   : > { %v1255_v45 = vmul.f32 0.125, %v1250_v42  ;;  %v2197_v46 = vpop.f32.mrb[27].mxu1 }
 0x910   : > { %v1256_v47 = vsel %vm570_vm2, %v1255_v45, -inf }
 0x911   : > { %1257 = vmax.xlane.f32.xlu1 %v1256_v47 }
 0x922   : > { %1548 = vrot.lane.b32.xlu1 %v1092_v31, %s3049_s12 }
 0x926   : > { %1545 = vrot.lane.b32.xlu1 %v1091_v40, %s3049_s12 }
 0x99e   : > { %v1258_v0 = vpop.xlane.xlu1 %1257 }
 0x99f   : > { %v1259_v3 = vsub.f32 %v1255_v45, %v1258_v0 }
 0x9a1   : > { %v1260_v5 = vmul.f32 1.442695, %v1259_v3 }
 0x9a2   : > { %v1549_v30 = vpop.permute.xlu1 %1548 }
 0x9a3   : > { %2386 = vpow2.f32 %v1260_v5  ;;  %v1558_v33 = vsel %vm447_vm0, %v1549_v30, 0 }
 0x9a6   : > { %v1546_v37 = vpop.permute.xlu1 %1545 }
 0x9ad   : > { %v2387_v6 = vpop.eup %2386 }
 0x9ae   : > { %v1262_v7 = vsel %vm570_vm2, %v2387_v6, 0.0 }
 0x9af   : > { %1263 = vadd.xlane.f32.xlu0 %v1262_v7 }
 0x9c5   : > { %1431 = vrot.lane.b32.xlu0 %v2794_v8, %s3049_s12  ;;  %v2354_v8 = vld [vmem:[%s3032_s5 + $0x80] ss:$8 sps:$4 sm:$0xff]  }
 0xa3c   : > { %v1264_v11 = vpop.xlane.xlu0 %1263 }
 0xa3d   : > { %2388 = vrcp.f32 %v1264_v11 }
 0xa40   : > { %v1432_v12 = vpop.permute.xlu0 %1431 }
 0xa41   : > { %2221 = vmatmul.mubr.msk.bf16.vlgmr.msra.gmra.mrb[8].mxu0 %vm447_vm0, %v1432_v12 }
 0xa47   : > { %v2389_v13 = vpop.eup %2388 }
 0xa48   : > { %v1266_v14 = vmul.f32 %v2389_v13, %v2387_v6 }
 0xa4a   : > { %1984 = vst.msk [vmem:[%s2666_s10 + $0x10] sm:$0xff] %vm570_vm2, %v1266_v14  ;;  %v1269_v16 = vpack.c.bf16 %v1266_v14, %v1266_v14 }
 0xa4c   : > { %2201 = vmatmul.mubr.msk.bf16.vlgmr.msra.gmra.mrb[28].mxu1 %vm570_vm2, %v1269_v16 }
 0xa4d   : > { %1371 = vmatpush1.bf16.msra.mxu1 %v2354_v8  ;;  %1402 = vmatprep.mubr.bf16.mxu1 %v2463_v2 }
 0xa4e   : > { %1372 = vmatprep.subr.bf16.mxu1 %v2359_v19 }
 0xa51   : > { %1373 = vmatpush1.bf16.msra.mxu1 %v2357_v20 }
 0xa52   : > { %1374 = vmatprep.subr.bf16.mxu1 %v2362_v21 }
 0xa55   : > { %1375 = vmatpush1.bf16.msra.mxu1 %v2360_v22 }
 0xa56   : > { %1376 = vmatprep.subr.bf16.mxu1 %v2365_v24 }
 0xa59   : > { %1377 = vmatpush1.bf16.msra.mxu1 %v2363_v23 }
 0xa5a   : > { %2224 = vmatprep.subr.bf16.mxu1 %v2458_v1 }
 0xb14   : > { %v1534_v25 = vpop.f32.mrb[8].mxu0 }
 0xb15   : > { %v2222_v27 = vpop.f32.mrb[9].mxu0  ;;  %1542 = vrot.lane.b32.xlu0 %v1534_v25, %s3047_s25 }
 0xb16   : > { %v1537_v28 = vpop.f32.mrb[10].mxu0 }
 0xb17   : > { %v2223_v29 = vpop.f32.mrb[11].mxu0 }
 0xb1f   : > { %v1311_v31 = vpop.f32.mrb[28].mxu1 }
 0xb20   : > { %v1317_v32 = vpack.c.bf16 %v1311_v31, %v1311_v31  ;;  %v2202_v34 = vpop.f32.mrb[29].mxu1 }
 0xb21   : > { %v1314_v35 = vpop.f32.mrb[30].mxu1 }
 0xb22   : > { %v2203_v36 = vpop.f32.mrb[31].mxu1  ;;  %2002 = vmatmul.mubr.msk.bf16.vlgmr.msra.gmra.mrb[8].mxu1 %vm447_vm0, %v1317_v32 }
 0xb23   : > { %2225 = vmatpush3.bf16.xpose.msra.mxu1 %v1558_v33  ;;  %2226 = vmatprep.mubr.msk.bf16.mxu1 %vm2459_vm1, %v2458_v1 }
 0xb24   : > { %2230 = vmatprep.subr.bf16.mxu1 %v2458_v1 }
 0xb2a   : > { %2227 = vmatmul.mubr.msk.bf16.vlgmr.msra.gmra.mrb[32].mxu1 %vm447_vm0, %v1546_v37 }
 0xb2b   : > { %2232 = vmatprep.mubr.msk.bf16.mxu1 %vm2459_vm1, %v2458_v1 }
 0xb87   : > { %v1543_v38 = vpop.permute.xlu0 %1542 }
 0xb88   : > { %1551 = vrot.lane.b32.xlu1 %v1543_v38, %s3048_s23 }
 0xbfa   : > { %v1552_v39 = vpop.permute.xlu1 %1551 }
 0xbfd   : > { %v1594_v40 = vpop.f32.mrb[32].mxu1 }
 0xbfe   : > { %v1595_v26 = vadd.f32 %v1594_v40, %v1552_v39  ;;  %v2228_v41 = vpop.f32.mrb[33].mxu1 }
 0xbff   : > { %v1597_v42 = vpop.f32.mrb[34].mxu1 }
 0xc00   : > { %v1600_v43 = vmul.f32 0.125, %v1595_v26  ;;  %v2229_v44 = vpop.f32.mrb[35].mxu1 }
 0xc02   : > { %v1601_v45 = vsel %vm570_vm2, %v1600_v43, -inf }
 0xc03   : > { %1602 = vmax.xlane.f32.xlu0 %v1601_v45 }
 0xc19   : > { %1616 = vrot.lane.b32.xlu0 %v1270_v10, %s3049_s12 }
 0xc90   : > { %v1603_v46 = vpop.xlane.xlu0 %1602 }
 0xc91   : > { %v1604_v47 = vsub.f32 %v1600_v43, %v1603_v46 }
 0xc93   : > { %v1605_v48 = vmul.f32 1.442695, %v1604_v47 }
 0xc94   : > { %v1617_v50 = vpop.permute.xlu0 %1616 }
 0xc95   : > { %2390 = vpow2.f32 %v1605_v48  ;;  %v1622_v51 = vsel %vm588_vm3, %v1617_v50, 0 }
 0xc96   : > { %2231 = vmatpush3.bf16.msra.mxu1 %v1622_v51 }
 0xc97   : > { %1717 = vmatprep.subr.bf16.mxu1 %v2368_v52 }
 0xc9f   : > { %v2391_v1 = vpop.eup %2390 }
 0xca0   : > { %v1607_v49 = vsel %vm570_vm2, %v2391_v1, 0.0 }
 0xca1   : > { %1608 = vadd.xlane.f32.xlu1 %v1607_v49 }
 0xd2e   : > { %v1609_v53 = vpop.xlane.xlu1 %1608 }
 0xd2f   : > { %2392 = vrcp.f32 %v1609_v53 }
 0xd39   : > { %v2393_v54 = vpop.eup %2392 }
 0xd3a   : > { %v1611_v55 = vmul.f32 %v2393_v54, %v2391_v1 }
 0xd3c   : > { %2029 = vst.msk [vmem:[%s2666_s10 + $0x18] sm:$0xff] %vm570_vm2, %v1611_v55  ;;  %v1614_v57 = vpack.c.bf16 %v1611_v55, %v1611_v55  ;;  %s2398_s10 = sshll.u32 %s2464_s9, 4  ;;  %s2399_s10 = int_to_ptr.vmem [resolvable:$false] %s2398_s10 }
 0xd3d   : > { %s2400_s25 = scalar_lea.vmem %s2399_s10, 1024  ;;  %p2401_p0 = scmp.lt.s32.totalorder %s2970_s0, %s2399_s10 }
 0xd3e   : > { %2233 = vmatmul.mubr.msk.bf16.vlgmr.msra.gmra.mrb[36].mxu1 %vm570_vm2, %v1614_v57  ;;  %p2402_p1 = scmp.lt.s32.totalorder %s2400_s25, %s2394_s19 }
 0xd3f   : > { %1718 = vmatpush1.bf16.msra.mxu1 %v2366_v56  ;;  %1749 = vmatprep.mubr.bf16.mxu1 %v2463_v2  ;;  %v2375_v2 = vld [vmem:[%s3032_s5 + $0xf0] ss:$8 sps:$4 sm:$0xff]  }
 0xd40   : > { %1719 = vmatprep.subr.bf16.mxu1 %v2371_v58  ;;  %p2403_p2 = por %p2402_p1, %p2401_p0 }
 0xd42   : > { %p2404_p3 = pnand %p2403_p2, %p2397_p13 }
 0xd43   : > { %1720 = vmatpush1.bf16.msra.mxu1 %v2369_v59 }
 0xd44   : > { %1721 = vmatprep.subr.bf16.mxu1 %v2374_v60 }
 0xd47   : > { %1722 = vmatpush1.bf16.msra.mxu1 %v2372_v61 }
 0xd48   : > { %1723 = vmatprep.subr.bf16.mxu1 %v2377_v62 }
 0xd4b   : > { %1724 = vmatpush1.bf16.msra.mxu1 %v2375_v2 }
 0xe11   : > { %v1658_v63 = vpop.f32.mrb[36].mxu1 }
 0xe12   : > { %v1664_v0 = vpack.c.bf16 %v1658_v63, %v1658_v63  ;;  %v2234_v3 = vpop.f32.mrb[37].mxu1 }
 0xe13   : > { %v1661_v5 = vpop.f32.mrb[38].mxu1 }
 0xe14   : > { %v2235_v6 = vpop.f32.mrb[39].mxu1  ;;  %2047 = vmatmul.mubr.msk.bf16.vlgmr.msra.gmra.mrb[8].mxu1 %vm447_vm0, %v1664_v0 }
 0xe15   : > { %2407 = shalt.err (!%p2404_p3)
}
 0xe16   : > { %s2408_s23 = scalar_lea.hbm %s2968_s20, 512  ;;  %s2412_s21 = scalar_lea.hbm %s3035_s8, 1024 }
 0xe17   : > { %p2409_p4 = scmp.ne.s32.totalorder %s2968_s20, %s2408_s23  ;;  %p2413_p9 = scmp.lt.u32.totalorder %s2968_s20, %s3035_s8 }
 0xe18   : > { %p2414_p10 = scmp.lt.u32.totalorder %s2412_s21, %s2408_s23  ;;  %p2416_p12 = scmp.lt.u32.totalorder %s2408_s23, %s2968_s20 }
 0xe19   : > { %p2410_p7 = pnand %p2409_p4, %p2550_p5 }
 0xe1a   : > { %p2415_p11 = por %p2414_p10, %p2413_p9 }
 0xe1b   : > { %p2411_p8 = pneg %p2410_p7 }
 0xe1c   : > { %p2417_p13 = por %p2416_p12, %p2415_p11 }
 0xe1e   : > { %p2418_p0 = pnand %p2417_p13, %p2411_p8 }
 0xe20   : > { %2421 = shalt.err (!%p2418_p0)
}
 0xe21   : > { %s2465_s26 = smov 128   ;;  %s2466_s19 = smov 8   ;;  %v372_v7 = vld [vmem:[%s3033_s6] sm:$0x3] }
 0xe22   : > { %2251 = dma.vmem_to_hbm [thread:$0]  (%p2550_p5), %s2970_s0, 512, %s2968_s20, %s2974_s24, %s2465_s26, %s2465_s26, %s2466_s19   ;;  %v379_v9 = vrot.slane %v372_v7, %v2608_v17  ;;  %v383_v15 = vrot.slane %v372_v7, %v2789_v4 }
 0xe23   : > { %s2053_s9 = sshll.u32 %s2601_s18, 4 }
 0xe24   : > { %s331_s23 = scalar_lea.vmem %s3028_s1, %s2053_s9  ;;  %s336_s18 = scalar_lea.vmem %s3034_s7, %s2053_s9 }
 0xe25   : > { %v373_v10 = vld [vmem:[%s331_s23] sm:$0xff]  ;;  %v374_v18 = vld [vmem:[%s331_s23 + $0x8] sm:$0xff] }
 0xe26   : > { %v386_v11 = vadd.f32 %v379_v9, %v373_v10  ;;  %v387_v12 = vadd.f32 %v383_v15, %v374_v18 }
 0xee7   : > { %v1751_v13 = vpop.f32.mrb[8].mxu1 }
 0xee8   : > { %v2236_v14 = vadd.f32 %v1751_v13, %v386_v11  ;;  %v1753_v8 = vpop.f32.mrb[9].mxu1 }
 0xee9   : > { %v2237_v16 = vadd.f32 %v1753_v8, %v387_v12  ;;  %v1755_v19 = vpop.f32.mrb[10].mxu1 }
 0xeea   : > { %1760 = vst [vmem:[%s336_s18] sm:$0xff] %v2236_v14  ;;  %v1756_v20 = vpop.f32.mrb[11].mxu1 }
 0xeeb   : > { %1761 = vst [vmem:[%s336_s18 + $0x8] sm:$0xff] %v2237_v16 }
 0xeec PF: > { %p2257_p5 = scmp.ge.s32.totalorder %s2456_s30, 2  ;;  %s1807_s0 = sand.u32 1, %s2444_s27  }
 0xeed   : > { %s1808_s20 = scalar_lea.sflag [#allocation3], %s1807_s0 }
 0xeee   : > { %p2254_p1 = pnand %p2257_p5, %p2554_p6 }
 0xef0   : > { %2439 = dma.done.wait (!%p2254_p1), %s1808_s20, 512  }
 0xef1   : > { %2441 = vsyncadd (!%p2254_p1), %s1808_s20, 4294966784  ;;  %p19_p2 = scmp.ge.s32.totalorder %s2537_s11, 4   ;;  %s3051_s27 = smov %s2448_s28 }
 0xef2   : > { %s3052_s28 = smov %s2452_s29  ;;  %s3053_s29 = smov %s2548_s14 }
 0xef3   : > { %s3054_s30 = smov %s2537_s11  ;;  %21 = sbr.rel (!%p19_p2) target bundleno = 5 (0x5), region = 107 }
 0xefa   :  { %1813 = vsyncpa [#allocation3], 1 }
 0xefb   :  { %1815 = vsyncpa [#allocation3 + $0x1], 1 }

// kernel: encoder_forward.8
= control target key start
LH: loop header
LB: loop body
LE: loop exit
PB: predicated region body
PF: predicated region fallthrough
CT: control target
= control target key end

     0   :  { %s7820_s0 = inlined_call_operand.vmem [shape: f32[2,8,256], index: 0, kind: input, shape index: {}]   ;;  %s7821_s1 = inlined_call_operand.vmem [shape: bf16[3,256,256], index: 1, kind: input, shape index: {}]   ;;  %s7822_s2 = inlined_call_operand.hbm [shape: f32[1,256], index: 2, kind: input, shape index: {}]   ;;  %s7823_s3 = inlined_call_operand.hbm [shape: f32[1,256], index: 3, kind: input, shape index: {}]   ;;  %s7824_s4 = inlined_call_operand.hbm [shape: f32[1,256], index: 4, kind: input, shape index: {}]   ;;  %s7825_s5 = inlined_call_operand.hbm [shape: bf16[3,256,256], index: 5, kind: input, shape index: {}]   ;;  %s7826_s6 = inlined_call_operand.hbm [shape: f32[1,256], index: 6, kind: input, shape index: {}]   ;;  %s7827_s7 = inlined_call_operand.hbm [shape: f32[1,256], index: 7, kind: input, shape index: {}]   ;;  %s7828_s8 = inlined_call_operand.hbm [shape: f32[1,256], index: 8, kind: input, shape index: {}]   ;;  %s7829_s9 = inlined_call_operand.hbm [shape: bf16[3,256,256], index: 9, kind: input, shape index: {}]   ;;  %s7830_s10 = inlined_call_operand.hbm [shape: f32[1,256], index: 10, kind: input, shape index: {}]   ;;  %s7831_s11 = inlined_call_operand.hbm [shape: bf16[256,256], index: 11, kind: input, shape index: {}]   ;;  %s7832_s12 = inlined_call_operand.hbm [shape: f32[1,256], index: 12, kind: input, shape index: {}]   ;;  %s7833_s13 = inlined_call_operand.hbm [shape: f32[1,256], index: 13, kind: input, shape index: {}]   ;;  %s7834_s14 = inlined_call_operand.hbm [shape: f32[1,256], index: 14, kind: input, shape index: {}]   ;;  %s7835_s15 = inlined_call_operand.hbm [shape: bf16[256,256], index: 15, kind: input, shape index: {}]   ;;  %s7836_s16 = inlined_call_operand.hbm [shape: f32[1,256], index: 16, kind: input, shape index: {}]   ;;  %s7837_s17 = inlined_call_operand.hbm [shape: f32[1,256], index: 17, kind: input, shape index: {}]   ;;  %s7838_s18 = inlined_call_operand.hbm [shape: f32[1,256], index: 18, kind: input, shape index: {}]   ;;  %s7839_s19 = inlined_call_operand.hbm [shape: bf16[256,256], index: 19, kind: input, shape index: {}]   ;;  %s7840_s20 = inlined_call_operand.hbm [shape: f32[1,256], index: 20, kind: input, shape index: {}]   ;;  %s7841_s21 = inlined_call_operand.hbm [shape: bf16[256,256], index: 21, kind: input, shape index: {}]   ;;  %s7842_s22 = inlined_call_operand.hbm [shape: f32[1,256], index: 22, kind: input, shape index: {}]   ;;  %s7843_s23 = inlined_call_operand.vmem [shape: f32[2,8,256], index: 23, kind: output, shape index: {}]  }
   0x1   :  { %7862 = sst [smem:[#allocation48_spill]] %s7820_s0 }
   0x2   :  { %7863 = sst [smem:[#allocation49_spill]] %s7821_s1 }
   0x3   :  { %7864 = sst [smem:[#allocation50_spill]] %s7822_s2 }
   0x4   :  { %7865 = sst [smem:[#allocation51_spill]] %s7823_s3 }
   0x5   :  { %7866 = sst [smem:[#allocation52_spill]] %s7824_s4 }
   0x6   :  { %7867 = sst [smem:[#allocation53_spill]] %s7825_s5 }
   0x7   :  { %7868 = sst [smem:[#allocation54_spill]] %s7826_s6 }
   0x8   :  { %7869 = sst [smem:[#allocation55_spill]] %s7827_s7 }
   0x9   :  { %7870 = sst [smem:[#allocation56_spill]] %s7829_s9 }
   0xa   :  { %7871 = sst [smem:[#allocation57_spill]] %s7840_s20 }
   0xb   :  { %7872 = sst [smem:[#allocation58_spill]] %s7842_s22 }
   0xc   :  { %7873 = sst [smem:[#allocation59_spill]] %s7843_s23 }
   0xd   :  { %28 = vsyncpa [#allocation3], 0 }
   0xe   :  { %29 = vsyncpa [#allocation5], 0 }
   0xf   :  { %30 = vsyncpa [#allocation8], 0 }
  0x10   :  { %31 = vsyncpa [#allocation11], 0 }
  0x11   :  { %32 = vsyncpa [#allocation14], 0 }
  0x12   :  { %33 = vsyncpa [#allocation17], 0 }
  0x13   :  { %34 = vsyncpa [#allocation20], 0 }
  0x14   :  { %35 = vsyncpa [#allocation23], 0 }
  0x15   :  { %36 = vsyncpa [#allocation26], 0 }
  0x16   :  { %37 = vsyncpa [#allocation29], 0 }
  0x17   :  { %38 = vsyncpa [#allocation32], 0  ;;  %s6868_s4 = smov 0  }
  0x18 LB: > { %7874 = sst [smem:[#allocation45_spill]] %s6722_s4  ;;  %s6724_s30 = smov [#allocation4]   ;;  %s6722_s4 = sphi %s6868_s4, %s44_s4  }
  0x19   : > { %s590_s24 = sshll.u32 %s6724_s30, 4  ;;  %s6874_s25 = sadd.s32 4294967295, %s6722_s4   ;;  %s6879_s24 = int_to_ptr.vmem [resolvable:$true] %s590_s24 }
  0x1a   : > { %7875 = sst [smem:[#allocation46_spill]] %s6874_s25  ;;  %p4679_p0 = scmp.ge.s32.totalorder %s6722_s4, 1 }
  0x1b   : > { %p563_p1 = scmp.lt.s32.totalorder %s6722_s4, 3  ;;  %p7858_p2 = scmp.eq.s32.totalorder %s6874_s25, 0 }
  0x1c   : > { %s6725_s1 = smov [#allocation7]   ;;  %s6726_s6 = smov [#allocation10]  }
  0x1d   : > { %p6881_p3 = pnand %p4679_p0, %p563_p1  ;;  %s611_s26 = sshll.u32 %s6725_s1, 4  ;;  %s6887_s26 = int_to_ptr.vmem [resolvable:$true] %s611_s26 }
  0x1e   : > { %s636_s27 = sshll.u32 %s6726_s6, 4  ;;  %s6727_s7 = smov [#allocation13]   ;;  %s6895_s27 = int_to_ptr.vmem [resolvable:$true] %s636_s27 }
  0x1f   : > { %s7876_s5 = scalar_select %p6881_p3, 1, 0 }
  0x20   : > { %p5298_p4 = pneg %p6881_p3  ;;  %s6897_s28 = sshll.u32 %s6727_s7, 4  ;;  %s658_s28 = int_to_ptr.vmem [resolvable:$true] %s6897_s28 }
  0x21   : > { %7877 = sst [smem:[#allocation47_spill]] %s7876_s5  ;;  %s7879_s0 = sld [smem:[#allocation51_spill]] }
  0x22   : > { %p6891_p5 = pnand %p7858_p2, %p5298_p4 }
  0x24   : > { %p6907_p7 = pneg %p6891_p5 }
  0x27   : > { %s6084_s30 = scalar_lea.hbm %s7879_s0, 32 }
  0x28   : > { %p6085_p6 = scmp.ne.s32.totalorder %s7879_s0, %s6084_s30  ;;  %p6091_p10 = scmp.lt.u32.totalorder %s6084_s30, %s7879_s0 }
  0x2a   : > { %p6087_p8 = pnand %p6907_p7, %p6085_p6 }
  0x2c   : > { %p6088_p9 = pneg %p6087_p8 }
  0x2e   : > { %p6093_p11 = pnand %p6091_p10, %p6088_p9 }
  0x30   : > { %6096 = shalt.err (!%p6093_p11)
}
  0x31   : > { %s6097_s4 = scalar_lea.vmem %s6879_s24, 32  ;;  %p6105_p1 = scmp.lt.s32.totalorder %s6879_s24, %s6879_s24 }
  0x32   : > { %p6098_p12 = scmp.ne.s32.totalorder %s6879_s24, %s6097_s4  ;;  %p6106_p4 = scmp.lt.s32.totalorder %s6097_s4, %s6097_s4 }
  0x34   : > { %p6100_p13 = pnand %p6098_p12, %p6907_p7  ;;  %p6107_p6 = por %p6106_p4, %p6105_p1 }
  0x36   : > { %p6101_p0 = pneg %p6100_p13 }
  0x38   : > { %p6108_p8 = pnand %p6107_p6, %p6101_p0 }
  0x3a   : > { %6111 = shalt.err (!%p6108_p8)
}
  0x3b   : > { %5304 = dma.hbm_to_vmem [thread:$0]  (!%p6891_p5), %s7879_s0, 32, %s6879_s24, [#allocation5]  }
  0x3c   : > { %s7881_s6 = sld [smem:[#allocation53_spill]] }
  0x42   : > { %s6112_s7 = scalar_lea.hbm %s7881_s6, 12288 }
  0x43   : > { %p6113_p9 = scmp.ne.s32.totalorder %s7881_s6, %s6112_s7  ;;  %p6119_p12 = scmp.lt.u32.totalorder %s6112_s7, %s7881_s6 }
  0x45   : > { %p6115_p10 = pnand %p6113_p9, %p6907_p7 }
  0x47   : > { %p6116_p11 = pneg %p6115_p10 }
  0x49   : > { %p6121_p13 = pnand %p6119_p12, %p6116_p11 }
  0x4b   : > { %6124 = shalt.err (!%p6121_p13)
}
  0x4c   : > { %s6125_s24 = scalar_lea.vmem %s6887_s26, 12288  ;;  %p6133_p6 = scmp.lt.s32.totalorder %s6887_s26, %s6887_s26 }
  0x4d   : > { %p6126_p0 = scmp.ne.s32.totalorder %s6887_s26, %s6125_s24  ;;  %p6134_p8 = scmp.lt.s32.totalorder %s6125_s24, %s6125_s24 }
  0x4f   : > { %p6128_p1 = pnand %p6126_p0, %p6907_p7  ;;  %p6135_p9 = por %p6134_p8, %p6133_p6 }
  0x51   : > { %p6129_p4 = pneg %p6128_p1 }
  0x53   : > { %p6136_p10 = pnand %p6135_p9, %p6129_p4 }
  0x55   : > { %6139 = shalt.err (!%p6136_p10)
}
  0x56   : > { %s6728_s25 = smov 128   ;;  %s6729_s22 = smov 8  }
  0x57   : > { %5310 = dma.hbm_to_vmem [thread:$0]  (!%p6891_p5), %s7881_s6, 12288, %s6887_s26, [#allocation8], %s6728_s25, %s6728_s25, %s6729_s22  }
  0x58   : > { %s7882_s1 = sld [smem:[#allocation55_spill]] }
  0x5e   : > { %s6140_s7 = scalar_lea.hbm %s7882_s1, 32 }
  0x5f   : > { %p6141_p11 = scmp.ne.s32.totalorder %s7882_s1, %s6140_s7  ;;  %p6147_p0 = scmp.lt.u32.totalorder %s6140_s7, %s7882_s1 }
  0x61   : > { %p6143_p12 = pnand %p6141_p11, %p6907_p7 }
  0x63   : > { %p6144_p13 = pneg %p6143_p12 }
  0x65   : > { %p6149_p1 = pnand %p6147_p0, %p6144_p13 }
  0x67   : > { %6152 = shalt.err (!%p6149_p1)
}
  0x68   : > { %s6153_s26 = scalar_lea.vmem %s6895_s27, 32  ;;  %p6161_p9 = scmp.lt.s32.totalorder %s6895_s27, %s6895_s27 }
  0x69   : > { %p6154_p4 = scmp.ne.s32.totalorder %s6895_s27, %s6153_s26  ;;  %p6162_p10 = scmp.lt.s32.totalorder %s6153_s26, %s6153_s26 }
  0x6b   : > { %p6156_p6 = pnand %p6154_p4, %p6907_p7  ;;  %p6163_p11 = por %p6162_p10, %p6161_p9 }
  0x6d   : > { %p6157_p8 = pneg %p6156_p6 }
  0x6f   : > { %p6164_p12 = pnand %p6163_p11, %p6157_p8 }
  0x71   : > { %6167 = shalt.err (!%p6164_p12)
}
  0x72   : > { %5316 = dma.hbm_to_vmem [thread:$0]  (!%p6891_p5), %s7882_s1, 32, %s6895_s27, [#allocation11]  }
  0x73   : > { %s7883_s9 = sld [smem:[#allocation56_spill]] }
  0x79   : > { %s6168_s3 = scalar_lea.hbm %s7883_s9, 12288 }
  0x7a   : > { %p6169_p13 = scmp.ne.s32.totalorder %s7883_s9, %s6168_s3  ;;  %p6175_p4 = scmp.lt.u32.totalorder %s6168_s3, %s7883_s9 }
  0x7c   : > { %p6171_p0 = pnand %p6169_p13, %p6907_p7 }
  0x7e   : > { %p6172_p1 = pneg %p6171_p0 }
  0x80   : > { %p6177_p6 = pnand %p6175_p4, %p6172_p1 }
  0x82   : > { %6180 = shalt.err (!%p6177_p6)
}
  0x83   : > { %s6181_s26 = scalar_lea.vmem %s658_s28, 12288  ;;  %p6189_p11 = scmp.lt.s32.totalorder %s658_s28, %s658_s28 }
  0x84   : > { %p6182_p8 = scmp.ne.s32.totalorder %s658_s28, %s6181_s26  ;;  %p6190_p12 = scmp.lt.s32.totalorder %s6181_s26, %s6181_s26 }
  0x86   : > { %p6184_p9 = pnand %p6182_p8, %p6907_p7  ;;  %p6191_p2 = por %p6190_p12, %p6189_p11 }
  0x88   : > { %p6185_p10 = pneg %p6184_p9 }
  0x8a   : > { %p6192_p3 = pnand %p6191_p2, %p6185_p10 }
  0x8c   : > { %6195 = shalt.err (!%p6192_p3)
}
  0x8d   : > { %5322 = dma.hbm_to_vmem [thread:$0]  (!%p6891_p5), %s7883_s9, 12288, %s658_s28, [#allocation14], %s6728_s25, %s6728_s25, %s6729_s22  }
  0x8e   : > { %s6730_s0 = smov [#allocation16]   ;;  %s6731_s29 = smov [#allocation19]  }
  0x8f   : > { %s681_s5 = sshll.u32 %s6730_s0, 4  ;;  %s706_s3 = sshll.u32 %s6731_s29, 4  ;;  %s682_s5 = int_to_ptr.vmem [resolvable:$true] %s681_s5  ;;  %s707_s3 = int_to_ptr.vmem [resolvable:$true] %s706_s3 }
  0x90   : > { %s6196_s4 = scalar_lea.hbm %s7831_s11, 4096 }
  0x91   : > { %p6197_p2 = scmp.ne.s32.totalorder %s7831_s11, %s6196_s4  ;;  %p6203_p0 = scmp.lt.u32.totalorder %s6196_s4, %s7831_s11 }
  0x93   : > { %p6199_p3 = pnand %p6197_p2, %p6907_p7 }
  0x95   : > { %p6200_p13 = pneg %p6199_p3 }
  0x97   : > { %p6205_p1 = pnand %p6203_p0, %p6200_p13 }
  0x99   : > { %6208 = shalt.err (!%p6205_p1)
}
  0x9a   : > { %s6209_s28 = scalar_lea.vmem %s682_s5, 4096  ;;  %p6217_p9 = scmp.lt.s32.totalorder %s682_s5, %s682_s5 }
  0x9b   : > { %p6210_p4 = scmp.ne.s32.totalorder %s682_s5, %s6209_s28  ;;  %p6218_p10 = scmp.lt.s32.totalorder %s6209_s28, %s6209_s28 }
  0x9d   : > { %p6212_p6 = pnand %p6210_p4, %p6907_p7  ;;  %p6219_p11 = por %p6218_p10, %p6217_p9 }
  0x9f   : > { %p6213_p8 = pneg %p6212_p6 }
  0xa1   : > { %p6220_p12 = pnand %p6219_p11, %p6213_p8 }
  0xa3   : > { %6223 = shalt.err (!%p6220_p12)
}
  0xa4   : > { %5328 = dma.hbm_to_vmem [thread:$0]  (!%p6891_p5), %s7831_s11, 4096, %s682_s5, [#allocation17], %s6728_s25, %s6728_s25, %s6729_s22  }
  0xa5   : > { %s6224_s30 = scalar_lea.hbm %s7833_s13, 32 }
  0xa6   : > { %p6225_p2 = scmp.ne.s32.totalorder %s7833_s13, %s6224_s30  ;;  %p6231_p0 = scmp.lt.u32.totalorder %s6224_s30, %s7833_s13 }
  0xa8   : > { %p6227_p3 = pnand %p6225_p2, %p6907_p7 }
  0xaa   : > { %p6228_p13 = pneg %p6227_p3 }
  0xac   : > { %p6233_p1 = pnand %p6231_p0, %p6228_p13 }
  0xae   : > { %6236 = shalt.err (!%p6233_p1)
}
  0xaf   : > { %s6237_s27 = scalar_lea.vmem %s707_s3, 32  ;;  %p6245_p9 = scmp.lt.s32.totalorder %s707_s3, %s707_s3 }
  0xb0   : > { %p6238_p4 = scmp.ne.s32.totalorder %s707_s3, %s6237_s27  ;;  %p6246_p10 = scmp.lt.s32.totalorder %s6237_s27, %s6237_s27 }
  0xb2   : > { %p6240_p6 = pnand %p6238_p4, %p6907_p7  ;;  %p6247_p11 = por %p6246_p10, %p6245_p9 }
  0xb4   : > { %p6241_p8 = pneg %p6240_p6 }
  0xb6   : > { %p6248_p12 = pnand %p6247_p11, %p6241_p8 }
  0xb8   : > { %6251 = shalt.err (!%p6248_p12)
}
  0xb9   : > { %5334 = dma.hbm_to_vmem [thread:$0]  (!%p6891_p5), %s7833_s13, 32, %s707_s3, [#allocation20]  }
  0xba   : > { %s6732_s1 = smov [#allocation22]   ;;  %s6733_s0 = smov [#allocation25]  }
  0xbb   : > { %s727_s20 = sshll.u32 %s6732_s1, 4  ;;  %s752_s29 = sshll.u32 %s6733_s0, 4  ;;  %s728_s20 = int_to_ptr.vmem [resolvable:$true] %s727_s20  ;;  %s753_s29 = int_to_ptr.vmem [resolvable:$true] %s752_s29 }
  0xbc   : > { %s6252_s4 = scalar_lea.hbm %s7835_s15, 4096 }
  0xbd   : > { %p6253_p2 = scmp.ne.s32.totalorder %s7835_s15, %s6252_s4  ;;  %p6259_p0 = scmp.lt.u32.totalorder %s6252_s4, %s7835_s15 }
  0xbf   : > { %p6255_p3 = pnand %p6253_p2, %p6907_p7 }
  0xc1   : > { %p6256_p13 = pneg %p6255_p3 }
  0xc3   : > { %p6261_p1 = pnand %p6259_p0, %p6256_p13 }
  0xc5   : > { %6264 = shalt.err (!%p6261_p1)
}
  0xc6   : > { %s6265_s3 = scalar_lea.vmem %s728_s20, 4096  ;;  %p6273_p9 = scmp.lt.s32.totalorder %s728_s20, %s728_s20 }
  0xc7   : > { %p6266_p4 = scmp.ne.s32.totalorder %s728_s20, %s6265_s3  ;;  %p6274_p10 = scmp.lt.s32.totalorder %s6265_s3, %s6265_s3 }
  0xc9   : > { %p6268_p6 = pnand %p6266_p4, %p6907_p7  ;;  %p6275_p11 = por %p6274_p10, %p6273_p9 }
  0xcb   : > { %p6269_p8 = pneg %p6268_p6 }
  0xcd   : > { %p6276_p12 = pnand %p6275_p11, %p6269_p8 }
  0xcf   : > { %6279 = shalt.err (!%p6276_p12)
}
  0xd0   : > { %5340 = dma.hbm_to_vmem [thread:$0]  (!%p6891_p5), %s7835_s15, 4096, %s728_s20, [#allocation23], %s6728_s25, %s6728_s25, %s6729_s22  }
  0xd1   : > { %s6280_s7 = scalar_lea.hbm %s7837_s17, 32 }
  0xd2   : > { %p6281_p2 = scmp.ne.s32.totalorder %s7837_s17, %s6280_s7  ;;  %p6287_p0 = scmp.lt.u32.totalorder %s6280_s7, %s7837_s17 }
  0xd4   : > { %p6283_p3 = pnand %p6281_p2, %p6907_p7 }
  0xd6   : > { %p6284_p13 = pneg %p6283_p3 }
  0xd8   : > { %p6289_p1 = pnand %p6287_p0, %p6284_p13 }
  0xda   : > { %6292 = shalt.err (!%p6289_p1)
}
  0xdb   : > { %s6293_s5 = scalar_lea.vmem %s753_s29, 32  ;;  %p6301_p9 = scmp.lt.s32.totalorder %s753_s29, %s753_s29 }
  0xdc   : > { %p6294_p4 = scmp.ne.s32.totalorder %s753_s29, %s6293_s5  ;;  %p6302_p10 = scmp.lt.s32.totalorder %s6293_s5, %s6293_s5 }
  0xde   : > { %p6296_p6 = pnand %p6294_p4, %p6907_p7  ;;  %p6303_p11 = por %p6302_p10, %p6301_p9 }
  0xe0   : > { %p6297_p8 = pneg %p6296_p6 }
  0xe2   : > { %p6304_p12 = pnand %p6303_p11, %p6297_p8 }
  0xe4   : > { %6307 = shalt.err (!%p6304_p12)
}
  0xe5   : > { %5346 = dma.hbm_to_vmem [thread:$0]  (!%p6891_p5), %s7837_s17, 32, %s753_s29, [#allocation26]  }
  0xe6   : > { %s6734_s28 = smov [#allocation28]   ;;  %s6735_s0 = smov [#allocation31]  }
  0xe7   : > { %s773_s1 = sshll.u32 %s6734_s28, 4  ;;  %s797_s30 = sshll.u32 %s6735_s0, 4  ;;  %s774_s1 = int_to_ptr.vmem [resolvable:$true] %s773_s1  ;;  %s798_s30 = int_to_ptr.vmem [resolvable:$true] %s797_s30 }
  0xe8   : > { %s6308_s24 = scalar_lea.hbm %s7839_s19, 4096 }
  0xe9   : > { %p6309_p2 = scmp.ne.s32.totalorder %s7839_s19, %s6308_s24  ;;  %p6315_p0 = scmp.lt.u32.totalorder %s6308_s24, %s7839_s19 }
  0xeb   : > { %p6311_p3 = pnand %p6309_p2, %p6907_p7 }
  0xed   : > { %p6312_p13 = pneg %p6311_p3 }
  0xef   : > { %p6317_p1 = pnand %p6315_p0, %p6312_p13 }
  0xf1   : > { %6320 = shalt.err (!%p6317_p1)
}
  0xf2   : > { %s6321_s29 = scalar_lea.vmem %s774_s1, 4096  ;;  %p6329_p9 = scmp.lt.s32.totalorder %s774_s1, %s774_s1 }
  0xf3   : > { %p6322_p4 = scmp.ne.s32.totalorder %s774_s1, %s6321_s29  ;;  %p6330_p10 = scmp.lt.s32.totalorder %s6321_s29, %s6321_s29 }
  0xf5   : > { %p6324_p6 = pnand %p6322_p4, %p6907_p7  ;;  %p6331_p11 = por %p6330_p10, %p6329_p9 }
  0xf7   : > { %p6325_p8 = pneg %p6324_p6 }
  0xf9   : > { %p6332_p12 = pnand %p6331_p11, %p6325_p8 }
  0xfb   : > { %6335 = shalt.err (!%p6332_p12)
}
  0xfc   : > { %5352 = dma.hbm_to_vmem [thread:$0]  (!%p6891_p5), %s7839_s19, 4096, %s774_s1, [#allocation29], %s6728_s25, %s6728_s25, %s6729_s22  }
  0xfd   : > { %s6336_s4 = scalar_lea.hbm %s7841_s21, 4096 }
  0xfe   : > { %p6337_p2 = scmp.ne.s32.totalorder %s7841_s21, %s6336_s4  ;;  %p6343_p0 = scmp.lt.u32.totalorder %s6336_s4, %s7841_s21 }
 0x100   : > { %p6339_p3 = pnand %p6337_p2, %p6907_p7 }
 0x102   : > { %p6340_p13 = pneg %p6339_p3 }
 0x104   : > { %p6345_p1 = pnand %p6343_p0, %p6340_p13 }
 0x106   : > { %6348 = shalt.err (!%p6345_p1)
}
 0x107   : > { %s6349_s20 = scalar_lea.vmem %s798_s30, 4096  ;;  %p6357_p9 = scmp.lt.s32.totalorder %s798_s30, %s798_s30 }
 0x108   : > { %p6350_p4 = scmp.ne.s32.totalorder %s798_s30, %s6349_s20  ;;  %p6358_p10 = scmp.lt.s32.totalorder %s6349_s20, %s6349_s20 }
 0x10a   : > { %p6352_p6 = pnand %p6350_p4, %p6907_p7  ;;  %p6359_p11 = por %p6358_p10, %p6357_p9 }
 0x10c   : > { %p6353_p8 = pneg %p6352_p6 }
 0x10e   : > { %p6360_p12 = pnand %p6359_p11, %p6353_p8 }
 0x110   : > { %6363 = shalt.err (!%p6360_p12)
}
 0x111   : > { %5358 = dma.hbm_to_vmem [thread:$0]  (!%p6891_p5), %s7841_s21, 4096, %s798_s30, [#allocation32], %s6728_s25, %s6728_s25, %s6729_s22  }
 0x112   : > { %s6736_s3 = smov [#allocation2]   ;;  %s6737_s0 = smov [#allocation6]  }
 0x113   : > { %s579_s28 = sshll.u32 %s6736_s3, 4  ;;  %s601_s7 = sshll.u32 %s6737_s0, 4  ;;  %s580_s28 = int_to_ptr.vmem [resolvable:$true] %s579_s28  ;;  %s602_s7 = int_to_ptr.vmem [resolvable:$true] %s601_s7 }
 0x114   : > { %s7884_s26 = sld [smem:[#allocation50_spill]] }
 0x11a   : > { %s6364_s27 = scalar_lea.hbm %s7884_s26, 32 }
 0x11b   : > { %p6365_p2 = scmp.ne.s32.totalorder %s7884_s26, %s6364_s27  ;;  %p6371_p0 = scmp.lt.u32.totalorder %s6364_s27, %s7884_s26 }
 0x11d   : > { %p6367_p3 = pnand %p6365_p2, %p6907_p7 }
 0x11f   : > { %p6368_p13 = pneg %p6367_p3 }
 0x121   : > { %p6373_p1 = pnand %p6371_p0, %p6368_p13 }
 0x123   : > { %6376 = shalt.err (!%p6373_p1)
}
 0x124   : > { %s6377_s25 = scalar_lea.vmem %s580_s28, 32  ;;  %p6385_p9 = scmp.lt.s32.totalorder %s580_s28, %s580_s28 }
 0x125   : > { %p6378_p4 = scmp.ne.s32.totalorder %s580_s28, %s6377_s25  ;;  %p6386_p10 = scmp.lt.s32.totalorder %s6377_s25, %s6377_s25 }
 0x127   : > { %p6380_p6 = pnand %p6378_p4, %p6907_p7  ;;  %p6387_p11 = por %p6386_p10, %p6385_p9 }
 0x129   : > { %p6381_p8 = pneg %p6380_p6 }
 0x12b   : > { %p6388_p12 = pnand %p6387_p11, %p6381_p8 }
 0x12d   : > { %6391 = shalt.err (!%p6388_p12)
}
 0x12e   : > { %5301 = dma.hbm_to_vmem [thread:$0]  (!%p6891_p5), %s7884_s26, 32, %s580_s28, [#allocation3]  }
 0x12f   : > { %s7885_s3 = sld [smem:[#allocation52_spill]] }
 0x135   : > { %s6392_s0 = scalar_lea.hbm %s7885_s3, 32 }
 0x136   : > { %p6393_p2 = scmp.ne.s32.totalorder %s7885_s3, %s6392_s0  ;;  %p6399_p0 = scmp.lt.u32.totalorder %s6392_s0, %s7885_s3 }
 0x138   : > { %p6395_p3 = pnand %p6393_p2, %p6907_p7 }
 0x13a   : > { %p6396_p13 = pneg %p6395_p3 }
 0x13c   : > { %p6401_p1 = pnand %p6399_p0, %p6396_p13 }
 0x13e   : > { %6404 = shalt.err (!%p6401_p1)
}
 0x13f   : > { %s6405_s20 = scalar_lea.vmem %s602_s7, 32  ;;  %p6413_p9 = scmp.lt.s32.totalorder %s602_s7, %s602_s7 }
 0x140   : > { %p6406_p4 = scmp.ne.s32.totalorder %s602_s7, %s6405_s20  ;;  %p6414_p10 = scmp.lt.s32.totalorder %s6405_s20, %s6405_s20 }
 0x142   : > { %p6408_p6 = pnand %p6406_p4, %p6907_p7  ;;  %p6415_p11 = por %p6414_p10, %p6413_p9 }
 0x144   : > { %p6409_p8 = pneg %p6408_p6 }
 0x146   : > { %p6416_p12 = pnand %p6415_p11, %p6409_p8 }
 0x148   : > { %6419 = shalt.err (!%p6416_p12)
}
 0x149   : > { %5307 = dma.hbm_to_vmem [thread:$0]  (!%p6891_p5), %s7885_s3, 32, %s602_s7, [#allocation5]  }
 0x14a   : > { %s6738_s25 = smov [#allocation9]   ;;  %s6739_s30 = smov [#allocation12]  }
 0x14b   : > { %s625_s22 = sshll.u32 %s6738_s25, 4  ;;  %s647_s6 = sshll.u32 %s6739_s30, 4  ;;  %s626_s22 = int_to_ptr.vmem [resolvable:$true] %s625_s22  ;;  %s648_s6 = int_to_ptr.vmem [resolvable:$true] %s647_s6 }
 0x14c   : > { %s7886_s4 = sld [smem:[#allocation54_spill]] }
 0x152   : > { %s7887_s24 = smov %s7886_s4  ;;  %s6420_s27 = scalar_lea.hbm %s7886_s4, 32 }
 0x153   : > { %p6421_p2 = scmp.ne.s32.totalorder %s7887_s24, %s6420_s27  ;;  %p6427_p0 = scmp.lt.u32.totalorder %s6420_s27, %s7887_s24 }
 0x155   : > { %p6423_p3 = pnand %p6421_p2, %p6907_p7 }
 0x157   : > { %p6424_p13 = pneg %p6423_p3 }
 0x159   : > { %p6429_p1 = pnand %p6427_p0, %p6424_p13 }
 0x15b   : > { %6432 = shalt.err (!%p6429_p1)
}
 0x15c   : > { %s6433_s7 = scalar_lea.vmem %s626_s22, 32  ;;  %p6441_p9 = scmp.lt.s32.totalorder %s626_s22, %s626_s22 }
 0x15d   : > { %p6434_p4 = scmp.ne.s32.totalorder %s626_s22, %s6433_s7  ;;  %p6442_p10 = scmp.lt.s32.totalorder %s6433_s7, %s6433_s7 }
 0x15f   : > { %p6436_p6 = pnand %p6434_p4, %p6907_p7  ;;  %p6443_p11 = por %p6442_p10, %p6441_p9 }
 0x161   : > { %p6437_p8 = pneg %p6436_p6 }
 0x163   : > { %p6444_p12 = pnand %p6443_p11, %p6437_p8 }
 0x165   : > { %6447 = shalt.err (!%p6444_p12)
}
 0x166   : > { %5313 = dma.hbm_to_vmem [thread:$0]  (!%p6891_p5), %s7887_s24, 32, %s626_s22, [#allocation8]  }
 0x167   : > { %s6448_s29 = scalar_lea.hbm %s7828_s8, 32 }
 0x168   : > { %p6449_p2 = scmp.ne.s32.totalorder %s7828_s8, %s6448_s29  ;;  %p6455_p0 = scmp.lt.u32.totalorder %s6448_s29, %s7828_s8 }
 0x16a   : > { %p6451_p3 = pnand %p6449_p2, %p6907_p7 }
 0x16c   : > { %p6452_p13 = pneg %p6451_p3 }
 0x16e   : > { %p6457_p1 = pnand %p6455_p0, %p6452_p13 }
 0x170   : > { %6460 = shalt.err (!%p6457_p1)
}
 0x171   : > { %s6461_s20 = scalar_lea.vmem %s648_s6, 32  ;;  %p6469_p9 = scmp.lt.s32.totalorder %s648_s6, %s648_s6 }
 0x172   : > { %p6462_p4 = scmp.ne.s32.totalorder %s648_s6, %s6461_s20  ;;  %p6470_p10 = scmp.lt.s32.totalorder %s6461_s20, %s6461_s20 }
 0x174   : > { %p6464_p6 = pnand %p6462_p4, %p6907_p7  ;;  %p6471_p11 = por %p6470_p10, %p6469_p9 }
 0x176   : > { %p6465_p8 = pneg %p6464_p6 }
 0x178   : > { %p6472_p12 = pnand %p6471_p11, %p6465_p8 }
 0x17a   : > { %6475 = shalt.err (!%p6472_p12)
}
 0x17b   : > { %5319 = dma.hbm_to_vmem [thread:$0]  (!%p6891_p5), %s7828_s8, 32, %s648_s6, [#allocation11]  }
 0x17c   : > { %s6740_s7 = smov [#allocation15]   ;;  %s6741_s25 = smov [#allocation18]  }
 0x17d   : > { %s671_s1 = sshll.u32 %s6740_s7, 4  ;;  %s695_s9 = sshll.u32 %s6741_s25, 4  ;;  %s672_s1 = int_to_ptr.vmem [resolvable:$true] %s671_s1  ;;  %s696_s9 = int_to_ptr.vmem [resolvable:$true] %s695_s9 }
 0x17e   : > { %s6476_s0 = scalar_lea.hbm %s7830_s10, 32 }
 0x17f   : > { %p6477_p2 = scmp.ne.s32.totalorder %s7830_s10, %s6476_s0  ;;  %p6483_p0 = scmp.lt.u32.totalorder %s6476_s0, %s7830_s10 }
 0x181   : > { %p6479_p3 = pnand %p6477_p2, %p6907_p7 }
 0x183   : > { %p6480_p13 = pneg %p6479_p3 }
 0x185   : > { %p6485_p1 = pnand %p6483_p0, %p6480_p13 }
 0x187   : > { %6488 = shalt.err (!%p6485_p1)
}
 0x188   : > { %s6489_s6 = scalar_lea.vmem %s672_s1, 32  ;;  %p6497_p9 = scmp.lt.s32.totalorder %s672_s1, %s672_s1 }
 0x189   : > { %p6490_p4 = scmp.ne.s32.totalorder %s672_s1, %s6489_s6  ;;  %p6498_p10 = scmp.lt.s32.totalorder %s6489_s6, %s6489_s6 }
 0x18b   : > { %p6492_p6 = pnand %p6490_p4, %p6907_p7  ;;  %p6499_p11 = por %p6498_p10, %p6497_p9 }
 0x18d   : > { %p6493_p8 = pneg %p6492_p6 }
 0x18f   : > { %p6500_p12 = pnand %p6499_p11, %p6493_p8 }
 0x191   : > { %6503 = shalt.err (!%p6500_p12)
}
 0x192   : > { %5325 = dma.hbm_to_vmem [thread:$0]  (!%p6891_p5), %s7830_s10, 32, %s672_s1, [#allocation14]  }
 0x193   : > { %s6504_s30 = scalar_lea.hbm %s7832_s12, 32 }
 0x194   : > { %p6505_p2 = scmp.ne.s32.totalorder %s7832_s12, %s6504_s30  ;;  %p6511_p0 = scmp.lt.u32.totalorder %s6504_s30, %s7832_s12 }
 0x196   : > { %p6507_p3 = pnand %p6505_p2, %p6907_p7 }
 0x198   : > { %p6508_p13 = pneg %p6507_p3 }
 0x19a   : > { %p6513_p1 = pnand %p6511_p0, %p6508_p13 }
 0x19c   : > { %6516 = shalt.err (!%p6513_p1)
}
 0x19d   : > { %s6517_s5 = scalar_lea.vmem %s696_s9, 32  ;;  %p6525_p9 = scmp.lt.s32.totalorder %s696_s9, %s696_s9 }
 0x19e   : > { %p6518_p4 = scmp.ne.s32.totalorder %s696_s9, %s6517_s5  ;;  %p6526_p10 = scmp.lt.s32.totalorder %s6517_s5, %s6517_s5 }
 0x1a0   : > { %p6520_p6 = pnand %p6518_p4, %p6907_p7  ;;  %p6527_p11 = por %p6526_p10, %p6525_p9 }
 0x1a2   : > { %p6521_p8 = pneg %p6520_p6 }
 0x1a4   : > { %p6528_p12 = pnand %p6527_p11, %p6521_p8 }
 0x1a6   : > { %6531 = shalt.err (!%p6528_p12)
}
 0x1a7   : > { %5331 = dma.hbm_to_vmem [thread:$0]  (!%p6891_p5), %s7832_s12, 32, %s696_s9, [#allocation17]  }
 0x1a8   : > { %s6742_s6 = smov [#allocation21]   ;;  %s6743_s28 = smov [#allocation24]  }
 0x1a9   : > { %s717_s22 = sshll.u32 %s6742_s6, 4  ;;  %s741_s7 = sshll.u32 %s6743_s28, 4  ;;  %s718_s22 = int_to_ptr.vmem [resolvable:$true] %s717_s22  ;;  %s742_s7 = int_to_ptr.vmem [resolvable:$true] %s741_s7 }
 0x1aa   : > { %s6532_s29 = scalar_lea.hbm %s7834_s14, 32 }
 0x1ab   : > { %p6533_p2 = scmp.ne.s32.totalorder %s7834_s14, %s6532_s29  ;;  %p6539_p0 = scmp.lt.u32.totalorder %s6532_s29, %s7834_s14 }
 0x1ad   : > { %p6535_p3 = pnand %p6533_p2, %p6907_p7 }
 0x1af   : > { %p6536_p13 = pneg %p6535_p3 }
 0x1b1   : > { %p6541_p1 = pnand %p6539_p0, %p6536_p13 }
 0x1b3   : > { %6544 = shalt.err (!%p6541_p1)
}
 0x1b4   : > { %s6545_s9 = scalar_lea.vmem %s718_s22, 32  ;;  %p6553_p9 = scmp.lt.s32.totalorder %s718_s22, %s718_s22 }
 0x1b5   : > { %p6546_p4 = scmp.ne.s32.totalorder %s718_s22, %s6545_s9  ;;  %p6554_p10 = scmp.lt.s32.totalorder %s6545_s9, %s6545_s9 }
 0x1b7   : > { %p6548_p6 = pnand %p6546_p4, %p6907_p7  ;;  %p6555_p11 = por %p6554_p10, %p6553_p9 }
 0x1b9   : > { %p6549_p8 = pneg %p6548_p6 }
 0x1bb   : > { %p6556_p12 = pnand %p6555_p11, %p6549_p8 }
 0x1bd   : > { %6559 = shalt.err (!%p6556_p12)
}
 0x1be   : > { %5337 = dma.hbm_to_vmem [thread:$0]  (!%p6891_p5), %s7834_s14, 32, %s718_s22, [#allocation20]  }
 0x1bf   : > { %s6560_s25 = scalar_lea.hbm %s7836_s16, 32 }
 0x1c0   : > { %p6561_p2 = scmp.ne.s32.totalorder %s7836_s16, %s6560_s25  ;;  %p6567_p0 = scmp.lt.u32.totalorder %s6560_s25, %s7836_s16 }
 0x1c2   : > { %p6563_p3 = pnand %p6561_p2, %p6907_p7 }
 0x1c4   : > { %p6564_p13 = pneg %p6563_p3 }
 0x1c6   : > { %p6569_p1 = pnand %p6567_p0, %p6564_p13 }
 0x1c8   : > { %6572 = shalt.err (!%p6569_p1)
}
 0x1c9   : > { %s6573_s27 = scalar_lea.vmem %s742_s7, 32  ;;  %p6581_p9 = scmp.lt.s32.totalorder %s742_s7, %s742_s7 }
 0x1ca   : > { %p6574_p4 = scmp.ne.s32.totalorder %s742_s7, %s6573_s27  ;;  %p6582_p10 = scmp.lt.s32.totalorder %s6573_s27, %s6573_s27 }
 0x1cc   : > { %p6576_p6 = pnand %p6574_p4, %p6907_p7  ;;  %p6583_p11 = por %p6582_p10, %p6581_p9 }
 0x1ce   : > { %p6577_p8 = pneg %p6576_p6 }
 0x1d0   : > { %p6584_p12 = pnand %p6583_p11, %p6577_p8 }
 0x1d2   : > { %6587 = shalt.err (!%p6584_p12)
}
 0x1d3   : > { %5343 = dma.hbm_to_vmem [thread:$0]  (!%p6891_p5), %s7836_s16, 32, %s742_s7, [#allocation23]  }
 0x1d4   : > { %s6744_s9 = smov [#allocation27]   ;;  %s6745_s20 = smov [#allocation30]  }
 0x1d5   : > { %s763_s1 = sshll.u32 %s6744_s9, 4  ;;  %s787_s6 = sshll.u32 %s6745_s20, 4  ;;  %s764_s1 = int_to_ptr.vmem [resolvable:$true] %s763_s1  ;;  %s788_s6 = int_to_ptr.vmem [resolvable:$true] %s787_s6 }
 0x1d6   : > { %s6588_s30 = scalar_lea.hbm %s7838_s18, 32 }
 0x1d7   : > { %p6589_p2 = scmp.ne.s32.totalorder %s7838_s18, %s6588_s30  ;;  %p6595_p0 = scmp.lt.u32.totalorder %s6588_s30, %s7838_s18 }
 0x1d9   : > { %p6591_p3 = pnand %p6589_p2, %p6907_p7 }
 0x1db   : > { %p6592_p13 = pneg %p6591_p3 }
 0x1dd   : > { %p6597_p1 = pnand %p6595_p0, %p6592_p13 }
 0x1df   : > { %6600 = shalt.err (!%p6597_p1)
}
 0x1e0   : > { %s6601_s7 = scalar_lea.vmem %s764_s1, 32  ;;  %p6609_p9 = scmp.lt.s32.totalorder %s764_s1, %s764_s1 }
 0x1e1   : > { %p6602_p4 = scmp.ne.s32.totalorder %s764_s1, %s6601_s7  ;;  %p6610_p10 = scmp.lt.s32.totalorder %s6601_s7, %s6601_s7 }
 0x1e3   : > { %p6604_p6 = pnand %p6602_p4, %p6907_p7  ;;  %p6611_p11 = por %p6610_p10, %p6609_p9 }
 0x1e5   : > { %p6605_p8 = pneg %p6604_p6 }
 0x1e7   : > { %p6612_p12 = pnand %p6611_p11, %p6605_p8 }
 0x1e9   : > { %6615 = shalt.err (!%p6612_p12)
}
 0x1ea   : > { %5349 = dma.hbm_to_vmem [thread:$0]  (!%p6891_p5), %s7838_s18, 32, %s764_s1, [#allocation26]  }
 0x1eb   : > { %s7888_s28 = sld [smem:[#allocation57_spill]] }
 0x1f1   : > { %s6616_s25 = scalar_lea.hbm %s7888_s28, 32 }
 0x1f2   : > { %p6617_p2 = scmp.ne.s32.totalorder %s7888_s28, %s6616_s25  ;;  %p6623_p0 = scmp.lt.u32.totalorder %s6616_s25, %s7888_s28 }
 0x1f4   : > { %p6619_p3 = pnand %p6617_p2, %p6907_p7 }
 0x1f6   : > { %p6620_p13 = pneg %p6619_p3 }
 0x1f8   : > { %p6625_p1 = pnand %p6623_p0, %p6620_p13 }
 0x1fa   : > { %6628 = shalt.err (!%p6625_p1)
}
 0x1fb   : > { %s6629_s27 = scalar_lea.vmem %s788_s6, 32  ;;  %p6637_p9 = scmp.lt.s32.totalorder %s788_s6, %s788_s6 }
 0x1fc   : > { %p6630_p4 = scmp.ne.s32.totalorder %s788_s6, %s6629_s27  ;;  %p6638_p10 = scmp.lt.s32.totalorder %s6629_s27, %s6629_s27 }
 0x1fe   : > { %p6632_p6 = pnand %p6630_p4, %p6907_p7  ;;  %p6639_p11 = por %p6638_p10, %p6637_p9 }
 0x200   : > { %p6633_p8 = pneg %p6632_p6 }
 0x202   : > { %p6640_p12 = pnand %p6639_p11, %p6633_p8 }
 0x204   : > { %6643 = shalt.err (!%p6640_p12)
}
 0x205   : > { %5355 = dma.hbm_to_vmem [thread:$0]  (!%p6891_p5), %s7888_s28, 32, %s788_s6, [#allocation29]  }
 0x206   : > { %s6746_s22 = smov [#allocation33]   ;;  %s7889_s25 = sld [smem:[#allocation58_spill]] }
 0x207   : > { %s811_s5 = sshll.u32 %s6746_s22, 4  ;;  %s812_s5 = int_to_ptr.vmem [resolvable:$true] %s811_s5 }
 0x20c   : > { %s6644_s30 = scalar_lea.hbm %s7889_s25, 32 }
 0x20d   : > { %p6645_p2 = scmp.ne.s32.totalorder %s7889_s25, %s6644_s30  ;;  %p6651_p0 = scmp.lt.u32.totalorder %s6644_s30, %s7889_s25 }
 0x20f   : > { %p6647_p3 = pnand %p6645_p2, %p6907_p7 }
 0x211   : > { %p6648_p13 = pneg %p6647_p3 }
 0x213   : > { %p6653_p1 = pnand %p6651_p0, %p6648_p13 }
 0x215   : > { %6656 = shalt.err (!%p6653_p1)
}
 0x216   : > { %s6657_s6 = scalar_lea.vmem %s812_s5, 32  ;;  %p6665_p9 = scmp.lt.s32.totalorder %s812_s5, %s812_s5 }
 0x217   : > { %p6658_p4 = scmp.ne.s32.totalorder %s812_s5, %s6657_s6  ;;  %p6666_p10 = scmp.lt.s32.totalorder %s6657_s6, %s6657_s6 }
 0x219   : > { %p6660_p6 = pnand %p6658_p4, %p6907_p7  ;;  %p6667_p11 = por %p6666_p10, %p6665_p9 }
 0x21b   : > { %p6661_p8 = pneg %p6660_p6 }
 0x21d   : > { %p6668_p12 = pnand %p6667_p11, %p6661_p8 }
 0x21f   : > { %6671 = shalt.err (!%p6668_p12)
}
 0x220   : > { %5361 = dma.hbm_to_vmem [thread:$0]  (!%p6891_p5), %s7889_s25, 32, %s812_s5, [#allocation32]  }
 0x221   : > { %s7890_s22 = sld [smem:[#allocation47_spill]] }
 0x227   : > { %p7891_p2 = scmp.ne.s32.totalorder %s7890_s22, 0 }
 0x228   : > { %s7892_s9 = sld [smem:[#allocation46_spill]] (!%p7891_p2) }
 0x229   : > { %832 = sbr.rel (%p7891_p2) target bundleno = 3752 (0xea8), region = 112 }
 0x22e   : > { %p7893_p3 = scmp.eq.s32.totalorder (!%p7891_p2), %s7892_s9, 0 }
 0x230   : > { %6677 = dma.done.wait (%p7893_p3), [#allocation3], 32   ;;  %p7894_p7 = pmov %p7893_p3 }
 0x231   : > { %p7895_p13 = pmov %p7893_p3 }
 0x232   : > { %6679 = vsyncadd (%p7894_p7), [#allocation3], 4294967264 }
 0x233   : > { %6681 = dma.done.wait (%p7895_p13), [#allocation5], 64   ;;  %p7896_p0 = pmov %p7893_p3 }
 0x235   : > { %6683 = vsyncadd (%p7896_p0), [#allocation5], 4294967232  ;;  %p7897_p1 = pmov %p7896_p0 }
 0x236   : > { %p7898_p5 = pmov %p7896_p0 }
 0x237   : > { %6685 = dma.done.wait (%p7897_p1), [#allocation8], 12320  }
 0x238   : > { %6687 = vsyncadd (%p7898_p5), [#allocation8], 4294954976  ;;  %p7899_p4 = pmov %p7896_p0 }
 0x239   : > { %p7900_p6 = pmov %p7896_p0 }
 0x23a   : > { %6689 = dma.done.wait (%p7899_p4), [#allocation11], 64  }
 0x23b   : > { %6691 = vsyncadd (%p7900_p6), [#allocation11], 4294967232  ;;  %p7901_p8 = pmov %p7896_p0 }
 0x23c   : > { %p7902_p9 = pmov %p7896_p0 }
 0x23d   : > { %6693 = dma.done.wait (%p7901_p8), [#allocation14], 12320  }
 0x23e   : > { %6695 = vsyncadd (%p7902_p9), [#allocation14], 4294954976  ;;  %p7903_p10 = pmov %p7896_p0 }
 0x23f   : > { %p7904_p11 = pmov %p7896_p0 }
 0x240   : > { %6697 = dma.done.wait (%p7903_p10), [#allocation17], 4128  }
 0x241   : > { %6699 = vsyncadd (%p7904_p11), [#allocation17], 4294963168  ;;  %p7905_p12 = pmov %p7896_p0 }
 0x242   : > { %p7906_p2 = pmov %p7896_p0 }
 0x243   : > { %6701 = dma.done.wait (%p7905_p12), [#allocation20], 64  }
 0x244   : > { %6703 = vsyncadd (%p7906_p2), [#allocation20], 4294967232  ;;  %p7907_p3 = pmov %p7896_p0 }
 0x245   : > { %p7908_p7 = pmov %p7896_p0 }
 0x246   : > { %6705 = dma.done.wait (%p7907_p3), [#allocation23], 4128  }
 0x247   : > { %6707 = vsyncadd (%p7908_p7), [#allocation23], 4294963168  ;;  %p7909_p13 = pmov %p7896_p0 }
 0x249   : > { %6709 = dma.done.wait (%p7909_p13), [#allocation26], 64  }
 0x24a   : > { %6711 = vsyncadd (%p7896_p0), [#allocation26], 4294967232  ;;  %p7910_p1 = pmov %p7896_p0 }
 0x24b   : > { %p7911_p5 = pmov %p7896_p0 }
 0x24c   : > { %6713 = dma.done.wait (%p7910_p1), [#allocation29], 4128  }
 0x24d   : > { %6715 = vsyncadd (%p7911_p5), [#allocation29], 4294963168  ;;  %p7912_p4 = pmov %p7896_p0 }
 0x24e   : > { %p7913_p6 = pmov %p7896_p0 }
 0x24f   : > { %6717 = dma.done.wait (%p7912_p4), [#allocation32], 4128  }
 0x250   : > { %6719 = vsyncadd (%p7913_p6), [#allocation32], 4294963168  ;;  %s7914_s5 = sld [smem:[#allocation49_spill]]  ;;  %p976_p8 = scmp.lt.s32.totalorder %s7892_s9, 1 }
 0x251   : > { %s7915_s30 = sld [smem:[#allocation48_spill]]  ;;  %s7916_s7 = sld [smem:[#allocation59_spill]] }
 0x252   : > { %s7919_s9 = smov (!%p976_p8, %s7892_s9), 1 }
 0x253   : > { %s5212_s4 = sshll.u32 %s7919_s9, 4 }
 0x256   : > { %v5436_v0 = vld [vmem:[%s7914_s5 + $0x4] ss:$8 sps:$4 sm:$0xff]   ;;  %v5438_v1 = vld [vmem:[%s7914_s5] ss:$8 sps:$4 sm:$0xff]   ;;  %v5441_v3 = vld [vmem:[%s7914_s5 + $0x14] ss:$8 sps:$4 sm:$0xff]  }
 0x257   : > { %1185 = vmatprep.subr.bf16.mxu0 %v5436_v0  ;;  %v5439_v2 = vld [vmem:[%s7914_s5 + $0x104] ss:$8 sps:$4 sm:$0xff]   ;;  %v5443_v4 = vld [vmem:[%s7914_s5 + $0x100] ss:$8 sps:$4 sm:$0xff]   ;;  %v5444_v5 = vld [vmem:[%s7914_s5 + $0x10] ss:$8 sps:$4 sm:$0xff]   ;;  %s7499_s29 = scalar_lea.vmem %s7915_s30, %s5212_s4  ;;  %s985_s22 = scalar_lea.vmem %s7916_s7, %s5212_s4 }
 0x258   : > { %1186 = vmatpush1.bf16.msra.mxu0 %v5438_v1  ;;  %1426 = vmatprep.subr.bf16.mxu1 %v5439_v2  ;;  %v5445_v6 = vld [vmem:[%s7914_s5 + $0x114] ss:$8 sps:$4 sm:$0xff]   ;;  %v5447_v7 = vld [vmem:[%s7914_s5 + $0x24] ss:$8 sps:$4 sm:$0xff]   ;;  %v5449_v8 = vld [vmem:[%s7914_s5 + $0x110] ss:$8 sps:$4 sm:$0xff]  }
 0x259   : > { %1187 = vmatprep.subr.bf16.mxu0 %v5441_v3  ;;  %1427 = vmatpush1.bf16.msra.mxu1 %v5443_v4  ;;  %v5450_v9 = vld [vmem:[%s7914_s5 + $0x20] ss:$8 sps:$4 sm:$0xff]   ;;  %v5451_v10 = vld [vmem:[%s7914_s5 + $0x124] ss:$8 sps:$4 sm:$0xff]   ;;  %v5453_v11 = vld [vmem:[%s7914_s5 + $0x34] ss:$8 sps:$4 sm:$0xff]  }
 0x25a   : > { %1428 = vmatprep.subr.bf16.mxu1 %v5445_v6  ;;  %v5455_v12 = vld [vmem:[%s7914_s5 + $0x120] ss:$8 sps:$4 sm:$0xff]   ;;  %v5457_v13 = vld [vmem:[%s7914_s5 + $0x134] ss:$8 sps:$4 sm:$0xff]   ;;  %v5456_v14 = vld [vmem:[%s7914_s5 + $0x30] ss:$8 sps:$4 sm:$0xff]  }
 0x25b   : > { %v5459_v15 = vld [vmem:[%s7914_s5 + $0x44] ss:$8 sps:$4 sm:$0xff]   ;;  %v5461_v16 = vld [vmem:[%s7914_s5 + $0x130] ss:$8 sps:$4 sm:$0xff]   ;;  %v5462_v18 = vld [vmem:[%s7914_s5 + $0x40] ss:$8 sps:$4 sm:$0xff]  }
 0x25c   : > { %1188 = vmatpush1.bf16.msra.mxu0 %v5444_v5  ;;  %v5463_v17 = vld [vmem:[%s7914_s5 + $0x144] ss:$8 sps:$4 sm:$0xff]   ;;  %v5465_v19 = vld [vmem:[%s7914_s5 + $0x54] ss:$8 sps:$4 sm:$0xff]   ;;  %v5467_v20 = vld [vmem:[%s7914_s5 + $0x140] ss:$8 sps:$4 sm:$0xff]  }
 0x25d   : > { %1189 = vmatprep.subr.bf16.mxu0 %v5447_v7  ;;  %1429 = vmatpush1.bf16.msra.mxu1 %v5449_v8  ;;  %v5469_v21 = vld [vmem:[%s7914_s5 + $0x154] ss:$8 sps:$4 sm:$0xff]   ;;  %v5468_v22 = vld [vmem:[%s7914_s5 + $0x50] ss:$8 sps:$4 sm:$0xff]   ;;  %v5471_v23 = vld [vmem:[%s7914_s5 + $0x64] ss:$8 sps:$4 sm:$0xff]  }
 0x25e   : > { %1430 = vmatprep.subr.bf16.mxu1 %v5451_v10  ;;  %v5473_v24 = vld [vmem:[%s7914_s5 + $0x150] ss:$8 sps:$4 sm:$0xff]   ;;  %v5475_v25 = vld [vmem:[%s7914_s5 + $0x164] ss:$8 sps:$4 sm:$0xff]   ;;  %v5474_v26 = vld [vmem:[%s7914_s5 + $0x60] ss:$8 sps:$4 sm:$0xff]  }
 0x25f   : > { %v5477_v27 = vld [vmem:[%s7914_s5 + $0x74] ss:$8 sps:$4 sm:$0xff]   ;;  %v5479_v28 = vld [vmem:[%s7914_s5 + $0x160] ss:$8 sps:$4 sm:$0xff]   ;;  %v5480_v30 = vld [vmem:[%s7914_s5 + $0x70] ss:$8 sps:$4 sm:$0xff]  }
 0x260   : > { %1190 = vmatpush1.bf16.msra.mxu0 %v5450_v9  ;;  %v5481_v29 = vld [vmem:[%s7914_s5 + $0x174] ss:$8 sps:$4 sm:$0xff]   ;;  %v5483_v31 = vld [vmem:[%s7914_s5 + $0x84] ss:$8 sps:$4 sm:$0xff]   ;;  %v5485_v32 = vld [vmem:[%s7914_s5 + $0x170] ss:$8 sps:$4 sm:$0xff]  }
 0x261   : > { %1191 = vmatprep.subr.bf16.mxu0 %v5453_v11  ;;  %1431 = vmatpush1.bf16.msra.mxu1 %v5455_v12  ;;  %v5487_v33 = vld [vmem:[%s7914_s5 + $0x184] ss:$8 sps:$4 sm:$0xff]   ;;  %v5486_v34 = vld [vmem:[%s7914_s5 + $0x80] ss:$8 sps:$4 sm:$0xff]   ;;  %v5489_v35 = vld [vmem:[%s7914_s5 + $0x94] ss:$8 sps:$4 sm:$0xff]  }
 0x262   : > { %1432 = vmatprep.subr.bf16.mxu1 %v5457_v13  ;;  %v5491_v36 = vld [vmem:[%s7914_s5 + $0x180] ss:$8 sps:$4 sm:$0xff]   ;;  %v5493_v37 = vld [vmem:[%s7914_s5 + $0x194] ss:$8 sps:$4 sm:$0xff]   ;;  %v5492_v38 = vld [vmem:[%s7914_s5 + $0x90] ss:$8 sps:$4 sm:$0xff]  }
 0x263   : > { %v5495_v39 = vld [vmem:[%s7914_s5 + $0xa4] ss:$8 sps:$4 sm:$0xff]   ;;  %v5497_v40 = vld [vmem:[%s7914_s5 + $0x190] ss:$8 sps:$4 sm:$0xff]   ;;  %v5498_v42 = vld [vmem:[%s7914_s5 + $0xa0] ss:$8 sps:$4 sm:$0xff]  }
 0x264   : > { %1192 = vmatpush1.bf16.msra.mxu0 %v5456_v14  ;;  %v5499_v41 = vld [vmem:[%s7914_s5 + $0x1a4] ss:$8 sps:$4 sm:$0xff]   ;;  %v5501_v43 = vld [vmem:[%s7914_s5 + $0xb4] ss:$8 sps:$4 sm:$0xff]   ;;  %v5503_v44 = vld [vmem:[%s7914_s5 + $0x1a0] ss:$8 sps:$4 sm:$0xff]  }
 0x265   : > { %1193 = vmatprep.subr.bf16.mxu0 %v5459_v15  ;;  %1433 = vmatpush1.bf16.msra.mxu1 %v5461_v16  ;;  %v989_v45 = vld [vmem:[%s7499_s29 + $0x8] sm:$0xff]  ;;  %v5505_v46 = vld [vmem:[%s7914_s5 + $0x1b4] ss:$8 sps:$4 sm:$0xff]   ;;  %v5504_v48 = vld [vmem:[%s7914_s5 + $0xb0] ss:$8 sps:$4 sm:$0xff]  }
 0x266   : > { %1434 = vmatprep.subr.bf16.mxu1 %v5463_v17  ;;  %v1024_v47 = vpack.c.bf16 %v989_v45, %v989_v45  ;;  %v5507_v49 = vld [vmem:[%s7914_s5 + $0xc4] ss:$8 sps:$4 sm:$0xff]   ;;  %v5509_v50 = vld [vmem:[%s7914_s5 + $0x1b0] ss:$8 sps:$4 sm:$0xff]   ;;  %v5510_v52 = vld [vmem:[%s7914_s5 + $0xc0] ss:$8 sps:$4 sm:$0xff]  }
 0x267   : > { %v5511_v51 = vld [vmem:[%s7914_s5 + $0x1c4] ss:$8 sps:$4 sm:$0xff]   ;;  %v5513_v53 = vld [vmem:[%s7914_s5 + $0xd4] ss:$8 sps:$4 sm:$0xff]   ;;  %v5515_v54 = vld [vmem:[%s7914_s5 + $0x1c0] ss:$8 sps:$4 sm:$0xff]  }
 0x268   : > { %1194 = vmatpush1.bf16.msra.mxu0 %v5462_v18  ;;  %1217 = vmatprep.mubr.bf16.mxu0 %v1024_v47  ;;  %v5517_v55 = vld [vmem:[%s7914_s5 + $0x1d4] ss:$8 sps:$4 sm:$0xff]   ;;  %v5516_v56 = vld [vmem:[%s7914_s5 + $0xd0] ss:$8 sps:$4 sm:$0xff]   ;;  %v5519_v57 = vld [vmem:[%s7914_s5 + $0xe4] ss:$8 sps:$4 sm:$0xff]  }
 0x269   : > { %1195 = vmatprep.subr.bf16.mxu0 %v5465_v19  ;;  %1435 = vmatpush1.bf16.msra.mxu1 %v5467_v20  ;;  %v5521_v58 = vld [vmem:[%s7914_s5 + $0x1d0] ss:$8 sps:$4 sm:$0xff]   ;;  %v5523_v59 = vld [vmem:[%s7914_s5 + $0x1e4] ss:$8 sps:$4 sm:$0xff]   ;;  %v5522_v60 = vld [vmem:[%s7914_s5 + $0xe0] ss:$8 sps:$4 sm:$0xff]  }
 0x26a   : > { %1436 = vmatprep.subr.bf16.mxu1 %v5469_v21  ;;  %1458 = vmatprep.mubr.bf16.mxu1 %v1024_v47  ;;  %v5525_v61 = vld [vmem:[%s7914_s5 + $0xf4] ss:$8 sps:$4 sm:$0xff]   ;;  %v5527_v62 = vld [vmem:[%s7914_s5 + $0x1e0] ss:$8 sps:$4 sm:$0xff]   ;;  %v5528_v63 = vld [vmem:[%s7914_s5 + $0xf0] ss:$8 sps:$4 sm:$0xff]  }
 0x26b   : > { %v5529_v0 = vld [vmem:[%s7914_s5 + $0x1f4] ss:$8 sps:$4 sm:$0xff]   ;;  %v988_v1 = vld [vmem:[%s7499_s29] sm:$0xff]  ;;  %v5531_v3 = vld [vmem:[%s7914_s5 + $0x1f0] ss:$8 sps:$4 sm:$0xff]  }
 0x26c   : > { %1196 = vmatpush1.bf16.msra.mxu0 %v5468_v22  ;;  %v5534_v2 = vld [vmem:[%s7914_s5 + $0x204] ss:$8 sps:$4 sm:$0xff]   ;;  %v7572_v4 = vpack.c.bf16 %v988_v1, %v988_v1  ;;  %v5532_v5 = vld [vmem:[%s7914_s5 + $0x200] ss:$8 sps:$4 sm:$0xff]   ;;  %v5537_v6 = vld [vmem:[%s7914_s5 + $0x214] ss:$8 sps:$4 sm:$0xff]  }
 0x26d   : > { %1197 = vmatprep.subr.bf16.mxu0 %v5471_v23  ;;  %1437 = vmatpush1.bf16.msra.mxu1 %v5473_v24  ;;  %v5535_v7 = vld [vmem:[%s7914_s5 + $0x210] ss:$8 sps:$4 sm:$0xff]   ;;  %v5540_v8 = vld [vmem:[%s7914_s5 + $0x224] ss:$8 sps:$4 sm:$0xff]   ;;  %v5538_v9 = vld [vmem:[%s7914_s5 + $0x220] ss:$8 sps:$4 sm:$0xff]  }
 0x26e   : > { %1438 = vmatprep.subr.bf16.mxu1 %v5475_v25  ;;  %v5543_v10 = vld [vmem:[%s7914_s5 + $0x234] ss:$8 sps:$4 sm:$0xff]   ;;  %v5541_v11 = vld [vmem:[%s7914_s5 + $0x230] ss:$8 sps:$4 sm:$0xff]   ;;  %v5546_v12 = vld [vmem:[%s7914_s5 + $0x244] ss:$8 sps:$4 sm:$0xff]  }
 0x26f   : > { %v5544_v13 = vld [vmem:[%s7914_s5 + $0x240] ss:$8 sps:$4 sm:$0xff]   ;;  %v5549_v14 = vld [vmem:[%s7914_s5 + $0x254] ss:$8 sps:$4 sm:$0xff]   ;;  %v5547_v15 = vld [vmem:[%s7914_s5 + $0x250] ss:$8 sps:$4 sm:$0xff]  }
 0x270   : > { %1198 = vmatpush1.bf16.msra.mxu0 %v5474_v26  ;;  %v5552_v16 = vld [vmem:[%s7914_s5 + $0x264] ss:$8 sps:$4 sm:$0xff]   ;;  %v5550_v17 = vld [vmem:[%s7914_s5 + $0x260] ss:$8 sps:$4 sm:$0xff]   ;;  %v5555_v18 = vld [vmem:[%s7914_s5 + $0x274] ss:$8 sps:$4 sm:$0xff]  }
 0x271   : > { %1199 = vmatprep.subr.bf16.mxu0 %v5477_v27  ;;  %1439 = vmatpush1.bf16.msra.mxu1 %v5479_v28  ;;  %v5553_v19 = vld [vmem:[%s7914_s5 + $0x270] ss:$8 sps:$4 sm:$0xff]   ;;  %v5558_v20 = vld [vmem:[%s7914_s5 + $0x284] ss:$8 sps:$4 sm:$0xff]   ;;  %v5556_v21 = vld [vmem:[%s7914_s5 + $0x280] ss:$8 sps:$4 sm:$0xff]  }
 0x272   : > { %1440 = vmatprep.subr.bf16.mxu1 %v5481_v29  ;;  %v5561_v22 = vld [vmem:[%s7914_s5 + $0x294] ss:$8 sps:$4 sm:$0xff]   ;;  %v5559_v23 = vld [vmem:[%s7914_s5 + $0x290] ss:$8 sps:$4 sm:$0xff]   ;;  %v5564_v24 = vld [vmem:[%s7914_s5 + $0x2a4] ss:$8 sps:$4 sm:$0xff]  }
 0x273   : > { %v5562_v25 = vld [vmem:[%s7914_s5 + $0x2a0] ss:$8 sps:$4 sm:$0xff]   ;;  %v5567_v26 = vld [vmem:[%s7914_s5 + $0x2b4] ss:$8 sps:$4 sm:$0xff]   ;;  %v5565_v27 = vld [vmem:[%s7914_s5 + $0x2b0] ss:$8 sps:$4 sm:$0xff]  }
 0x274   : > { %1200 = vmatpush1.bf16.msra.mxu0 %v5480_v30  ;;  %v5570_v28 = vld [vmem:[%s7914_s5 + $0x2c4] ss:$8 sps:$4 sm:$0xff]   ;;  %v5568_v29 = vld [vmem:[%s7914_s5 + $0x2c0] ss:$8 sps:$4 sm:$0xff]   ;;  %v5573_v30 = vld [vmem:[%s7914_s5 + $0x2d4] ss:$8 sps:$4 sm:$0xff]  }
 0x275   : > { %1201 = vmatprep.subr.bf16.mxu0 %v5483_v31  ;;  %1441 = vmatpush1.bf16.msra.mxu1 %v5485_v32  ;;  %v5571_v31 = vld [vmem:[%s7914_s5 + $0x2d0] ss:$8 sps:$4 sm:$0xff]   ;;  %v5576_v32 = vld [vmem:[%s7914_s5 + $0x2e4] ss:$8 sps:$4 sm:$0xff]  }
 0x276   : > { %1442 = vmatprep.subr.bf16.mxu1 %v5487_v33  ;;  %v5574_v33 = vld [vmem:[%s7914_s5 + $0x2e0] ss:$8 sps:$4 sm:$0xff]  }
 0x278   : > { %1202 = vmatpush1.bf16.msra.mxu0 %v5486_v34  ;;  %v5579_v34 = vld [vmem:[%s7914_s5 + $0x2f4] ss:$8 sps:$4 sm:$0xff]  }
 0x279   : > { %1203 = vmatprep.subr.bf16.mxu0 %v5489_v35  ;;  %1443 = vmatpush1.bf16.msra.mxu1 %v5491_v36  ;;  %v5577_v35 = vld [vmem:[%s7914_s5 + $0x2f0] ss:$8 sps:$4 sm:$0xff]   ;;  %v986_v36 = vlaneseq }
 0x27a   : > { %1444 = vmatprep.subr.bf16.mxu1 %v5493_v37 }
 0x27b   : > { %v7670_v37 = vshrl.u32 %v986_v36, 7  ;;  %v5622_v36 = vld [vmem:[#allocation7 + $0x70] ss:$8 sps:$4 sm:$0xff]  }
 0x27c   : > { %1204 = vmatpush1.bf16.msra.mxu0 %v5492_v38 }
 0x27d   : > { %1205 = vmatprep.subr.bf16.mxu0 %v5495_v39  ;;  %1445 = vmatpush1.bf16.msra.mxu1 %v5497_v40  ;;  %vm1228_vm0 = vcmp.ge.s32.totalorder %v7670_v37, 1  ;;  %vm1705_vm1 = vcmp.lt.s32.totalorder %v7670_v37, 7 }
 0x27e   : > { %1446 = vmatprep.subr.bf16.mxu1 %v5499_v41 }
 0x280   : > { %1206 = vmatpush1.bf16.msra.mxu0 %v5498_v42 }
 0x281   : > { %1207 = vmatprep.subr.bf16.mxu0 %v5501_v43  ;;  %1447 = vmatpush1.bf16.msra.mxu1 %v5503_v44 }
 0x282   : > { %1448 = vmatprep.subr.bf16.mxu1 %v5505_v46 }
 0x284   : > { %1208 = vmatpush1.bf16.msra.mxu0 %v5504_v48 }
 0x285   : > { %1209 = vmatprep.subr.bf16.mxu0 %v5507_v49  ;;  %1449 = vmatpush1.bf16.msra.mxu1 %v5509_v50 }
 0x286   : > { %1450 = vmatprep.subr.bf16.mxu1 %v5511_v51 }
 0x288   : > { %1210 = vmatpush1.bf16.msra.mxu0 %v5510_v52  ;;  %v7678_v52 = vsub.s32 0, %v7670_v37 }
 0x289   : > { %1211 = vmatprep.subr.bf16.mxu0 %v5513_v53  ;;  %1451 = vmatpush1.bf16.msra.mxu1 %v5515_v54  ;;  %v7681_v53 = vsub.s32 1, %v7670_v37  ;;  %v990_v54 = vld [vmem:[#allocation2] sm:$0x3]  ;;  %v3312_v37 = vld [vmem:[#allocation18] sm:$0x3] }
 0x28a   : > { %1452 = vmatprep.subr.bf16.mxu1 %v5517_v55 }
 0x28c   : > { %1212 = vmatpush1.bf16.msra.mxu0 %v5516_v56 }
 0x28d   : > { %1213 = vmatprep.subr.bf16.mxu0 %v5519_v57  ;;  %1453 = vmatpush1.bf16.msra.mxu1 %v5521_v58 }
 0x28e   : > { %1454 = vmatprep.subr.bf16.mxu1 %v5523_v59 }
 0x290   : > { %1214 = vmatpush1.bf16.msra.mxu0 %v5522_v60  ;;  %v1716_v60 = vrot.slane %v990_v54, %v7678_v52 }
 0x291   : > { %1215 = vmatprep.subr.bf16.mxu0 %v5525_v61  ;;  %1455 = vmatpush1.bf16.msra.mxu1 %v5527_v62 }
 0x292   : > { %1456 = vmatprep.subr.bf16.mxu1 %v5529_v0 }
 0x294   : > { %1216 = vmatpush1.bf16.msra.mxu0 %v5528_v63  ;;  %v1720_v63 = vrot.slane %v990_v54, %v7681_v53 }
 0x295   : > { %1662 = vmatprep.subr.bf16.mxu0 %v5534_v2  ;;  %1457 = vmatpush1.bf16.msra.mxu1 %v5531_v3 }
 0x297   : > { %1218 = vmatmul.mubr.bf16.vlgmr.msra.gmra.mrb[0].mxu0 %v7572_v4 }
 0x298   : > { %1663 = vmatpush1.bf16.msra.mxu0 %v5532_v5  ;;  %1694 = vmatprep.mubr.bf16.mxu0 %v1024_v47 }
 0x299   : > { %1459 = vmatmul.mubr.bf16.vlgmr.msra.gmra.mrb[0].mxu1 %v7572_v4  ;;  %1664 = vmatprep.subr.bf16.mxu0 %v5537_v6  ;;  %v5580_v6 = vld [vmem:[#allocation7] ss:$8 sps:$4 sm:$0xff]  }
 0x29c   : > { %1665 = vmatpush1.bf16.msra.mxu0 %v5535_v7  ;;  %v5582_v7 = vld [vmem:[#allocation7 + $0x4] ss:$8 sps:$4 sm:$0xff]  }
 0x29d   : > { %1666 = vmatprep.subr.bf16.mxu0 %v5540_v8  ;;  %v5583_v8 = vld [vmem:[#allocation7 + $0x100] ss:$8 sps:$4 sm:$0xff]   ;;  %1967 = vmatprep.subr.bf16.mxu1 %v5582_v7  ;;  %v5663_v7 = vld [vmem:[#allocation7 + $0x1d4] ss:$8 sps:$4 sm:$0xff]  }
 0x29e   : > { %1968 = vmatpush1.bf16.msra.mxu1 %v5580_v6  ;;  %v5660_v6 = vld [vmem:[#allocation7 + $0xd4] ss:$8 sps:$4 sm:$0xff]  }
 0x2a0   : > { %1667 = vmatpush1.bf16.msra.mxu0 %v5538_v9  ;;  %v5585_v9 = vld [vmem:[#allocation7 + $0x104] ss:$8 sps:$4 sm:$0xff]  }
 0x2a1   : > { %1668 = vmatprep.subr.bf16.mxu0 %v5543_v10  ;;  %v5588_v10 = vld [vmem:[#allocation7 + $0x14] ss:$8 sps:$4 sm:$0xff]  }
 0x2a2   : > { %1969 = vmatprep.subr.bf16.mxu1 %v5588_v10  ;;  %v5666_v10 = vld [vmem:[#allocation7 + $0xe4] ss:$8 sps:$4 sm:$0xff]  }
 0x2a4   : > { %1669 = vmatpush1.bf16.msra.mxu0 %v5541_v11  ;;  %v5591_v11 = vld [vmem:[#allocation7 + $0x114] ss:$8 sps:$4 sm:$0xff]  }
 0x2a5   : > { %1670 = vmatprep.subr.bf16.mxu0 %v5546_v12  ;;  %v5586_v12 = vld [vmem:[#allocation7 + $0x10] ss:$8 sps:$4 sm:$0xff]  }
 0x2a6   : > { %1970 = vmatpush1.bf16.msra.mxu1 %v5586_v12  ;;  %v5664_v12 = vld [vmem:[#allocation7 + $0xe0] ss:$8 sps:$4 sm:$0xff]  }
 0x2a8   : > { %1671 = vmatpush1.bf16.msra.mxu0 %v5544_v13  ;;  %v5589_v13 = vld [vmem:[#allocation7 + $0x110] ss:$8 sps:$4 sm:$0xff]  }
 0x2a9   : > { %1672 = vmatprep.subr.bf16.mxu0 %v5549_v14  ;;  %v5594_v14 = vld [vmem:[#allocation7 + $0x24] ss:$8 sps:$4 sm:$0xff]  }
 0x2aa   : > { %1971 = vmatprep.subr.bf16.mxu1 %v5594_v14  ;;  %v5672_v14 = vld [vmem:[#allocation7 + $0xf4] ss:$8 sps:$4 sm:$0xff]  }
 0x2ac   : > { %1673 = vmatpush1.bf16.msra.mxu0 %v5547_v15  ;;  %v5597_v15 = vld [vmem:[#allocation7 + $0x124] ss:$8 sps:$4 sm:$0xff]  }
 0x2ad   : > { %1674 = vmatprep.subr.bf16.mxu0 %v5552_v16  ;;  %v5592_v16 = vld [vmem:[#allocation7 + $0x20] ss:$8 sps:$4 sm:$0xff]  }
 0x2ae   : > { %1972 = vmatpush1.bf16.msra.mxu1 %v5592_v16  ;;  %v5670_v16 = vld [vmem:[#allocation7 + $0xf0] ss:$8 sps:$4 sm:$0xff]  }
 0x2b0   : > { %1675 = vmatpush1.bf16.msra.mxu0 %v5550_v17  ;;  %v5595_v17 = vld [vmem:[#allocation7 + $0x120] ss:$8 sps:$4 sm:$0xff]  }
 0x2b1   : > { %1676 = vmatprep.subr.bf16.mxu0 %v5555_v18  ;;  %v5600_v18 = vld [vmem:[#allocation7 + $0x34] ss:$8 sps:$4 sm:$0xff]  }
 0x2b2   : > { %1973 = vmatprep.subr.bf16.mxu1 %v5600_v18  ;;  %v5678_v18 = vld [vmem:[#allocation7 + $0x204] ss:$8 sps:$4 sm:$0xff]  }
 0x2b4   : > { %1677 = vmatpush1.bf16.msra.mxu0 %v5553_v19  ;;  %v5603_v19 = vld [vmem:[#allocation7 + $0x134] ss:$8 sps:$4 sm:$0xff]  }
 0x2b5   : > { %1678 = vmatprep.subr.bf16.mxu0 %v5558_v20  ;;  %v5598_v20 = vld [vmem:[#allocation7 + $0x30] ss:$8 sps:$4 sm:$0xff]  }
 0x2b6   : > { %1974 = vmatpush1.bf16.msra.mxu1 %v5598_v20 }
 0x2b8   : > { %1679 = vmatpush1.bf16.msra.mxu0 %v5556_v21  ;;  %v5601_v21 = vld [vmem:[#allocation7 + $0x130] ss:$8 sps:$4 sm:$0xff]  }
 0x2b9   : > { %1680 = vmatprep.subr.bf16.mxu0 %v5561_v22  ;;  %v5606_v22 = vld [vmem:[#allocation7 + $0x44] ss:$8 sps:$4 sm:$0xff]  }
 0x2ba   : > { %1975 = vmatprep.subr.bf16.mxu1 %v5606_v22  ;;  %v1725_v22 = vld [vmem:[#allocation4] sm:$0x3] }
 0x2bc   : > { %1681 = vmatpush1.bf16.msra.mxu0 %v5559_v23  ;;  %v5609_v23 = vld [vmem:[#allocation7 + $0x144] ss:$8 sps:$4 sm:$0xff]  }
 0x2bd   : > { %1682 = vmatprep.subr.bf16.mxu0 %v5564_v24  ;;  %v5604_v24 = vld [vmem:[#allocation7 + $0x40] ss:$8 sps:$4 sm:$0xff]  }
 0x2be   : > { %1976 = vmatpush1.bf16.msra.mxu1 %v5604_v24  ;;  %v1748_v24 = vrot.slane %v1725_v22, %v7678_v52 }
 0x2c0   : > { %1683 = vmatpush1.bf16.msra.mxu0 %v5562_v25  ;;  %v5607_v25 = vld [vmem:[#allocation7 + $0x140] ss:$8 sps:$4 sm:$0xff]  }
 0x2c1   : > { %1684 = vmatprep.subr.bf16.mxu0 %v5567_v26  ;;  %v5612_v26 = vld [vmem:[#allocation7 + $0x54] ss:$8 sps:$4 sm:$0xff]  }
 0x2c2   : > { %1977 = vmatprep.subr.bf16.mxu1 %v5612_v26 }
 0x2c4   : > { %1685 = vmatpush1.bf16.msra.mxu0 %v5565_v27  ;;  %v5615_v27 = vld [vmem:[#allocation7 + $0x154] ss:$8 sps:$4 sm:$0xff]  }
 0x2c5   : > { %1686 = vmatprep.subr.bf16.mxu0 %v5570_v28  ;;  %v5610_v28 = vld [vmem:[#allocation7 + $0x50] ss:$8 sps:$4 sm:$0xff]  }
 0x2c6   : > { %1978 = vmatpush1.bf16.msra.mxu1 %v5610_v28 }
 0x2c8   : > { %1687 = vmatpush1.bf16.msra.mxu0 %v5568_v29  ;;  %v5613_v29 = vld [vmem:[#allocation7 + $0x150] ss:$8 sps:$4 sm:$0xff]  }
 0x2c9   : > { %1688 = vmatprep.subr.bf16.mxu0 %v5573_v30  ;;  %v5618_v30 = vld [vmem:[#allocation7 + $0x64] ss:$8 sps:$4 sm:$0xff]  }
 0x2ca   : > { %1979 = vmatprep.subr.bf16.mxu1 %v5618_v30 }
 0x2cc   : > { %1689 = vmatpush1.bf16.msra.mxu0 %v5571_v31  ;;  %v5621_v31 = vld [vmem:[#allocation7 + $0x164] ss:$8 sps:$4 sm:$0xff]  }
 0x2cd   : > { %1690 = vmatprep.subr.bf16.mxu0 %v5576_v32  ;;  %v5616_v32 = vld [vmem:[#allocation7 + $0x60] ss:$8 sps:$4 sm:$0xff]  }
 0x2ce   : > { %1980 = vmatpush1.bf16.msra.mxu1 %v5616_v32 }
 0x2d0   : > { %1691 = vmatpush1.bf16.msra.mxu0 %v5574_v33  ;;  %v5619_v33 = vld [vmem:[#allocation7 + $0x160] ss:$8 sps:$4 sm:$0xff]  }
 0x2d1   : > { %1692 = vmatprep.subr.bf16.mxu0 %v5579_v34  ;;  %v5624_v34 = vld [vmem:[#allocation7 + $0x74] ss:$8 sps:$4 sm:$0xff]  }
 0x2d2   : > { %1981 = vmatprep.subr.bf16.mxu1 %v5624_v34 }
 0x2d3   : > { %1982 = vmatpush1.bf16.msra.mxu1 %v5622_v36 }
 0x2d4   : > { %1693 = vmatpush1.bf16.msra.mxu0 %v5577_v35  ;;  %v5627_v35 = vld [vmem:[#allocation7 + $0x174] ss:$8 sps:$4 sm:$0xff]  }
 0x2d5   : > { %2205 = vmatprep.subr.bf16.mxu0 %v5585_v9  ;;  %v5661_v9 = vld [vmem:[#allocation7 + $0x1d0] ss:$8 sps:$4 sm:$0xff]  }
 0x2d7   : > { %1695 = vmatmul.mubr.bf16.vlgmr.msra.gmra.mrb[4].mxu0 %v7572_v4 }
 0x2d8   : > { %2206 = vmatpush1.bf16.msra.mxu0 %v5583_v8  ;;  %v5658_v8 = vld [vmem:[#allocation7 + $0xd0] ss:$8 sps:$4 sm:$0xff]  }
 0x2d9   : > { %2207 = vmatprep.subr.bf16.mxu0 %v5591_v11  ;;  %v5669_v11 = vld [vmem:[#allocation7 + $0x1e4] ss:$8 sps:$4 sm:$0xff]  }
 0x2dc   : > { %2208 = vmatpush1.bf16.msra.mxu0 %v5589_v13  ;;  %v5667_v13 = vld [vmem:[#allocation7 + $0x1e0] ss:$8 sps:$4 sm:$0xff]  }
 0x2dd   : > { %2209 = vmatprep.subr.bf16.mxu0 %v5597_v15  ;;  %v5675_v15 = vld [vmem:[#allocation7 + $0x1f4] ss:$8 sps:$4 sm:$0xff]  }
 0x2e0   : > { %2210 = vmatpush1.bf16.msra.mxu0 %v5595_v17  ;;  %v5673_v17 = vld [vmem:[#allocation7 + $0x1f0] ss:$8 sps:$4 sm:$0xff]  }
 0x2e1   : > { %2211 = vmatprep.subr.bf16.mxu0 %v5603_v19 }
 0x2e4   : > { %2212 = vmatpush1.bf16.msra.mxu0 %v5601_v21 }
 0x2e5   : > { %2213 = vmatprep.subr.bf16.mxu0 %v5609_v23  ;;  %v1726_v23 = vld [vmem:[#allocation6] sm:$0x3] }
 0x2e6   : > { %v1761_v28 = vrot.slane %v1726_v23, %v7678_v52 }
 0x2e8   : > { %2214 = vmatpush1.bf16.msra.mxu0 %v5607_v25  ;;  %v1752_v25 = vrot.slane %v1725_v22, %v7681_v53 }
 0x2e9   : > { %2215 = vmatprep.subr.bf16.mxu0 %v5615_v27 }
 0x2ec   : > { %2216 = vmatpush1.bf16.msra.mxu0 %v5613_v29  ;;  %v1765_v29 = vrot.slane %v1726_v23, %v7681_v53 }
 0x2ed   : > { %2217 = vmatprep.subr.bf16.mxu0 %v5621_v31 }
 0x2f0   : > { %2218 = vmatpush1.bf16.msra.mxu0 %v5619_v33 }
 0x2f1   : > { %2219 = vmatprep.subr.bf16.mxu0 %v5627_v35 }
 0x36a   : > { %v1219_v38 = vpop.f32.mrb[0].mxu0 }
 0x36b   : > { %v1226_v39 = vrot.slane %v1219_v38, 7  ;;  %v1221_v40 = vpop.f32.mrb[1].mxu0  ;;  %v5625_v38 = vld [vmem:[#allocation7 + $0x170] ss:$8 sps:$4 sm:$0xff]  }
 0x36c   : > { %v1227_v41 = vrot.slane %v1221_v40, 7  ;;  %v1223_v42 = vpop.f32.mrb[2].mxu0  ;;  %v1460_v43 = vpop.f32.mrb[0].mxu1  ;;  %v5633_v40 = vld [vmem:[#allocation7 + $0x184] ss:$8 sps:$4 sm:$0xff]   ;;  %2220 = vmatpush1.bf16.msra.mxu0 %v5625_v38 }
 0x36d   : > { %v1224_v44 = vpop.f32.mrb[3].mxu0  ;;  %v1231_v45 = vsel %vm1228_vm0, %v1226_v39, 0.0  ;;  %v1462_v46 = vpop.f32.mrb[1].mxu1  ;;  %v5630_v39 = vld [vmem:[#allocation7 + $0x84] ss:$8 sps:$4 sm:$0xff]   ;;  %2221 = vmatprep.subr.bf16.mxu0 %v5633_v40 }
 0x36e   : > { %v1467_v47 = vadd.f32 %v1460_v43, %v1231_v45  ;;  %v1232_v48 = vsel %vm1228_vm0, %v1227_v41, 0.0  ;;  %v1464_v49 = vpop.f32.mrb[2].mxu1  ;;  %v5628_v41 = vld [vmem:[#allocation7 + $0x80] ss:$8 sps:$4 sm:$0xff]   ;;  %1983 = vmatprep.subr.bf16.mxu1 %v5630_v39  ;;  %v5636_v43 = vld [vmem:[#allocation7 + $0x94] ss:$8 sps:$4 sm:$0xff]  }
 0x36f   : > { %v1468_v50 = vadd.f32 %v1462_v46, %v1232_v48  ;;  %v1465_v51 = vpop.f32.mrb[3].mxu1  ;;  %v5631_v42 = vld [vmem:[#allocation7 + $0x180] ss:$8 sps:$4 sm:$0xff]   ;;  %v5639_v44 = vld [vmem:[#allocation7 + $0x194] ss:$8 sps:$4 sm:$0xff]   ;;  %1984 = vmatpush1.bf16.msra.mxu1 %v5628_v41 }
 0x370   : > { %v5634_v45 = vld [vmem:[#allocation7 + $0x90] ss:$8 sps:$4 sm:$0xff]   ;;  %2222 = vmatpush1.bf16.msra.mxu0 %v5631_v42  ;;  %1985 = vmatprep.subr.bf16.mxu1 %v5636_v43  ;;  %v5676_v39 = vld [vmem:[#allocation7 + $0x200] ss:$8 sps:$4 sm:$0xff]   ;;  %v5681_v41 = vld [vmem:[#allocation7 + $0x214] ss:$8 sps:$4 sm:$0xff]  }
 0x371   : > { %v5637_v46 = vld [vmem:[#allocation7 + $0x190] ss:$8 sps:$4 sm:$0xff]   ;;  %2223 = vmatprep.subr.bf16.mxu0 %v5639_v44  ;;  %v5684_v43 = vld [vmem:[#allocation7 + $0x224] ss:$8 sps:$4 sm:$0xff]   ;;  %v5682_v44 = vld [vmem:[#allocation7 + $0x220] ss:$8 sps:$4 sm:$0xff]  }
 0x372   : > { %v5679_v42 = vld [vmem:[#allocation7 + $0x210] ss:$8 sps:$4 sm:$0xff]  }
 0x373   : > { %1986 = vmatpush1.bf16.msra.mxu1 %v5634_v45  ;;  %v5687_v45 = vld [vmem:[#allocation7 + $0x234] ss:$8 sps:$4 sm:$0xff]  }
 0x374   : > { %2224 = vmatpush1.bf16.msra.mxu0 %v5637_v46  ;;  %v5685_v46 = vld [vmem:[#allocation7 + $0x230] ss:$8 sps:$4 sm:$0xff]  }
 0x3aa   : > { %v1696_v55 = vpop.f32.mrb[4].mxu0 }
 0x3ab   : > { %v1703_v56 = vrot.slane %v1696_v55, 1  ;;  %v1698_v57 = vpop.f32.mrb[5].mxu0 }
 0x3ac   : > { %v1704_v58 = vrot.slane %v1698_v57, 1  ;;  %v1700_v59 = vpop.f32.mrb[6].mxu0  ;;  %v5640_v57 = vld [vmem:[#allocation7 + $0xa0] ss:$8 sps:$4 sm:$0xff]  }
 0x3ad   : > { %v1708_v61 = vsel %vm1705_vm1, %v1703_v56, 0.0  ;;  %v1701_v62 = vpop.f32.mrb[7].mxu0  ;;  %v5642_v56 = vld [vmem:[#allocation7 + $0xa4] ss:$8 sps:$4 sm:$0xff]   ;;  %v5643_v59 = vld [vmem:[#allocation7 + $0x1a0] ss:$8 sps:$4 sm:$0xff]  }
 0x3ae   : > { %v1710_v0 = vadd.f32 %v1708_v61, %v1467_v47  ;;  %v1709_v1 = vsel %vm1705_vm1, %v1704_v58, 0.0  ;;  %v5645_v58 = vld [vmem:[#allocation7 + $0x1a4] ss:$8 sps:$4 sm:$0xff]   ;;  %1987 = vmatprep.subr.bf16.mxu1 %v5642_v56  ;;  %v5646_v61 = vld [vmem:[#allocation7 + $0xb0] ss:$8 sps:$4 sm:$0xff]  }
 0x3af   : > { %v1711_v2 = vadd.f32 %v1709_v1, %v1468_v50  ;;  %1988 = vmatpush1.bf16.msra.mxu1 %v5640_v57  ;;  %2225 = vmatprep.subr.bf16.mxu0 %v5645_v58  ;;  %v5649_v62 = vld [vmem:[#allocation7 + $0x1b0] ss:$8 sps:$4 sm:$0xff]   ;;  %v5652_v1 = vld [vmem:[#allocation7 + $0xc0] ss:$8 sps:$4 sm:$0xff]   ;;  %v5702_v57 = vld [vmem:[#allocation7 + $0x284] ss:$8 sps:$4 sm:$0xff]  }
 0x3b0   : > { %v7690_v3 = vadd.f32 %v1716_v60, %v1710_v0  ;;  %2226 = vmatpush1.bf16.msra.mxu0 %v5643_v59  ;;  %v5648_v60 = vld [vmem:[#allocation7 + $0xb4] ss:$8 sps:$4 sm:$0xff]   ;;  %v5654_v0 = vld [vmem:[#allocation7 + $0xc4] ss:$8 sps:$4 sm:$0xff]   ;;  %v5697_v56 = vld [vmem:[#allocation7 + $0x270] ss:$8 sps:$4 sm:$0xff]  }
 0x3b1   : > { %v7692_v4 = vadd.f32 %v1720_v63, %v1711_v2  ;;  %v5651_v63 = vld [vmem:[#allocation7 + $0x1b4] ss:$8 sps:$4 sm:$0xff]   ;;  %1989 = vmatprep.subr.bf16.mxu1 %v5648_v60  ;;  %v5657_v2 = vld [vmem:[#allocation7 + $0x1c4] ss:$8 sps:$4 sm:$0xff]   ;;  %v5700_v58 = vld [vmem:[#allocation7 + $0x280] ss:$8 sps:$4 sm:$0xff]  }
 0x3b2   : > { %2227 = vmatprep.subr.bf16.mxu0 %v5651_v63  ;;  %v5705_v59 = vld [vmem:[#allocation7 + $0x294] ss:$8 sps:$4 sm:$0xff]   ;;  %v5703_v60 = vld [vmem:[#allocation7 + $0x290] ss:$8 sps:$4 sm:$0xff]  }
 0x3b3   : > { %v1727_v5 = vadd.f32 %v7692_v4, %v7690_v3  ;;  %1990 = vmatpush1.bf16.msra.mxu1 %v5646_v61  ;;  %v5708_v61 = vld [vmem:[#allocation7 + $0x2a4] ss:$8 sps:$4 sm:$0xff]   ;;  %v5711_v63 = vld [vmem:[#allocation7 + $0x2b4] ss:$8 sps:$4 sm:$0xff]  }
 0x3b4   : > { %2228 = vmatpush1.bf16.msra.mxu0 %v5649_v62  ;;  %1991 = vmatprep.subr.bf16.mxu1 %v5654_v0  ;;  %v5706_v62 = vld [vmem:[#allocation7 + $0x2a0] ss:$8 sps:$4 sm:$0xff]   ;;  %v5709_v0 = vld [vmem:[#allocation7 + $0x2b0] ss:$8 sps:$4 sm:$0xff]  }
 0x3b5   : > { %1728 = vadd.xlane.f32.xlu0 %v1727_v5  ;;  %v5655_v5 = vld [vmem:[#allocation7 + $0x1c0] ss:$8 sps:$4 sm:$0xff]   ;;  %2229 = vmatprep.subr.bf16.mxu0 %v5657_v2 }
 0x3b6   : > { %v5712_v2 = vld [vmem:[#allocation7 + $0x2c0] ss:$8 sps:$4 sm:$0xff]  }
 0x3b7   : > { %1992 = vmatpush1.bf16.msra.mxu1 %v5652_v1  ;;  %v5714_v1 = vld [vmem:[#allocation7 + $0x2c4] ss:$8 sps:$4 sm:$0xff]  }
 0x3b8   : > { %2230 = vmatpush1.bf16.msra.mxu0 %v5655_v5  ;;  %1993 = vmatprep.subr.bf16.mxu1 %v5660_v6  ;;  %v5717_v5 = vld [vmem:[#allocation7 + $0x2d4] ss:$8 sps:$4 sm:$0xff]   ;;  %v5715_v6 = vld [vmem:[#allocation7 + $0x2d0] ss:$8 sps:$4 sm:$0xff]  }
 0x3b9   : > { %2231 = vmatprep.subr.bf16.mxu0 %v5663_v7  ;;  %v5720_v7 = vld [vmem:[#allocation7 + $0x2e4] ss:$8 sps:$4 sm:$0xff]  }
 0x3bb   : > { %1994 = vmatpush1.bf16.msra.mxu1 %v5658_v8  ;;  %v5718_v8 = vld [vmem:[#allocation7 + $0x2e0] ss:$8 sps:$4 sm:$0xff]  }
 0x3bc   : > { %2232 = vmatpush1.bf16.msra.mxu0 %v5661_v9  ;;  %1995 = vmatprep.subr.bf16.mxu1 %v5666_v10  ;;  %v5723_v9 = vld [vmem:[#allocation7 + $0x2f4] ss:$8 sps:$4 sm:$0xff]   ;;  %v5721_v10 = vld [vmem:[#allocation7 + $0x2f0] ss:$8 sps:$4 sm:$0xff]  }
 0x3bd   : > { %2233 = vmatprep.subr.bf16.mxu0 %v5669_v11 }
 0x3bf   : > { %1996 = vmatpush1.bf16.msra.mxu1 %v5664_v12 }
 0x3c0   : > { %2234 = vmatpush1.bf16.msra.mxu0 %v5667_v13  ;;  %1997 = vmatprep.subr.bf16.mxu1 %v5672_v14 }
 0x3c1   : > { %2235 = vmatprep.subr.bf16.mxu0 %v5675_v15 }
 0x3c3   : > { %1998 = vmatpush1.bf16.msra.mxu1 %v5670_v16 }
 0x3c4   : > { %2236 = vmatpush1.bf16.msra.mxu0 %v5673_v17  ;;  %2441 = vmatprep.subr.bf16.mxu1 %v5678_v18 }
 0x442   : > { %v1729_v47 = vpop.xlane.xlu0 %1728 }
 0x443   : > { %v1731_v48 = vmul.f32 0.00390625, %v1729_v47  ;;  %v5690_v47 = vld [vmem:[#allocation7 + $0x244] ss:$8 sps:$4 sm:$0xff]  }
 0x445   : > { %v7697_v49 = vsub.f32 %v7690_v3, %v1731_v48  ;;  %v7700_v50 = vsub.f32 %v7692_v4, %v1731_v48  ;;  %v5688_v48 = vld [vmem:[#allocation7 + $0x240] ss:$8 sps:$4 sm:$0xff]  }
 0x447   : > { %v1734_v51 = vmul.f32 %v7697_v49, %v7697_v49  ;;  %v1735_v54 = vmul.f32 %v7700_v50, %v7700_v50 }
 0x449   : > { %v1736_v55 = vadd.f32 %v1735_v54, %v1734_v51  ;;  %v5696_v51 = vld [vmem:[#allocation7 + $0x264] ss:$8 sps:$4 sm:$0xff]   ;;  %v5694_v54 = vld [vmem:[#allocation7 + $0x260] ss:$8 sps:$4 sm:$0xff]  }
 0x44b   : > { %1737 = vadd.xlane.f32.xlu0 %v1736_v55  ;;  %v5699_v55 = vld [vmem:[#allocation7 + $0x274] ss:$8 sps:$4 sm:$0xff]  }
 0x4d8   : > { %v1738_v19 = vpop.xlane.xlu0 %1737 }
 0x4d9   : > { %v1739_v20 = vmul.f32 0.00390625, %v1738_v19 }
 0x4db   : > { %v1740_v21 = vadd.f32 1e-05, %v1739_v20 }
 0x4dd   : > { %6060 = vrsqrt.f32 %v1740_v21 }
 0x4e7   : > { %v6061_v26 = vpop.eup %6060 }
 0x4e8   : > { %v1743_v27 = vmul.f32 %v6061_v26, %v7700_v50  ;;  %v1742_v30 = vmul.f32 %v6061_v26, %v7697_v49  ;;  %v5693_v49 = vld [vmem:[#allocation7 + $0x254] ss:$8 sps:$4 sm:$0xff]   ;;  %v5691_v50 = vld [vmem:[#allocation7 + $0x250] ss:$8 sps:$4 sm:$0xff]  }
 0x4ea   : > { %v1756_v31 = vmul.f32 %v1752_v25, %v1743_v27  ;;  %v1755_v32 = vmul.f32 %v1748_v24, %v1742_v30  ;;  %v1772_v25 = vld [vmem:[#allocation9] sm:$0x3] }
 0x4ec   : > { %v1769_v33 = vadd.f32 %v1765_v29, %v1756_v31  ;;  %v1768_v34 = vadd.f32 %v1761_v28, %v1755_v32  ;;  %v2492_v31 = vrot.slane %v1772_v25, %v7678_v52 }
 0x4ee   : > { %v1771_v35 = vmax.f32 %v1769_v33, 0.0  ;;  %v1770_v36 = vmax.f32 %v1768_v34, 0.0  ;;  %v2496_v34 = vrot.slane %v1772_v25, %v7681_v53 }
 0x4f0   : > { %v1806_v38 = vpack.c.bf16 %v1771_v35, %v1771_v35  ;;  %v7712_v40 = vpack.c.bf16 %v1770_v36, %v1770_v36 }
 0x4f2   : > { %1999 = vmatprep.mubr.bf16.mxu1 %v1806_v38  ;;  %2237 = vmatprep.mubr.bf16.mxu0 %v1806_v38 }
 0x4f3   : > { %2000 = vmatmul.mubr.bf16.vlgmr.msra.gmra.mrb[4].mxu1 %v7712_v40  ;;  %2238 = vmatmul.mubr.bf16.vlgmr.msra.gmra.mrb[8].mxu0 %v7712_v40 }
 0x4f4   : > { %2442 = vmatpush1.bf16.msra.mxu1 %v5676_v39  ;;  %2473 = vmatprep.mubr.bf16.mxu1 %v1806_v38 }
 0x4f5   : > { %2443 = vmatprep.subr.bf16.mxu1 %v5681_v41 }
 0x4f8   : > { %2444 = vmatpush1.bf16.msra.mxu1 %v5679_v42  ;;  %v5724_v42 = vld [vmem:[#allocation13] ss:$8 sps:$4 sm:$0xff]  }
 0x4f9   : > { %2445 = vmatprep.subr.bf16.mxu1 %v5684_v43  ;;  %v5726_v43 = vld [vmem:[#allocation13 + $0x4] ss:$8 sps:$4 sm:$0xff]  }
 0x4fa   : > { %2742 = vmatprep.subr.bf16.mxu0 %v5726_v43  ;;  %v5807_v43 = vld [vmem:[#allocation13 + $0x1d4] ss:$8 sps:$4 sm:$0xff]  }
 0x4fb   : > { %2743 = vmatpush1.bf16.msra.mxu0 %v5724_v42  ;;  %v5804_v42 = vld [vmem:[#allocation13 + $0xd4] ss:$8 sps:$4 sm:$0xff]  }
 0x4fc   : > { %2446 = vmatpush1.bf16.msra.mxu1 %v5682_v44  ;;  %v5727_v44 = vld [vmem:[#allocation13 + $0x100] ss:$8 sps:$4 sm:$0xff]  }
 0x4fd   : > { %2447 = vmatprep.subr.bf16.mxu1 %v5687_v45  ;;  %v5729_v45 = vld [vmem:[#allocation13 + $0x104] ss:$8 sps:$4 sm:$0xff]  }
 0x500   : > { %2448 = vmatpush1.bf16.msra.mxu1 %v5685_v46  ;;  %v5732_v46 = vld [vmem:[#allocation13 + $0x14] ss:$8 sps:$4 sm:$0xff]  }
 0x501   : > { %2449 = vmatprep.subr.bf16.mxu1 %v5690_v47  ;;  %v5735_v47 = vld [vmem:[#allocation13 + $0x114] ss:$8 sps:$4 sm:$0xff]   ;;  %2744 = vmatprep.subr.bf16.mxu0 %v5732_v46  ;;  %v5810_v46 = vld [vmem:[#allocation13 + $0xe4] ss:$8 sps:$4 sm:$0xff]  }
 0x504   : > { %2450 = vmatpush1.bf16.msra.mxu1 %v5688_v48  ;;  %v5730_v48 = vld [vmem:[#allocation13 + $0x10] ss:$8 sps:$4 sm:$0xff]  }
 0x505   : > { %2451 = vmatprep.subr.bf16.mxu1 %v5693_v49  ;;  %v5733_v49 = vld [vmem:[#allocation13 + $0x110] ss:$8 sps:$4 sm:$0xff]   ;;  %2745 = vmatpush1.bf16.msra.mxu0 %v5730_v48  ;;  %v5808_v48 = vld [vmem:[#allocation13 + $0xe0] ss:$8 sps:$4 sm:$0xff]  }
 0x508   : > { %2452 = vmatpush1.bf16.msra.mxu1 %v5691_v50  ;;  %v5738_v50 = vld [vmem:[#allocation13 + $0x24] ss:$8 sps:$4 sm:$0xff]  }
 0x509   : > { %2453 = vmatprep.subr.bf16.mxu1 %v5696_v51  ;;  %v5741_v51 = vld [vmem:[#allocation13 + $0x124] ss:$8 sps:$4 sm:$0xff]   ;;  %2746 = vmatprep.subr.bf16.mxu0 %v5738_v50  ;;  %v5816_v50 = vld [vmem:[#allocation13 + $0xf4] ss:$8 sps:$4 sm:$0xff]  }
 0x50c   : > { %2454 = vmatpush1.bf16.msra.mxu1 %v5694_v54  ;;  %v5736_v54 = vld [vmem:[#allocation13 + $0x20] ss:$8 sps:$4 sm:$0xff]  }
 0x50d   : > { %2455 = vmatprep.subr.bf16.mxu1 %v5699_v55  ;;  %v5739_v55 = vld [vmem:[#allocation13 + $0x120] ss:$8 sps:$4 sm:$0xff]   ;;  %2747 = vmatpush1.bf16.msra.mxu0 %v5736_v54  ;;  %v5814_v54 = vld [vmem:[#allocation13 + $0xf0] ss:$8 sps:$4 sm:$0xff]  }
 0x510   : > { %2456 = vmatpush1.bf16.msra.mxu1 %v5697_v56  ;;  %v5744_v56 = vld [vmem:[#allocation13 + $0x34] ss:$8 sps:$4 sm:$0xff]  }
 0x511   : > { %2457 = vmatprep.subr.bf16.mxu1 %v5702_v57  ;;  %v5747_v57 = vld [vmem:[#allocation13 + $0x134] ss:$8 sps:$4 sm:$0xff]   ;;  %2748 = vmatprep.subr.bf16.mxu0 %v5744_v56  ;;  %v5822_v56 = vld [vmem:[#allocation13 + $0x204] ss:$8 sps:$4 sm:$0xff]  }
 0x514   : > { %2458 = vmatpush1.bf16.msra.mxu1 %v5700_v58  ;;  %v5742_v58 = vld [vmem:[#allocation13 + $0x30] ss:$8 sps:$4 sm:$0xff]  }
 0x515   : > { %2459 = vmatprep.subr.bf16.mxu1 %v5705_v59  ;;  %v5745_v59 = vld [vmem:[#allocation13 + $0x130] ss:$8 sps:$4 sm:$0xff]   ;;  %2749 = vmatpush1.bf16.msra.mxu0 %v5742_v58 }
 0x518   : > { %2460 = vmatpush1.bf16.msra.mxu1 %v5703_v60  ;;  %v5750_v60 = vld [vmem:[#allocation13 + $0x44] ss:$8 sps:$4 sm:$0xff]  }
 0x519   : > { %2461 = vmatprep.subr.bf16.mxu1 %v5708_v61  ;;  %v5753_v61 = vld [vmem:[#allocation13 + $0x144] ss:$8 sps:$4 sm:$0xff]   ;;  %2750 = vmatprep.subr.bf16.mxu0 %v5750_v60  ;;  %v2501_v60 = vld [vmem:[#allocation10] sm:$0x3] }
 0x51c   : > { %2462 = vmatpush1.bf16.msra.mxu1 %v5706_v62  ;;  %v5748_v62 = vld [vmem:[#allocation13 + $0x40] ss:$8 sps:$4 sm:$0xff]  }
 0x51d   : > { %2463 = vmatprep.subr.bf16.mxu1 %v5711_v63  ;;  %v5751_v63 = vld [vmem:[#allocation13 + $0x140] ss:$8 sps:$4 sm:$0xff]   ;;  %2751 = vmatpush1.bf16.msra.mxu0 %v5748_v62  ;;  %v2523_v62 = vrot.slane %v2501_v60, %v7678_v52 }
 0x520   : > { %2464 = vmatpush1.bf16.msra.mxu1 %v5709_v0  ;;  %v5756_v0 = vld [vmem:[#allocation13 + $0x54] ss:$8 sps:$4 sm:$0xff]  }
 0x521   : > { %2465 = vmatprep.subr.bf16.mxu1 %v5714_v1  ;;  %v5759_v1 = vld [vmem:[#allocation13 + $0x154] ss:$8 sps:$4 sm:$0xff]   ;;  %2752 = vmatprep.subr.bf16.mxu0 %v5756_v0 }
 0x524   : > { %2466 = vmatpush1.bf16.msra.mxu1 %v5712_v2  ;;  %v5754_v2 = vld [vmem:[#allocation13 + $0x50] ss:$8 sps:$4 sm:$0xff]  }
 0x525   : > { %2467 = vmatprep.subr.bf16.mxu1 %v5717_v5  ;;  %v5757_v5 = vld [vmem:[#allocation13 + $0x150] ss:$8 sps:$4 sm:$0xff]   ;;  %2753 = vmatpush1.bf16.msra.mxu0 %v5754_v2 }
 0x528   : > { %2468 = vmatpush1.bf16.msra.mxu1 %v5715_v6  ;;  %v5762_v6 = vld [vmem:[#allocation13 + $0x64] ss:$8 sps:$4 sm:$0xff]  }
 0x529   : > { %2469 = vmatprep.subr.bf16.mxu1 %v5720_v7  ;;  %v5765_v7 = vld [vmem:[#allocation13 + $0x164] ss:$8 sps:$4 sm:$0xff]   ;;  %2754 = vmatprep.subr.bf16.mxu0 %v5762_v6 }
 0x52c   : > { %2470 = vmatpush1.bf16.msra.mxu1 %v5718_v8  ;;  %v5760_v8 = vld [vmem:[#allocation13 + $0x60] ss:$8 sps:$4 sm:$0xff]  }
 0x52d   : > { %2471 = vmatprep.subr.bf16.mxu1 %v5723_v9  ;;  %v5763_v9 = vld [vmem:[#allocation13 + $0x160] ss:$8 sps:$4 sm:$0xff]   ;;  %2755 = vmatpush1.bf16.msra.mxu0 %v5760_v8 }
 0x530   : > { %2472 = vmatpush1.bf16.msra.mxu1 %v5721_v10  ;;  %v5768_v10 = vld [vmem:[#allocation13 + $0x74] ss:$8 sps:$4 sm:$0xff]  }
 0x531   : > { %2980 = vmatprep.subr.bf16.mxu1 %v5729_v45  ;;  %2756 = vmatprep.subr.bf16.mxu0 %v5768_v10  ;;  %v5805_v45 = vld [vmem:[#allocation13 + $0x1d0] ss:$8 sps:$4 sm:$0xff]  }
 0x533   : > { %2474 = vmatmul.mubr.bf16.vlgmr.msra.gmra.mrb[8].mxu1 %v7712_v40 }
 0x534   : > { %2981 = vmatpush1.bf16.msra.mxu1 %v5727_v44  ;;  %v5802_v44 = vld [vmem:[#allocation13 + $0xd0] ss:$8 sps:$4 sm:$0xff]  }
 0x535   : > { %2982 = vmatprep.subr.bf16.mxu1 %v5735_v47  ;;  %v5813_v47 = vld [vmem:[#allocation13 + $0x1e4] ss:$8 sps:$4 sm:$0xff]  }
 0x538   : > { %2983 = vmatpush1.bf16.msra.mxu1 %v5733_v49  ;;  %v5811_v49 = vld [vmem:[#allocation13 + $0x1e0] ss:$8 sps:$4 sm:$0xff]  }
 0x539   : > { %2984 = vmatprep.subr.bf16.mxu1 %v5741_v51  ;;  %v5819_v51 = vld [vmem:[#allocation13 + $0x1f4] ss:$8 sps:$4 sm:$0xff]  }
 0x53c   : > { %2985 = vmatpush1.bf16.msra.mxu1 %v5739_v55  ;;  %v5817_v55 = vld [vmem:[#allocation13 + $0x1f0] ss:$8 sps:$4 sm:$0xff]  }
 0x53d   : > { %2986 = vmatprep.subr.bf16.mxu1 %v5747_v57 }
 0x540   : > { %2987 = vmatpush1.bf16.msra.mxu1 %v5745_v59 }
 0x541   : > { %2988 = vmatprep.subr.bf16.mxu1 %v5753_v61  ;;  %v2502_v61 = vld [vmem:[#allocation12] sm:$0x3] }
 0x542   : > { %v2536_v2 = vrot.slane %v2502_v61, %v7678_v52 }
 0x544   : > { %2989 = vmatpush1.bf16.msra.mxu1 %v5751_v63  ;;  %v2527_v63 = vrot.slane %v2501_v60, %v7681_v53  ;;  %v5883_v60 = vld [vmem:[#allocation16 + $0x50] ss:$8 sps:$4 sm:$0xff]  }
 0x545   : > { %2990 = vmatprep.subr.bf16.mxu1 %v5759_v1 }
 0x548   : > { %2991 = vmatpush1.bf16.msra.mxu1 %v5757_v5  ;;  %v2540_v5 = vrot.slane %v2502_v61, %v7681_v53  ;;  %v5888_v61 = vld [vmem:[#allocation16 + $0x64] ss:$8 sps:$4 sm:$0xff]  }
 0x549   : > { %2992 = vmatprep.subr.bf16.mxu1 %v5765_v7 }
 0x54c   : > { %2993 = vmatpush1.bf16.msra.mxu1 %v5763_v9 }
 0x5c6   : > { %v2001_v11 = vpop.f32.mrb[4].mxu1  ;;  %v2239_v12 = vpop.f32.mrb[8].mxu0 }
 0x5c7   : > { %v2008_v13 = vrot.slane %v2001_v11, 7  ;;  %v2003_v14 = vpop.f32.mrb[5].mxu1  ;;  %v2241_v15 = vpop.f32.mrb[9].mxu0  ;;  %v5771_v11 = vld [vmem:[#allocation13 + $0x174] ss:$8 sps:$4 sm:$0xff]  }
 0x5c8   : > { %v2009_v16 = vrot.slane %v2003_v14, 7  ;;  %v2005_v17 = vpop.f32.mrb[6].mxu1  ;;  %v2243_v18 = vpop.f32.mrb[10].mxu0  ;;  %v5774_v14 = vld [vmem:[#allocation13 + $0x84] ss:$8 sps:$4 sm:$0xff]   ;;  %2994 = vmatprep.subr.bf16.mxu1 %v5771_v11 }
 0x5c9   : > { %v2010_v19 = vsel %vm1228_vm0, %v2008_v13, 0.0  ;;  %v2006_v20 = vpop.f32.mrb[7].mxu1  ;;  %v2244_v21 = vpop.f32.mrb[11].mxu0  ;;  %v5769_v13 = vld [vmem:[#allocation13 + $0x170] ss:$8 sps:$4 sm:$0xff]  }
 0x5ca   : > { %v2246_v22 = vadd.f32 %v2239_v12, %v2010_v19  ;;  %v2011_v23 = vsel %vm1228_vm0, %v2009_v16, 0.0  ;;  %v5766_v12 = vld [vmem:[#allocation13 + $0x70] ss:$8 sps:$4 sm:$0xff]   ;;  %v5772_v16 = vld [vmem:[#allocation13 + $0x80] ss:$8 sps:$4 sm:$0xff]   ;;  %2995 = vmatpush1.bf16.msra.mxu1 %v5769_v13 }
 0x5cb   : > { %v2247_v24 = vadd.f32 %v2241_v15, %v2011_v23  ;;  %v5777_v15 = vld [vmem:[#allocation13 + $0x184] ss:$8 sps:$4 sm:$0xff]   ;;  %2757 = vmatpush1.bf16.msra.mxu0 %v5766_v12  ;;  %v5775_v17 = vld [vmem:[#allocation13 + $0x180] ss:$8 sps:$4 sm:$0xff]   ;;  %v5780_v18 = vld [vmem:[#allocation13 + $0x94] ss:$8 sps:$4 sm:$0xff]  }
 0x5cc   : > { %2758 = vmatprep.subr.bf16.mxu0 %v5774_v14  ;;  %2996 = vmatprep.subr.bf16.mxu1 %v5777_v15  ;;  %v5783_v19 = vld [vmem:[#allocation13 + $0x194] ss:$8 sps:$4 sm:$0xff]   ;;  %v5778_v20 = vld [vmem:[#allocation13 + $0x90] ss:$8 sps:$4 sm:$0xff]   ;;  %v5820_v14 = vld [vmem:[#allocation13 + $0x200] ss:$8 sps:$4 sm:$0xff]  }
 0x5cd   : > { %v5781_v21 = vld [vmem:[#allocation13 + $0x190] ss:$8 sps:$4 sm:$0xff]  }
 0x5ce   : > { %2997 = vmatpush1.bf16.msra.mxu1 %v5775_v17  ;;  %v5823_v17 = vld [vmem:[#allocation13 + $0x210] ss:$8 sps:$4 sm:$0xff]  }
 0x5cf   : > { %2759 = vmatpush1.bf16.msra.mxu0 %v5772_v16  ;;  %2998 = vmatprep.subr.bf16.mxu1 %v5783_v19  ;;  %v5825_v16 = vld [vmem:[#allocation13 + $0x214] ss:$8 sps:$4 sm:$0xff]   ;;  %v5826_v19 = vld [vmem:[#allocation13 + $0x220] ss:$8 sps:$4 sm:$0xff]  }
 0x5d0   : > { %2760 = vmatprep.subr.bf16.mxu0 %v5780_v18  ;;  %v5828_v18 = vld [vmem:[#allocation13 + $0x224] ss:$8 sps:$4 sm:$0xff]  }
 0x5d2   : > { %2999 = vmatpush1.bf16.msra.mxu1 %v5781_v21  ;;  %v5829_v21 = vld [vmem:[#allocation13 + $0x230] ss:$8 sps:$4 sm:$0xff]  }
 0x5d3   : > { %2761 = vmatpush1.bf16.msra.mxu0 %v5778_v20  ;;  %v5831_v20 = vld [vmem:[#allocation13 + $0x234] ss:$8 sps:$4 sm:$0xff]  }
 0x606   : > { %v2475_v26 = vpop.f32.mrb[8].mxu1 }
 0x607   : > { %v2482_v27 = vrot.slane %v2475_v26, 1  ;;  %v2477_v28 = vpop.f32.mrb[9].mxu1 }
 0x608   : > { %v2483_v29 = vrot.slane %v2477_v28, 1  ;;  %v2479_v30 = vpop.f32.mrb[10].mxu1 }
 0x609   : > { %v2484_v32 = vsel %vm1705_vm1, %v2482_v27, 0.0  ;;  %v2480_v33 = vpop.f32.mrb[11].mxu1  ;;  %v5784_v30 = vld [vmem:[#allocation13 + $0xa0] ss:$8 sps:$4 sm:$0xff]  }
 0x60a   : > { %v2486_v35 = vadd.f32 %v2484_v32, %v2246_v22  ;;  %v2485_v36 = vsel %vm1705_vm1, %v2483_v29, 0.0  ;;  %v5786_v29 = vld [vmem:[#allocation13 + $0xa4] ss:$8 sps:$4 sm:$0xff]   ;;  %v5787_v32 = vld [vmem:[#allocation13 + $0x1a0] ss:$8 sps:$4 sm:$0xff]  }
 0x60b   : > { %v2487_v38 = vadd.f32 %v2485_v36, %v2247_v24  ;;  %2762 = vmatprep.subr.bf16.mxu0 %v5786_v29  ;;  %v5792_v33 = vld [vmem:[#allocation13 + $0xb4] ss:$8 sps:$4 sm:$0xff]   ;;  %v5841_v29 = vld [vmem:[#allocation13 + $0x270] ss:$8 sps:$4 sm:$0xff]  }
 0x60c   : > { %v7727_v39 = vadd.f32 %v2492_v31, %v2486_v35  ;;  %v5789_v31 = vld [vmem:[#allocation13 + $0x1a4] ss:$8 sps:$4 sm:$0xff]   ;;  %2763 = vmatpush1.bf16.msra.mxu0 %v5784_v30  ;;  %v5793_v35 = vld [vmem:[#allocation13 + $0x1b0] ss:$8 sps:$4 sm:$0xff]   ;;  %v5795_v36 = vld [vmem:[#allocation13 + $0x1b4] ss:$8 sps:$4 sm:$0xff]  }
 0x60d   : > { %v7729_v40 = vadd.f32 %v2496_v34, %v2487_v38  ;;  %3000 = vmatprep.subr.bf16.mxu1 %v5789_v31  ;;  %v5790_v34 = vld [vmem:[#allocation13 + $0xb0] ss:$8 sps:$4 sm:$0xff]   ;;  %2764 = vmatprep.subr.bf16.mxu0 %v5792_v33  ;;  %v5798_v38 = vld [vmem:[#allocation13 + $0xc4] ss:$8 sps:$4 sm:$0xff]   ;;  %v5844_v31 = vld [vmem:[#allocation13 + $0x280] ss:$8 sps:$4 sm:$0xff]  }
 0x60e   : > { %3001 = vmatpush1.bf16.msra.mxu1 %v5787_v32  ;;  %v5846_v30 = vld [vmem:[#allocation13 + $0x284] ss:$8 sps:$4 sm:$0xff]   ;;  %v5849_v32 = vld [vmem:[#allocation13 + $0x294] ss:$8 sps:$4 sm:$0xff]   ;;  %v5847_v33 = vld [vmem:[#allocation13 + $0x290] ss:$8 sps:$4 sm:$0xff]  }
 0x60f   : > { %v2503_v41 = vadd.f32 %v7729_v40, %v7727_v39  ;;  %3002 = vmatprep.subr.bf16.mxu1 %v5795_v36  ;;  %v5855_v36 = vld [vmem:[#allocation13 + $0x2b4] ss:$8 sps:$4 sm:$0xff]  }
 0x610   : > { %2765 = vmatpush1.bf16.msra.mxu0 %v5790_v34  ;;  %v5852_v34 = vld [vmem:[#allocation13 + $0x2a4] ss:$8 sps:$4 sm:$0xff]  }
 0x611   : > { %2504 = vadd.xlane.f32.xlu1 %v2503_v41  ;;  %2766 = vmatprep.subr.bf16.mxu0 %v5798_v38  ;;  %v5799_v41 = vld [vmem:[#allocation13 + $0x1c0] ss:$8 sps:$4 sm:$0xff]   ;;  %v5853_v38 = vld [vmem:[#allocation13 + $0x2b0] ss:$8 sps:$4 sm:$0xff]  }
 0x612   : > { %3003 = vmatpush1.bf16.msra.mxu1 %v5793_v35  ;;  %v5850_v35 = vld [vmem:[#allocation13 + $0x2a0] ss:$8 sps:$4 sm:$0xff]  }
 0x69e   : > { %v2505_v22 = vpop.xlane.xlu1 %2504 }
 0x69f   : > { %v2506_v23 = vmul.f32 0.00390625, %v2505_v22  ;;  %v5834_v22 = vld [vmem:[#allocation13 + $0x244] ss:$8 sps:$4 sm:$0xff]  }
 0x6a1   : > { %v7734_v24 = vsub.f32 %v7727_v39, %v2506_v23  ;;  %v7737_v25 = vsub.f32 %v7729_v40, %v2506_v23  ;;  %v5796_v39 = vld [vmem:[#allocation13 + $0xc0] ss:$8 sps:$4 sm:$0xff]   ;;  %v5801_v40 = vld [vmem:[#allocation13 + $0x1c4] ss:$8 sps:$4 sm:$0xff]  }
 0x6a2   : > { %3004 = vmatprep.subr.bf16.mxu1 %v5801_v40  ;;  %2767 = vmatpush1.bf16.msra.mxu0 %v5796_v39  ;;  %v5832_v23 = vld [vmem:[#allocation13 + $0x240] ss:$8 sps:$4 sm:$0xff]   ;;  %v5858_v39 = vld [vmem:[#allocation13 + $0x2c4] ss:$8 sps:$4 sm:$0xff]  }
 0x6a3   : > { %v2509_v26 = vmul.f32 %v7734_v24, %v7734_v24  ;;  %v2510_v27 = vmul.f32 %v7737_v25, %v7737_v25  ;;  %3005 = vmatpush1.bf16.msra.mxu1 %v5799_v41  ;;  %2768 = vmatprep.subr.bf16.mxu0 %v5804_v42  ;;  %v5856_v40 = vld [vmem:[#allocation13 + $0x2c0] ss:$8 sps:$4 sm:$0xff]   ;;  %v5861_v41 = vld [vmem:[#allocation13 + $0x2d4] ss:$8 sps:$4 sm:$0xff]   ;;  %v5859_v42 = vld [vmem:[#allocation13 + $0x2d0] ss:$8 sps:$4 sm:$0xff]  }
 0x6a4   : > { %3006 = vmatprep.subr.bf16.mxu1 %v5807_v43  ;;  %v5864_v43 = vld [vmem:[#allocation13 + $0x2e4] ss:$8 sps:$4 sm:$0xff]  }
 0x6a5   : > { %v2511_v28 = vadd.f32 %v2510_v27, %v2509_v26  ;;  %v5840_v26 = vld [vmem:[#allocation13 + $0x264] ss:$8 sps:$4 sm:$0xff]   ;;  %v5838_v27 = vld [vmem:[#allocation13 + $0x260] ss:$8 sps:$4 sm:$0xff]  }
 0x6a6   : > { %2769 = vmatpush1.bf16.msra.mxu0 %v5802_v44  ;;  %v5862_v44 = vld [vmem:[#allocation13 + $0x2e0] ss:$8 sps:$4 sm:$0xff]  }
 0x6a7   : > { %2512 = vadd.xlane.f32.xlu1 %v2511_v28  ;;  %3007 = vmatpush1.bf16.msra.mxu1 %v5805_v45  ;;  %v5843_v28 = vld [vmem:[#allocation13 + $0x274] ss:$8 sps:$4 sm:$0xff]  }
 0x6a8   : > { %2770 = vmatprep.subr.bf16.mxu0 %v5810_v46  ;;  %3008 = vmatprep.subr.bf16.mxu1 %v5813_v47  ;;  %v5867_v45 = vld [vmem:[#allocation13 + $0x2f4] ss:$8 sps:$4 sm:$0xff]   ;;  %v5865_v46 = vld [vmem:[#allocation13 + $0x2f0] ss:$8 sps:$4 sm:$0xff]   ;;  %v5868_v47 = vld [vmem:[#allocation16] ss:$8 sps:$4 sm:$0xff]  }
 0x6aa   : > { %2771 = vmatpush1.bf16.msra.mxu0 %v5808_v48  ;;  %v5870_v48 = vld [vmem:[#allocation16 + $0x4] ss:$8 sps:$4 sm:$0xff]  }
 0x6ab   : > { %3009 = vmatpush1.bf16.msra.mxu1 %v5811_v49  ;;  %2772 = vmatprep.subr.bf16.mxu0 %v5816_v50  ;;  %v5873_v49 = vld [vmem:[#allocation16 + $0x14] ss:$8 sps:$4 sm:$0xff]   ;;  %v5871_v50 = vld [vmem:[#allocation16 + $0x10] ss:$8 sps:$4 sm:$0xff]  }
 0x6ac   : > { %3010 = vmatprep.subr.bf16.mxu1 %v5819_v51  ;;  %v5876_v51 = vld [vmem:[#allocation16 + $0x24] ss:$8 sps:$4 sm:$0xff]  }
 0x6ae   : > { %2773 = vmatpush1.bf16.msra.mxu0 %v5814_v54  ;;  %v5874_v54 = vld [vmem:[#allocation16 + $0x20] ss:$8 sps:$4 sm:$0xff]  }
 0x6af   : > { %3011 = vmatpush1.bf16.msra.mxu1 %v5817_v55  ;;  %3216 = vmatprep.subr.bf16.mxu0 %v5822_v56  ;;  %v5879_v55 = vld [vmem:[#allocation16 + $0x34] ss:$8 sps:$4 sm:$0xff]   ;;  %v5877_v56 = vld [vmem:[#allocation16 + $0x30] ss:$8 sps:$4 sm:$0xff]  }
 0x6b0   : > { %3484 = vmatprep.subr.bf16.mxu1 %v5870_v48 }
 0x734   : > { %v2513_v57 = vpop.xlane.xlu1 %2512 }
 0x735   : > { %v2514_v58 = vmul.f32 0.00390625, %v2513_v57  ;;  %v5882_v57 = vld [vmem:[#allocation16 + $0x44] ss:$8 sps:$4 sm:$0xff]  }
 0x737   : > { %v2515_v59 = vadd.f32 1e-05, %v2514_v58  ;;  %v5880_v58 = vld [vmem:[#allocation16 + $0x40] ss:$8 sps:$4 sm:$0xff]  }
 0x739   : > { %6062 = vrsqrt.f32 %v2515_v59  ;;  %v5885_v59 = vld [vmem:[#allocation16 + $0x54] ss:$8 sps:$4 sm:$0xff]  }
 0x743   : > { %v6063_v0 = vpop.eup %6062 }
 0x744   : > { %v2518_v1 = vmul.f32 %v6063_v0, %v7737_v25  ;;  %v2517_v6 = vmul.f32 %v6063_v0, %v7734_v24  ;;  %v5837_v24 = vld [vmem:[#allocation13 + $0x254] ss:$8 sps:$4 sm:$0xff]   ;;  %v5835_v25 = vld [vmem:[#allocation13 + $0x250] ss:$8 sps:$4 sm:$0xff]  }
 0x745   : > { %v5889_v0 = vld [vmem:[#allocation16 + $0x70] ss:$8 sps:$4 sm:$0xff]  }
 0x746   : > { %v2531_v7 = vmul.f32 %v2527_v63, %v2518_v1  ;;  %v2530_v8 = vmul.f32 %v2523_v62, %v2517_v6  ;;  %v5886_v62 = vld [vmem:[#allocation16 + $0x60] ss:$8 sps:$4 sm:$0xff]   ;;  %v5891_v63 = vld [vmem:[#allocation16 + $0x74] ss:$8 sps:$4 sm:$0xff]   ;;  %v5894_v1 = vld [vmem:[#allocation16 + $0x84] ss:$8 sps:$4 sm:$0xff]  }
 0x747   : > { %v5895_v6 = vld [vmem:[#allocation16 + $0x90] ss:$8 sps:$4 sm:$0xff]  }
 0x748   : > { %v2544_v9 = vadd.f32 %v2540_v5, %v2531_v7  ;;  %v2543_v10 = vadd.f32 %v2536_v2, %v2530_v8  ;;  %v5892_v2 = vld [vmem:[#allocation16 + $0x80] ss:$8 sps:$4 sm:$0xff]   ;;  %v5897_v5 = vld [vmem:[#allocation16 + $0x94] ss:$8 sps:$4 sm:$0xff]   ;;  %v5900_v7 = vld [vmem:[#allocation16 + $0xa4] ss:$8 sps:$4 sm:$0xff]  }
 0x749   : > { %v5898_v8 = vld [vmem:[#allocation16 + $0xa0] ss:$8 sps:$4 sm:$0xff]  }
 0x74a   : > { %v2546_v11 = vmax.f32 %v2544_v9, 0.0  ;;  %v2545_v12 = vmax.f32 %v2543_v10, 0.0  ;;  %v5903_v9 = vld [vmem:[#allocation16 + $0xb4] ss:$8 sps:$4 sm:$0xff]   ;;  %v5901_v10 = vld [vmem:[#allocation16 + $0xb0] ss:$8 sps:$4 sm:$0xff]  }
 0x74c   : > { %v2581_v13 = vpack.c.bf16 %v2546_v11, %v2546_v11  ;;  %v7749_v15 = vpack.c.bf16 %v2545_v12, %v2545_v12  ;;  %v5906_v11 = vld [vmem:[#allocation16 + $0xc4] ss:$8 sps:$4 sm:$0xff]   ;;  %v5904_v12 = vld [vmem:[#allocation16 + $0xc0] ss:$8 sps:$4 sm:$0xff]  }
 0x74e   : > { %2774 = vmatprep.mubr.bf16.mxu0 %v2581_v13  ;;  %3012 = vmatprep.mubr.bf16.mxu1 %v2581_v13 }
 0x74f   : > { %2775 = vmatmul.mubr.bf16.vlgmr.msra.gmra.mrb[12].mxu0 %v7749_v15  ;;  %3013 = vmatmul.mubr.bf16.vlgmr.msra.gmra.mrb[12].mxu1 %v7749_v15 }
 0x750   : > { %3217 = vmatpush1.bf16.msra.mxu0 %v5820_v14  ;;  %3248 = vmatprep.mubr.bf16.mxu0 %v2581_v13  ;;  %v5909_v13 = vld [vmem:[#allocation16 + $0xd4] ss:$8 sps:$4 sm:$0xff]   ;;  %v5907_v14 = vld [vmem:[#allocation16 + $0xd0] ss:$8 sps:$4 sm:$0xff]  }
 0x751   : > { %3218 = vmatprep.subr.bf16.mxu0 %v5825_v16  ;;  %3485 = vmatpush1.bf16.msra.mxu1 %v5868_v47  ;;  %v5910_v16 = vld [vmem:[#allocation16 + $0xe0] ss:$8 sps:$4 sm:$0xff]  }
 0x752   : > { %3486 = vmatprep.subr.bf16.mxu1 %v5873_v49 }
 0x754   : > { %3219 = vmatpush1.bf16.msra.mxu0 %v5823_v17  ;;  %v5915_v17 = vld [vmem:[#allocation16 + $0xf4] ss:$8 sps:$4 sm:$0xff]  }
 0x755   : > { %3220 = vmatprep.subr.bf16.mxu0 %v5828_v18  ;;  %3487 = vmatpush1.bf16.msra.mxu1 %v5871_v50  ;;  %v5913_v18 = vld [vmem:[#allocation16 + $0xf0] ss:$8 sps:$4 sm:$0xff]  }
 0x756   : > { %3488 = vmatprep.subr.bf16.mxu1 %v5876_v51 }
 0x758   : > { %3221 = vmatpush1.bf16.msra.mxu0 %v5826_v19 }
 0x759   : > { %3222 = vmatprep.subr.bf16.mxu0 %v5831_v20  ;;  %3489 = vmatpush1.bf16.msra.mxu1 %v5874_v54 }
 0x75a   : > { %3490 = vmatprep.subr.bf16.mxu1 %v5879_v55  ;;  %v3317_v55 = vrot.slane %v3312_v37, %v7678_v52 }
 0x75c   : > { %3223 = vmatpush1.bf16.msra.mxu0 %v5829_v21 }
 0x75d   : > { %3224 = vmatprep.subr.bf16.mxu0 %v5834_v22  ;;  %3491 = vmatpush1.bf16.msra.mxu1 %v5877_v56  ;;  %v3321_v56 = vrot.slane %v3312_v37, %v7681_v53 }
 0x75e   : > { %3492 = vmatprep.subr.bf16.mxu1 %v5882_v57 }
 0x760   : > { %3225 = vmatpush1.bf16.msra.mxu0 %v5832_v23 }
 0x761   : > { %3226 = vmatprep.subr.bf16.mxu0 %v5837_v24  ;;  %3493 = vmatpush1.bf16.msra.mxu1 %v5880_v58 }
 0x762   : > { %3494 = vmatprep.subr.bf16.mxu1 %v5885_v59 }
 0x764   : > { %3227 = vmatpush1.bf16.msra.mxu0 %v5835_v25 }
 0x765   : > { %3228 = vmatprep.subr.bf16.mxu0 %v5840_v26  ;;  %3495 = vmatpush1.bf16.msra.mxu1 %v5883_v60 }
 0x766   : > { %3496 = vmatprep.subr.bf16.mxu1 %v5888_v61 }
 0x768   : > { %3229 = vmatpush1.bf16.msra.mxu0 %v5838_v27 }
 0x769   : > { %3230 = vmatprep.subr.bf16.mxu0 %v5843_v28  ;;  %3497 = vmatpush1.bf16.msra.mxu1 %v5886_v62 }
 0x76a   : > { %3498 = vmatprep.subr.bf16.mxu1 %v5891_v63 }
 0x76c   : > { %3231 = vmatpush1.bf16.msra.mxu0 %v5841_v29 }
 0x76d   : > { %3232 = vmatprep.subr.bf16.mxu0 %v5846_v30  ;;  %3499 = vmatpush1.bf16.msra.mxu1 %v5889_v0  ;;  %v5916_v0 = vld [vmem:[#allocation22] ss:$8 sps:$4 sm:$0xff]  }
 0x76e   : > { %3500 = vmatprep.subr.bf16.mxu1 %v5894_v1  ;;  %v5918_v1 = vld [vmem:[#allocation22 + $0x4] ss:$8 sps:$4 sm:$0xff]  }
 0x770   : > { %3233 = vmatpush1.bf16.msra.mxu0 %v5844_v31 }
 0x771   : > { %3234 = vmatprep.subr.bf16.mxu0 %v5849_v32  ;;  %3501 = vmatpush1.bf16.msra.mxu1 %v5892_v2  ;;  %v5921_v2 = vld [vmem:[#allocation22 + $0x14] ss:$8 sps:$4 sm:$0xff]  }
 0x772   : > { %3502 = vmatprep.subr.bf16.mxu1 %v5897_v5  ;;  %v5919_v5 = vld [vmem:[#allocation22 + $0x10] ss:$8 sps:$4 sm:$0xff]  }
 0x774   : > { %3235 = vmatpush1.bf16.msra.mxu0 %v5847_v33  ;;  %v2547_v33 = vld [vmem:[#allocation15] sm:$0x3] }
 0x775   : > { %3236 = vmatprep.subr.bf16.mxu0 %v5852_v34  ;;  %3503 = vmatpush1.bf16.msra.mxu1 %v5895_v6  ;;  %v5924_v6 = vld [vmem:[#allocation22 + $0x24] ss:$8 sps:$4 sm:$0xff]  }
 0x776   : > { %3504 = vmatprep.subr.bf16.mxu1 %v5900_v7  ;;  %v5922_v7 = vld [vmem:[#allocation22 + $0x20] ss:$8 sps:$4 sm:$0xff]  }
 0x778   : > { %3237 = vmatpush1.bf16.msra.mxu0 %v5850_v35 }
 0x779   : > { %3238 = vmatprep.subr.bf16.mxu0 %v5855_v36  ;;  %3505 = vmatpush1.bf16.msra.mxu1 %v5898_v8  ;;  %v5927_v8 = vld [vmem:[#allocation22 + $0x34] ss:$8 sps:$4 sm:$0xff]  }
 0x77a   : > { %3506 = vmatprep.subr.bf16.mxu1 %v5903_v9  ;;  %v5925_v9 = vld [vmem:[#allocation22 + $0x30] ss:$8 sps:$4 sm:$0xff]  }
 0x77c   : > { %3239 = vmatpush1.bf16.msra.mxu0 %v5853_v38  ;;  %v3267_v38 = vrot.slane %v2547_v33, %v7678_v52 }
 0x77d   : > { %3240 = vmatprep.subr.bf16.mxu0 %v5858_v39  ;;  %3507 = vmatpush1.bf16.msra.mxu1 %v5901_v10  ;;  %v5930_v10 = vld [vmem:[#allocation22 + $0x44] ss:$8 sps:$4 sm:$0xff]  }
 0x77e   : > { %3508 = vmatprep.subr.bf16.mxu1 %v5906_v11  ;;  %v5928_v11 = vld [vmem:[#allocation22 + $0x40] ss:$8 sps:$4 sm:$0xff]  }
 0x780   : > { %3241 = vmatpush1.bf16.msra.mxu0 %v5856_v40 }
 0x781   : > { %3242 = vmatprep.subr.bf16.mxu0 %v5861_v41  ;;  %3509 = vmatpush1.bf16.msra.mxu1 %v5904_v12  ;;  %v5933_v12 = vld [vmem:[#allocation22 + $0x54] ss:$8 sps:$4 sm:$0xff]  }
 0x782   : > { %3510 = vmatprep.subr.bf16.mxu1 %v5909_v13  ;;  %v5931_v13 = vld [vmem:[#allocation22 + $0x50] ss:$8 sps:$4 sm:$0xff]  }
 0x784   : > { %3243 = vmatpush1.bf16.msra.mxu0 %v5859_v42  ;;  %v3271_v42 = vrot.slane %v2547_v33, %v7681_v53  ;;  %v5954_v33 = vld [vmem:[#allocation22 + $0xc4] ss:$8 sps:$4 sm:$0xff]  }
 0x785   : > { %3244 = vmatprep.subr.bf16.mxu0 %v5864_v43  ;;  %3511 = vmatpush1.bf16.msra.mxu1 %v5907_v14  ;;  %v5936_v14 = vld [vmem:[#allocation22 + $0x64] ss:$8 sps:$4 sm:$0xff]  }
 0x788   : > { %3245 = vmatpush1.bf16.msra.mxu0 %v5862_v44 }
 0x789   : > { %3246 = vmatprep.subr.bf16.mxu0 %v5867_v45 }
 0x78c   : > { %3247 = vmatpush1.bf16.msra.mxu0 %v5865_v46 }
 0x78d   : > { %3777 = vmatprep.subr.bf16.mxu0 %v5918_v1 }
 0x78f   : > { %3249 = vmatmul.mubr.bf16.vlgmr.msra.gmra.mrb[16].mxu0 %v7749_v15  ;;  %v5912_v15 = vld [vmem:[#allocation16 + $0xe4] ss:$8 sps:$4 sm:$0xff]  }
 0x790   : > { %3512 = vmatprep.subr.bf16.mxu1 %v5912_v15  ;;  %3778 = vmatpush1.bf16.msra.mxu0 %v5916_v0  ;;  %v5934_v15 = vld [vmem:[#allocation22 + $0x60] ss:$8 sps:$4 sm:$0xff]  }
 0x791   : > { %3513 = vmatpush1.bf16.msra.mxu1 %v5910_v16  ;;  %3779 = vmatprep.subr.bf16.mxu0 %v5921_v2  ;;  %v5939_v16 = vld [vmem:[#allocation22 + $0x74] ss:$8 sps:$4 sm:$0xff]  }
 0x792   : > { %3514 = vmatprep.subr.bf16.mxu1 %v5915_v17  ;;  %v5937_v17 = vld [vmem:[#allocation22 + $0x70] ss:$8 sps:$4 sm:$0xff]  }
 0x794   : > { %3780 = vmatpush1.bf16.msra.mxu0 %v5919_v5  ;;  %v3605_v5 = vld [vmem:[#allocation24] sm:$0x3] }
 0x795   : > { %3515 = vmatpush1.bf16.msra.mxu1 %v5913_v18  ;;  %3781 = vmatprep.subr.bf16.mxu0 %v5924_v6  ;;  %v5942_v18 = vld [vmem:[#allocation22 + $0x84] ss:$8 sps:$4 sm:$0xff]   ;;  %v3610_v6 = vrot.slane %v3605_v5, %v7678_v52 }
 0x798   : > { %3782 = vmatpush1.bf16.msra.mxu0 %v5922_v7  ;;  %v3614_v7 = vrot.slane %v3605_v5, %v7681_v53  ;;  %v6002_v5 = vld [vmem:[#allocation28 + $0xc4] ss:$8 sps:$4 sm:$0xff]  }
 0x799   : > { %3783 = vmatprep.subr.bf16.mxu0 %v5927_v8 }
 0x79c   : > { %3784 = vmatpush1.bf16.msra.mxu0 %v5925_v9 }
 0x79d   : > { %3785 = vmatprep.subr.bf16.mxu0 %v5930_v10 }
 0x7a0   : > { %3786 = vmatpush1.bf16.msra.mxu0 %v5928_v11 }
 0x7a1   : > { %3787 = vmatprep.subr.bf16.mxu0 %v5933_v12 }
 0x7a4   : > { %3788 = vmatpush1.bf16.msra.mxu0 %v5931_v13 }
 0x7a5   : > { %3789 = vmatprep.subr.bf16.mxu0 %v5936_v14 }
 0x7a8   : > { %3790 = vmatpush1.bf16.msra.mxu0 %v5934_v15 }
 0x7a9   : > { %3791 = vmatprep.subr.bf16.mxu0 %v5939_v16 }
 0x7ac   : > { %3792 = vmatpush1.bf16.msra.mxu0 %v5937_v17 }
 0x7ad   : > { %3793 = vmatprep.subr.bf16.mxu0 %v5942_v18 }
 0x822   : > { %v2776_v19 = vpop.f32.mrb[12].mxu0  ;;  %v3014_v20 = vpop.f32.mrb[12].mxu1 }
 0x823   : > { %v2783_v21 = vrot.slane %v2776_v19, 7  ;;  %v2778_v22 = vpop.f32.mrb[13].mxu0  ;;  %v3016_v23 = vpop.f32.mrb[13].mxu1  ;;  %v5940_v19 = vld [vmem:[#allocation22 + $0x80] ss:$8 sps:$4 sm:$0xff]  }
 0x824   : > { %v2784_v24 = vrot.slane %v2778_v22, 7  ;;  %v2780_v25 = vpop.f32.mrb[14].mxu0  ;;  %v3018_v26 = vpop.f32.mrb[14].mxu1  ;;  %3794 = vmatpush1.bf16.msra.mxu0 %v5940_v19 }
 0x825   : > { %v2785_v27 = vsel %vm1228_vm0, %v2783_v21, 0.0  ;;  %v2781_v28 = vpop.f32.mrb[15].mxu0  ;;  %v3019_v29 = vpop.f32.mrb[15].mxu1  ;;  %v5943_v21 = vld [vmem:[#allocation22 + $0x90] ss:$8 sps:$4 sm:$0xff]  }
 0x826   : > { %v3021_v30 = vadd.f32 %v3014_v20, %v2785_v27  ;;  %v2786_v31 = vsel %vm1228_vm0, %v2784_v24, 0.0  ;;  %v5945_v20 = vld [vmem:[#allocation22 + $0x94] ss:$8 sps:$4 sm:$0xff]   ;;  %v5948_v29 = vld [vmem:[#allocation22 + $0xa4] ss:$8 sps:$4 sm:$0xff]  }
 0x827   : > { %v3022_v32 = vadd.f32 %v3016_v23, %v2786_v31  ;;  %3795 = vmatprep.subr.bf16.mxu0 %v5945_v20  ;;  %v5949_v31 = vld [vmem:[#allocation22 + $0xb0] ss:$8 sps:$4 sm:$0xff]  }
 0x828   : > { %3796 = vmatpush1.bf16.msra.mxu0 %v5943_v21 }
 0x829   : > { %3797 = vmatprep.subr.bf16.mxu0 %v5948_v29 }
 0x862   : > { %v3250_v34 = vpop.f32.mrb[16].mxu0 }
 0x863   : > { %v3257_v35 = vrot.slane %v3250_v34, 1  ;;  %v3252_v36 = vpop.f32.mrb[17].mxu0  ;;  %v5952_v34 = vld [vmem:[#allocation22 + $0xc0] ss:$8 sps:$4 sm:$0xff]  }
 0x864   : > { %v3258_v39 = vrot.slane %v3252_v36, 1  ;;  %v3254_v40 = vpop.f32.mrb[18].mxu0  ;;  %v5955_v36 = vld [vmem:[#allocation22 + $0xd0] ss:$8 sps:$4 sm:$0xff]  }
 0x865   : > { %v3259_v41 = vsel %vm1705_vm1, %v3257_v35, 0.0  ;;  %v3255_v43 = vpop.f32.mrb[19].mxu0  ;;  %v5957_v35 = vld [vmem:[#allocation22 + $0xd4] ss:$8 sps:$4 sm:$0xff]  }
 0x866   : > { %v3261_v44 = vadd.f32 %v3259_v41, %v3021_v30  ;;  %v3260_v45 = vsel %vm1705_vm1, %v3258_v39, 0.0  ;;  %v5946_v30 = vld [vmem:[#allocation22 + $0xa0] ss:$8 sps:$4 sm:$0xff]   ;;  %v5963_v40 = vld [vmem:[#allocation22 + $0xf4] ss:$8 sps:$4 sm:$0xff]  }
 0x867   : > { %v3262_v46 = vadd.f32 %v3260_v45, %v3022_v32  ;;  %3798 = vmatpush1.bf16.msra.mxu0 %v5946_v30  ;;  %v5951_v32 = vld [vmem:[#allocation22 + $0xb4] ss:$8 sps:$4 sm:$0xff]   ;;  %v5958_v39 = vld [vmem:[#allocation22 + $0xe0] ss:$8 sps:$4 sm:$0xff]   ;;  %v5961_v41 = vld [vmem:[#allocation22 + $0xf0] ss:$8 sps:$4 sm:$0xff]  }
 0x868   : > { %v7764_v47 = vadd.f32 %v3267_v38, %v3261_v44  ;;  %3799 = vmatprep.subr.bf16.mxu0 %v5951_v32  ;;  %v5960_v38 = vld [vmem:[#allocation22 + $0xe4] ss:$8 sps:$4 sm:$0xff]   ;;  %v3525_v45 = vld [vmem:[#allocation19] sm:$0x3] }
 0x869   : > { %v7766_v48 = vadd.f32 %v3271_v42, %v3262_v46  ;;  %v3526_v46 = vld [vmem:[#allocation21] sm:$0x3] }
 0x86a   : > { %v7769_v49 = vand.u32 2147483647, %v7764_v47  ;;  %vm3836_vm2 = vcmp.ge.f32.partialorder %v7764_v47, 0.0  ;;  %v5969_v47 = vld [vmem:[#allocation28 + $0x14] ss:$8 sps:$4 sm:$0xff]  }
 0x86b   : > { %v7772_v50 = vand.u32 2147483647, %v7766_v48  ;;  %3800 = vmatpush1.bf16.msra.mxu0 %v5949_v31  ;;  %vm3837_vm3 = vcmp.ge.f32.partialorder %v7766_v48, 0.0  ;;  %v5972_v48 = vld [vmem:[#allocation28 + $0x24] ss:$8 sps:$4 sm:$0xff]  }
 0x86c   : > { %v3310_v54 = vpack.c.bf16 %v7769_v49, %v7769_v49  ;;  %3801 = vmatprep.subr.bf16.mxu0 %v5954_v33 }
 0x86d   : > { %v3311_v51 = vpack.c.bf16 %v7772_v50, %v7772_v50 }
 0x86f   : > { %3516 = vmatprep.mubr.bf16.mxu1 %v3311_v51  ;;  %3802 = vmatpush1.bf16.msra.mxu0 %v5952_v34  ;;  %v3547_v51 = vrot.slane %v3525_v45, %v7678_v52 }
 0x870   : > { %3517 = vmatmul.mubr.bf16.vlgmr.msra.gmra.mrb[16].mxu1 %v3310_v54  ;;  %3803 = vmatprep.subr.bf16.mxu0 %v5957_v35  ;;  %v3551_v54 = vrot.slane %v3525_v45, %v7681_v53  ;;  %v5987_v45 = vld [vmem:[#allocation28 + $0x74] ss:$8 sps:$4 sm:$0xff]  }
 0x873   : > { %3804 = vmatpush1.bf16.msra.mxu0 %v5955_v36  ;;  %v5966_v36 = vld [vmem:[#allocation28 + $0x4] ss:$8 sps:$4 sm:$0xff]  }
 0x874   : > { %3805 = vmatprep.subr.bf16.mxu0 %v5960_v38  ;;  %4096 = vmatprep.subr.bf16.mxu1 %v5966_v36  ;;  %v5970_v38 = vld [vmem:[#allocation28 + $0x20] ss:$8 sps:$4 sm:$0xff]  }
 0x875   : > { %v6050_v36 = vld [vmem:[#allocation31 + $0xc4] ss:$8 sps:$4 sm:$0xff]  }
 0x877   : > { %3806 = vmatpush1.bf16.msra.mxu0 %v5958_v39  ;;  %v5975_v39 = vld [vmem:[#allocation28 + $0x34] ss:$8 sps:$4 sm:$0xff]  }
 0x878   : > { %3807 = vmatprep.subr.bf16.mxu0 %v5963_v40  ;;  %v5973_v40 = vld [vmem:[#allocation28 + $0x30] ss:$8 sps:$4 sm:$0xff]  }
 0x87b   : > { %3808 = vmatpush1.bf16.msra.mxu0 %v5961_v41  ;;  %v5981_v41 = vld [vmem:[#allocation28 + $0x54] ss:$8 sps:$4 sm:$0xff]  }
 0x943   : > { %v3518_v57 = vpop.f32.mrb[16].mxu1 }
 0x944   : > { %v3519_v58 = vadd.f32 %v3518_v57, %v3317_v55  ;;  %v3520_v59 = vpop.f32.mrb[17].mxu1  ;;  %v3564_v57 = vrot.slane %v3526_v46, %v7681_v53 }
 0x945   : > { %v3521_v60 = vadd.f32 %v3520_v59, %v3321_v56  ;;  %v3522_v61 = vpop.f32.mrb[18].mxu1  ;;  %v3560_v56 = vrot.slane %v3526_v46, %v7678_v52  ;;  %v5985_v46 = vld [vmem:[#allocation28 + $0x70] ss:$8 sps:$4 sm:$0xff]  }
 0x946   : > { %v3523_v62 = vpop.f32.mrb[19].mxu1 }
 0x947   : > { %v3527_v63 = vadd.f32 %v3521_v60, %v3519_v58 }
 0x949   : > { %3528 = vadd.xlane.f32.xlu0 %v3527_v63 }
 0x9d6   : > { %v3529_v22 = vpop.xlane.xlu0 %3528 }
 0x9d7   : > { %v3530_v23 = vmul.f32 0.00390625, %v3529_v22 }
 0x9d9   : > { %v3531_v24 = vsub.f32 %v3519_v58, %v3530_v23  ;;  %v3532_v25 = vsub.f32 %v3521_v60, %v3530_v23 }
 0x9db   : > { %v3533_v26 = vmul.f32 %v3531_v24, %v3531_v24  ;;  %v3534_v27 = vmul.f32 %v3532_v25, %v3532_v25 }
 0x9dd   : > { %v3535_v28 = vadd.f32 %v3534_v27, %v3533_v26 }
 0x9df   : > { %3536 = vadd.xlane.f32.xlu1 %v3535_v28  ;;  %v6747_v28 = vmov -1.0  }
 0x9e0   : > { %v3838_v29 = vsel %vm3836_vm2, 1.0, %v6747_v28  ;;  %v3839_v30 = vsel %vm3837_vm3, 1.0, %v6747_v28  ;;  %v6033_v28 = vld [vmem:[#allocation31 + $0x70] ss:$8 sps:$4 sm:$0xff]  }
 0xa6c   : > { %v3537_v42 = vpop.xlane.xlu1 %3536 }
 0xa6d   : > { %v3538_v43 = vmul.f32 0.00390625, %v3537_v42  ;;  %v5979_v42 = vld [vmem:[#allocation28 + $0x50] ss:$8 sps:$4 sm:$0xff]  }
 0xa6f   : > { %v3539_v44 = vadd.f32 1e-05, %v3538_v43  ;;  %v5984_v43 = vld [vmem:[#allocation28 + $0x64] ss:$8 sps:$4 sm:$0xff]  }
 0xa71   : > { %6064 = vrsqrt.f32 %v3539_v44  ;;  %v5982_v44 = vld [vmem:[#allocation28 + $0x60] ss:$8 sps:$4 sm:$0xff]  }
 0xa7b   : > { %v6065_v37 = vpop.eup %6064 }
 0xa7c   : > { %v3542_v55 = vmul.f32 %v6065_v37, %v3532_v25  ;;  %v3541_v58 = vmul.f32 %v6065_v37, %v3531_v24  ;;  %v5993_v37 = vld [vmem:[#allocation28 + $0x94] ss:$8 sps:$4 sm:$0xff]  }
 0xa7e   : > { %v3555_v59 = vmul.f32 %v3551_v54, %v3542_v55  ;;  %v3554_v60 = vmul.f32 %v3547_v51, %v3541_v58  ;;  %v5990_v51 = vld [vmem:[#allocation28 + $0x84] ss:$8 sps:$4 sm:$0xff]   ;;  %v5988_v54 = vld [vmem:[#allocation28 + $0x80] ss:$8 sps:$4 sm:$0xff]   ;;  %v5991_v55 = vld [vmem:[#allocation28 + $0x90] ss:$8 sps:$4 sm:$0xff]  }
 0xa80   : > { %v3568_v61 = vadd.f32 %v3564_v57, %v3555_v59  ;;  %v3567_v62 = vadd.f32 %v3560_v56, %v3554_v60 }
 0xa82   : > { %v3570_v63 = vmax.f32 %v3568_v61, 0.0  ;;  %v3569_v0 = vmax.f32 %v3567_v62, 0.0 }
 0xa84   : > { %v3604_v1 = vpack.c.bf16 %v3570_v63, %v3570_v63  ;;  %v3603_v2 = vpack.c.bf16 %v3569_v0, %v3569_v0  ;;  %v5996_v63 = vld [vmem:[#allocation28 + $0xa4] ss:$8 sps:$4 sm:$0xff]   ;;  %v5994_v0 = vld [vmem:[#allocation28 + $0xa0] ss:$8 sps:$4 sm:$0xff]  }
 0xa86   : > { %3809 = vmatprep.mubr.bf16.mxu0 %v3604_v1  ;;  %v5999_v1 = vld [vmem:[#allocation28 + $0xb4] ss:$8 sps:$4 sm:$0xff]  }
 0xa87   : > { %3810 = vmatmul.mubr.bf16.vlgmr.msra.gmra.mrb[20].mxu0 %v3603_v2  ;;  %v5997_v2 = vld [vmem:[#allocation28 + $0xb0] ss:$8 sps:$4 sm:$0xff]  }
 0xb5a   : > { %v3811_v8 = vpop.f32.mrb[20].mxu0 }
 0xb5b   : > { %v3812_v9 = vadd.f32 %v3811_v8, %v3610_v6  ;;  %v3813_v10 = vpop.f32.mrb[21].mxu0  ;;  %v6000_v6 = vld [vmem:[#allocation28 + $0xc0] ss:$8 sps:$4 sm:$0xff]   ;;  %v6003_v8 = vld [vmem:[#allocation28 + $0xd0] ss:$8 sps:$4 sm:$0xff]  }
 0xb5c   : > { %v3814_v11 = vadd.f32 %v3813_v10, %v3614_v7  ;;  %v3815_v12 = vpop.f32.mrb[22].mxu0  ;;  %v6005_v7 = vld [vmem:[#allocation28 + $0xd4] ss:$8 sps:$4 sm:$0xff]   ;;  %v6008_v10 = vld [vmem:[#allocation28 + $0xe4] ss:$8 sps:$4 sm:$0xff]  }
 0xb5d   : > { %v5144_v13 = vmul.f32 -1.442695, %v3812_v9  ;;  %v3816_v14 = vpop.f32.mrb[23].mxu0  ;;  %v6006_v9 = vld [vmem:[#allocation28 + $0xe0] ss:$8 sps:$4 sm:$0xff]  }
 0xb5e   : > { %v5145_v15 = vmul.f32 -1.442695, %v3814_v11  ;;  %v6011_v11 = vld [vmem:[#allocation28 + $0xf4] ss:$8 sps:$4 sm:$0xff]   ;;  %v6009_v12 = vld [vmem:[#allocation28 + $0xf0] ss:$8 sps:$4 sm:$0xff]  }
 0xb5f   : > { %6066 = vpow2.f32 %v5144_v13  ;;  %v6012_v13 = vld [vmem:[#allocation31] ss:$8 sps:$4 sm:$0xff]   ;;  %v6014_v14 = vld [vmem:[#allocation31 + $0x4] ss:$8 sps:$4 sm:$0xff]  }
 0xb60   : > { %6068 = vpow2.f32 %v5145_v15  ;;  %v6017_v15 = vld [vmem:[#allocation31 + $0x14] ss:$8 sps:$4 sm:$0xff]   ;;  %4343 = vmatprep.subr.bf16.mxu0 %v6014_v14  ;;  %v4171_v14 = vld [vmem:[#allocation33] sm:$0x3] }
 0xb61   : > { %4344 = vmatpush1.bf16.msra.mxu0 %v6012_v13 }
 0xb62   : > { %4345 = vmatprep.subr.bf16.mxu0 %v6017_v15  ;;  %v4176_v15 = vrot.slane %v4171_v14, %v7678_v52 }
 0xb69   : > { %v6067_v16 = vpop.eup %6066 }
 0xb6a   : > { %v6069_v17 = vpop.eup %6068  ;;  %v3824_v18 = vadd.f32 1.0, %v6067_v16  ;;  %v6015_v16 = vld [vmem:[#allocation31 + $0x10] ss:$8 sps:$4 sm:$0xff]  }
 0xb6b   : > { %v3825_v19 = vadd.f32 1.0, %v6069_v17  ;;  %v6020_v17 = vld [vmem:[#allocation31 + $0x24] ss:$8 sps:$4 sm:$0xff]   ;;  %4346 = vmatpush1.bf16.msra.mxu0 %v6015_v16  ;;  %v4180_v16 = vrot.slane %v4171_v14, %v7681_v53 }
 0xb6c   : > { %6070 = vrcp.f32 %v3824_v18  ;;  %v6018_v18 = vld [vmem:[#allocation31 + $0x20] ss:$8 sps:$4 sm:$0xff]   ;;  %4347 = vmatprep.subr.bf16.mxu0 %v6020_v17 }
 0xb6d   : > { %6072 = vrcp.f32 %v3825_v19  ;;  %v6023_v19 = vld [vmem:[#allocation31 + $0x34] ss:$8 sps:$4 sm:$0xff]  }
 0xb6f   : > { %4348 = vmatpush1.bf16.msra.mxu0 %v6018_v18 }
 0xb70   : > { %4349 = vmatprep.subr.bf16.mxu0 %v6023_v19 }
 0xb76   : > { %v6071_v20 = vpop.eup %6070 }
 0xb77   : > { %v6073_v21 = vpop.eup %6072  ;;  %v3830_v22 = vmul.f32 %v6071_v20, %v7769_v49  ;;  %v6021_v20 = vld [vmem:[#allocation31 + $0x30] ss:$8 sps:$4 sm:$0xff]  }
 0xb78   : > { %v3831_v23 = vmul.f32 %v6073_v21, %v7772_v50  ;;  %v6026_v21 = vld [vmem:[#allocation31 + $0x44] ss:$8 sps:$4 sm:$0xff]   ;;  %4350 = vmatpush1.bf16.msra.mxu0 %v6021_v20 }
 0xb79   : > { %v3832_v24 = vsub.f32 %v7769_v49, %v3830_v22  ;;  %v5964_v49 = vld [vmem:[#allocation28] ss:$8 sps:$4 sm:$0xff]   ;;  %4351 = vmatprep.subr.bf16.mxu0 %v6026_v21 }
 0xb7a   : > { %v3833_v25 = vsub.f32 %v7772_v50, %v3831_v23  ;;  %4097 = vmatpush1.bf16.msra.mxu1 %v5964_v49  ;;  %v5967_v50 = vld [vmem:[#allocation28 + $0x10] ss:$8 sps:$4 sm:$0xff]   ;;  %v6024_v22 = vld [vmem:[#allocation31 + $0x40] ss:$8 sps:$4 sm:$0xff]  }
 0xb7b   : > { %v3834_v26 = vmax.f32 %v3832_v24, 0.0  ;;  %4098 = vmatprep.subr.bf16.mxu1 %v5969_v47  ;;  %v6029_v23 = vld [vmem:[#allocation31 + $0x54] ss:$8 sps:$4 sm:$0xff]   ;;  %v6027_v24 = vld [vmem:[#allocation31 + $0x50] ss:$8 sps:$4 sm:$0xff]  }
 0xb7c   : > { %v3835_v27 = vmax.f32 %v3833_v25, 0.0  ;;  %4352 = vmatpush1.bf16.msra.mxu0 %v6024_v22  ;;  %v6032_v25 = vld [vmem:[#allocation31 + $0x64] ss:$8 sps:$4 sm:$0xff]   ;;  %v6045_v49 = vld [vmem:[#allocation31 + $0xb0] ss:$8 sps:$4 sm:$0xff]  }
 0xb7d   : > { %v3840_v31 = vmul.f32 %v3838_v29, %v3834_v26  ;;  %4353 = vmatprep.subr.bf16.mxu0 %v6029_v23  ;;  %v6030_v26 = vld [vmem:[#allocation31 + $0x60] ss:$8 sps:$4 sm:$0xff]   ;;  %v6038_v29 = vld [vmem:[#allocation31 + $0x84] ss:$8 sps:$4 sm:$0xff]  }
 0xb7e   : > { %v3841_v32 = vmul.f32 %v3839_v30, %v3835_v27  ;;  %4099 = vmatpush1.bf16.msra.mxu1 %v5967_v50  ;;  %v6035_v27 = vld [vmem:[#allocation31 + $0x74] ss:$8 sps:$4 sm:$0xff]   ;;  %v6036_v30 = vld [vmem:[#allocation31 + $0x80] ss:$8 sps:$4 sm:$0xff]  }
 0xb7f   : > { %v3842_v33 = vadd.f32 %v3840_v31, %v7690_v3  ;;  %4100 = vmatprep.subr.bf16.mxu1 %v5972_v48  ;;  %v5978_v3 = vld [vmem:[#allocation28 + $0x44] ss:$8 sps:$4 sm:$0xff]   ;;  %v6041_v31 = vld [vmem:[#allocation31 + $0x94] ss:$8 sps:$4 sm:$0xff]   ;;  %v6051_v48 = vld [vmem:[#allocation31 + $0xd0] ss:$8 sps:$4 sm:$0xff]  }
 0xb80   : > { %v3843_v34 = vadd.f32 %v3841_v32, %v7692_v4  ;;  %v5976_v4 = vld [vmem:[#allocation28 + $0x40] ss:$8 sps:$4 sm:$0xff]   ;;  %4354 = vmatpush1.bf16.msra.mxu0 %v6027_v24  ;;  %v6039_v32 = vld [vmem:[#allocation31 + $0x90] ss:$8 sps:$4 sm:$0xff]  }
 0xb81   : > { %4355 = vmatprep.subr.bf16.mxu0 %v6032_v25  ;;  %v6048_v47 = vld [vmem:[#allocation31 + $0xc0] ss:$8 sps:$4 sm:$0xff]   ;;  %v6053_v50 = vld [vmem:[#allocation31 + $0xd4] ss:$8 sps:$4 sm:$0xff]  }
 0xb82   : > { %v3846_v35 = vadd.f32 %v3843_v34, %v3842_v33  ;;  %4101 = vmatpush1.bf16.msra.mxu1 %v5970_v38  ;;  %v6056_v38 = vld [vmem:[#allocation31 + $0xe4] ss:$8 sps:$4 sm:$0xff]  }
 0xb83   : > { %4102 = vmatprep.subr.bf16.mxu1 %v5975_v39  ;;  %v6054_v39 = vld [vmem:[#allocation31 + $0xe0] ss:$8 sps:$4 sm:$0xff]  }
 0xb84   : > { %3847 = vadd.xlane.f32.xlu0 %v3846_v35  ;;  %4356 = vmatpush1.bf16.msra.mxu0 %v6030_v26  ;;  %v6047_v35 = vld [vmem:[#allocation31 + $0xb4] ss:$8 sps:$4 sm:$0xff]  }
 0xb85   : > { %4357 = vmatprep.subr.bf16.mxu0 %v6035_v27 }
 0xb86   : > { %4103 = vmatpush1.bf16.msra.mxu1 %v5973_v40 }
 0xb87   : > { %4104 = vmatprep.subr.bf16.mxu1 %v5978_v3 }
 0xb88   : > { %4358 = vmatpush1.bf16.msra.mxu0 %v6033_v28 }
 0xb89   : > { %4359 = vmatprep.subr.bf16.mxu0 %v6038_v29 }
 0xb8a   : > { %4105 = vmatpush1.bf16.msra.mxu1 %v5976_v4 }
 0xb8b   : > { %4106 = vmatprep.subr.bf16.mxu1 %v5981_v41  ;;  %v3844_v41 = vld [vmem:[#allocation25] sm:$0x3] }
 0xb8c   : > { %4360 = vmatpush1.bf16.msra.mxu0 %v6036_v30 }
 0xb8d   : > { %4361 = vmatprep.subr.bf16.mxu0 %v6041_v31 }
 0xb8e   : > { %4107 = vmatpush1.bf16.msra.mxu1 %v5979_v42  ;;  %v3845_v42 = vld [vmem:[#allocation27] sm:$0x3] }
 0xb8f   : > { %4108 = vmatprep.subr.bf16.mxu1 %v5984_v43  ;;  %v3866_v43 = vrot.slane %v3844_v41, %v7678_v52 }
 0xb90   : > { %4362 = vmatpush1.bf16.msra.mxu0 %v6039_v32 }
 0xb92   : > { %4109 = vmatpush1.bf16.msra.mxu1 %v5982_v44  ;;  %v3870_v44 = vrot.slane %v3844_v41, %v7681_v53 }
 0xb93   : > { %4110 = vmatprep.subr.bf16.mxu1 %v5987_v45 }
 0xb96   : > { %4111 = vmatpush1.bf16.msra.mxu1 %v5985_v46 }
 0xb97   : > { %4112 = vmatprep.subr.bf16.mxu1 %v5990_v51 }
 0xb9a   : > { %4113 = vmatpush1.bf16.msra.mxu1 %v5988_v54  ;;  %v3879_v54 = vrot.slane %v3845_v42, %v7678_v52 }
 0xb9b   : > { %4114 = vmatprep.subr.bf16.mxu1 %v5993_v37  ;;  %v3883_v37 = vrot.slane %v3845_v42, %v7681_v53 }
 0xb9e   : > { %4115 = vmatpush1.bf16.msra.mxu1 %v5991_v55 }
 0xb9f   : > { %4116 = vmatprep.subr.bf16.mxu1 %v5996_v63 }
 0xba2   : > { %4117 = vmatpush1.bf16.msra.mxu1 %v5994_v0 }
 0xba3   : > { %4118 = vmatprep.subr.bf16.mxu1 %v5999_v1  ;;  %v6059_v1 = vld [vmem:[#allocation31 + $0xf4] ss:$8 sps:$4 sm:$0xff]  }
 0xba6   : > { %4119 = vmatpush1.bf16.msra.mxu1 %v5997_v2  ;;  %v6057_v2 = vld [vmem:[#allocation31 + $0xf0] ss:$8 sps:$4 sm:$0xff]  }
 0xba7   : > { %4120 = vmatprep.subr.bf16.mxu1 %v6002_v5 }
 0xbaa   : > { %4121 = vmatpush1.bf16.msra.mxu1 %v6000_v6 }
 0xbab   : > { %4122 = vmatprep.subr.bf16.mxu1 %v6005_v7 }
 0xbae   : > { %4123 = vmatpush1.bf16.msra.mxu1 %v6003_v8 }
 0xbaf   : > { %4124 = vmatprep.subr.bf16.mxu1 %v6008_v10 }
 0xbb2   : > { %4125 = vmatpush1.bf16.msra.mxu1 %v6006_v9 }
 0xbb3   : > { %4126 = vmatprep.subr.bf16.mxu1 %v6011_v11 }
 0xbb6   : > { %4127 = vmatpush1.bf16.msra.mxu1 %v6009_v12 }
 0xc11   : > { %v3848_v56 = vpop.xlane.xlu0 %3847 }
 0xc12   : > { %v3849_v57 = vmul.f32 0.00390625, %v3848_v56 }
 0xc14   : > { %v7794_v58 = vsub.f32 %v3842_v33, %v3849_v57  ;;  %v7796_v59 = vsub.f32 %v3843_v34, %v3849_v57  ;;  %v6044_v33 = vld [vmem:[#allocation31 + $0xa4] ss:$8 sps:$4 sm:$0xff]   ;;  %v6042_v34 = vld [vmem:[#allocation31 + $0xa0] ss:$8 sps:$4 sm:$0xff]  }
 0xc15   : > { %4363 = vmatprep.subr.bf16.mxu0 %v6044_v33 }
 0xc16   : > { %v3852_v60 = vmul.f32 %v7794_v58, %v7794_v58  ;;  %v3853_v61 = vmul.f32 %v7796_v59, %v7796_v59  ;;  %4364 = vmatpush1.bf16.msra.mxu0 %v6042_v34 }
 0xc17   : > { %4365 = vmatprep.subr.bf16.mxu0 %v6047_v35 }
 0xc18   : > { %v3854_v62 = vadd.f32 %v3853_v61, %v3852_v60 }
 0xc1a   : > { %3855 = vadd.xlane.f32.xlu1 %v3854_v62  ;;  %4366 = vmatpush1.bf16.msra.mxu0 %v6045_v49 }
 0xc1b   : > { %4367 = vmatprep.subr.bf16.mxu0 %v6050_v36 }
 0xc1e   : > { %4368 = vmatpush1.bf16.msra.mxu0 %v6048_v47 }
 0xc1f   : > { %4369 = vmatprep.subr.bf16.mxu0 %v6053_v50 }
 0xc22   : > { %4370 = vmatpush1.bf16.msra.mxu0 %v6051_v48 }
 0xc23   : > { %4371 = vmatprep.subr.bf16.mxu0 %v6056_v38 }
 0xc26   : > { %4372 = vmatpush1.bf16.msra.mxu0 %v6054_v39 }
 0xc27   : > { %4373 = vmatprep.subr.bf16.mxu0 %v6059_v1 }
 0xc2a   : > { %4374 = vmatpush1.bf16.msra.mxu0 %v6057_v2 }
 0xca7   : > { %v3856_v40 = vpop.xlane.xlu1 %3855 }
 0xca8   : > { %v3857_v3 = vmul.f32 0.00390625, %v3856_v40 }
 0xcaa   : > { %v3858_v4 = vadd.f32 1e-05, %v3857_v3 }
 0xcac   : > { %6074 = vrsqrt.f32 %v3858_v4 }
 0xcb6   : > { %v6075_v45 = vpop.eup %6074 }
 0xcb7   : > { %v3860_v46 = vmul.f32 %v6075_v45, %v7794_v58  ;;  %v3861_v51 = vmul.f32 %v6075_v45, %v7796_v59  ;;  %v3924_v58 = vld [vmem:[#allocation30] sm:$0x3] }
 0xcb8   : > { %v3929_v59 = vrot.slane %v3924_v58, %v7678_v52  ;;  %v3933_v5 = vrot.slane %v3924_v58, %v7681_v53 }
 0xcb9   : > { %v3874_v55 = vmul.f32 %v3870_v44, %v3861_v51  ;;  %v3873_v56 = vmul.f32 %v3866_v43, %v3860_v46 }
 0xcbb   : > { %v3887_v57 = vadd.f32 %v3883_v37, %v3874_v55  ;;  %v3886_v60 = vadd.f32 %v3879_v54, %v3873_v56 }
 0xcbd   : > { %v3889_v61 = vmax.f32 %v3887_v57, 0.0  ;;  %v3888_v62 = vmax.f32 %v3886_v60, 0.0 }
 0xcbf   : > { %v3923_v63 = vpack.c.bf16 %v3889_v61, %v3889_v61  ;;  %v3922_v0 = vpack.c.bf16 %v3888_v62, %v3888_v62 }
 0xcc1   : > { %4128 = vmatprep.mubr.bf16.mxu1 %v3923_v63 }
 0xcc2   : > { %4129 = vmatmul.mubr.bf16.vlgmr.msra.gmra.mrb[20].mxu1 %v3922_v0 }
 0xd95   : > { %v4130_v6 = vpop.f32.mrb[20].mxu1 }
 0xd96   : > { %v4131_v7 = vadd.f32 %v4130_v6, %v3929_v59  ;;  %v4132_v8 = vpop.f32.mrb[21].mxu1 }
 0xd97   : > { %v4133_v9 = vadd.f32 %v4132_v8, %v3933_v5  ;;  %v4134_v10 = vpop.f32.mrb[22].mxu1 }
 0xd98   : > { %v4135_v11 = vpop.f32.mrb[23].mxu1  ;;  %v4169_v13 = vpack.c.bf16 %v4131_v7, %v4131_v7 }
 0xd99   : > { %v4170_v12 = vpack.c.bf16 %v4133_v9, %v4133_v9 }
 0xd9b   : > { %4375 = vmatprep.mubr.bf16.mxu0 %v4170_v12 }
 0xd9c   : > { %4376 = vmatmul.mubr.bf16.vlgmr.msra.gmra.mrb[24].mxu0 %v4169_v13 }
 0xe6f   : > { %v4377_v17 = vpop.f32.mrb[24].mxu0 }
 0xe70   : > { %v4378_v18 = vadd.f32 %v4377_v17, %v4176_v15  ;;  %v4379_v19 = vpop.f32.mrb[25].mxu0 }
 0xe71   : > { %v4380_v20 = vadd.f32 %v4379_v19, %v4180_v16  ;;  %v4381_v21 = vpop.f32.mrb[26].mxu0 }
 0xe72   : > { %v4384_v22 = vrot.slane %v4378_v18, 4  ;;  %v4382_v23 = vpop.f32.mrb[27].mxu0 }
 0xe73   : > { %v4390_v24 = vrot.slane %v4380_v20, 4 }
 0xe74   : > { %v4385_v25 = vmax.f32 %v4378_v18, %v4384_v22 }
 0xe75   : > { %v4391_v26 = vmax.f32 %v4380_v20, %v4390_v24 }
 0xe76   : > { %v4386_v27 = vrot.slane %v4385_v25, 2 }
 0xe77   : > { %v4392_v28 = vrot.slane %v4391_v26, 2 }
 0xe78   : > { %v4387_v29 = vmax.f32 %v4385_v25, %v4386_v27 }
 0xe79   : > { %v4393_v30 = vmax.f32 %v4391_v26, %v4392_v28 }
 0xe7a   : > { %v4388_v31 = vrot.slane %v4387_v29, 1 }
 0xe7b   : > { %v4394_v32 = vrot.slane %v4393_v30, 1 }
 0xe7c   : > { %v4389_v33 = vmax.f32 %v4387_v29, %v4388_v31 }
 0xe7d   : > { %v4395_v52 = vmax.f32 %v4393_v30, %v4394_v32 }
 0xe7e   : > { %v4396_v34 = vsub.f32 %v4378_v18, %v4389_v33 }
 0xe7f   : > { %v4397_v53 = vsub.f32 %v4380_v20, %v4395_v52 }
 0xe80   : > { %v4398_v35 = vmul.f32 1.442695, %v4396_v34 }
 0xe81   : > { %v4400_v49 = vmul.f32 1.442695, %v4397_v53 }
 0xe82   : > { %6076 = vpow2.f32 %v4398_v35 }
 0xe83   : > { %6078 = vpow2.f32 %v4400_v49 }
 0xe8c   : > { %v6077_v36 = vpop.eup %6076 }
 0xe8d   : > { %v6079_v47 = vpop.eup %6078  ;;  %v4402_v50 = vrot.slane %v6077_v36, 4 }
 0xe8e   : > { %v4408_v48 = vrot.slane %v6079_v47, 4 }
 0xe8f   : > { %v4403_v38 = vadd.f32 %v6077_v36, %v4402_v50 }
 0xe90   : > { %v4409_v39 = vadd.f32 %v6079_v47, %v4408_v48 }
 0xe91   : > { %v4404_v40 = vrot.slane %v4403_v38, 2 }
 0xe92   : > { %v4410_v3 = vrot.slane %v4409_v39, 2 }
 0xe93   : > { %v4405_v4 = vadd.f32 %v4404_v40, %v4403_v38 }
 0xe94   : > { %v4411_v41 = vadd.f32 %v4410_v3, %v4409_v39 }
 0xe95   : > { %v4406_v42 = vrot.slane %v4405_v4, 1 }
 0xe96   : > { %v4412_v43 = vrot.slane %v4411_v41, 1 }
 0xe97   : > { %v4407_v44 = vadd.f32 %v4406_v42, %v4405_v4 }
 0xe98   : > { %v4413_v45 = vadd.f32 %v4412_v43, %v4411_v41 }
 0xe99   : > { %6080 = vrcp.f32 %v4407_v44 }
 0xe9a   : > { %6082 = vrcp.f32 %v4413_v45 }
 0xea3   : > { %v6081_v46 = vpop.eup %6080 }
 0xea4   : > { %v6083_v51 = vpop.eup %6082  ;;  %v4415_v54 = vmul.f32 %v6081_v46, %v6077_v36 }
 0xea5   : > { %v4417_v37 = vmul.f32 %v6083_v51, %v6079_v47 }
 0xea6   : > { %4418 = vst [vmem:[%s985_s22] sm:$0xff] %v4415_v54 }
 0xea7   : > { %4419 = vst [vmem:[%s985_s22 + $0x8] sm:$0xff] %v4417_v37 }
 0xea8 PF: > { %s7917_s23 = sld [smem:[#allocation45_spill]] }
 0xeae   : > { %s44_s4 = sadd.s32 1, %s7917_s23  }
 0xeaf   : > { %p41_p9 = scmp.ge.s32.totalorder %s44_s4, 4  }
 0xeb1   :  { %43 = sbr.rel (!%p41_p9) target bundleno = 24 (0x18), region = 233 }
 0xeb8   :  { %4441 = vsyncpa [#allocation3], 1 }
 0xeb9   :  { %4443 = vsyncpa [#allocation3 + $0x1], 1 }
 0xeba   :  { %4444 = vsyncpa [#allocation5], 1 }
 0xebb   :  { %4445 = vsyncpa [#allocation8], 1 }
 0xebc   :  { %4446 = vsyncpa [#allocation11], 1 }
 0xebd   :  { %4447 = vsyncpa [#allocation14], 1 }
 0xebe   :  { %4448 = vsyncpa [#allocation17], 1 }
 0xebf   :  { %4449 = vsyncpa [#allocation20], 1 }
 0xec0   :  { %4450 = vsyncpa [#allocation23], 1 }
 0xec1   :  { %4451 = vsyncpa [#allocation26], 1 }
 0xec2   :  { %4452 = vsyncpa [#allocation29], 1 }
 0xec3   :  { %4453 = vsyncpa [#allocation32], 1 }

// kernel: encoder_forward.13
= control target key start
LH: loop header
LB: loop body
LE: loop exit
PB: predicated region body
PF: predicated region fallthrough
CT: control target
= control target key end

     0   :  { %8 = vsyncpa [#allocation3], 0  ;;  %s538_s0 = inlined_call_operand.vmem [shape: f32[16,256], index: 0, kind: input, shape index: {}]   ;;  %s539_s1 = inlined_call_operand.vmem [shape: f32[1,256], index: 1, kind: input, shape index: {}]   ;;  %s540_s2 = inlined_call_operand.vmem [shape: f32[1,256], index: 2, kind: input, shape index: {}]   ;;  %s541_s3 = inlined_call_operand.hbm [shape: f32[16,256], index: 3, kind: output, shape index: {}]  }
   0x1   :  { %10 = vsyncpa [#allocation3 + $0x1], 0  ;;  %s432_s12 = smov 0   ;;  %s434_s13 = smov 0  }
   0x2   :  { %s436_s14 = smov 0   ;;  %s438_s15 = smov 0  }
   0x3 LB: > { %s453_s16 = sadd.s32 4294967295, %s409_s15   ;;  %s292_s17 = sadd.s32 4294967294, %s409_s15   ;;  %s409_s15 = sphi %s438_s15, %s547_s15   ;;  %s405_s14 = sphi %s436_s14, %s546_s14   ;;  %s401_s13 = sphi %s434_s13, %s545_s13   ;;  %s397_s12 = sphi %s432_s12, %s544_s12  }
   0x4   : > { %s457_s18 = sadd.s32 1, %s409_s15   ;;  %s91_s19 = sadd.s32 1, %s405_s14 }
   0x5   : > { %s88_s20 = ssub.s32 %s409_s15, %s457_s18  ;;  %p101_p0 = scmp.ne.s32.totalorder %s405_s14, %s401_s13 }
   0x6   : > { %p89_p1 = scmp.eq.s32.totalorder %s88_s20, 0  ;;  %p102_p2 = scmp.eq.s32.totalorder %s453_s16, 1 }
   0x7   : > { %p107_p3 = scmp.ne.s32.totalorder %s401_s13, %s397_s12  ;;  %p108_p4 = scmp.eq.s32.totalorder %s292_s17, 1 }
   0x8   : > { %s468_s21 = scalar_select %p89_p1, %s405_s14, %s91_s19  }
   0x9   : > { %p470_p5 = por %p102_p2, %p101_p0  ;;  %p474_p6 = por %p108_p4, %p107_p3 }
   0xa   : > { %p295_p7 = scmp.ge.s32.totalorder %s409_s15, 1  ;;  %p140_p8 = scmp.lt.s32.totalorder %s409_s15, 3 }
   0xc   : > { %p141_p9 = pnand %p295_p7, %p140_p8 }
   0xd   : > { %p164_p10 = scmp.lt.s32.totalorder (!%p141_p9), %s453_s16, 1  ;;  %v191_v12 = vlaneseq (!%p141_p9)  ;;  %s161_s29 = sand.u32 (!%p141_p9), 1, %s401_s13   ;;  %v171_v17 = vld [vmem:[%s539_s1] sm:$0x3] (!%p141_p9) }
   0xe   : > { %144 = sbr.rel (%p141_p9) target bundleno = 355 (0x163), region = 32  ;;  %s296_s30 = sshll.u32 (!%p141_p9), %s161_s29, 4  ;;  %v172_v18 = vld [vmem:[%s540_s2] sm:$0x3] (!%p141_p9) }
   0xf   : > { %v192_v14 = vshrl.u32 (!%p141_p9), %v191_v12, 7  ;;  %s305_s8 = sshll.u32 (!%p141_p9), %s453_s16, 8  ;;  %s163_s9 = scalar_lea.vmem (!%p141_p9), [#allocation2], %s296_s30 }
  0x10   : > { %s233_s10 = sshll.u32 (!%p141_p9), %s163_s9, 4  ;;  %s496_s19 = scalar_lea.hbm (!%p141_p9), %s541_s3, %s305_s8  ;;  %s498_s10 = int_to_ptr.vmem [resolvable:$true] %s233_s10 }
  0x11   : > { %v193_v15 = vsub.s32 (!%p141_p9), 0, %v192_v14  ;;  %v197_v16 = vsub.s32 (!%p141_p9), 1, %v192_v14  ;;  %s219_s20 = scalar_lea.sflag (!%p141_p9), [#allocation3], %s161_s29 }
  0x13   : > { %v194_v19 = vrot.slane (!%p141_p9), %v171_v17, %v193_v15  ;;  %v198_v20 = vrot.slane (!%p141_p9), %v171_v17, %v197_v16  ;;  %v207_v24 = vrot.slane (!%p141_p9), %v172_v18, %v193_v15  ;;  %v211_v25 = vrot.slane (!%p141_p9), %v172_v18, %v197_v16 }
  0x15   : > { %s165_s24 = scalar_select %p164_p10, %s453_s16, 1 }
  0x16   : > { %s347_s16 = scalar_lea.vmem %s498_s10, 256 }
  0x17   : > { %s304_s25 = sshll.u32 %s165_s24, 4  ;;  %p348_p11 = scmp.ne.s32.totalorder %s498_s10, %s347_s16 }
  0x18   : > { %s168_s28 = scalar_lea.vmem %s538_s0, %s304_s25  ;;  %s411_s24 = smov [#allocation2]  }
  0x19   : > { %v169_v0 = vld [vmem:[%s168_s28] sm:$0xff]  ;;  %v170_v1 = vld [vmem:[%s168_s28 + $0x8] sm:$0xff]  ;;  %p349_p12 = pnand %p348_p11, %p470_p5  ;;  %s351_s25 = sshll.u32 %s411_s24, 4  ;;  %s352_s25 = int_to_ptr.vmem [resolvable:$false] %s351_s25 }
  0x1a   : > { %v173_v2 = vadd.f32 %v170_v1, %v169_v0  ;;  %s353_s26 = scalar_lea.vmem %s352_s25, 512  ;;  %p354_p0 = scmp.lt.s32.totalorder %s498_s10, %s352_s25 }
  0x1b   : > { %p350_p13 = pneg %p349_p12  ;;  %p355_p1 = scmp.lt.s32.totalorder %s353_s26, %s347_s16 }
  0x1c   : > { %174 = vadd.xlane.f32.xlu0 %v173_v2 }
  0x1d   : > { %p356_p2 = por %p355_p1, %p354_p0 }
  0x1f   : > { %p357_p3 = pnand %p356_p2, %p350_p13 }
  0xa9   : > { %v175_v3 = vpop.xlane.xlu0 %174 }
  0xaa   : > { %v177_v4 = vmul.f32 0.00390625, %v175_v3 }
  0xac   : > { %v178_v5 = vsub.f32 %v169_v0, %v177_v4  ;;  %v179_v6 = vsub.f32 %v170_v1, %v177_v4 }
  0xae   : > { %v180_v7 = vmul.f32 %v178_v5, %v178_v5  ;;  %v181_v8 = vmul.f32 %v179_v6, %v179_v6 }
  0xb0   : > { %v182_v9 = vadd.f32 %v181_v8, %v180_v7 }
  0xb2   : > { %183 = vadd.xlane.f32.xlu0 %v182_v9 }
 0x13f   : > { %v184_v10 = vpop.xlane.xlu0 %183 }
 0x140   : > { %v185_v11 = vmul.f32 0.00390625, %v184_v10 }
 0x142   : > { %v186_v13 = vadd.f32 1e-06, %v185_v11 }
 0x144   : > { %345 = vrsqrt.f32 %v186_v13 }
 0x14e   : > { %v346_v21 = vpop.eup %345 }
 0x14f   : > { %v188_v22 = vmul.f32 %v346_v21, %v178_v5  ;;  %v189_v23 = vmul.f32 %v346_v21, %v179_v6 }
 0x151   : > { %v201_v26 = vmul.f32 %v194_v19, %v188_v22  ;;  %v202_v27 = vmul.f32 %v198_v20, %v189_v23 }
 0x153   : > { %v214_v28 = vadd.f32 %v207_v24, %v201_v26  ;;  %v215_v29 = vadd.f32 %v211_v25, %v202_v27 }
 0x155   : > { %216 = vst [vmem:[%s163_s9] sm:$0xff] %v214_v28  ;;  %217 = vst [vmem:[%s163_s9 + $0x8] sm:$0xff] %v215_v29 }
 0x156   : > { %360 = shalt.err (!%p357_p3)
}
 0x157   : > { %s361_s27 = scalar_lea.hbm %s496_s19, 256  ;;  %s365_s30 = scalar_lea.hbm %s541_s3, 512 }
 0x158   : > { %p362_p4 = scmp.ne.s32.totalorder %s496_s19, %s361_s27  ;;  %p366_p9 = scmp.lt.u32.totalorder %s496_s19, %s541_s3 }
 0x159   : > { %p367_p10 = scmp.lt.u32.totalorder %s365_s30, %s361_s27  ;;  %p369_p12 = scmp.lt.u32.totalorder %s361_s27, %s496_s19 }
 0x15a   : > { %p363_p7 = pnand %p362_p4, %p470_p5 }
 0x15b   : > { %p368_p11 = por %p367_p10, %p366_p9 }
 0x15c   : > { %p364_p8 = pneg %p363_p7 }
 0x15d   : > { %p370_p13 = por %p369_p12, %p368_p11 }
 0x15f   : > { %p371_p0 = pnand %p370_p13, %p364_p8 }
 0x161   : > { %374 = shalt.err (!%p371_p0)
}
 0x162   : > { %306 = dma.vmem_to_hbm [thread:$0]  (%p470_p5), %s498_s10, 256, %s496_s19, %s219_s20  }
 0x163 PF: > { %p312_p1 = scmp.ge.s32.totalorder %s409_s15, 2  ;;  %s245_s6 = sand.u32 1, %s397_s12  }
 0x164   : > { %s246_s7 = scalar_lea.sflag [#allocation3], %s245_s6 }
 0x165   : > { %p309_p2 = pnand %p312_p1, %p474_p6 }
 0x167   : > { %392 = dma.done.wait (!%p309_p2), %s246_s7, 256  }
 0x168   : > { %394 = vsyncadd (!%p309_p2), %s246_s7, 4294967040  ;;  %p13_p3 = scmp.ge.s32.totalorder %s457_s18, 4   ;;  %s544_s12 = smov %s401_s13 }
 0x169   : > { %s545_s13 = smov %s405_s14  ;;  %s546_s14 = smov %s468_s21 }
 0x16a   : > { %s547_s15 = smov %s457_s18  ;;  %15 = sbr.rel (!%p13_p3) target bundleno = 3 (0x3), region = 67 }
 0x171   :  { %251 = vsyncpa [#allocation3], 1 }
 0x172   :  { %253 = vsyncpa [#allocation3 + $0x1], 1 }

// kernel: encoder_forward.11
= control target key start
LH: loop header
LB: loop body
LE: loop exit
PB: predicated region body
PF: predicated region fallthrough
CT: control target
= control target key end

     0   :  { %s2950_s17 = smov 0   ;;  %s3731_s0 = inlined_call_operand.vmem [shape: f32[2,8,256], index: 0, kind: input, shape index: {}]   ;;  %s3732_s1 = inlined_call_operand.vmem [shape: f32[2,1,256], index: 1, kind: input, shape index: {}]   ;;  %s3733_s2 = inlined_call_operand.vmem [shape: f32[2,1,256], index: 2, kind: input, shape index: {}]   ;;  %s3734_s3 = inlined_call_operand.vmem [shape: bf16[2,256,512], index: 3, kind: input, shape index: {}]   ;;  %s3735_s4 = inlined_call_operand.vmem [shape: f32[2,1,512], index: 4, kind: input, shape index: {}]   ;;  %s3736_s5 = inlined_call_operand.vmem [shape: f32[2,7,256], index: 5, kind: input, shape index: {}]   ;;  %s3737_s6 = inlined_call_operand.vmem [shape: f32[2,1,256], index: 6, kind: input, shape index: {}]   ;;  %s3738_s7 = inlined_call_operand.vmem [shape: f32[2,1,256], index: 7, kind: input, shape index: {}]   ;;  %s3739_s8 = inlined_call_operand.vmem [shape: f32[2,1,256], index: 8, kind: input, shape index: {}]   ;;  %s3740_s9 = inlined_call_operand.vmem [shape: bf16[2,256,128], index: 9, kind: input, shape index: {}]   ;;  %s3741_s10 = inlined_call_operand.vmem [shape: f32[2,1,128], index: 10, kind: input, shape index: {}]   ;;  %s3742_s11 = inlined_call_operand.vmem [shape: f32[2,8,256], index: 11, kind: output, shape index: {}]  }
   0x1 LB: > { %s2278_s18 = sadd.s32 4294967295, %s2888_s17   ;;  %p2282_p0 = scmp.ge.s32.totalorder %s2888_s17, 1  ;;  %s2888_s17 = sphi %s2950_s17, %s21_s17  }
   0x2   : > { %p337_p1 = scmp.lt.s32.totalorder %s2888_s17, 3 }
   0x4   : > { %p338_p2 = pnand %p2282_p0, %p337_p1 }
   0x5   : > { %p377_p3 = scmp.lt.s32.totalorder (!%p338_p2), %s2278_s18, 1  ;;  %v2618_v3 = vld [vmem:[%s3734_s3 + $0xc] ss:$16 sps:$4 sm:$0xff] (!%p338_p2)   ;;  %v2620_v4 = vld [vmem:[%s3734_s3 + $0x4] ss:$16 sps:$4 sm:$0xff] (!%p338_p2)  }
   0x6   : > { %341 = sbr.rel (%p338_p2) target bundleno = 1835 (0x72b), region = 64  ;;  %v2622_v5 = vld [vmem:[%s3734_s3 + $0x8] ss:$16 sps:$4 sm:$0xff] (!%p338_p2)   ;;  %v2623_v6 = vld [vmem:[%s3734_s3] ss:$16 sps:$4 sm:$0xff] (!%p338_p2)   ;;  %886 = vmatprep.subr.bf16.mxu1 (!%p338_p2), %v2618_v3  ;;  %845 = vmatprep.subr.bf16.mxu0 (!%p338_p2), %v2620_v4 }
   0x7   : > { %v2624_v7 = vld [vmem:[%s3734_s3 + $0x2c] ss:$16 sps:$4 sm:$0xff] (!%p338_p2)   ;;  %v2626_v8 = vld [vmem:[%s3734_s3 + $0x24] ss:$16 sps:$4 sm:$0xff] (!%p338_p2)   ;;  %887 = vmatpush1.bf16.msra.mxu1 (!%p338_p2), %v2622_v5  ;;  %846 = vmatpush1.bf16.msra.mxu0 (!%p338_p2), %v2623_v6  ;;  %v2628_v9 = vld [vmem:[%s3734_s3 + $0x28] ss:$16 sps:$4 sm:$0xff] (!%p338_p2)  }
   0x8   : > { %v2629_v10 = vld [vmem:[%s3734_s3 + $0x20] ss:$16 sps:$4 sm:$0xff] (!%p338_p2)   ;;  %888 = vmatprep.subr.bf16.mxu1 (!%p338_p2), %v2624_v7  ;;  %847 = vmatprep.subr.bf16.mxu0 (!%p338_p2), %v2626_v8  ;;  %v2630_v11 = vld [vmem:[%s3734_s3 + $0x4c] ss:$16 sps:$4 sm:$0xff] (!%p338_p2)   ;;  %v2632_v12 = vld [vmem:[%s3734_s3 + $0x44] ss:$16 sps:$4 sm:$0xff] (!%p338_p2)  }
   0x9   : > { %v2634_v13 = vld [vmem:[%s3734_s3 + $0x48] ss:$16 sps:$4 sm:$0xff] (!%p338_p2)   ;;  %v2635_v14 = vld [vmem:[%s3734_s3 + $0x40] ss:$16 sps:$4 sm:$0xff] (!%p338_p2)   ;;  %v2636_v15 = vld [vmem:[%s3734_s3 + $0x6c] ss:$16 sps:$4 sm:$0xff] (!%p338_p2)  }
   0xa   : > { %v2638_v16 = vld [vmem:[%s3734_s3 + $0x64] ss:$16 sps:$4 sm:$0xff] (!%p338_p2)   ;;  %v2640_v17 = vld [vmem:[%s3734_s3 + $0x68] ss:$16 sps:$4 sm:$0xff] (!%p338_p2)   ;;  %v2641_v18 = vld [vmem:[%s3734_s3 + $0x60] ss:$16 sps:$4 sm:$0xff] (!%p338_p2)  }
   0xb   : > { %889 = vmatpush1.bf16.msra.mxu1 (!%p338_p2), %v2628_v9  ;;  %848 = vmatpush1.bf16.msra.mxu0 (!%p338_p2), %v2629_v10  ;;  %v2642_v19 = vld [vmem:[%s3734_s3 + $0x8c] ss:$16 sps:$4 sm:$0xff] (!%p338_p2)   ;;  %v2644_v20 = vld [vmem:[%s3734_s3 + $0x84] ss:$16 sps:$4 sm:$0xff] (!%p338_p2)   ;;  %v2646_v21 = vld [vmem:[%s3734_s3 + $0x88] ss:$16 sps:$4 sm:$0xff] (!%p338_p2)  }
   0xc   : > { %890 = vmatprep.subr.bf16.mxu1 (!%p338_p2), %v2630_v11  ;;  %849 = vmatprep.subr.bf16.mxu0 (!%p338_p2), %v2632_v12  ;;  %v2647_v22 = vld [vmem:[%s3734_s3 + $0x80] ss:$16 sps:$4 sm:$0xff] (!%p338_p2)   ;;  %v2648_v23 = vld [vmem:[%s3734_s3 + $0xac] ss:$16 sps:$4 sm:$0xff] (!%p338_p2)   ;;  %v2650_v24 = vld [vmem:[%s3734_s3 + $0xa4] ss:$16 sps:$4 sm:$0xff] (!%p338_p2)  }
   0xd   : > { %s3744_s18 = smov (!%p377_p3, %s2278_s18), 1  ;;  %v2652_v25 = vld [vmem:[%s3734_s3 + $0xa8] ss:$16 sps:$4 sm:$0xff]   ;;  %v2653_v26 = vld [vmem:[%s3734_s3 + $0xa0] ss:$16 sps:$4 sm:$0xff]  }
   0xe   : > { %s2564_s19 = sshll.u32 %s3744_s18, 4  ;;  %v2654_v27 = vld [vmem:[%s3734_s3 + $0xcc] ss:$16 sps:$4 sm:$0xff]   ;;  %v2656_v28 = vld [vmem:[%s3734_s3 + $0xc4] ss:$16 sps:$4 sm:$0xff]  }
   0xf   : > { %s2966_s22 = scalar_lea.vmem %s3731_s0, %s2564_s19  ;;  %891 = vmatpush1.bf16.msra.mxu1 %v2634_v13  ;;  %850 = vmatpush1.bf16.msra.mxu0 %v2635_v14  ;;  %v2658_v29 = vld [vmem:[%s3734_s3 + $0xc8] ss:$16 sps:$4 sm:$0xff]   ;;  %v2659_v30 = vld [vmem:[%s3734_s3 + $0xc0] ss:$16 sps:$4 sm:$0xff]   ;;  %v2660_v31 = vld [vmem:[%s3734_s3 + $0xec] ss:$16 sps:$4 sm:$0xff]   ;;  %v390_v13 = vlaneseq  ;;  %s3585_s16 = scalar_lea.vmem %s3742_s11, %s2564_s19 }
  0x10   : > { %v2969_v0 = vld [vmem:[%s2966_s22] sm:$0xff]  ;;  %v2972_v1 = vld [vmem:[%s2966_s22 + $0x8] sm:$0xff]  ;;  %892 = vmatprep.subr.bf16.mxu1 %v2636_v15  ;;  %851 = vmatprep.subr.bf16.mxu0 %v2638_v16 }
  0x11   : > { %v394_v2 = vadd.f32 %v2972_v1, %v2969_v0  ;;  %v2662_v32 = vld [vmem:[%s3734_s3 + $0xe4] ss:$16 sps:$4 sm:$0xff]   ;;  %v2664_v33 = vld [vmem:[%s3734_s3 + $0xe8] ss:$16 sps:$4 sm:$0xff]   ;;  %v2665_v34 = vld [vmem:[%s3734_s3 + $0xe0] ss:$16 sps:$4 sm:$0xff]  }
  0x12   : > { %v2666_v35 = vld [vmem:[%s3734_s3 + $0x10c] ss:$16 sps:$4 sm:$0xff]   ;;  %v2668_v36 = vld [vmem:[%s3734_s3 + $0x104] ss:$16 sps:$4 sm:$0xff]   ;;  %v2670_v37 = vld [vmem:[%s3734_s3 + $0x108] ss:$16 sps:$4 sm:$0xff]  }
  0x13   : > { %395 = vadd.xlane.f32.xlu0 %v394_v2  ;;  %893 = vmatpush1.bf16.msra.mxu1 %v2640_v17  ;;  %v2671_v38 = vld [vmem:[%s3734_s3 + $0x100] ss:$16 sps:$4 sm:$0xff]   ;;  %v2672_v39 = vld [vmem:[%s3734_s3 + $0x12c] ss:$16 sps:$4 sm:$0xff]   ;;  %v2674_v40 = vld [vmem:[%s3734_s3 + $0x124] ss:$16 sps:$4 sm:$0xff]  }
  0x14   : > { %852 = vmatpush1.bf16.msra.mxu0 %v2641_v18  ;;  %894 = vmatprep.subr.bf16.mxu1 %v2642_v19  ;;  %v2676_v41 = vld [vmem:[%s3734_s3 + $0x128] ss:$16 sps:$4 sm:$0xff]   ;;  %v2677_v42 = vld [vmem:[%s3734_s3 + $0x120] ss:$16 sps:$4 sm:$0xff]   ;;  %v2678_v43 = vld [vmem:[%s3734_s3 + $0x14c] ss:$16 sps:$4 sm:$0xff]  }
  0x15   : > { %853 = vmatprep.subr.bf16.mxu0 %v2644_v20  ;;  %v2680_v51 = vld [vmem:[%s3734_s3 + $0x144] ss:$16 sps:$4 sm:$0xff]   ;;  %v2682_v52 = vld [vmem:[%s3734_s3 + $0x148] ss:$16 sps:$4 sm:$0xff]   ;;  %v2683_v53 = vld [vmem:[%s3734_s3 + $0x140] ss:$16 sps:$4 sm:$0xff]  }
  0x16   : > { %v2684_v54 = vld [vmem:[%s3734_s3 + $0x16c] ss:$16 sps:$4 sm:$0xff]   ;;  %v2686_v55 = vld [vmem:[%s3734_s3 + $0x164] ss:$16 sps:$4 sm:$0xff]   ;;  %v2688_v56 = vld [vmem:[%s3734_s3 + $0x168] ss:$16 sps:$4 sm:$0xff]  }
  0x17   : > { %895 = vmatpush1.bf16.msra.mxu1 %v2646_v21  ;;  %v2689_v57 = vld [vmem:[%s3734_s3 + $0x160] ss:$16 sps:$4 sm:$0xff]   ;;  %v2690_v58 = vld [vmem:[%s3734_s3 + $0x18c] ss:$16 sps:$4 sm:$0xff]   ;;  %v2692_v59 = vld [vmem:[%s3734_s3 + $0x184] ss:$16 sps:$4 sm:$0xff]  }
  0x18   : > { %854 = vmatpush1.bf16.msra.mxu0 %v2647_v22  ;;  %896 = vmatprep.subr.bf16.mxu1 %v2648_v23  ;;  %v2694_v60 = vld [vmem:[%s3734_s3 + $0x188] ss:$16 sps:$4 sm:$0xff]   ;;  %v2695_v61 = vld [vmem:[%s3734_s3 + $0x180] ss:$16 sps:$4 sm:$0xff]   ;;  %v2696_v62 = vld [vmem:[%s3734_s3 + $0x1ac] ss:$16 sps:$4 sm:$0xff]  }
  0x19   : > { %855 = vmatprep.subr.bf16.mxu0 %v2650_v24  ;;  %v2698_v63 = vld [vmem:[%s3734_s3 + $0x1a4] ss:$16 sps:$4 sm:$0xff]   ;;  %v2702_v2 = vld [vmem:[%s3734_s3 + $0x1cc] ss:$16 sps:$4 sm:$0xff]   ;;  %v2706_v4 = vld [vmem:[%s3734_s3 + $0x1c8] ss:$16 sps:$4 sm:$0xff]  }
  0x1a   : > { %v2704_v3 = vld [vmem:[%s3734_s3 + $0x1c4] ss:$16 sps:$4 sm:$0xff]   ;;  %v2707_v5 = vld [vmem:[%s3734_s3 + $0x1c0] ss:$16 sps:$4 sm:$0xff]   ;;  %v2708_v6 = vld [vmem:[%s3734_s3 + $0x1ec] ss:$16 sps:$4 sm:$0xff]  }
  0x1b   : > { %897 = vmatpush1.bf16.msra.mxu1 %v2652_v25  ;;  %v2710_v7 = vld [vmem:[%s3734_s3 + $0x1e4] ss:$16 sps:$4 sm:$0xff]   ;;  %v2712_v8 = vld [vmem:[%s3734_s3 + $0x1e8] ss:$16 sps:$4 sm:$0xff]   ;;  %v2713_v9 = vld [vmem:[%s3734_s3 + $0x1e0] ss:$16 sps:$4 sm:$0xff]  }
  0x1c   : > { %856 = vmatpush1.bf16.msra.mxu0 %v2653_v26  ;;  %898 = vmatprep.subr.bf16.mxu1 %v2654_v27  ;;  %v2716_v10 = vld [vmem:[%s3734_s3 + $0x204] ss:$16 sps:$4 sm:$0xff]   ;;  %v3181_v15 = vshrl.u32 %v390_v13, 7  ;;  %v392_v18 = vld [vmem:[%s3732_s1] sm:$0x3] }
  0x1d   : > { %857 = vmatprep.subr.bf16.mxu0 %v2656_v28  ;;  %v3195_v19 = vld [vmem:[%s3732_s1 + $0x2] sm:$0x3]  ;;  %v393_v20 = vld [vmem:[%s3733_s2] sm:$0x3] }
  0x1e   : > { %v3184_v16 = vsub.s32 0, %v3181_v15  ;;  %v3187_v17 = vsub.s32 1, %v3181_v15  ;;  %v3203_v21 = vld [vmem:[%s3733_s2 + $0x2] sm:$0x3]  ;;  %vm945_vm0 = vcmp.ge.s32.totalorder %v3181_v15, 3  ;;  %vm964_vm1 = vcmp.ge.s32.totalorder %v3181_v15, 2 }
  0x1f   : > { %899 = vmatpush1.bf16.msra.mxu1 %v2658_v29  ;;  %v503_v13 = vld [vmem:[%s3735_s4] sm:$0xf]  ;;  %vm983_vm2 = vcmp.ge.s32.totalorder %v3181_v15, 1  ;;  %vm1014_vm3 = vcmp.lt.s32.totalorder %v3181_v15, 7  ;;  %vm1033_vm4 = vcmp.lt.s32.totalorder %v3181_v15, 6  ;;  %vm1052_vm5 = vcmp.lt.s32.totalorder %v3181_v15, 5 }
  0x20   : > { %858 = vmatpush1.bf16.msra.mxu0 %v2659_v30  ;;  %900 = vmatprep.subr.bf16.mxu1 %v2660_v31  ;;  %v415_v22 = vrot.slane %v392_v18, %v3184_v16  ;;  %v419_v23 = vrot.slane %v392_v18, %v3187_v17  ;;  %v1330_v24 = vrot.slane %v3195_v19, %v3187_v17 }
  0x21   : > { %859 = vmatprep.subr.bf16.mxu0 %v2662_v32  ;;  %v428_v26 = vrot.slane %v393_v20, %v3184_v16  ;;  %v432_v28 = vrot.slane %v393_v20, %v3187_v17  ;;  %v1343_v30 = vrot.slane %v3203_v21, %v3187_v17 }
  0x23   : > { %901 = vmatpush1.bf16.msra.mxu1 %v2664_v33 }
  0x24   : > { %860 = vmatpush1.bf16.msra.mxu0 %v2665_v34  ;;  %902 = vmatprep.subr.bf16.mxu1 %v2666_v35 }
  0x25   : > { %861 = vmatprep.subr.bf16.mxu0 %v2668_v36 }
  0x27   : > { %903 = vmatpush1.bf16.msra.mxu1 %v2670_v37 }
  0x28   : > { %862 = vmatpush1.bf16.msra.mxu0 %v2671_v38  ;;  %904 = vmatprep.subr.bf16.mxu1 %v2672_v39  ;;  %v2714_v38 = vld [vmem:[%s3734_s3 + $0x200] ss:$16 sps:$4 sm:$0xff]  }
  0x29   : > { %863 = vmatprep.subr.bf16.mxu0 %v2674_v40  ;;  %v2719_v40 = vld [vmem:[%s3734_s3 + $0x224] ss:$16 sps:$4 sm:$0xff]  }
  0x2b   : > { %905 = vmatpush1.bf16.msra.mxu1 %v2676_v41 }
  0x2c   : > { %864 = vmatpush1.bf16.msra.mxu0 %v2677_v42  ;;  %906 = vmatprep.subr.bf16.mxu1 %v2678_v43  ;;  %v2717_v42 = vld [vmem:[%s3734_s3 + $0x220] ss:$16 sps:$4 sm:$0xff]   ;;  %v2722_v43 = vld [vmem:[%s3734_s3 + $0x244] ss:$16 sps:$4 sm:$0xff]  }
  0x2d   : > { %865 = vmatprep.subr.bf16.mxu0 %v2680_v51  ;;  %v2734_v51 = vld [vmem:[%s3734_s3 + $0x2c4] ss:$16 sps:$4 sm:$0xff]  }
  0x2f   : > { %907 = vmatpush1.bf16.msra.mxu1 %v2682_v52  ;;  %v2732_v52 = vld [vmem:[%s3734_s3 + $0x2c0] ss:$16 sps:$4 sm:$0xff]  }
  0x30   : > { %866 = vmatpush1.bf16.msra.mxu0 %v2683_v53  ;;  %908 = vmatprep.subr.bf16.mxu1 %v2684_v54  ;;  %v2737_v53 = vld [vmem:[%s3734_s3 + $0x2e4] ss:$16 sps:$4 sm:$0xff]   ;;  %v2735_v54 = vld [vmem:[%s3734_s3 + $0x2e0] ss:$16 sps:$4 sm:$0xff]  }
  0x31   : > { %867 = vmatprep.subr.bf16.mxu0 %v2686_v55  ;;  %v2740_v55 = vld [vmem:[%s3734_s3 + $0x304] ss:$16 sps:$4 sm:$0xff]  }
  0x33   : > { %909 = vmatpush1.bf16.msra.mxu1 %v2688_v56  ;;  %v2738_v56 = vld [vmem:[%s3734_s3 + $0x300] ss:$16 sps:$4 sm:$0xff]  }
  0x34   : > { %868 = vmatpush1.bf16.msra.mxu0 %v2689_v57  ;;  %910 = vmatprep.subr.bf16.mxu1 %v2690_v58  ;;  %v2743_v57 = vld [vmem:[%s3734_s3 + $0x324] ss:$16 sps:$4 sm:$0xff]   ;;  %v2741_v58 = vld [vmem:[%s3734_s3 + $0x320] ss:$16 sps:$4 sm:$0xff]  }
  0x35   : > { %869 = vmatprep.subr.bf16.mxu0 %v2692_v59  ;;  %v2746_v59 = vld [vmem:[%s3734_s3 + $0x344] ss:$16 sps:$4 sm:$0xff]  }
  0x37   : > { %911 = vmatpush1.bf16.msra.mxu1 %v2694_v60  ;;  %v2744_v60 = vld [vmem:[%s3734_s3 + $0x340] ss:$16 sps:$4 sm:$0xff]  }
  0x38   : > { %870 = vmatpush1.bf16.msra.mxu0 %v2695_v61  ;;  %912 = vmatprep.subr.bf16.mxu1 %v2696_v62  ;;  %v2749_v61 = vld [vmem:[%s3734_s3 + $0x364] ss:$16 sps:$4 sm:$0xff]   ;;  %v2747_v62 = vld [vmem:[%s3734_s3 + $0x360] ss:$16 sps:$4 sm:$0xff]  }
  0x39   : > { %871 = vmatprep.subr.bf16.mxu0 %v2698_v63  ;;  %v2752_v63 = vld [vmem:[%s3734_s3 + $0x384] ss:$16 sps:$4 sm:$0xff]  }
  0xa0   : > { %v396_v44 = vpop.xlane.xlu0 %395 }
  0xa1   : > { %v398_v45 = vmul.f32 0.00390625, %v396_v44  ;;  %v2720_v44 = vld [vmem:[%s3734_s3 + $0x240] ss:$16 sps:$4 sm:$0xff]  }
  0xa3   : > { %v3100_v46 = vsub.f32 %v2969_v0, %v398_v45  ;;  %v3103_v47 = vsub.f32 %v2972_v1, %v398_v45  ;;  %v2700_v0 = vld [vmem:[%s3734_s3 + $0x1a8] ss:$16 sps:$4 sm:$0xff]   ;;  %v2701_v1 = vld [vmem:[%s3734_s3 + $0x1a0] ss:$16 sps:$4 sm:$0xff]   ;;  %v2725_v45 = vld [vmem:[%s3734_s3 + $0x264] ss:$16 sps:$4 sm:$0xff]  }
  0xa4   : > { %913 = vmatpush1.bf16.msra.mxu1 %v2700_v0  ;;  %872 = vmatpush1.bf16.msra.mxu0 %v2701_v1  ;;  %v2750_v0 = vld [vmem:[%s3734_s3 + $0x380] ss:$16 sps:$4 sm:$0xff]   ;;  %v2755_v1 = vld [vmem:[%s3734_s3 + $0x3a4] ss:$16 sps:$4 sm:$0xff]  }
  0xa5   : > { %v401_v48 = vmul.f32 %v3100_v46, %v3100_v46  ;;  %v402_v49 = vmul.f32 %v3103_v47, %v3103_v47  ;;  %914 = vmatprep.subr.bf16.mxu1 %v2702_v2  ;;  %873 = vmatprep.subr.bf16.mxu0 %v2704_v3  ;;  %v2753_v2 = vld [vmem:[%s3734_s3 + $0x3a0] ss:$16 sps:$4 sm:$0xff]   ;;  %v1326_v3 = vrot.slane %v3195_v19, %v3184_v16 }
  0xa7   : > { %v403_v50 = vadd.f32 %v402_v49, %v401_v48  ;;  %v2726_v48 = vld [vmem:[%s3734_s3 + $0x280] ss:$16 sps:$4 sm:$0xff]   ;;  %v2731_v49 = vld [vmem:[%s3734_s3 + $0x2a4] ss:$16 sps:$4 sm:$0xff]  }
  0xa8   : > { %915 = vmatpush1.bf16.msra.mxu1 %v2706_v4  ;;  %874 = vmatpush1.bf16.msra.mxu0 %v2707_v5  ;;  %v2758_v4 = vld [vmem:[%s3734_s3 + $0x3c4] ss:$16 sps:$4 sm:$0xff]   ;;  %v2756_v5 = vld [vmem:[%s3734_s3 + $0x3c0] ss:$16 sps:$4 sm:$0xff]  }
  0xa9   : > { %404 = vadd.xlane.f32.xlu0 %v403_v50  ;;  %916 = vmatprep.subr.bf16.mxu1 %v2708_v6  ;;  %v2729_v50 = vld [vmem:[%s3734_s3 + $0x2a0] ss:$16 sps:$4 sm:$0xff]   ;;  %v1339_v6 = vrot.slane %v3203_v21, %v3184_v16 }
  0xaa   : > { %875 = vmatprep.subr.bf16.mxu0 %v2710_v7  ;;  %v2761_v7 = vld [vmem:[%s3734_s3 + $0x3e4] ss:$16 sps:$4 sm:$0xff]  }
  0xac   : > { %917 = vmatpush1.bf16.msra.mxu1 %v2712_v8  ;;  %876 = vmatpush1.bf16.msra.mxu0 %v2713_v9  ;;  %v2759_v9 = vld [vmem:[%s3734_s3 + $0x3e0] ss:$16 sps:$4 sm:$0xff]  }
  0xad   : > { %1758 = vmatprep.subr.bf16.mxu1 %v2716_v10 }
 0x136   : > { %v405_v11 = vpop.xlane.xlu0 %404 }
 0x137   : > { %v406_v12 = vmul.f32 0.00390625, %v405_v11 }
 0x139   : > { %v407_v14 = vadd.f32 1e-05, %v406_v12  ;;  %v3323_v12 = vsub.s32 2, %v3181_v15 }
 0x13b   : > { %2842 = vrsqrt.f32 %v407_v14  ;;  %v3329_v14 = vsub.s32 3, %v3181_v15  ;;  %v516_v18 = vrot.slane %v503_v13, %v3323_v12 }
 0x13d   : > { %v520_v19 = vrot.slane %v503_v13, %v3329_v14 }
 0x145   : > { %v2843_v25 = vpop.eup %2842 }
 0x146   : > { %v410_v27 = vmul.f32 %v2843_v25, %v3103_v47  ;;  %v3213_v29 = vmul.f32 %v2843_v25, %v3100_v46  ;;  %v2723_v46 = vld [vmem:[%s3734_s3 + $0x260] ss:$16 sps:$4 sm:$0xff]   ;;  %v2728_v47 = vld [vmem:[%s3734_s3 + $0x284] ss:$16 sps:$4 sm:$0xff]  }
 0x148   : > { %v423_v31 = vmul.f32 %v419_v23, %v410_v27  ;;  %v422_v32 = vmul.f32 %v415_v22, %v3213_v29  ;;  %v1334_v33 = vmul.f32 %v1330_v24, %v410_v27  ;;  %v1333_v8 = vmul.f32 %v1326_v3, %v3213_v29 }
 0x14a   : > { %v436_v34 = vadd.f32 %v432_v28, %v423_v31  ;;  %v435_v35 = vadd.f32 %v428_v26, %v422_v32  ;;  %v1347_v36 = vadd.f32 %v1343_v30, %v1334_v33  ;;  %v1346_v10 = vadd.f32 %v1339_v6, %v1333_v8 }
 0x14c   : > { %v502_v37 = vpack.c.bf16 %v436_v34, %v436_v34  ;;  %v501_v39 = vpack.c.bf16 %v435_v35, %v435_v35  ;;  %v3224_v41 = vpack.c.bf16 %v1347_v36, %v1347_v36  ;;  %v3319_v11 = vpack.c.bf16 %v1346_v10, %v1346_v10  ;;  %v3336_v36 = vld [vmem:[%s3736_s5] sm:$0x7f] }
 0x14e   : > { %877 = vmatprep.mubr.bf16.mxu0 %v502_v37  ;;  %918 = vmatprep.mubr.bf16.mxu1 %v502_v37  ;;  %v508_v37 = vrot.slane %v503_v13, %v3184_v16 }
 0x14f   : > { %878 = vmatmul.mubr.bf16.vlgmr.msra.gmra.mrb[0].mxu0 %v501_v39  ;;  %919 = vmatmul.mubr.bf16.vlgmr.msra.gmra.mrb[0].mxu1 %v501_v39  ;;  %v512_v39 = vrot.slane %v503_v13, %v3187_v17 }
 0x150   : > { %1759 = vmatpush1.bf16.msra.mxu1 %v2714_v38  ;;  %1790 = vmatprep.mubr.bf16.mxu1 %v3224_v41  ;;  %v3342_v38 = vld [vmem:[%s3736_s5 + $0x8] sm:$0x7f] }
 0x151   : > { %1760 = vmatprep.subr.bf16.mxu1 %v2719_v40  ;;  %v1003_v40 = vrot.slane %v3336_v36, %v3329_v14 }
 0x154   : > { %1761 = vmatpush1.bf16.msra.mxu1 %v2717_v42  ;;  %v3348_v42 = vsub.s32 4, %v3181_v15 }
 0x155   : > { %1762 = vmatprep.subr.bf16.mxu1 %v2722_v43  ;;  %v953_v43 = vrot.slane %v3336_v36, %v3184_v16 }
 0x158   : > { %1763 = vmatpush1.bf16.msra.mxu1 %v2720_v44  ;;  %v1007_v44 = vrot.slane %v3342_v38, %v3329_v14 }
 0x159   : > { %1764 = vmatprep.subr.bf16.mxu1 %v2725_v45 }
 0x15c   : > { %1765 = vmatpush1.bf16.msra.mxu1 %v2723_v46  ;;  %v972_v46 = vrot.slane %v3336_v36, %v3187_v17 }
 0x15d   : > { %1766 = vmatprep.subr.bf16.mxu1 %v2728_v47  ;;  %v3360_v47 = vsub.s32 5, %v3181_v15 }
 0x160   : > { %1767 = vmatpush1.bf16.msra.mxu1 %v2726_v48 }
 0x161   : > { %1768 = vmatprep.subr.bf16.mxu1 %v2731_v49 }
 0x164   : > { %1769 = vmatpush1.bf16.msra.mxu1 %v2729_v50  ;;  %v957_v50 = vrot.slane %v3342_v38, %v3184_v16 }
 0x165   : > { %1770 = vmatprep.subr.bf16.mxu1 %v2734_v51  ;;  %v976_v51 = vrot.slane %v3342_v38, %v3187_v17 }
 0x168   : > { %1771 = vmatpush1.bf16.msra.mxu1 %v2732_v52  ;;  %v991_v52 = vrot.slane %v3336_v36, %v3323_v12 }
 0x169   : > { %1772 = vmatprep.subr.bf16.mxu1 %v2737_v53 }
 0x16c   : > { %1773 = vmatpush1.bf16.msra.mxu1 %v2735_v54 }
 0x16d   : > { %1774 = vmatprep.subr.bf16.mxu1 %v2740_v55  ;;  %v995_v55 = vrot.slane %v3342_v38, %v3323_v12 }
 0x170   : > { %1775 = vmatpush1.bf16.msra.mxu1 %v2738_v56  ;;  %v1022_v56 = vrot.slane %v3336_v36, %v3348_v42 }
 0x171   : > { %1776 = vmatprep.subr.bf16.mxu1 %v2743_v57 }
 0x174   : > { %1777 = vmatpush1.bf16.msra.mxu1 %v2741_v58  ;;  %v1026_v58 = vrot.slane %v3342_v38, %v3348_v42 }
 0x175   : > { %1778 = vmatprep.subr.bf16.mxu1 %v2746_v59  ;;  %v3377_v59 = vsub.s32 6, %v3181_v15 }
 0x178   : > { %1779 = vmatpush1.bf16.msra.mxu1 %v2744_v60 }
 0x179   : > { %1780 = vmatprep.subr.bf16.mxu1 %v2749_v61 }
 0x17c   : > { %1781 = vmatpush1.bf16.msra.mxu1 %v2747_v62 }
 0x17d   : > { %1782 = vmatprep.subr.bf16.mxu1 %v2752_v63  ;;  %v1041_v63 = vrot.slane %v3336_v36, %v3360_v47 }
 0x180   : > { %1783 = vmatpush1.bf16.msra.mxu1 %v2750_v0 }
 0x181   : > { %1784 = vmatprep.subr.bf16.mxu1 %v2755_v1 }
 0x184   : > { %1785 = vmatpush1.bf16.msra.mxu1 %v2753_v2 }
 0x185   : > { %1786 = vmatprep.subr.bf16.mxu1 %v2758_v4 }
 0x188   : > { %1787 = vmatpush1.bf16.msra.mxu1 %v2756_v5 }
 0x189   : > { %1788 = vmatprep.subr.bf16.mxu1 %v2761_v7 }
 0x18c   : > { %1789 = vmatpush1.bf16.msra.mxu1 %v2759_v9 }
 0x18f   : > { %1791 = vmatmul.mubr.bf16.vlgmr.msra.gmra.mrb[4].mxu1 %v3319_v11 }
 0x222   : > { %v879_v20 = vpop.f32.mrb[0].mxu0  ;;  %v920_v21 = vpop.f32.mrb[0].mxu1 }
 0x223   : > { %v921_v22 = vadd.f32 %v920_v21, %v516_v18  ;;  %v881_v23 = vpop.f32.mrb[1].mxu0  ;;  %v922_v24 = vpop.f32.mrb[1].mxu1  ;;  %v880_v45 = vadd.f32 %v879_v20, %v508_v37  ;;  %v1045_v37 = vrot.slane %v3342_v38, %v3360_v47 }
 0x224   : > { %v923_v25 = vadd.f32 %v922_v24, %v520_v19  ;;  %v883_v26 = vpop.f32.mrb[2].mxu0  ;;  %v924_v27 = vpop.f32.mrb[2].mxu1  ;;  %v882_v49 = vadd.f32 %v881_v23, %v512_v39 }
 0x225   : > { %v2351_v28 = vmul.f32 -1.442695, %v921_v22  ;;  %v884_v29 = vpop.f32.mrb[3].mxu0  ;;  %v925_v30 = vpop.f32.mrb[3].mxu1 }
 0x226   : > { %v2352_v31 = vmul.f32 -1.442695, %v923_v25 }
 0x227   : > { %2844 = vpow2.f32 %v2351_v28 }
 0x228   : > { %2846 = vpow2.f32 %v2352_v31 }
 0x231   : > { %v2845_v32 = vpop.eup %2844 }
 0x232   : > { %v2847_v33 = vpop.eup %2846  ;;  %v933_v34 = vadd.f32 1.0, %v2845_v32 }
 0x233   : > { %v934_v35 = vadd.f32 1.0, %v2847_v33 }
 0x234   : > { %2848 = vrcp.f32 %v933_v34 }
 0x235   : > { %2850 = vrcp.f32 %v934_v35 }
 0x23e   : > { %v2849_v48 = vpop.eup %2848 }
 0x23f   : > { %v2851_v53 = vpop.eup %2850  ;;  %v939_v54 = vmul.f32 %v2849_v48, %v880_v45  ;;  %v1060_v45 = vrot.slane %v3336_v36, %v3377_v59 }
 0x240   : > { %v940_v57 = vmul.f32 %v2851_v53, %v882_v49 }
 0x241   : > { %v943_v60 = vrot.slane %v939_v54, 5  ;;  %v962_v61 = vrot.slane %v939_v54, 6  ;;  %v981_v62 = vrot.slane %v939_v54, 7  ;;  %v1012_v6 = vrot.slane %v939_v54, 1 }
 0x242   : > { %v944_v0 = vrot.slane %v940_v57, 5  ;;  %v963_v1 = vrot.slane %v940_v57, 6  ;;  %v982_v2 = vrot.slane %v940_v57, 7  ;;  %v1008_v20 = vmul.f32 %v1003_v40, %v939_v54 }
 0x243   : > { %v948_v3 = vsel %vm945_vm0, %v943_v60, 0.0  ;;  %v967_v4 = vsel %vm964_vm1, %v962_v61, 0.0  ;;  %v986_v5 = vsel %vm983_vm2, %v981_v62, 0.0  ;;  %v1013_v24 = vrot.slane %v940_v57, 1 }
 0x244   : > { %v949_v7 = vsel %vm945_vm0, %v944_v0, 0.0  ;;  %v958_v8 = vmul.f32 %v953_v43, %v948_v3  ;;  %v968_v9 = vsel %vm964_vm1, %v963_v1, 0.0  ;;  %v977_v10 = vmul.f32 %v972_v46, %v967_v4 }
 0x245   : > { %v959_v13 = vmul.f32 %v957_v50, %v949_v7  ;;  %v978_v18 = vmul.f32 %v976_v51, %v968_v9  ;;  %v987_v19 = vsel %vm983_vm2, %v982_v2, 0.0  ;;  %v996_v22 = vmul.f32 %v991_v52, %v986_v5  ;;  %v1069_v50 = vld [vmem:[%s3737_s6] sm:$0x3] }
 0x246   : > { %v979_v21 = vadd.f32 %v977_v10, %v958_v8  ;;  %v997_v23 = vmul.f32 %v995_v55, %v987_v19  ;;  %v1017_v26 = vsel %vm1014_vm3, %v1012_v6, 0.0  ;;  %v1031_v27 = vrot.slane %v939_v54, 2  ;;  %v2762_v19 = vld [vmem:[%s3740_s9 + $0x40] sm:$0xff]  }
 0x247   : > { %v980_v25 = vadd.f32 %v978_v18, %v959_v13  ;;  %v1032_v28 = vrot.slane %v940_v57, 2  ;;  %v1018_v30 = vsel %vm1014_vm3, %v1013_v24, 0.0  ;;  %v1050_v31 = vrot.slane %v939_v54, 3  ;;  %2566 = vmatprep.subr.bf16.mxu0 %v2762_v19  ;;  %v2767_v24 = vld [vmem:[%s3740_s9 + $0x10] sm:$0xff]   ;;  %v2790_v19 = vld [vmem:[%s3734_s3 + $0x288] ss:$16 sps:$4 sm:$0xff]  }
 0x248   : > { %v998_v29 = vadd.f32 %v996_v22, %v979_v21  ;;  %v1051_v32 = vrot.slane %v940_v57, 3  ;;  %v1009_v34 = vmul.f32 %v1007_v44, %v940_v57  ;;  %v1036_v35 = vsel %vm1033_vm4, %v1031_v27, 0.0  ;;  %v2764_v21 = vld [vmem:[%s3740_s9 + $0x48] sm:$0xff]   ;;  %v2770_v27 = vld [vmem:[%s3740_s9 + $0x60] sm:$0xff]  }
 0x249   : > { %v999_v33 = vadd.f32 %v997_v23, %v980_v25  ;;  %v1027_v40 = vmul.f32 %v1022_v56, %v1017_v26  ;;  %v1037_v43 = vsel %vm1033_vm4, %v1032_v28, 0.0  ;;  %v1028_v48 = vmul.f32 %v1026_v58, %v1018_v30  ;;  %v2765_v22 = vld [vmem:[%s3740_s9 + $0x8] sm:$0xff]   ;;  %v2766_v23 = vld [vmem:[%s3740_s9 + $0x50] sm:$0xff]   ;;  %v2768_v25 = vld [vmem:[%s3740_s9 + $0x58] sm:$0xff]  }
 0x24a   : > { %v1010_v39 = vadd.f32 %v1008_v20, %v998_v29  ;;  %v1055_v49 = vsel %vm1052_vm5, %v1050_v31, 0.0  ;;  %v1064_v44 = vrot.slane %v3342_v38, %v3377_v59  ;;  %v1046_v52 = vmul.f32 %v1041_v63, %v1036_v35  ;;  %v2763_v20 = vld [vmem:[%s3740_s9] sm:$0xff]   ;;  %v2769_v26 = vld [vmem:[%s3740_s9 + $0x18] sm:$0xff]   ;;  %v2772_v29 = vld [vmem:[%s3740_s9 + $0x68] sm:$0xff]  }
 0x24b   : > { %v1011_v46 = vadd.f32 %v1009_v34, %v999_v33  ;;  %v1056_v53 = vsel %vm1052_vm5, %v1051_v32, 0.0  ;;  %v1047_v55 = vmul.f32 %v1045_v37, %v1037_v43  ;;  %v1065_v56 = vmul.f32 %v1060_v45, %v1055_v49  ;;  %2567 = vmatpush3.bf16.msra.mxu0 %v2763_v20  ;;  %v2771_v28 = vld [vmem:[%s3740_s9 + $0x20] sm:$0xff]   ;;  %v2773_v30 = vld [vmem:[%s3740_s9 + $0x28] sm:$0xff]   ;;  %v2774_v31 = vld [vmem:[%s3740_s9 + $0x70] sm:$0xff]  }
 0x24c   : > { %v1029_v51 = vadd.f32 %v1027_v40, %v1010_v39  ;;  %v1074_v57 = vrot.slane %v1069_v50, %v3184_v16  ;;  %v1066_v60 = vmul.f32 %v1064_v44, %v1056_v53  ;;  %v1078_v61 = vrot.slane %v1069_v50, %v3187_v17  ;;  %2568 = vmatprep.subr.bf16.mxu0 %v2764_v21  ;;  %v2775_v32 = vld [vmem:[%s3740_s9 + $0x30] sm:$0xff]   ;;  %v2776_v33 = vld [vmem:[%s3740_s9 + $0x78] sm:$0xff]   ;;  %v1083_v43 = vld [vmem:[%s3738_s7] sm:$0x3] }
 0x24d   : > { %v1030_v54 = vadd.f32 %v1028_v48, %v1011_v46  ;;  %v2777_v34 = vld [vmem:[%s3740_s9 + $0x38] sm:$0xff]   ;;  %v1084_v45 = vld [vmem:[%s3739_s8] sm:$0x3]  ;;  %v1105_v46 = vrot.slane %v1083_v43, %v3184_v16  ;;  %v1109_v48 = vrot.slane %v1083_v43, %v3187_v17 }
 0x24e   : > { %v1048_v36 = vadd.f32 %v1046_v52, %v1029_v51  ;;  %v2780_v35 = vld [vmem:[%s3734_s3 + $0x20c] ss:$16 sps:$4 sm:$0xff]   ;;  %v1118_v51 = vrot.slane %v1084_v45, %v3184_v16  ;;  %v1122_v52 = vrot.slane %v1084_v45, %v3187_v17  ;;  %v2793_v21 = vld [vmem:[%s3734_s3 + $0x2a8] ss:$16 sps:$4 sm:$0xff]  }
 0x24f   : > { %v1049_v58 = vadd.f32 %v1047_v55, %v1030_v54  ;;  %2569 = vmatpush3.bf16.msra.mxu0 %v2765_v22  ;;  %v2795_v20 = vld [vmem:[%s3734_s3 + $0x2ac] ss:$16 sps:$4 sm:$0xff]   ;;  %v2820_v43 = vld [vmem:[%s3734_s3 + $0x3c8] ss:$16 sps:$4 sm:$0xff]  }
 0x250   : > { %v1067_v38 = vadd.f32 %v1065_v56, %v1048_v36  ;;  %2570 = vmatprep.subr.bf16.mxu0 %v2766_v23  ;;  %v2798_v22 = vld [vmem:[%s3734_s3 + $0x2cc] ss:$16 sps:$4 sm:$0xff]   ;;  %v2796_v23 = vld [vmem:[%s3734_s3 + $0x2c8] ss:$16 sps:$4 sm:$0xff]  }
 0x251   : > { %v1068_v62 = vadd.f32 %v1066_v60, %v1049_v58  ;;  %v2825_v45 = vld [vmem:[%s3734_s3 + $0x3ec] ss:$16 sps:$4 sm:$0xff]  }
 0x252   : > { %v1081_v0 = vadd.f32 %v1074_v57, %v1067_v38 }
 0x253   : > { %v1082_v1 = vadd.f32 %v1078_v61, %v1068_v62  ;;  %2571 = vmatpush3.bf16.msra.mxu0 %v2767_v24  ;;  %v2801_v24 = vld [vmem:[%s3734_s3 + $0x2ec] ss:$16 sps:$4 sm:$0xff]  }
 0x254   : > { %2572 = vmatprep.subr.bf16.mxu0 %v2768_v25  ;;  %v2799_v25 = vld [vmem:[%s3734_s3 + $0x2e8] ss:$16 sps:$4 sm:$0xff]  }
 0x255   : > { %v1085_v2 = vadd.f32 %v1082_v1, %v1081_v0 }
 0x257   : > { %1086 = vadd.xlane.f32.xlu1 %v1085_v2  ;;  %2573 = vmatpush3.bf16.msra.mxu0 %v2769_v26  ;;  %v2804_v26 = vld [vmem:[%s3734_s3 + $0x30c] ss:$16 sps:$4 sm:$0xff]  }
 0x258   : > { %2574 = vmatprep.subr.bf16.mxu0 %v2770_v27  ;;  %v2802_v27 = vld [vmem:[%s3734_s3 + $0x308] ss:$16 sps:$4 sm:$0xff]  }
 0x25b   : > { %2575 = vmatpush3.bf16.msra.mxu0 %v2771_v28  ;;  %v2807_v28 = vld [vmem:[%s3734_s3 + $0x32c] ss:$16 sps:$4 sm:$0xff]  }
 0x25c   : > { %2576 = vmatprep.subr.bf16.mxu0 %v2772_v29  ;;  %v2805_v29 = vld [vmem:[%s3734_s3 + $0x328] ss:$16 sps:$4 sm:$0xff]  }
 0x25f   : > { %2577 = vmatpush3.bf16.msra.mxu0 %v2773_v30  ;;  %v2810_v30 = vld [vmem:[%s3734_s3 + $0x34c] ss:$16 sps:$4 sm:$0xff]  }
 0x260   : > { %2578 = vmatprep.subr.bf16.mxu0 %v2774_v31  ;;  %v2808_v31 = vld [vmem:[%s3734_s3 + $0x348] ss:$16 sps:$4 sm:$0xff]  }
 0x262   : > { %v3417_v63 = vpop.f32.mrb[4].mxu1 }
 0x263   : > { %v3419_v3 = vpop.f32.mrb[5].mxu1  ;;  %2579 = vmatpush3.bf16.msra.mxu0 %v2775_v32  ;;  %v2813_v32 = vld [vmem:[%s3734_s3 + $0x36c] ss:$16 sps:$4 sm:$0xff]  }
 0x264   : > { %v1796_v4 = vpop.f32.mrb[6].mxu1  ;;  %2580 = vmatprep.subr.bf16.mxu0 %v2776_v33  ;;  %v2811_v33 = vld [vmem:[%s3734_s3 + $0x368] ss:$16 sps:$4 sm:$0xff]  }
 0x265   : > { %v1797_v5 = vpop.f32.mrb[7].mxu1 }
 0x266   : > { %v2778_v5 = vld [vmem:[%s3734_s3 + $0x208] ss:$16 sps:$4 sm:$0xff]  }
 0x267   : > { %2581 = vmatpush3.bf16.msra.mxu0 %v2777_v34  ;;  %v2816_v34 = vld [vmem:[%s3734_s3 + $0x38c] ss:$16 sps:$4 sm:$0xff]  }
 0x268   : > { %1799 = vmatprep.subr.bf16.mxu0 %v2780_v35  ;;  %v2814_v35 = vld [vmem:[%s3734_s3 + $0x388] ss:$16 sps:$4 sm:$0xff]  }
 0x2e4   : > { %v1087_v6 = vpop.xlane.xlu1 %1086 }
 0x2e5   : > { %v1088_v7 = vmul.f32 0.00390625, %v1087_v6 }
 0x2e7   : > { %v1089_v8 = vsub.f32 %v1081_v0, %v1088_v7  ;;  %v1090_v9 = vsub.f32 %v1082_v1, %v1088_v7  ;;  %v2783_v7 = vld [vmem:[%s3734_s3 + $0x22c] ss:$16 sps:$4 sm:$0xff]  }
 0x2e9   : > { %v1091_v10 = vmul.f32 %v1089_v8, %v1089_v8  ;;  %v1092_v13 = vmul.f32 %v1090_v9, %v1090_v9 }
 0x2eb   : > { %v1093_v18 = vadd.f32 %v1092_v13, %v1091_v10  ;;  %v2784_v10 = vld [vmem:[%s3734_s3 + $0x248] ss:$16 sps:$4 sm:$0xff]   ;;  %v2789_v13 = vld [vmem:[%s3734_s3 + $0x26c] ss:$16 sps:$4 sm:$0xff]  }
 0x2ed   : > { %1094 = vadd.xlane.f32.xlu1 %v1093_v18  ;;  %v2792_v18 = vld [vmem:[%s3734_s3 + $0x28c] ss:$16 sps:$4 sm:$0xff]  }
 0x37a   : > { %v1095_v37 = vpop.xlane.xlu1 %1094 }
 0x37b   : > { %v1096_v39 = vmul.f32 0.00390625, %v1095_v37  ;;  %v2819_v37 = vld [vmem:[%s3734_s3 + $0x3ac] ss:$16 sps:$4 sm:$0xff]  }
 0x37d   : > { %v1097_v40 = vadd.f32 1e-05, %v1096_v39  ;;  %v2817_v39 = vld [vmem:[%s3734_s3 + $0x3a8] ss:$16 sps:$4 sm:$0xff]  }
 0x37f   : > { %2852 = vrsqrt.f32 %v1097_v40  ;;  %v2822_v40 = vld [vmem:[%s3734_s3 + $0x3cc] ss:$16 sps:$4 sm:$0xff]  }
 0x389   : > { %v2853_v49 = vpop.eup %2852 }
 0x38a   : > { %v1099_v44 = vmul.f32 %v2853_v49, %v1089_v8  ;;  %v1100_v50 = vmul.f32 %v2853_v49, %v1090_v9  ;;  %v2781_v8 = vld [vmem:[%s3734_s3 + $0x228] ss:$16 sps:$4 sm:$0xff]   ;;  %v2786_v9 = vld [vmem:[%s3734_s3 + $0x24c] ss:$16 sps:$4 sm:$0xff]   ;;  %v2355_v49 = vld [vmem:[%s3741_s10] ss:$0 sm:$0xff] }
 0x38c   : > { %v1113_v53 = vmul.f32 %v1109_v48, %v1100_v50  ;;  %v1112_v54 = vmul.f32 %v1105_v46, %v1099_v44  ;;  %v2823_v46 = vld [vmem:[%s3734_s3 + $0x3e8] ss:$16 sps:$4 sm:$0xff]  }
 0x38e   : > { %v1126_v55 = vadd.f32 %v1122_v52, %v1113_v53  ;;  %v1125_v36 = vadd.f32 %v1118_v51, %v1112_v54  ;;  %v2880_v54 = vld [vmem:[%s2966_s22] sm:$0xff] }
 0x390   : > { %v2354_v56 = vmul.f32 -1.442695, %v1126_v55  ;;  %v2353_v57 = vmul.f32 -1.442695, %v1125_v36 }
 0x392   : > { %2854 = vpow2.f32 %v2354_v56 }
 0x393   : > { %2856 = vpow2.f32 %v2353_v57 }
 0x39c   : > { %v2855_v58 = vpop.eup %2854 }
 0x39d   : > { %v2857_v60 = vpop.eup %2856  ;;  %v1134_v61 = vadd.f32 1.0, %v2855_v58 }
 0x39e   : > { %v1133_v38 = vadd.f32 1.0, %v2857_v60 }
 0x39f   : > { %2858 = vrcp.f32 %v1134_v61 }
 0x3a0   : > { %2860 = vrcp.f32 %v1133_v38 }
 0x3a9   : > { %v2859_v62 = vpop.eup %2858 }
 0x3aa   : > { %v2861_v0 = vpop.eup %2860  ;;  %v1140_v1 = vmul.f32 %v2859_v62, %v1126_v55 }
 0x3ab   : > { %v1139_v2 = vmul.f32 %v2861_v0, %v1125_v36 }
 0x3ac   : > { %v1174_v4 = vpack.c.bf16 %v1140_v1, %v1140_v1 }
 0x3ad   : > { %v1173_v6 = vpack.c.bf16 %v1139_v2, %v1139_v2 }
 0x3ae   : > { %1310 = vmatprep.mubr.bf16.mxu0 %v1174_v4 }
 0x3af   : > { %1311 = vmatmul.mubr.bf16.vlgmr.msra.gmra.mrb[4].mxu0 %v1173_v6 }
 0x3b0   : > { %1800 = vmatpush1.bf16.msra.mxu0 %v2778_v5  ;;  %1831 = vmatprep.mubr.bf16.mxu0 %v3224_v41  ;;  %v2787_v41 = vld [vmem:[%s3734_s3 + $0x268] ss:$16 sps:$4 sm:$0xff]  }
 0x3b1   : > { %1801 = vmatprep.subr.bf16.mxu0 %v2783_v7 }
 0x3b4   : > { %1802 = vmatpush1.bf16.msra.mxu0 %v2781_v8 }
 0x3b5   : > { %1803 = vmatprep.subr.bf16.mxu0 %v2786_v9  ;;  %v3599_v9 = vld [vmem:[%s3736_s5 + $0x10] sm:$0x7f] }
 0x3b8   : > { %1804 = vmatpush1.bf16.msra.mxu0 %v2784_v10  ;;  %v3604_v10 = vld [vmem:[%s3736_s5 + $0x18] sm:$0x7f] }
 0x3b9   : > { %1805 = vmatprep.subr.bf16.mxu0 %v2789_v13 }
 0x3bc   : > { %1806 = vmatpush1.bf16.msra.mxu0 %v2787_v41 }
 0x3bd   : > { %1807 = vmatprep.subr.bf16.mxu0 %v2792_v18 }
 0x3c0   : > { %1808 = vmatpush1.bf16.msra.mxu0 %v2790_v19  ;;  %v1864_v19 = vrot.slane %v3599_v9, %v3184_v16 }
 0x3c1   : > { %1809 = vmatprep.subr.bf16.mxu0 %v2795_v20  ;;  %v1868_v20 = vrot.slane %v3604_v10, %v3184_v16 }
 0x3c4   : > { %1810 = vmatpush1.bf16.msra.mxu0 %v2793_v21  ;;  %v1880_v21 = vrot.slane %v3599_v9, %v3187_v17 }
 0x3c5   : > { %1811 = vmatprep.subr.bf16.mxu0 %v2798_v22 }
 0x3c8   : > { %1812 = vmatpush1.bf16.msra.mxu0 %v2796_v23 }
 0x3c9   : > { %1813 = vmatprep.subr.bf16.mxu0 %v2801_v24  ;;  %v1884_v24 = vrot.slane %v3604_v10, %v3187_v17 }
 0x3cc   : > { %1814 = vmatpush1.bf16.msra.mxu0 %v2799_v25 }
 0x3cd   : > { %1815 = vmatprep.subr.bf16.mxu0 %v2804_v26  ;;  %v1896_v26 = vrot.slane %v3599_v9, %v3323_v12 }
 0x3d0   : > { %1816 = vmatpush1.bf16.msra.mxu0 %v2802_v27  ;;  %v1900_v27 = vrot.slane %v3604_v10, %v3323_v12 }
 0x3d1   : > { %1817 = vmatprep.subr.bf16.mxu0 %v2807_v28  ;;  %v1924_v28 = vrot.slane %v3599_v9, %v3348_v42 }
 0x3d4   : > { %1818 = vmatpush1.bf16.msra.mxu0 %v2805_v29 }
 0x3d5   : > { %1819 = vmatprep.subr.bf16.mxu0 %v2810_v30 }
 0x3d8   : > { %1820 = vmatpush1.bf16.msra.mxu0 %v2808_v31 }
 0x3d9   : > { %1821 = vmatprep.subr.bf16.mxu0 %v2813_v32  ;;  %v1940_v32 = vrot.slane %v3599_v9, %v3360_v47 }
 0x3dc   : > { %1822 = vmatpush1.bf16.msra.mxu0 %v2811_v33 }
 0x3dd   : > { %1823 = vmatprep.subr.bf16.mxu0 %v2816_v34 }
 0x3e0   : > { %1824 = vmatpush1.bf16.msra.mxu0 %v2814_v35 }
 0x3e1   : > { %1825 = vmatprep.subr.bf16.mxu0 %v2819_v37 }
 0x3e4   : > { %1826 = vmatpush1.bf16.msra.mxu0 %v2817_v39 }
 0x3e5   : > { %1827 = vmatprep.subr.bf16.mxu0 %v2822_v40 }
 0x3e8   : > { %1828 = vmatpush1.bf16.msra.mxu0 %v2820_v43 }
 0x3e9   : > { %1829 = vmatprep.subr.bf16.mxu0 %v2825_v45 }
 0x3ec   : > { %1830 = vmatpush1.bf16.msra.mxu0 %v2823_v46 }
 0x3ef   : > { %1832 = vmatmul.mubr.bf16.vlgmr.msra.gmra.mrb[8].mxu0 %v3319_v11  ;;  %v2438_v11 = vld [vmem:[%s3735_s4 + $0x4] sm:$0xf] }
 0x3f0   : > { %v1429_v36 = vrot.slane %v2438_v11, %v3323_v12  ;;  %v1433_v56 = vrot.slane %v2438_v11, %v3329_v14  ;;  %v1421_v7 = vrot.slane %v2438_v11, %v3184_v16  ;;  %v1425_v8 = vrot.slane %v2438_v11, %v3187_v17 }
 0x3f2   : > { %v1793_v13 = vadd.f32 %v3417_v63, %v1421_v7  ;;  %v1795_v18 = vadd.f32 %v3419_v3, %v1425_v8  ;;  %v1908_v63 = vrot.slane %v3599_v9, %v3329_v14  ;;  %v1912_v3 = vrot.slane %v3604_v10, %v3329_v14 }
 0x3f3   : > { %v1928_v14 = vrot.slane %v3604_v10, %v3348_v42 }
 0x482   : > { %v2582_v48 = vpop.f32.mrb[4].mxu0 }
 0x483   : > { %v2583_v44 = vpop.f32.mrb[5].mxu0 }
 0x484   : > { %v2584_v50 = vadd.f32 %v2583_v44, %v2582_v48  ;;  %v2585_v51 = vpop.f32.mrb[6].mxu0 }
 0x485   : > { %v2586_v52 = vpop.f32.mrb[7].mxu0 }
 0x486   : > { %v1313_v53 = vadd.f32 %v2584_v50, %v2355_v49 }
 0x488   : > { %v2219_v55 = vadd.f32 %v2880_v54, %v1313_v53 }
 0x48a   : > { %2221 = vst [vmem:[%s3585_s16] sm:$0xff] %v2219_v55 }
 0x4c2   : > { %v1833_v57 = vpop.f32.mrb[8].mxu0 }
 0x4c3   : > { %v1834_v58 = vadd.f32 %v1833_v57, %v1429_v36  ;;  %v1835_v60 = vpop.f32.mrb[9].mxu0 }
 0x4c4   : > { %v1836_v61 = vadd.f32 %v1835_v60, %v1433_v56  ;;  %v1837_v38 = vpop.f32.mrb[10].mxu0 }
 0x4c5   : > { %v2503_v62 = vmul.f32 -1.442695, %v1834_v58  ;;  %v1838_v0 = vpop.f32.mrb[11].mxu0 }
 0x4c6   : > { %v2504_v1 = vmul.f32 -1.442695, %v1836_v61 }
 0x4c7   : > { %2862 = vpow2.f32 %v2503_v62 }
 0x4c8   : > { %2864 = vpow2.f32 %v2504_v1  ;;  %v1944_v1 = vrot.slane %v3604_v10, %v3360_v47  ;;  %v2507_v47 = vld [vmem:[%s3737_s6 + $0x2] sm:$0x3] }
 0x4d1   : > { %v2863_v2 = vpop.eup %2862 }
 0x4d2   : > { %v2865_v4 = vpop.eup %2864  ;;  %v1846_v5 = vadd.f32 1.0, %v2863_v2 }
 0x4d3   : > { %v1847_v6 = vadd.f32 1.0, %v2865_v4 }
 0x4d4   : > { %2866 = vrcp.f32 %v1846_v5 }
 0x4d5   : > { %2868 = vrcp.f32 %v1847_v6  ;;  %v1956_v6 = vrot.slane %v3599_v9, %v3377_v59 }
 0x4de   : > { %v2867_v41 = vpop.eup %2866 }
 0x4df   : > { %v2869_v22 = vpop.eup %2868  ;;  %v1852_v23 = vmul.f32 %v2867_v41, %v1793_v13  ;;  %v1960_v41 = vrot.slane %v3604_v10, %v3377_v59 }
 0x4e0   : > { %v1853_v25 = vmul.f32 %v2869_v22, %v1795_v18 }
 0x4e1   : > { %v1857_v29 = vrot.slane %v1852_v23, 5  ;;  %v1873_v30 = vrot.slane %v1852_v23, 6  ;;  %v1889_v31 = vrot.slane %v1852_v23, 7  ;;  %v1917_v40 = vrot.slane %v1852_v23, 1 }
 0x4e2   : > { %v1858_v33 = vrot.slane %v1853_v25, 5  ;;  %v1874_v34 = vrot.slane %v1853_v25, 6  ;;  %v1890_v35 = vrot.slane %v1853_v25, 7  ;;  %v1913_v50 = vmul.f32 %v1908_v63, %v1852_v23 }
 0x4e3   : > { %v1859_v37 = vsel %vm945_vm0, %v1857_v29, 0.0  ;;  %v1875_v12 = vsel %vm964_vm1, %v1873_v30, 0.0  ;;  %v1891_v39 = vsel %vm983_vm2, %v1889_v31, 0.0  ;;  %v1918_v54 = vrot.slane %v1853_v25, 1 }
 0x4e4   : > { %v1860_v43 = vsel %vm945_vm0, %v1858_v33, 0.0  ;;  %v1869_v45 = vmul.f32 %v1864_v19, %v1859_v37  ;;  %v1876_v46 = vsel %vm964_vm1, %v1874_v34, 0.0  ;;  %v1885_v48 = vmul.f32 %v1880_v21, %v1875_v12  ;;  %v2828_v37 = vld [vmem:[%s3740_s9 + $0xc8] sm:$0xff]  }
 0x4e5   : > { %v1870_v49 = vmul.f32 %v1868_v20, %v1860_v43  ;;  %v1886_v42 = vmul.f32 %v1884_v24, %v1876_v46  ;;  %v1892_v44 = vsel %vm983_vm2, %v1890_v35, 0.0  ;;  %v1901_v52 = vmul.f32 %v1896_v26, %v1891_v39  ;;  %v2826_v35 = vld [vmem:[%s3740_s9 + $0xc0] sm:$0xff]   ;;  %v2829_v12 = vld [vmem:[%s3740_s9 + $0x88] sm:$0xff]   ;;  %v2830_v39 = vld [vmem:[%s3740_s9 + $0xd0] sm:$0xff]  }
 0x4e6   : > { %v1887_v51 = vadd.f32 %v1885_v48, %v1869_v45  ;;  %v1902_v53 = vmul.f32 %v1900_v27, %v1892_v44  ;;  %v1919_v11 = vsel %vm1014_vm3, %v1917_v40, 0.0  ;;  %v1933_v36 = vrot.slane %v1852_v23, 2  ;;  %2588 = vmatprep.subr.bf16.mxu1 %v2826_v35  ;;  %v2831_v40 = vld [vmem:[%s3740_s9 + $0x90] sm:$0xff]   ;;  %v2832_v43 = vld [vmem:[%s3740_s9 + $0xd8] sm:$0xff]   ;;  %v2834_v46 = vld [vmem:[%s3740_s9 + $0xe0] sm:$0xff]  }
 0x4e7   : > { %v1888_v55 = vadd.f32 %v1886_v42, %v1870_v49  ;;  %v1934_v56 = vrot.slane %v1853_v25, 2  ;;  %v1920_v58 = vsel %vm1014_vm3, %v1918_v54, 0.0  ;;  %v1949_v60 = vrot.slane %v1852_v23, 3  ;;  %v2833_v45 = vld [vmem:[%s3740_s9 + $0x98] sm:$0xff]   ;;  %v2835_v48 = vld [vmem:[%s3740_s9 + $0xa0] sm:$0xff]   ;;  %v2836_v49 = vld [vmem:[%s3740_s9 + $0xe8] sm:$0xff]  }
 0x4e8   : > { %v1903_v57 = vadd.f32 %v1901_v52, %v1887_v51  ;;  %v1950_v61 = vrot.slane %v1853_v25, 3  ;;  %v1914_v62 = vmul.f32 %v1912_v3, %v1853_v25  ;;  %v1935_v0 = vsel %vm1033_vm4, %v1933_v36, 0.0  ;;  %v2837_v42 = vld [vmem:[%s3740_s9 + $0xa8] sm:$0xff]   ;;  %v2838_v44 = vld [vmem:[%s3740_s9 + $0xf0] sm:$0xff]   ;;  %v2840_v51 = vld [vmem:[%s3740_s9 + $0xf8] sm:$0xff]  }
 0x4e9   : > { %v1904_v38 = vadd.f32 %v1902_v53, %v1888_v55  ;;  %v1929_v4 = vmul.f32 %v1924_v28, %v1919_v11  ;;  %v1936_v5 = vsel %vm1033_vm4, %v1934_v56, 0.0  ;;  %v1930_v8 = vmul.f32 %v1928_v14, %v1920_v58  ;;  %v2827_v14 = vld [vmem:[%s3740_s9 + $0x80] sm:$0xff]   ;;  %v2841_v52 = vld [vmem:[%s3740_s9 + $0xb8] sm:$0xff]  }
 0x4ea   : > { %v1915_v2 = vadd.f32 %v1913_v50, %v1903_v57  ;;  %v1951_v13 = vsel %vm1052_vm5, %v1949_v60, 0.0  ;;  %v1945_v19 = vmul.f32 %v1940_v32, %v1935_v0  ;;  %v1952_v20 = vsel %vm1052_vm5, %v1950_v61, 0.0  ;;  %2589 = vmatpush3.bf16.msra.mxu1 %v2827_v14  ;;  %v2839_v50 = vld [vmem:[%s3740_s9 + $0xb0] sm:$0xff]   ;;  %v2508_v11 = vld [vmem:[%s3738_s7 + $0x2] sm:$0x3] }
 0x4eb   : > { %v1916_v7 = vadd.f32 %v1914_v62, %v1904_v38  ;;  %v1946_v22 = vmul.f32 %v1944_v1, %v1936_v5  ;;  %v1961_v23 = vmul.f32 %v1956_v6, %v1951_v13  ;;  %v1971_v24 = vrot.slane %v2507_v47, %v3184_v16  ;;  %2590 = vmatprep.subr.bf16.mxu1 %v2828_v37  ;;  %v2509_v36 = vld [vmem:[%s3739_s8 + $0x2] sm:$0x3] }
 0x4ec   : > { %v1931_v18 = vadd.f32 %v1929_v4, %v1915_v2  ;;  %v1962_v3 = vmul.f32 %v1960_v41, %v1952_v20  ;;  %v1975_v25 = vrot.slane %v2507_v47, %v3187_v17  ;;  %v2004_v56 = vrot.slane %v2508_v11, %v3184_v16 }
 0x4ed   : > { %v1932_v21 = vadd.f32 %v1930_v8, %v1916_v7  ;;  %v2008_v57 = vrot.slane %v2508_v11, %v3187_v17  ;;  %v2017_v38 = vrot.slane %v2509_v36, %v3184_v16  ;;  %v2021_v62 = vrot.slane %v2509_v36, %v3187_v17 }
 0x4ee   : > { %v1947_v9 = vadd.f32 %v1945_v19, %v1931_v18  ;;  %2591 = vmatpush3.bf16.msra.mxu1 %v2829_v12 }
 0x4ef   : > { %v1948_v63 = vadd.f32 %v1946_v22, %v1932_v21  ;;  %2592 = vmatprep.subr.bf16.mxu1 %v2830_v39  ;;  %v2545_v22 = vld [vmem:[%s3741_s10 + $0x1] ss:$0 sm:$0xff] }
 0x4f0   : > { %v1963_v59 = vadd.f32 %v1961_v23, %v1947_v9 }
 0x4f1   : > { %v1964_v10 = vadd.f32 %v1962_v3, %v1948_v63 }
 0x4f2   : > { %v1978_v26 = vadd.f32 %v1971_v24, %v1963_v59  ;;  %2593 = vmatpush3.bf16.msra.mxu1 %v2831_v40 }
 0x4f3   : > { %v1979_v27 = vadd.f32 %v1975_v25, %v1964_v10  ;;  %2594 = vmatprep.subr.bf16.mxu1 %v2832_v43  ;;  %v2881_v25 = vld [vmem:[%s2966_s22 + $0x8] sm:$0xff] }
 0x4f5   : > { %v1984_v28 = vadd.f32 %v1979_v27, %v1978_v26 }
 0x4f6   : > { %2595 = vmatpush3.bf16.msra.mxu1 %v2833_v45 }
 0x4f7   : > { %1985 = vadd.xlane.f32.xlu0 %v1984_v28  ;;  %2596 = vmatprep.subr.bf16.mxu1 %v2834_v46 }
 0x4fa   : > { %2597 = vmatpush3.bf16.msra.mxu1 %v2835_v48 }
 0x4fb   : > { %2598 = vmatprep.subr.bf16.mxu1 %v2836_v49 }
 0x4fe   : > { %2599 = vmatpush3.bf16.msra.mxu1 %v2837_v42 }
 0x4ff   : > { %2600 = vmatprep.subr.bf16.mxu1 %v2838_v44 }
 0x502   : > { %2601 = vmatpush3.bf16.msra.mxu1 %v2839_v50 }
 0x503   : > { %2602 = vmatprep.subr.bf16.mxu1 %v2840_v51 }
 0x506   : > { %2603 = vmatpush3.bf16.msra.mxu1 %v2841_v52 }
 0x584   : > { %v1986_v29 = vpop.xlane.xlu0 %1985 }
 0x585   : > { %v1987_v30 = vmul.f32 0.00390625, %v1986_v29 }
 0x587   : > { %v1988_v15 = vsub.f32 %v1978_v26, %v1987_v30  ;;  %v1989_v31 = vsub.f32 %v1979_v27, %v1987_v30 }
 0x589   : > { %v1990_v32 = vmul.f32 %v1988_v15, %v1988_v15  ;;  %v1991_v33 = vmul.f32 %v1989_v31, %v1989_v31 }
 0x58b   : > { %v1992_v34 = vadd.f32 %v1991_v33, %v1990_v32 }
 0x58d   : > { %1993 = vadd.xlane.f32.xlu1 %v1992_v34 }
 0x61a   : > { %v1994_v53 = vpop.xlane.xlu1 %1993 }
 0x61b   : > { %v1995_v54 = vmul.f32 0.00390625, %v1994_v53 }
 0x61d   : > { %v1996_v55 = vadd.f32 1e-05, %v1995_v54 }
 0x61f   : > { %2870 = vrsqrt.f32 %v1996_v55 }
 0x629   : > { %v2871_v58 = vpop.eup %2870 }
 0x62a   : > { %v1998_v60 = vmul.f32 %v2871_v58, %v1988_v15  ;;  %v1999_v61 = vmul.f32 %v2871_v58, %v1989_v31 }
 0x62c   : > { %v2012_v0 = vmul.f32 %v2008_v57, %v1999_v61  ;;  %v2011_v1 = vmul.f32 %v2004_v56, %v1998_v60 }
 0x62e   : > { %v2025_v2 = vadd.f32 %v2021_v62, %v2012_v0  ;;  %v2024_v4 = vadd.f32 %v2017_v38, %v2011_v1 }
 0x630   : > { %v2511_v5 = vmul.f32 -1.442695, %v2025_v2  ;;  %v2510_v6 = vmul.f32 -1.442695, %v2024_v4 }
 0x632   : > { %2872 = vpow2.f32 %v2511_v5 }
 0x633   : > { %2874 = vpow2.f32 %v2510_v6 }
 0x63c   : > { %v2873_v7 = vpop.eup %2872 }
 0x63d   : > { %v2875_v8 = vpop.eup %2874  ;;  %v2033_v13 = vadd.f32 1.0, %v2873_v7 }
 0x63e   : > { %v2032_v41 = vadd.f32 1.0, %v2875_v8 }
 0x63f   : > { %2876 = vrcp.f32 %v2033_v13 }
 0x640   : > { %2878 = vrcp.f32 %v2032_v41 }
 0x649   : > { %v2877_v47 = vpop.eup %2876 }
 0x64a   : > { %v2879_v18 = vpop.eup %2878  ;;  %v2039_v16 = vmul.f32 %v2877_v47, %v2025_v2 }
 0x64b   : > { %v2038_v17 = vmul.f32 %v2879_v18, %v2024_v4 }
 0x64c   : > { %v2074_v19 = vpack.c.bf16 %v2039_v16, %v2039_v16 }
 0x64d   : > { %v2073_v20 = vpack.c.bf16 %v2038_v17, %v2038_v17 }
 0x64e   : > { %2211 = vmatprep.mubr.bf16.mxu1 %v2074_v19 }
 0x64f   : > { %2212 = vmatmul.mubr.bf16.vlgmr.msra.gmra.mrb[8].mxu1 %v2073_v20 }
 0x722   : > { %v2604_v21 = vpop.f32.mrb[8].mxu1 }
 0x723   : > { %v2605_v9 = vpop.f32.mrb[9].mxu1 }
 0x724   : > { %v2606_v23 = vadd.f32 %v2605_v9, %v2604_v21  ;;  %v2607_v24 = vpop.f32.mrb[10].mxu1 }
 0x725   : > { %v2608_v63 = vpop.f32.mrb[11].mxu1 }
 0x726   : > { %v2214_v3 = vadd.f32 %v2606_v23, %v2545_v22 }
 0x728   : > { %v2220_v59 = vadd.f32 %v2881_v25, %v2214_v3 }
 0x72a   : > { %2222 = vst [vmem:[%s3585_s16 + $0x8] sm:$0xff] %v2220_v59 }
 0x72b PF: > { %s21_s17 = sadd.s32 1, %s2888_s17  }
 0x72c   : > { %p18_p4 = scmp.ge.s32.totalorder %s21_s17, 4  }
 0x72e   :  { %20 = sbr.rel (!%p18_p4) target bundleno = 1 (0x1), region = 104 }

</bundles_post_ra>
